<compile_context>
chip_gen: v7x
topology: tpu7x:2x2x1
jax: 0.10.0
libtpu: 0.0.40
codegen_flags: <defaults>
</compile_context>

<pallas_src>
import functools

import jax
import jax.numpy as jnp
from jax.experimental import pallas as pl
from jax.experimental.pallas import tpu as pltpu


# ---------------------------------------------------------------------------
# Pallas kernels
# ---------------------------------------------------------------------------

def matmul_bias_kernel(x_ref, w_ref, b_ref, o_ref):
    # o = x @ w + b    (1x1 convolution over an M-tile of flattened pixels)
    acc = jnp.dot(x_ref[...], w_ref[...], preferred_element_type=jnp.float32)
    o_ref[...] = (acc + b_ref[...]).astype(o_ref.dtype)


def matmul_bias_add_kernel(x_ref, w_ref, b_ref, r_ref, o_ref):
    # o = x @ w + b + r  (lateral 1x1 conv fused with the top-down FPN add)
    acc = jnp.dot(x_ref[...], w_ref[...], preferred_element_type=jnp.float32)
    o_ref[...] = (acc + b_ref[...] + r_ref[...].astype(jnp.float32)).astype(o_ref.dtype)


def conv3x3_kernel(x_ref, w_ref, b_ref, o_ref, *, row_w, out_rows, k3):
    # x_ref: ((H+2)*W, 3*C) bf16 -- W-direction taps already concatenated into
    #        the channel (lane) dim, rows zero-padded in H and flattened.
    # w_ref: (9*C, Cout) bf16 in [ky][kx][cin] order, b_ref: (1, Cout) f32,
    # o_ref: (H*W, Cout) f32.
    # Take the three H-direction taps as shifted (static) sublane slices of the
    # resident block and accumulate three K = 3*C MXU matmuls in f32 registers
    # (no (H*W, 9C) concat copy is materialized in VMEM).
    acc = jnp.dot(x_ref[0:out_rows, :], w_ref[0:k3, :],
                  preferred_element_type=jnp.float32)
    acc += jnp.dot(x_ref[row_w:row_w + out_rows, :], w_ref[k3:2 * k3, :],
                   preferred_element_type=jnp.float32)
    acc += jnp.dot(x_ref[2 * row_w:2 * row_w + out_rows, :], w_ref[2 * k3:3 * k3, :],
                   preferred_element_type=jnp.float32)
    o_ref[...] = (acc + b_ref[...]).astype(o_ref.dtype)


# ---------------------------------------------------------------------------
# pallas_call wrappers
# ---------------------------------------------------------------------------

_VMEM_LIMIT = 48 * 1024 * 1024  # explicit scoped-VMEM budget (fits v7x's 64 MiB)


def _round_up(x, m):
    return (x + m - 1) // m * m


def _compiler_params(n_grid_axes=1):
    return pltpu.CompilerParams(
        dimension_semantics=("parallel",) * n_grid_axes,
        vmem_limit_bytes=_VMEM_LIMIT)


def conv1x1_nhwc(x, w, b, residual=None):
    """1x1 conv (+ optional fused top-down residual add) on an NHWC tensor.

    x: (B,H,W,Cin) bf16, w: (Cin,Cout) f32, b: (1,Cout) f32,
    residual: (B,H,W,Cout) bf16 or None.   Returns (B,H,W,Cout) bf16.
    """
    B, H, W, cin = x.shape
    cout = w.shape[1]
    M = B * H * W
    tm = min(512, _round_up(M, 8))          # M-tile: multiple of 8 sublanes
    m_pad = _round_up(M, tm)
    grid = (m_pad // tm,)

    def pad_rows(t):
        if t.shape[0] == m_pad:
            return t
        return jnp.pad(t, ((0, m_pad - t.shape[0]), (0, 0)))

    xf = pad_rows(x.reshape(M, cin))
    wb = w.astype(jnp.bfloat16)             # bf16 MXU operands, f32 accumulation

    x_spec = pl.BlockSpec((tm, cin), lambda i: (i, 0))
    w_spec = pl.BlockSpec((cin, cout), lambda i: (0, 0))
    b_spec = pl.BlockSpec((1, cout), lambda i: (0, 0))
    o_spec = pl.BlockSpec((tm, cout), lambda i: (i, 0))
    out_shape = jax.ShapeDtypeStruct((m_pad, cout), jnp.bfloat16)

    if residual is None:
        y = pl.pallas_call(
            matmul_bias_kernel,
            out_shape=out_shape,
            grid=grid,
            in_specs=[x_spec, w_spec, b_spec],
            out_specs=o_spec,
            compiler_params=_compiler_params(),
        )(xf, wb, b)
    else:
        rf = pad_rows(residual.reshape(M, cout))
        y = pl.pallas_call(
            matmul_bias_add_kernel,
            out_shape=out_shape,
            grid=grid,
            in_specs=[x_spec, w_spec, b_spec, o_spec],
            out_specs=o_spec,
            input_output_aliases={3: 0},    # reuse the residual buffer as output
            compiler_params=_compiler_params(),
        )(xf, wb, b, rf)
    return y[:M].reshape(B, H, W, cout)


def conv3x3_nhwc(x, w3, b):
    """3x3 conv, stride 1, padding 1 on an NHWC bf16 tensor. w3: (3,3,Cin,Cout) f32."""
    B, H, W, cin = x.shape
    cout = w3.shape[-1]

    # W-direction im2col in XLA (pure lane concat -> 3x feature bytes, not 9x);
    # the H-direction taps are taken inside the kernel from a single block.
    xpw = jnp.pad(x, ((0, 0), (0, 0), (1, 1), (0, 0)))            # (B,H,W+2,C)
    xw = jnp.concatenate([xpw[:, :, dx:dx + W, :] for dx in range(3)], axis=-1)
    xwp = jnp.pad(xw, ((0, 0), (1, 1), (0, 0), (0, 0)))           # (B,H+2,W,3C)
    x_flat = xwp.reshape(B, (H + 2) * W, 3 * cin)                 # free reshape
    wf = w3.reshape(9 * cin, cout).astype(jnp.bfloat16)           # [ky][kx][cin] order

    kernel = functools.partial(conv3x3_kernel, row_w=W, out_rows=H * W,
                               k3=3 * cin)

    # One image per grid step (a whole padded FPN level easily fits VMEM);
    # "parallel" lets megacore take one image per TensorCore.
    y = pl.pallas_call(
        kernel,
        out_shape=jax.ShapeDtypeStruct((B, H * W, cout), jnp.float32),
        grid=(B,),
        in_specs=[pl.BlockSpec((None, (H + 2) * W, 3 * cin), lambda bb: (bb, 0, 0)),
                  pl.BlockSpec((9 * cin, cout), lambda bb: (0, 0)),
                  pl.BlockSpec((1, cout), lambda bb: (0, 0))],
        out_specs=pl.BlockSpec((None, H * W, cout), lambda bb: (bb, 0, 0)),
        compiler_params=_compiler_params(),
    )(x_flat, wf, b)
    return y.reshape(B, H, W, cout)


# ---------------------------------------------------------------------------
# JAX-side glue (layout plumbing only, no FLOPs)
# ---------------------------------------------------------------------------

def nearest_up2x(x):
    """Nearest-neighbor 2x upsample (matches F.interpolate(..., mode='nearest'))."""
    B, h, w, c = x.shape
    y = jnp.broadcast_to(x[:, :, None, :, None, :], (B, h, 2, w, 2, c))
    return y.reshape(B, 2 * h, 2 * w, c)


def space_to_depth(x, s):
    """(B, H, W, C) -> (B, H/s, W/s, s*s*C)."""
    B, H, W, C = x.shape
    x = x.reshape(B, H // s, s, W // s, s, C)
    x = jnp.transpose(x, (0, 1, 3, 2, 4, 5))
    return x.reshape(B, H // s, W // s, s * s * C)


# ---------------------------------------------------------------------------
# Parameters (deterministic synthetic init — shapes follow the module __init__)
# ---------------------------------------------------------------------------

_STUB_CFG = (("c3", 8, 64), ("c4", 16, 160), ("c5", 32, 400))  # name, stride, channels


def init_params(key, out_channels):
    params = {}

    def dense_init(k, cin, cout):
        kw, kb = jax.random.split(k)
        w = jax.random.normal(kw, (cin, cout), jnp.float32) * (1.0 / jnp.sqrt(cin))
        b = jax.random.normal(kb, (1, cout), jnp.float32) * 0.01
        return w, b

    def conv3_init(k, cin, cout):
        kw, kb = jax.random.split(k)
        w = jax.random.normal(kw, (3, 3, cin, cout), jnp.float32) * (
            1.0 / jnp.sqrt(9 * cin))
        b = jax.random.normal(kb, (1, cout), jnp.float32) * 0.01
        return w, b

    keys = jax.random.split(key, 16)
    ki = iter(keys)

    # stub backbone 1x1 convs (space-to-depth input has 3*s*s channels)
    for name, s, c in _STUB_CFG:
        w, b = dense_init(next(ki), 3 * s * s, c)
        params[f"stub_{name}_w"], params[f"stub_{name}_b"] = w, b

    # lateral 1x1 convs m3/m4/m5
    for name, _, c in _STUB_CFG:
        w, b = dense_init(next(ki), c, out_channels)
        params[f"m{name[-1]}_w"], params[f"m{name[-1]}_b"] = w, b

    # output 3x3 convs p3/p4/p5
    for lvl in ("p3", "p4", "p5"):
        w, b = conv3_init(next(ki), out_channels, out_channels)
        params[f"{lvl}_w"], params[f"{lvl}_b"] = w, b

    return params


# ---------------------------------------------------------------------------
# Forward pass (mirrors DetectorBackboneWithFPN.forward)
# ---------------------------------------------------------------------------

def backbone_stub(x_nhwc, params):
    # Read the full-resolution image once: the three strided views come from
    # nested space-to-depth (the big shuffle runs only on the full-res tensor).
    x8 = space_to_depth(x_nhwc, 8)     # (B, H/8,  W/8,  192)
    x16 = space_to_depth(x8, 2)        # (B, H/16, W/16, 768)
    x32 = space_to_depth(x16, 2)       # (B, H/32, W/32, 3072)
    c3 = conv1x1_nhwc(x8, params["stub_c3_w"], params["stub_c3_b"])
    c4 = conv1x1_nhwc(x16, params["stub_c4_w"], params["stub_c4_b"])
    c5 = conv1x1_nhwc(x32, params["stub_c5_w"], params["stub_c5_b"])
    return c3, c4, c5


def fpn_forward(images_nchw, params):
    # NCHW (PyTorch convention) -> NHWC bf16 for the kernels.
    x = jnp.transpose(images_nchw, (0, 2, 3, 1)).astype(jnp.bfloat16)
    c3, c4, c5 = backbone_stub(x, params)

    m5 = conv1x1_nhwc(c5, params["m5_w"], params["m5_b"])
    m4 = conv1x1_nhwc(c4, params["m4_w"], params["m4_b"],
                      residual=nearest_up2x(m5))
    m3 = conv1x1_nhwc(c3, params["m3_w"], params["m3_b"],
                      residual=nearest_up2x(m4))

    p3 = conv3x3_nhwc(m3, params["p3_w"], params["p3_b"])
    p4 = conv3x3_nhwc(m4, params["p4_w"], params["p4_b"])
    p5 = conv3x3_nhwc(m5, params["p5_w"], params["p5_b"])

    to_nchw = lambda t: jnp.transpose(t, (0, 3, 1, 2))
    return {"p3": to_nchw(p3), "p4": to_nchw(p4), "p5": to_nchw(p5)}


# ---------------------------------------------------------------------------
# Plain-JAX reference (same bf16 cast points, for checking the Pallas path)
# ---------------------------------------------------------------------------

def ref_forward(images_nchw, params):
    x = jnp.transpose(images_nchw, (0, 2, 3, 1)).astype(jnp.bfloat16)

    def c1x1(t, w, b, res=None):
        y = jnp.einsum("bhwc,co->bhwo", t, w.astype(jnp.bfloat16),
                       preferred_element_type=jnp.float32) + b.reshape(1, 1, 1, -1)
        if res is not None:
            y = y + res.astype(jnp.float32)
        return y.astype(jnp.bfloat16)

    x8 = space_to_depth(x, 8)
    x16 = space_to_depth(x8, 2)
    x32 = space_to_depth(x16, 2)
    c3 = c1x1(x8, params["stub_c3_w"], params["stub_c3_b"])
    c4 = c1x1(x16, params["stub_c4_w"], params["stub_c4_b"])
    c5 = c1x1(x32, params["stub_c5_w"], params["stub_c5_b"])

    m5 = c1x1(c5, params["m5_w"], params["m5_b"])
    m4 = c1x1(c4, params["m4_w"], params["m4_b"], res=nearest_up2x(m5))
    m3 = c1x1(c3, params["m3_w"], params["m3_b"], res=nearest_up2x(m4))

    def c3x3(t, w, b):
        y = jax.lax.conv_general_dilated(
            t, w.astype(jnp.bfloat16), window_strides=(1, 1), padding="SAME",
            dimension_numbers=("NHWC", "HWIO", "NHWC"),
            preferred_element_type=jnp.float32)
        return y + b.reshape(1, 1, 1, -1)

    p3 = c3x3(m3, params["p3_w"], params["p3_b"])
    p4 = c3x3(m4, params["p4_w"], params["p4_b"])
    p5 = c3x3(m5, params["p5_w"], params["p5_b"])
    to_nchw = lambda t: jnp.transpose(t, (0, 3, 1, 2))
    return {"p3": to_nchw(p3), "p4": to_nchw(p4), "p5": to_nchw(p5)}


# ---------------------------------------------------------------------------

if __name__ == "__main__":
    out_channels = 64
    B, H, W = 2, 64, 64  # H, W must be divisible by 32

    key = jax.random.PRNGKey(0)
    k_img, k_param = jax.random.split(key)
    images = jax.random.normal(k_img, (B, 3, H, W), jnp.float32)  # NCHW input
    params = init_params(k_param, out_channels)

    fwd = jax.jit(fpn_forward)
    out = fwd(images, params)
    jax.block_until_ready(out)

    # shape checks (match the PyTorch module's documented output shapes)
    assert out["p3"].shape == (B, out_channels, H // 8, W // 8)
    assert out["p4"].shape == (B, out_channels, H // 16, W // 16)
    assert out["p5"].shape == (B, out_channels, H // 32, W // 32)

    # numerical check against a plain-JAX reference with identical bf16 casts
    ref = jax.jit(ref_forward)(images, params)
    for lvl in ("p3", "p4", "p5"):
        assert jnp.allclose(out[lvl], ref[lvl], atol=2e-2, rtol=2e-2), lvl

    print("KERNEL_OK")
</pallas_src>

<mosaic_0001>
module attributes {stable_mosaic.version = 11 : i64} {
  func.func @matmul_bias_kernel(%arg0: i32, %arg1: memref<128x192xbf16, #tpu.memory_space<vmem>>, %arg2: memref<192x64xbf16, #tpu.memory_space<vmem>>, %arg3: memref<1x64xf32, #tpu.memory_space<vmem>>, %arg4: memref<128x64xbf16, #tpu.memory_space<vmem>>) attributes {dimension_semantics = [#tpu.dimension_semantics<parallel>], iteration_bounds = array<i64: 1>, scalar_prefetch = 0 : i64, scratch_operands = 0 : i64, tpu.core_type = #tpu.core_type<tc>, window_params = [{transform_indices = @transform_0, window_bounds = array<i64: 128, 192>}, {pipeline_mode = #tpu.pipeline_mode<synchronous>, transform_indices = @transform_1, window_bounds = array<i64: 192, 64>}, {pipeline_mode = #tpu.pipeline_mode<synchronous>, transform_indices = @transform_2, window_bounds = array<i64: 1, 64>}, {transform_indices = @transform_3, window_bounds = array<i64: 128, 64>}]} {
    %c0 = arith.constant 0 : index
    %c0_0 = arith.constant 0 : index
    %0 = vector.load %arg1[%c0, %c0_0] : memref<128x192xbf16, #tpu.memory_space<vmem>>, vector<128x192xbf16>
    %c0_1 = arith.constant 0 : index
    %c0_2 = arith.constant 0 : index
    %1 = vector.load %arg2[%c0_1, %c0_2] : memref<192x64xbf16, #tpu.memory_space<vmem>>, vector<192x64xbf16>
    %cst = arith.constant dense<0.000000e+00> : vector<128x64xf32>
    %2 = tpu.matmul %0, %1, %cst {dimension_numbers = #tpu.dot_dimension_numbers<[1], [0], [0], [1], [0, 0, 1, 1], [], []>} : vector<128x192xbf16>, vector<192x64xbf16>, vector<128x64xf32> -> vector<128x64xf32>
    %c0_3 = arith.constant 0 : index
    %c0_4 = arith.constant 0 : index
    %3 = vector.load %arg3[%c0_3, %c0_4] : memref<1x64xf32, #tpu.memory_space<vmem>>, vector<1x64xf32>
    %4 = vector.broadcast %3 : vector<1x64xf32> to vector<128x64xf32>
    %5 = arith.addf %2, %4 : vector<128x64xf32>
    %6 = arith.truncf %5 : vector<128x64xf32> to vector<128x64xbf16>
    %c0_5 = arith.constant 0 : index
    %c0_6 = arith.constant 0 : index
    %7 = vector.load %arg4[%c0_5, %c0_6] : memref<128x64xbf16, #tpu.memory_space<vmem>>, vector<128x64xbf16>
    tpu.vector_store %arg4[%c0_5, %c0_6], %6 {strides = array<i32>} : memref<128x64xbf16, #tpu.memory_space<vmem>>, vector<128x64xbf16>,
    return
  }
  func.func @transform_0(%arg0: i32) -> (i32, i32) {
    %c0_i32 = arith.constant 0 : i32
    %c0_i32_0 = arith.constant 0 : i32
    return %arg0, %c0_i32 : i32, i32
  }
  func.func @transform_1(%arg0: i32) -> (i32, i32) {
    %c0_i32 = arith.constant 0 : i32
    %c0_i32_0 = arith.constant 0 : i32
    %c0_i32_1 = arith.constant 0 : i32
    return %c0_i32, %c0_i32_0 : i32, i32
  }
  func.func @transform_2(%arg0: i32) -> (i32, i32) {
    %c0_i32 = arith.constant 0 : i32
    %c0_i32_0 = arith.constant 0 : i32
    %c0_i32_1 = arith.constant 0 : i32
    return %c0_i32, %c0_i32_0 : i32, i32
  }
  func.func @transform_3(%arg0: i32) -> (i32, i32) {
    %c0_i32 = arith.constant 0 : i32
    %c0_i32_0 = arith.constant 0 : i32
    return %arg0, %c0_i32 : i32, i32
  }
}

module attributes {stable_mosaic.version = 11 : i64} {
  func.func @matmul_bias_kernel(%arg0: i32, %arg1: memref<32x768xbf16, #tpu.memory_space<vmem>>, %arg2: memref<768x160xbf16, #tpu.memory_space<vmem>>, %arg3: memref<1x160xf32, #tpu.memory_space<vmem>>, %arg4: memref<32x160xbf16, #tpu.memory_space<vmem>>) attributes {dimension_semantics = [#tpu.dimension_semantics<parallel>], iteration_bounds = array<i64: 1>, scalar_prefetch = 0 : i64, scratch_operands = 0 : i64, tpu.core_type = #tpu.core_type<tc>, window_params = [{transform_indices = @transform_0, window_bounds = array<i64: 32, 768>}, {pipeline_mode = #tpu.pipeline_mode<synchronous>, transform_indices = @transform_1, window_bounds = array<i64: 768, 160>}, {pipeline_mode = #tpu.pipeline_mode<synchronous>, transform_indices = @transform_2, window_bounds = array<i64: 1, 160>}, {transform_indices = @transform_3, window_bounds = array<i64: 32, 160>}]} {
    %c0 = arith.constant 0 : index
    %c0_0 = arith.constant 0 : index
    %0 = vector.load %arg1[%c0, %c0_0] : memref<32x768xbf16, #tpu.memory_space<vmem>>, vector<32x768xbf16>
    %c0_1 = arith.constant 0 : index
    %c0_2 = arith.constant 0 : index
    %1 = vector.load %arg2[%c0_1, %c0_2] : memref<768x160xbf16, #tpu.memory_space<vmem>>, vector<768x160xbf16>
    %cst = arith.constant dense<0.000000e+00> : vector<32x160xf32>
    %2 = tpu.matmul %0, %1, %cst {dimension_numbers = #tpu.dot_dimension_numbers<[1], [0], [0], [1], [0, 0, 1, 1], [], []>} : vector<32x768xbf16>, vector<768x160xbf16>, vector<32x160xf32> -> vector<32x160xf32>
    %c0_3 = arith.constant 0 : index
    %c0_4 = arith.constant 0 : index
    %3 = vector.load %arg3[%c0_3, %c0_4] : memref<1x160xf32, #tpu.memory_space<vmem>>, vector<1x160xf32>
    %4 = vector.broadcast %3 : vector<1x160xf32> to vector<32x160xf32>
    %5 = arith.addf %2, %4 : vector<32x160xf32>
    %6 = arith.truncf %5 : vector<32x160xf32> to vector<32x160xbf16>
    %c0_5 = arith.constant 0 : index
    %c0_6 = arith.constant 0 : index
    %7 = vector.load %arg4[%c0_5, %c0_6] : memref<32x160xbf16, #tpu.memory_space<vmem>>, vector<32x160xbf16>
    tpu.vector_store %arg4[%c0_5, %c0_6], %6 {strides = array<i32>} : memref<32x160xbf16, #tpu.memory_space<vmem>>, vector<32x160xbf16>,
    return
  }
  func.func @transform_0(%arg0: i32) -> (i32, i32) {
    %c0_i32 = arith.constant 0 : i32
    %c0_i32_0 = arith.constant 0 : i32
    return %arg0, %c0_i32 : i32, i32
  }
  func.func @transform_1(%arg0: i32) -> (i32, i32) {
    %c0_i32 = arith.constant 0 : i32
    %c0_i32_0 = arith.constant 0 : i32
    %c0_i32_1 = arith.constant 0 : i32
    return %c0_i32, %c0_i32_0 : i32, i32
  }
  func.func @transform_2(%arg0: i32) -> (i32, i32) {
    %c0_i32 = arith.constant 0 : i32
    %c0_i32_0 = arith.constant 0 : i32
    %c0_i32_1 = arith.constant 0 : i32
    return %c0_i32, %c0_i32_0 : i32, i32
  }
  func.func @transform_3(%arg0: i32) -> (i32, i32) {
    %c0_i32 = arith.constant 0 : i32
    %c0_i32_0 = arith.constant 0 : i32
    return %arg0, %c0_i32 : i32, i32
  }
}

module attributes {stable_mosaic.version = 11 : i64} {
  func.func @matmul_bias_kernel(%arg0: i32, %arg1: memref<8x3072xbf16, #tpu.memory_space<vmem>>, %arg2: memref<3072x400xbf16, #tpu.memory_space<vmem>>, %arg3: memref<1x400xf32, #tpu.memory_space<vmem>>, %arg4: memref<8x400xbf16, #tpu.memory_space<vmem>>) attributes {dimension_semantics = [#tpu.dimension_semantics<parallel>], iteration_bounds = array<i64: 1>, scalar_prefetch = 0 : i64, scratch_operands = 0 : i64, tpu.core_type = #tpu.core_type<tc>, window_params = [{transform_indices = @transform_0, window_bounds = array<i64: 8, 3072>}, {pipeline_mode = #tpu.pipeline_mode<synchronous>, transform_indices = @transform_1, window_bounds = array<i64: 3072, 400>}, {pipeline_mode = #tpu.pipeline_mode<synchronous>, transform_indices = @transform_2, window_bounds = array<i64: 1, 400>}, {transform_indices = @transform_3, window_bounds = array<i64: 8, 400>}]} {
    %c0 = arith.constant 0 : index
    %c0_0 = arith.constant 0 : index
    %0 = vector.load %arg1[%c0, %c0_0] : memref<8x3072xbf16, #tpu.memory_space<vmem>>, vector<8x3072xbf16>
    %c0_1 = arith.constant 0 : index
    %c0_2 = arith.constant 0 : index
    %1 = vector.load %arg2[%c0_1, %c0_2] : memref<3072x400xbf16, #tpu.memory_space<vmem>>, vector<3072x400xbf16>
    %cst = arith.constant dense<0.000000e+00> : vector<8x400xf32>
    %2 = tpu.matmul %0, %1, %cst {dimension_numbers = #tpu.dot_dimension_numbers<[1], [0], [0], [1], [0, 0, 1, 1], [], []>} : vector<8x3072xbf16>, vector<3072x400xbf16>, vector<8x400xf32> -> vector<8x400xf32>
    %c0_3 = arith.constant 0 : index
    %c0_4 = arith.constant 0 : index
    %3 = vector.load %arg3[%c0_3, %c0_4] : memref<1x400xf32, #tpu.memory_space<vmem>>, vector<1x400xf32>
    %4 = vector.broadcast %3 : vector<1x400xf32> to vector<8x400xf32>
    %5 = arith.addf %2, %4 : vector<8x400xf32>
    %6 = arith.truncf %5 : vector<8x400xf32> to vector<8x400xbf16>
    %c0_5 = arith.constant 0 : index
    %c0_6 = arith.constant 0 : index
    %7 = vector.load %arg4[%c0_5, %c0_6] : memref<8x400xbf16, #tpu.memory_space<vmem>>, vector<8x400xbf16>
    tpu.vector_store %arg4[%c0_5, %c0_6], %6 {strides = array<i32>} : memref<8x400xbf16, #tpu.memory_space<vmem>>, vector<8x400xbf16>,
    return
  }
  func.func @transform_0(%arg0: i32) -> (i32, i32) {
    %c0_i32 = arith.constant 0 : i32
    %c0_i32_0 = arith.constant 0 : i32
    return %arg0, %c0_i32 : i32, i32
  }
  func.func @transform_1(%arg0: i32) -> (i32, i32) {
    %c0_i32 = arith.constant 0 : i32
    %c0_i32_0 = arith.constant 0 : i32
    %c0_i32_1 = arith.constant 0 : i32
    return %c0_i32, %c0_i32_0 : i32, i32
  }
  func.func @transform_2(%arg0: i32) -> (i32, i32) {
    %c0_i32 = arith.constant 0 : i32
    %c0_i32_0 = arith.constant 0 : i32
    %c0_i32_1 = arith.constant 0 : i32
    return %c0_i32, %c0_i32_0 : i32, i32
  }
  func.func @transform_3(%arg0: i32) -> (i32, i32) {
    %c0_i32 = arith.constant 0 : i32
    %c0_i32_0 = arith.constant 0 : i32
    return %arg0, %c0_i32 : i32, i32
  }
}

module attributes {stable_mosaic.version = 11 : i64} {
  func.func @matmul_bias_kernel(%arg0: i32, %arg1: memref<8x400xbf16, #tpu.memory_space<vmem>>, %arg2: memref<400x64xbf16, #tpu.memory_space<vmem>>, %arg3: memref<1x64xf32, #tpu.memory_space<vmem>>, %arg4: memref<8x64xbf16, #tpu.memory_space<vmem>>) attributes {dimension_semantics = [#tpu.dimension_semantics<parallel>], iteration_bounds = array<i64: 1>, scalar_prefetch = 0 : i64, scratch_operands = 0 : i64, tpu.core_type = #tpu.core_type<tc>, window_params = [{transform_indices = @transform_0, window_bounds = array<i64: 8, 400>}, {pipeline_mode = #tpu.pipeline_mode<synchronous>, transform_indices = @transform_1, window_bounds = array<i64: 400, 64>}, {pipeline_mode = #tpu.pipeline_mode<synchronous>, transform_indices = @transform_2, window_bounds = array<i64: 1, 64>}, {transform_indices = @transform_3, window_bounds = array<i64: 8, 64>}]} {
    %c0 = arith.constant 0 : index
    %c0_0 = arith.constant 0 : index
    %0 = vector.load %arg1[%c0, %c0_0] : memref<8x400xbf16, #tpu.memory_space<vmem>>, vector<8x400xbf16>
    %c0_1 = arith.constant 0 : index
    %c0_2 = arith.constant 0 : index
    %1 = vector.load %arg2[%c0_1, %c0_2] : memref<400x64xbf16, #tpu.memory_space<vmem>>, vector<400x64xbf16>
    %cst = arith.constant dense<0.000000e+00> : vector<8x64xf32>
    %2 = tpu.matmul %0, %1, %cst {dimension_numbers = #tpu.dot_dimension_numbers<[1], [0], [0], [1], [0, 0, 1, 1], [], []>} : vector<8x400xbf16>, vector<400x64xbf16>, vector<8x64xf32> -> vector<8x64xf32>
    %c0_3 = arith.constant 0 : index
    %c0_4 = arith.constant 0 : index
    %3 = vector.load %arg3[%c0_3, %c0_4] : memref<1x64xf32, #tpu.memory_space<vmem>>, vector<1x64xf32>
    %4 = vector.broadcast %3 : vector<1x64xf32> to vector<8x64xf32>
    %5 = arith.addf %2, %4 : vector<8x64xf32>
    %6 = arith.truncf %5 : vector<8x64xf32> to vector<8x64xbf16>
    %c0_5 = arith.constant 0 : index
    %c0_6 = arith.constant 0 : index
    %7 = vector.load %arg4[%c0_5, %c0_6] : memref<8x64xbf16, #tpu.memory_space<vmem>>, vector<8x64xbf16>
    tpu.vector_store %arg4[%c0_5, %c0_6], %6 {strides = array<i32>} : memref<8x64xbf16, #tpu.memory_space<vmem>>, vector<8x64xbf16>,
    return
  }
  func.func @transform_0(%arg0: i32) -> (i32, i32) {
    %c0_i32 = arith.constant 0 : i32
    %c0_i32_0 = arith.constant 0 : i32
    return %arg0, %c0_i32 : i32, i32
  }
  func.func @transform_1(%arg0: i32) -> (i32, i32) {
    %c0_i32 = arith.constant 0 : i32
    %c0_i32_0 = arith.constant 0 : i32
    %c0_i32_1 = arith.constant 0 : i32
    return %c0_i32, %c0_i32_0 : i32, i32
  }
  func.func @transform_2(%arg0: i32) -> (i32, i32) {
    %c0_i32 = arith.constant 0 : i32
    %c0_i32_0 = arith.constant 0 : i32
    %c0_i32_1 = arith.constant 0 : i32
    return %c0_i32, %c0_i32_0 : i32, i32
  }
  func.func @transform_3(%arg0: i32) -> (i32, i32) {
    %c0_i32 = arith.constant 0 : i32
    %c0_i32_0 = arith.constant 0 : i32
    return %arg0, %c0_i32 : i32, i32
  }
}

module attributes {stable_mosaic.version = 11 : i64} {
  func.func @matmul_bias_add_kernel(%arg0: i32, %arg1: memref<32x160xbf16, #tpu.memory_space<vmem>>, %arg2: memref<160x64xbf16, #tpu.memory_space<vmem>>, %arg3: memref<1x64xf32, #tpu.memory_space<vmem>>, %arg4: memref<32x64xbf16, #tpu.memory_space<vmem>>, %arg5: memref<32x64xbf16, #tpu.memory_space<vmem>>) attributes {dimension_semantics = [#tpu.dimension_semantics<parallel>], iteration_bounds = array<i64: 1>, scalar_prefetch = 0 : i64, scratch_operands = 0 : i64, tpu.core_type = #tpu.core_type<tc>, window_params = [{transform_indices = @transform_0, window_bounds = array<i64: 32, 160>}, {pipeline_mode = #tpu.pipeline_mode<synchronous>, transform_indices = @transform_1, window_bounds = array<i64: 160, 64>}, {pipeline_mode = #tpu.pipeline_mode<synchronous>, transform_indices = @transform_2, window_bounds = array<i64: 1, 64>}, {transform_indices = @transform_3, window_bounds = array<i64: 32, 64>}, {transform_indices = @transform_4, window_bounds = array<i64: 32, 64>}]} {
    %c0 = arith.constant 0 : index
    %c0_0 = arith.constant 0 : index
    %0 = vector.load %arg1[%c0, %c0_0] : memref<32x160xbf16, #tpu.memory_space<vmem>>, vector<32x160xbf16>
    %c0_1 = arith.constant 0 : index
    %c0_2 = arith.constant 0 : index
    %1 = vector.load %arg2[%c0_1, %c0_2] : memref<160x64xbf16, #tpu.memory_space<vmem>>, vector<160x64xbf16>
    %cst = arith.constant dense<0.000000e+00> : vector<32x64xf32>
    %2 = tpu.matmul %0, %1, %cst {dimension_numbers = #tpu.dot_dimension_numbers<[1], [0], [0], [1], [0, 0, 1, 1], [], []>} : vector<32x160xbf16>, vector<160x64xbf16>, vector<32x64xf32> -> vector<32x64xf32>
    %c0_3 = arith.constant 0 : index
    %c0_4 = arith.constant 0 : index
    %3 = vector.load %arg3[%c0_3, %c0_4] : memref<1x64xf32, #tpu.memory_space<vmem>>, vector<1x64xf32>
    %4 = vector.broadcast %3 : vector<1x64xf32> to vector<32x64xf32>
    %5 = arith.addf %2, %4 : vector<32x64xf32>
    %c0_5 = arith.constant 0 : index
    %c0_6 = arith.constant 0 : index
    %6 = vector.load %arg4[%c0_5, %c0_6] : memref<32x64xbf16, #tpu.memory_space<vmem>>, vector<32x64xbf16>
    %7 = arith.extf %6 : vector<32x64xbf16> to vector<32x64xf32>
    %8 = arith.addf %5, %7 : vector<32x64xf32>
    %9 = arith.truncf %8 : vector<32x64xf32> to vector<32x64xbf16>
    %c0_7 = arith.constant 0 : index
    %c0_8 = arith.constant 0 : index
    %10 = vector.load %arg5[%c0_7, %c0_8] : memref<32x64xbf16, #tpu.memory_space<vmem>>, vector<32x64xbf16>
    tpu.vector_store %arg5[%c0_7, %c0_8], %9 {strides = array<i32>} : memref<32x64xbf16, #tpu.memory_space<vmem>>, vector<32x64xbf16>,
    return
  }
  func.func @transform_0(%arg0: i32) -> (i32, i32) {
    %c0_i32 = arith.constant 0 : i32
    %c0_i32_0 = arith.constant 0 : i32
    return %arg0, %c0_i32 : i32, i32
  }
  func.func @transform_1(%arg0: i32) -> (i32, i32) {
    %c0_i32 = arith.constant 0 : i32
    %c0_i32_0 = arith.constant 0 : i32
    %c0_i32_1 = arith.constant 0 : i32
    return %c0_i32, %c0_i32_0 : i32, i32
  }
  func.func @transform_2(%arg0: i32) -> (i32, i32) {
    %c0_i32 = arith.constant 0 : i32
    %c0_i32_0 = arith.constant 0 : i32
    %c0_i32_1 = arith.constant 0 : i32
    return %c0_i32, %c0_i32_0 : i32, i32
  }
  func.func @transform_3(%arg0: i32) -> (i32, i32) {
    %c0_i32 = arith.constant 0 : i32
    %c0_i32_0 = arith.constant 0 : i32
    return %arg0, %c0_i32 : i32, i32
  }
  func.func @transform_4(%arg0: i32) -> (i32, i32) {
    %c0_i32 = arith.constant 0 : i32
    %c0_i32_0 = arith.constant 0 : i32
    return %arg0, %c0_i32 : i32, i32
  }
}

module attributes {stable_mosaic.version = 11 : i64} {
  func.func @matmul_bias_add_kernel(%arg0: i32, %arg1: memref<128x64xbf16, #tpu.memory_space<vmem>>, %arg2: memref<64x64xbf16, #tpu.memory_space<vmem>>, %arg3: memref<1x64xf32, #tpu.memory_space<vmem>>, %arg4: memref<128x64xbf16, #tpu.memory_space<vmem>>, %arg5: memref<128x64xbf16, #tpu.memory_space<vmem>>) attributes {dimension_semantics = [#tpu.dimension_semantics<parallel>], iteration_bounds = array<i64: 1>, scalar_prefetch = 0 : i64, scratch_operands = 0 : i64, tpu.core_type = #tpu.core_type<tc>, window_params = [{transform_indices = @transform_0, window_bounds = array<i64: 128, 64>}, {pipeline_mode = #tpu.pipeline_mode<synchronous>, transform_indices = @transform_1, window_bounds = array<i64: 64, 64>}, {pipeline_mode = #tpu.pipeline_mode<synchronous>, transform_indices = @transform_2, window_bounds = array<i64: 1, 64>}, {transform_indices = @transform_3, window_bounds = array<i64: 128, 64>}, {transform_indices = @transform_4, window_bounds = array<i64: 128, 64>}]} {
    %c0 = arith.constant 0 : index
    %c0_0 = arith.constant 0 : index
    %0 = vector.load %arg1[%c0, %c0_0] : memref<128x64xbf16, #tpu.memory_space<vmem>>, vector<128x64xbf16>
    %c0_1 = arith.constant 0 : index
    %c0_2 = arith.constant 0 : index
    %1 = vector.load %arg2[%c0_1, %c0_2] : memref<64x64xbf16, #tpu.memory_space<vmem>>, vector<64x64xbf16>
    %cst = arith.constant dense<0.000000e+00> : vector<128x64xf32>
    %2 = tpu.matmul %0, %1, %cst {dimension_numbers = #tpu.dot_dimension_numbers<[1], [0], [0], [1], [0, 0, 1, 1], [], []>} : vector<128x64xbf16>, vector<64x64xbf16>, vector<128x64xf32> -> vector<128x64xf32>
    %c0_3 = arith.constant 0 : index
    %c0_4 = arith.constant 0 : index
    %3 = vector.load %arg3[%c0_3, %c0_4] : memref<1x64xf32, #tpu.memory_space<vmem>>, vector<1x64xf32>
    %4 = vector.broadcast %3 : vector<1x64xf32> to vector<128x64xf32>
    %5 = arith.addf %2, %4 : vector<128x64xf32>
    %c0_5 = arith.constant 0 : index
    %c0_6 = arith.constant 0 : index
    %6 = vector.load %arg4[%c0_5, %c0_6] : memref<128x64xbf16, #tpu.memory_space<vmem>>, vector<128x64xbf16>
    %7 = arith.extf %6 : vector<128x64xbf16> to vector<128x64xf32>
    %8 = arith.addf %5, %7 : vector<128x64xf32>
    %9 = arith.truncf %8 : vector<128x64xf32> to vector<128x64xbf16>
    %c0_7 = arith.constant 0 : index
    %c0_8 = arith.constant 0 : index
    %10 = vector.load %arg5[%c0_7, %c0_8] : memref<128x64xbf16, #tpu.memory_space<vmem>>, vector<128x64xbf16>
    tpu.vector_store %arg5[%c0_7, %c0_8], %9 {strides = array<i32>} : memref<128x64xbf16, #tpu.memory_space<vmem>>, vector<128x64xbf16>,
    return
  }
  func.func @transform_0(%arg0: i32) -> (i32, i32) {
    %c0_i32 = arith.constant 0 : i32
    %c0_i32_0 = arith.constant 0 : i32
    return %arg0, %c0_i32 : i32, i32
  }
  func.func @transform_1(%arg0: i32) -> (i32, i32) {
    %c0_i32 = arith.constant 0 : i32
    %c0_i32_0 = arith.constant 0 : i32
    %c0_i32_1 = arith.constant 0 : i32
    return %c0_i32, %c0_i32_0 : i32, i32
  }
  func.func @transform_2(%arg0: i32) -> (i32, i32) {
    %c0_i32 = arith.constant 0 : i32
    %c0_i32_0 = arith.constant 0 : i32
    %c0_i32_1 = arith.constant 0 : i32
    return %c0_i32, %c0_i32_0 : i32, i32
  }
  func.func @transform_3(%arg0: i32) -> (i32, i32) {
    %c0_i32 = arith.constant 0 : i32
    %c0_i32_0 = arith.constant 0 : i32
    return %arg0, %c0_i32 : i32, i32
  }
  func.func @transform_4(%arg0: i32) -> (i32, i32) {
    %c0_i32 = arith.constant 0 : i32
    %c0_i32_0 = arith.constant 0 : i32
    return %arg0, %c0_i32 : i32, i32
  }
}

module attributes {stable_mosaic.version = 11 : i64} {
  func.func @conv3x3_kernel(%arg0: i32, %arg1: memref<1x80x192xbf16, #tpu.memory_space<vmem>>, %arg2: memref<576x64xbf16, #tpu.memory_space<vmem>>, %arg3: memref<1x64xf32, #tpu.memory_space<vmem>>, %arg4: memref<1x64x64xf32, #tpu.memory_space<vmem>>) attributes {dimension_semantics = [#tpu.dimension_semantics<parallel>], iteration_bounds = array<i64: 2>, scalar_prefetch = 0 : i64, scratch_operands = 0 : i64, tpu.core_type = #tpu.core_type<tc>, window_params = [{transform_indices = @transform_0, window_bounds = array<i64: 1, 80, 192>}, {pipeline_mode = #tpu.pipeline_mode<synchronous>, transform_indices = @transform_1, window_bounds = array<i64: 576, 64>}, {pipeline_mode = #tpu.pipeline_mode<synchronous>, transform_indices = @transform_2, window_bounds = array<i64: 1, 64>}, {transform_indices = @transform_3, window_bounds = array<i64: 1, 64, 64>}]} {
    %c0 = arith.constant 0 : index
    %c0_0 = arith.constant 0 : index
    %c0_1 = arith.constant 0 : index
    %0 = vector.load %arg1[%c0, %c0_0, %c0_1] : memref<1x80x192xbf16, #tpu.memory_space<vmem>>, vector<1x64x192xbf16>
    %1 = vector.shape_cast %0 : vector<1x64x192xbf16> to vector<64x192xbf16>
    %c0_2 = arith.constant 0 : index
    %c0_3 = arith.constant 0 : index
    %2 = vector.load %arg2[%c0_2, %c0_3] : memref<576x64xbf16, #tpu.memory_space<vmem>>, vector<192x64xbf16>
    %cst = arith.constant dense<0.000000e+00> : vector<64x64xf32>
    %3 = tpu.matmul %1, %2, %cst {dimension_numbers = #tpu.dot_dimension_numbers<[1], [0], [0], [1], [0, 0, 1, 1], [], []>} : vector<64x192xbf16>, vector<192x64xbf16>, vector<64x64xf32> -> vector<64x64xf32>
    %c0_4 = arith.constant 0 : index
    %c8 = arith.constant 8 : index
    %c0_5 = arith.constant 0 : index
    %4 = vector.load %arg1[%c0_4, %c8, %c0_5] : memref<1x80x192xbf16, #tpu.memory_space<vmem>>, vector<1x64x192xbf16>
    %5 = vector.shape_cast %4 : vector<1x64x192xbf16> to vector<64x192xbf16>
    %c192 = arith.constant 192 : index
    %c0_6 = arith.constant 0 : index
    %6 = vector.load %arg2[%c192, %c0_6] : memref<576x64xbf16, #tpu.memory_space<vmem>>, vector<192x64xbf16>
    %cst_7 = arith.constant dense<0.000000e+00> : vector<64x64xf32>
    %7 = tpu.matmul %5, %6, %cst_7 {dimension_numbers = #tpu.dot_dimension_numbers<[1], [0], [0], [1], [0, 0, 1, 1], [], []>} : vector<64x192xbf16>, vector<192x64xbf16>, vector<64x64xf32> -> vector<64x64xf32>
    %8 = arith.addf %3, %7 : vector<64x64xf32>
    %c0_8 = arith.constant 0 : index
    %c16 = arith.constant 16 : index
    %c0_9 = arith.constant 0 : index
    %9 = vector.load %arg1[%c0_8, %c16, %c0_9] : memref<1x80x192xbf16, #tpu.memory_space<vmem>>, vector<1x64x192xbf16>
    %10 = vector.shape_cast %9 : vector<1x64x192xbf16> to vector<64x192xbf16>
    %c384 = arith.constant 384 : index
    %c0_10 = arith.constant 0 : index
    %11 = vector.load %arg2[%c384, %c0_10] : memref<576x64xbf16, #tpu.memory_space<vmem>>, vector<192x64xbf16>
    %cst_11 = arith.constant dense<0.000000e+00> : vector<64x64xf32>
    %12 = tpu.matmul %10, %11, %cst_11 {dimension_numbers = #tpu.dot_dimension_numbers<[1], [0], [0], [1], [0, 0, 1, 1], [], []>} : vector<64x192xbf16>, vector<192x64xbf16>, vector<64x64xf32> -> vector<64x64xf32>
    %13 = arith.addf %8, %12 : vector<64x64xf32>
    %c0_12 = arith.constant 0 : index
    %c0_13 = arith.constant 0 : index
    %14 = vector.load %arg3[%c0_12, %c0_13] : memref<1x64xf32, #tpu.memory_space<vmem>>, vector<1x64xf32>
    %15 = vector.broadcast %14 : vector<1x64xf32> to vector<64x64xf32>
    %16 = arith.addf %13, %15 : vector<64x64xf32>
    %c0_14 = arith.constant 0 : index
    %c0_15 = arith.constant 0 : index
    %c0_16 = arith.constant 0 : index
    %17 = vector.load %arg4[%c0_14, %c0_15, %c0_16] : memref<1x64x64xf32, #tpu.memory_space<vmem>>, vector<1x64x64xf32>
    %18 = vector.shape_cast %17 : vector<1x64x64xf32> to vector<64x64xf32>
    %19 = vector.shape_cast %16 : vector<64x64xf32> to vector<1x64x64xf32>
    tpu.vector_store %arg4[%c0_14, %c0_15, %c0_16], %19 {strides = array<i32>} : memref<1x64x64xf32, #tpu.memory_space<vmem>>, vector<1x64x64xf32>,
    return
  }
  func.func @transform_0(%arg0: i32) -> (i32, i32, i32) {
    %c0_i32 = arith.constant 0 : i32
    %c0_i32_0 = arith.constant 0 : i32
    %c0_i32_1 = arith.constant 0 : i32
    return %arg0, %c0_i32, %c0_i32_0 : i32, i32, i32
  }
  func.func @transform_1(%arg0: i32) -> (i32, i32) {
    %c0_i32 = arith.constant 0 : i32
    %c0_i32_0 = arith.constant 0 : i32
    %c0_i32_1 = arith.constant 0 : i32
    return %c0_i32, %c0_i32_0 : i32, i32
  }
  func.func @transform_2(%arg0: i32) -> (i32, i32) {
    %c0_i32 = arith.constant 0 : i32
    %c0_i32_0 = arith.constant 0 : i32
    %c0_i32_1 = arith.constant 0 : i32
    return %c0_i32, %c0_i32_0 : i32, i32
  }
  func.func @transform_3(%arg0: i32) -> (i32, i32, i32) {
    %c0_i32 = arith.constant 0 : i32
    %c0_i32_0 = arith.constant 0 : i32
    %c0_i32_1 = arith.constant 0 : i32
    return %arg0, %c0_i32, %c0_i32_0 : i32, i32, i32
  }
}

module attributes {stable_mosaic.version = 11 : i64} {
  func.func @conv3x3_kernel(%arg0: i32, %arg1: memref<1x24x192xbf16, #tpu.memory_space<vmem>>, %arg2: memref<576x64xbf16, #tpu.memory_space<vmem>>, %arg3: memref<1x64xf32, #tpu.memory_space<vmem>>, %arg4: memref<1x16x64xf32, #tpu.memory_space<vmem>>) attributes {dimension_semantics = [#tpu.dimension_semantics<parallel>], iteration_bounds = array<i64: 2>, scalar_prefetch = 0 : i64, scratch_operands = 0 : i64, tpu.core_type = #tpu.core_type<tc>, window_params = [{transform_indices = @transform_0, window_bounds = array<i64: 1, 24, 192>}, {pipeline_mode = #tpu.pipeline_mode<synchronous>, transform_indices = @transform_1, window_bounds = array<i64: 576, 64>}, {pipeline_mode = #tpu.pipeline_mode<synchronous>, transform_indices = @transform_2, window_bounds = array<i64: 1, 64>}, {transform_indices = @transform_3, window_bounds = array<i64: 1, 16, 64>}]} {
    %c0 = arith.constant 0 : index
    %c0_0 = arith.constant 0 : index
    %c0_1 = arith.constant 0 : index
    %0 = vector.load %arg1[%c0, %c0_0, %c0_1] : memref<1x24x192xbf16, #tpu.memory_space<vmem>>, vector<1x16x192xbf16>
    %1 = vector.shape_cast %0 : vector<1x16x192xbf16> to vector<16x192xbf16>
    %c0_2 = arith.constant 0 : index
    %c0_3 = arith.constant 0 : index
    %2 = vector.load %arg2[%c0_2, %c0_3] : memref<576x64xbf16, #tpu.memory_space<vmem>>, vector<192x64xbf16>
    %cst = arith.constant dense<0.000000e+00> : vector<16x64xf32>
    %3 = tpu.matmul %1, %2, %cst {dimension_numbers = #tpu.dot_dimension_numbers<[1], [0], [0], [1], [0, 0, 1, 1], [], []>} : vector<16x192xbf16>, vector<192x64xbf16>, vector<16x64xf32> -> vector<16x64xf32>
    %c0_4 = arith.constant 0 : index
    %c4 = arith.constant 4 : index
    %c0_5 = arith.constant 0 : index
    %4 = vector.load %arg1[%c0_4, %c4, %c0_5] : memref<1x24x192xbf16, #tpu.memory_space<vmem>>, vector<1x16x192xbf16>
    %5 = vector.shape_cast %4 : vector<1x16x192xbf16> to vector<16x192xbf16>
    %c192 = arith.constant 192 : index
    %c0_6 = arith.constant 0 : index
    %6 = vector.load %arg2[%c192, %c0_6] : memref<576x64xbf16, #tpu.memory_space<vmem>>, vector<192x64xbf16>
    %cst_7 = arith.constant dense<0.000000e+00> : vector<16x64xf32>
    %7 = tpu.matmul %5, %6, %cst_7 {dimension_numbers = #tpu.dot_dimension_numbers<[1], [0], [0], [1], [0, 0, 1, 1], [], []>} : vector<16x192xbf16>, vector<192x64xbf16>, vector<16x64xf32> -> vector<16x64xf32>
    %8 = arith.addf %3, %7 : vector<16x64xf32>
    %c0_8 = arith.constant 0 : index
    %c8 = arith.constant 8 : index
    %c0_9 = arith.constant 0 : index
    %9 = vector.load %arg1[%c0_8, %c8, %c0_9] : memref<1x24x192xbf16, #tpu.memory_space<vmem>>, vector<1x16x192xbf16>
    %10 = vector.shape_cast %9 : vector<1x16x192xbf16> to vector<16x192xbf16>
    %c384 = arith.constant 384 : index
    %c0_10 = arith.constant 0 : index
    %11 = vector.load %arg2[%c384, %c0_10] : memref<576x64xbf16, #tpu.memory_space<vmem>>, vector<192x64xbf16>
    %cst_11 = arith.constant dense<0.000000e+00> : vector<16x64xf32>
    %12 = tpu.matmul %10, %11, %cst_11 {dimension_numbers = #tpu.dot_dimension_numbers<[1], [0], [0], [1], [0, 0, 1, 1], [], []>} : vector<16x192xbf16>, vector<192x64xbf16>, vector<16x64xf32> -> vector<16x64xf32>
    %13 = arith.addf %8, %12 : vector<16x64xf32>
    %c0_12 = arith.constant 0 : index
    %c0_13 = arith.constant 0 : index
    %14 = vector.load %arg3[%c0_12, %c0_13] : memref<1x64xf32, #tpu.memory_space<vmem>>, vector<1x64xf32>
    %15 = vector.broadcast %14 : vector<1x64xf32> to vector<16x64xf32>
    %16 = arith.addf %13, %15 : vector<16x64xf32>
    %c0_14 = arith.constant 0 : index
    %c0_15 = arith.constant 0 : index
    %c0_16 = arith.constant 0 : index
    %17 = vector.load %arg4[%c0_14, %c0_15, %c0_16] : memref<1x16x64xf32, #tpu.memory_space<vmem>>, vector<1x16x64xf32>
    %18 = vector.shape_cast %17 : vector<1x16x64xf32> to vector<16x64xf32>
    %19 = vector.shape_cast %16 : vector<16x64xf32> to vector<1x16x64xf32>
    tpu.vector_store %arg4[%c0_14, %c0_15, %c0_16], %19 {strides = array<i32>} : memref<1x16x64xf32, #tpu.memory_space<vmem>>, vector<1x16x64xf32>,
    return
  }
  func.func @transform_0(%arg0: i32) -> (i32, i32, i32) {
    %c0_i32 = arith.constant 0 : i32
    %c0_i32_0 = arith.constant 0 : i32
    %c0_i32_1 = arith.constant 0 : i32
    return %arg0, %c0_i32, %c0_i32_0 : i32, i32, i32
  }
  func.func @transform_1(%arg0: i32) -> (i32, i32) {
    %c0_i32 = arith.constant 0 : i32
    %c0_i32_0 = arith.constant 0 : i32
    %c0_i32_1 = arith.constant 0 : i32
    return %c0_i32, %c0_i32_0 : i32, i32
  }
  func.func @transform_2(%arg0: i32) -> (i32, i32) {
    %c0_i32 = arith.constant 0 : i32
    %c0_i32_0 = arith.constant 0 : i32
    %c0_i32_1 = arith.constant 0 : i32
    return %c0_i32, %c0_i32_0 : i32, i32
  }
  func.func @transform_3(%arg0: i32) -> (i32, i32, i32) {
    %c0_i32 = arith.constant 0 : i32
    %c0_i32_0 = arith.constant 0 : i32
    %c0_i32_1 = arith.constant 0 : i32
    return %arg0, %c0_i32, %c0_i32_0 : i32, i32, i32
  }
}

module attributes {stable_mosaic.version = 11 : i64} {
  func.func @conv3x3_kernel(%arg0: i32, %arg1: memref<1x8x192xbf16, #tpu.memory_space<vmem>>, %arg2: memref<576x64xbf16, #tpu.memory_space<vmem>>, %arg3: memref<1x64xf32, #tpu.memory_space<vmem>>, %arg4: memref<1x4x64xf32, #tpu.memory_space<vmem>>) attributes {dimension_semantics = [#tpu.dimension_semantics<parallel>], iteration_bounds = array<i64: 2>, scalar_prefetch = 0 : i64, scratch_operands = 0 : i64, tpu.core_type = #tpu.core_type<tc>, window_params = [{transform_indices = @transform_0, window_bounds = array<i64: 1, 8, 192>}, {pipeline_mode = #tpu.pipeline_mode<synchronous>, transform_indices = @transform_1, window_bounds = array<i64: 576, 64>}, {pipeline_mode = #tpu.pipeline_mode<synchronous>, transform_indices = @transform_2, window_bounds = array<i64: 1, 64>}, {transform_indices = @transform_3, window_bounds = array<i64: 1, 4, 64>}]} {
    %c0 = arith.constant 0 : index
    %c0_0 = arith.constant 0 : index
    %c0_1 = arith.constant 0 : index
    %0 = vector.load %arg1[%c0, %c0_0, %c0_1] : memref<1x8x192xbf16, #tpu.memory_space<vmem>>, vector<1x4x192xbf16>
    %1 = vector.shape_cast %0 : vector<1x4x192xbf16> to vector<4x192xbf16>
    %c0_2 = arith.constant 0 : index
    %c0_3 = arith.constant 0 : index
    %2 = vector.load %arg2[%c0_2, %c0_3] : memref<576x64xbf16, #tpu.memory_space<vmem>>, vector<192x64xbf16>
    %cst = arith.constant dense<0.000000e+00> : vector<4x64xf32>
    %3 = tpu.matmul %1, %2, %cst {dimension_numbers = #tpu.dot_dimension_numbers<[1], [0], [0], [1], [0, 0, 1, 1], [], []>} : vector<4x192xbf16>, vector<192x64xbf16>, vector<4x64xf32> -> vector<4x64xf32>
    %c0_4 = arith.constant 0 : index
    %c2 = arith.constant 2 : index
    %c0_5 = arith.constant 0 : index
    %4 = vector.load %arg1[%c0_4, %c2, %c0_5] : memref<1x8x192xbf16, #tpu.memory_space<vmem>>, vector<1x4x192xbf16>
    %5 = vector.shape_cast %4 : vector<1x4x192xbf16> to vector<4x192xbf16>
    %c192 = arith.constant 192 : index
    %c0_6 = arith.constant 0 : index
    %6 = vector.load %arg2[%c192, %c0_6] : memref<576x64xbf16, #tpu.memory_space<vmem>>, vector<192x64xbf16>
    %cst_7 = arith.constant dense<0.000000e+00> : vector<4x64xf32>
    %7 = tpu.matmul %5, %6, %cst_7 {dimension_numbers = #tpu.dot_dimension_numbers<[1], [0], [0], [1], [0, 0, 1, 1], [], []>} : vector<4x192xbf16>, vector<192x64xbf16>, vector<4x64xf32> -> vector<4x64xf32>
    %8 = arith.addf %3, %7 : vector<4x64xf32>
    %c0_8 = arith.constant 0 : index
    %c4 = arith.constant 4 : index
    %c0_9 = arith.constant 0 : index
    %9 = vector.load %arg1[%c0_8, %c4, %c0_9] : memref<1x8x192xbf16, #tpu.memory_space<vmem>>, vector<1x4x192xbf16>
    %10 = vector.shape_cast %9 : vector<1x4x192xbf16> to vector<4x192xbf16>
    %c384 = arith.constant 384 : index
    %c0_10 = arith.constant 0 : index
    %11 = vector.load %arg2[%c384, %c0_10] : memref<576x64xbf16, #tpu.memory_space<vmem>>, vector<192x64xbf16>
    %cst_11 = arith.constant dense<0.000000e+00> : vector<4x64xf32>
    %12 = tpu.matmul %10, %11, %cst_11 {dimension_numbers = #tpu.dot_dimension_numbers<[1], [0], [0], [1], [0, 0, 1, 1], [], []>} : vector<4x192xbf16>, vector<192x64xbf16>, vector<4x64xf32> -> vector<4x64xf32>
    %13 = arith.addf %8, %12 : vector<4x64xf32>
    %c0_12 = arith.constant 0 : index
    %c0_13 = arith.constant 0 : index
    %14 = vector.load %arg3[%c0_12, %c0_13] : memref<1x64xf32, #tpu.memory_space<vmem>>, vector<1x64xf32>
    %15 = vector.broadcast %14 : vector<1x64xf32> to vector<4x64xf32>
    %16 = arith.addf %13, %15 : vector<4x64xf32>
    %c0_14 = arith.constant 0 : index
    %c0_15 = arith.constant 0 : index
    %c0_16 = arith.constant 0 : index
    %17 = vector.load %arg4[%c0_14, %c0_15, %c0_16] : memref<1x4x64xf32, #tpu.memory_space<vmem>>, vector<1x4x64xf32>
    %18 = vector.shape_cast %17 : vector<1x4x64xf32> to vector<4x64xf32>
    %19 = vector.shape_cast %16 : vector<4x64xf32> to vector<1x4x64xf32>
    tpu.vector_store %arg4[%c0_14, %c0_15, %c0_16], %19 {strides = array<i32>} : memref<1x4x64xf32, #tpu.memory_space<vmem>>, vector<1x4x64xf32>,
    return
  }
  func.func @transform_0(%arg0: i32) -> (i32, i32, i32) {
    %c0_i32 = arith.constant 0 : i32
    %c0_i32_0 = arith.constant 0 : i32
    %c0_i32_1 = arith.constant 0 : i32
    return %arg0, %c0_i32, %c0_i32_0 : i32, i32, i32
  }
  func.func @transform_1(%arg0: i32) -> (i32, i32) {
    %c0_i32 = arith.constant 0 : i32
    %c0_i32_0 = arith.constant 0 : i32
    %c0_i32_1 = arith.constant 0 : i32
    return %c0_i32, %c0_i32_0 : i32, i32
  }
  func.func @transform_2(%arg0: i32) -> (i32, i32) {
    %c0_i32 = arith.constant 0 : i32
    %c0_i32_0 = arith.constant 0 : i32
    %c0_i32_1 = arith.constant 0 : i32
    return %c0_i32, %c0_i32_0 : i32, i32
  }
  func.func @transform_3(%arg0: i32) -> (i32, i32, i32) {
    %c0_i32 = arith.constant 0 : i32
    %c0_i32_0 = arith.constant 0 : i32
    %c0_i32_1 = arith.constant 0 : i32
    return %arg0, %c0_i32, %c0_i32_0 : i32, i32, i32
  }
}

</mosaic_0001>

<bundles_post_ra>
// kernel: fpn_forward.9
= control target key start
LH: loop header
LB: loop body
LE: loop exit
PB: predicated region body
PF: predicated region fallthrough
CT: control target
= control target key end

     0   :  { %v543_v0 = vmov 0   ;;  %vm206_vm0 = vcmask 523264   ;;  %vm392_vm1 = vcmask 519168   ;;  %s765_s1 = inlined_call_operand.vmem [shape: bf16[192,64], index: 1, kind: input, shape index: {}]   ;;  %s766_s0 = inlined_call_operand.vmem [shape: bf16[128,192], index: 0, kind: input, shape index: {}]   ;;  %s767_s2 = inlined_call_operand.vmem [shape: f32[1,64], index: 2, kind: input, shape index: {}]   ;;  %s768_s3 = inlined_call_operand.vmem [shape: bf16[128,64], index: 3, kind: output, shape index: {}]  }
   0x1   :  { %231 = vmatprep.subr.bf16.mxu0 %v543_v0  ;;  %482 = vmatprep.subr.bf16.mxu1 %v543_v0  ;;  %v507_v1 = vld [vmem:[%s765_s1] sm:$0xff]   ;;  %v508_v2 = vld [vmem:[%s765_s1 + $0x8] sm:$0xff]   ;;  %v509_v3 = vld [vmem:[%s765_s1 + $0x10] sm:$0xff]  }
   0x2   :  { %232 = vmatpush1.bf16.msra.mxu0 %v507_v1  ;;  %494 = vmatpush1.bf16.msra.mxu1 %v507_v1  ;;  %v510_v4 = vld [vmem:[%s765_s1 + $0x18] sm:$0xff]   ;;  %v521_v5 = vld [vmem:[%s766_s0 + $0x4] ss:$8 sps:$4 sm:$0xff]   ;;  %v513_v9 = vld [vmem:[%s765_s1 + $0x30] sm:$0xff]  }
   0x3   :  { %233 = vmatprep.subr.bf16.mxu0 %v543_v0  ;;  %483 = vmatprep.subr.bf16.mxu1 %v543_v0  ;;  %v511_v6 = vld [vmem:[%s765_s1 + $0x20] sm:$0xff]   ;;  %v512_v8 = vld [vmem:[%s765_s1 + $0x28] sm:$0xff]   ;;  %v514_v10 = vld [vmem:[%s765_s1 + $0x38] sm:$0xff]  }
   0x4   :  { %v524_v7 = vld [vmem:[%s766_s0 + $0x44] ss:$8 sps:$4 sm:$0xff]   ;;  %442 = vmatprep.mubr.msk.bf16.mxu0 %vm206_vm0, %v521_v5  ;;  %v517_v13 = vld [vmem:[%s765_s1 + $0x50] sm:$0xff]   ;;  %v518_v14 = vld [vmem:[%s765_s1 + $0x58] sm:$0xff]  }
   0x5   :  { %446 = vmatprep.mubr.msk.bf16.mxu1 %vm206_vm0, %v524_v7  ;;  %v515_v11 = vld [vmem:[%s765_s1 + $0x40] sm:$0xff]   ;;  %v516_v12 = vld [vmem:[%s765_s1 + $0x48] sm:$0xff]   ;;  %v525_v17 = vld [vmem:[%s766_s0 + $0x14] ss:$8 sps:$4 sm:$0xff]  }
   0x6   :  { %234 = vmatpush1.bf16.msra.mxu0 %v508_v2  ;;  %495 = vmatpush1.bf16.msra.mxu1 %v508_v2  ;;  %v519_v15 = vld [vmem:[%s766_s0] ss:$8 sps:$4 sm:$0xff]   ;;  %v527_v18 = vld [vmem:[%s766_s0 + $0x54] ss:$8 sps:$4 sm:$0xff]   ;;  %v529_v19 = vld [vmem:[%s766_s0 + $0x10] ss:$8 sps:$4 sm:$0xff]  }
   0x7   :  { %235 = vmatprep.subr.bf16.mxu0 %v543_v0  ;;  %484 = vmatprep.subr.bf16.mxu1 %v543_v0  ;;  %v522_v16 = vld [vmem:[%s766_s0 + $0x40] ss:$8 sps:$4 sm:$0xff]   ;;  %v530_v20 = vld [vmem:[%s766_s0 + $0x50] ss:$8 sps:$4 sm:$0xff]   ;;  %v531_v21 = vld [vmem:[%s766_s0 + $0x24] ss:$8 sps:$4 sm:$0xff]  }
   0x8   :  { %v533_v22 = vld [vmem:[%s766_s0 + $0x64] ss:$8 sps:$4 sm:$0xff]   ;;  %v535_v23 = vld [vmem:[%s766_s0 + $0x20] ss:$8 sps:$4 sm:$0xff]   ;;  %v537_v25 = vld [vmem:[%s766_s0 + $0x34] ss:$8 sps:$4 sm:$0xff]  }
   0x9   :  { %v536_v24 = vld [vmem:[%s766_s0 + $0x60] ss:$8 sps:$4 sm:$0xff]   ;;  %v539_v26 = vld [vmem:[%s766_s0 + $0x74] ss:$8 sps:$4 sm:$0xff]   ;;  %v541_v27 = vld [vmem:[%s766_s0 + $0x30] ss:$8 sps:$4 sm:$0xff]  }
   0xa   :  { %236 = vmatpush1.bf16.msra.mxu0 %v509_v3  ;;  %496 = vmatpush1.bf16.msra.mxu1 %v509_v3  ;;  %v542_v28 = vld [vmem:[%s766_s0 + $0x70] ss:$8 sps:$4 sm:$0xff]   ;;  %v683_v29 = vld [vmem:[%s767_s2] ss:$0 sm:$0xff] }
   0xb   :  { %237 = vmatprep.subr.bf16.mxu0 %v543_v0  ;;  %485 = vmatprep.subr.bf16.mxu1 %v543_v0 }
   0xe   :  { %238 = vmatpush1.bf16.msra.mxu0 %v510_v4  ;;  %497 = vmatpush1.bf16.msra.mxu1 %v510_v4 }
   0xf   :  { %239 = vmatprep.subr.bf16.mxu0 %v543_v0  ;;  %486 = vmatprep.subr.bf16.mxu1 %v543_v0 }
  0x12   :  { %240 = vmatpush1.bf16.msra.mxu0 %v511_v6  ;;  %498 = vmatpush1.bf16.msra.mxu1 %v511_v6 }
  0x13   :  { %241 = vmatprep.subr.bf16.mxu0 %v543_v0  ;;  %487 = vmatprep.subr.bf16.mxu1 %v543_v0 }
  0x16   :  { %242 = vmatpush1.bf16.msra.mxu0 %v512_v8  ;;  %499 = vmatpush1.bf16.msra.mxu1 %v512_v8 }
  0x17   :  { %243 = vmatprep.subr.bf16.mxu0 %v543_v0  ;;  %488 = vmatprep.subr.bf16.mxu1 %v543_v0 }
  0x1a   :  { %244 = vmatpush1.bf16.msra.mxu0 %v513_v9  ;;  %500 = vmatpush1.bf16.msra.mxu1 %v513_v9 }
  0x1b   :  { %245 = vmatprep.subr.bf16.mxu0 %v543_v0  ;;  %489 = vmatprep.subr.bf16.mxu1 %v543_v0 }
  0x1e   :  { %246 = vmatpush1.bf16.msra.mxu0 %v514_v10  ;;  %501 = vmatpush1.bf16.msra.mxu1 %v514_v10 }
  0x1f   :  { %247 = vmatprep.subr.bf16.mxu0 %v543_v0  ;;  %490 = vmatprep.subr.bf16.mxu1 %v543_v0 }
  0x22   :  { %248 = vmatpush1.bf16.msra.mxu0 %v515_v11  ;;  %502 = vmatpush1.bf16.msra.mxu1 %v515_v11 }
  0x23   :  { %249 = vmatprep.subr.bf16.mxu0 %v543_v0  ;;  %491 = vmatprep.subr.bf16.mxu1 %v543_v0 }
  0x26   :  { %250 = vmatpush1.bf16.msra.mxu0 %v516_v12  ;;  %503 = vmatpush1.bf16.msra.mxu1 %v516_v12 }
  0x27   :  { %251 = vmatprep.subr.bf16.mxu0 %v543_v0  ;;  %492 = vmatprep.subr.bf16.mxu1 %v543_v0 }
  0x2a   :  { %252 = vmatpush1.bf16.msra.mxu0 %v517_v13  ;;  %504 = vmatpush1.bf16.msra.mxu1 %v517_v13 }
  0x2b   :  { %253 = vmatprep.subr.bf16.mxu0 %v543_v0  ;;  %493 = vmatprep.subr.bf16.mxu1 %v543_v0 }
  0x2e   :  { %254 = vmatpush1.bf16.msra.mxu0 %v518_v14  ;;  %505 = vmatpush1.bf16.msra.mxu1 %v518_v14 }
  0x31   :  { %264 = vmatmul.mubr.bf16.vlgmr.msra.gmra.mrb[0].mxu0 %v519_v15  ;;  %296 = vmatmul.mubr.bf16.vlgmr.msra.gmra.mrb[0].mxu1 %v522_v16 }
  0x32   :  { %443 = vmatprep.mubr.msk.bf16.mxu0 %vm206_vm0, %v525_v17  ;;  %447 = vmatprep.mubr.msk.bf16.mxu1 %vm206_vm0, %v527_v18 }
  0x39   :  { %272 = vmatmul.mubr.bf16.gmra.mrb[4].mxu0 %v529_v19  ;;  %304 = vmatmul.mubr.bf16.gmra.mrb[4].mxu1 %v530_v20 }
  0x3a   :  { %444 = vmatprep.mubr.msk.bf16.mxu0 %vm206_vm0, %v531_v21  ;;  %448 = vmatprep.mubr.msk.bf16.mxu1 %vm206_vm0, %v533_v22 }
  0x41   :  { %280 = vmatmul.mubr.bf16.gmra.mrb[8].mxu0 %v535_v23  ;;  %312 = vmatmul.mubr.bf16.gmra.mrb[8].mxu1 %v536_v24 }
  0x42   :  { %445 = vmatprep.mubr.msk.bf16.mxu0 %vm206_vm0, %v537_v25  ;;  %449 = vmatprep.mubr.msk.bf16.mxu1 %vm206_vm0, %v539_v26 }
  0x49   :  { %288 = vmatmul.mubr.bf16.gmra.mrb[12].mxu0 %v541_v27  ;;  %320 = vmatmul.mubr.bf16.gmra.mrb[12].mxu1 %v542_v28 }
 0x104   :  { %v265_v30 = vpop.f32.mrb[0].mxu0  ;;  %v297_v31 = vpop.f32.mrb[0].mxu1 }
 0x105   :  { %v266_v32 = vadd.f32 %v683_v29, %v265_v30  ;;  %v298_v33 = vadd.f32 %v683_v29, %v297_v31  ;;  %v267_v34 = vpop.f32.mrb[1].mxu0  ;;  %v299_v35 = vpop.f32.mrb[1].mxu1 }
 0x106   :  { %v268_v36 = vpop.f32.mrb[2].mxu0  ;;  %v300_v37 = vpop.f32.mrb[2].mxu1 }
 0x107   :  { %v466_v38 = vpack.c.bf16 %v266_v32, %v266_v32  ;;  %v474_v39 = vpack.c.bf16 %v298_v33, %v298_v33  ;;  %v269_v40 = vadd.f32 %v683_v29, %v268_v36  ;;  %v301_v41 = vadd.f32 %v683_v29, %v300_v37  ;;  %v270_v42 = vpop.f32.mrb[3].mxu0  ;;  %v302_v43 = vpop.f32.mrb[3].mxu1 }
 0x109   :  { %393 = vst.msk [vmem:[%s768_s3] sm:$0xf] %vm392_vm1, %v466_v38  ;;  %401 = vst.msk [vmem:[%s768_s3 + $0x20] sm:$0xf] %vm392_vm1, %v474_v39  ;;  %v467_v44 = vpack.c.bf16 %v269_v40, %v269_v40  ;;  %v475_v45 = vpack.c.bf16 %v301_v41, %v301_v41 }
 0x10b   :  { %394 = vst.msk [vmem:[%s768_s3 + $0x4] sm:$0xf] %vm392_vm1, %v467_v44  ;;  %402 = vst.msk [vmem:[%s768_s3 + $0x24] sm:$0xf] %vm392_vm1, %v475_v45 }
 0x10c   :  { %v273_v46 = vpop.f32.mrb[4].mxu0  ;;  %v305_v47 = vpop.f32.mrb[4].mxu1 }
 0x10d   :  { %v274_v48 = vadd.f32 %v683_v29, %v273_v46  ;;  %v306_v49 = vadd.f32 %v683_v29, %v305_v47  ;;  %v275_v50 = vpop.f32.mrb[5].mxu0  ;;  %v307_v51 = vpop.f32.mrb[5].mxu1 }
 0x10e   :  { %v276_v52 = vpop.f32.mrb[6].mxu0  ;;  %v308_v53 = vpop.f32.mrb[6].mxu1 }
 0x10f   :  { %v468_v54 = vpack.c.bf16 %v274_v48, %v274_v48  ;;  %v476_v55 = vpack.c.bf16 %v306_v49, %v306_v49  ;;  %v277_v56 = vadd.f32 %v683_v29, %v276_v52  ;;  %v309_v57 = vadd.f32 %v683_v29, %v308_v53  ;;  %v278_v58 = vpop.f32.mrb[7].mxu0  ;;  %v310_v59 = vpop.f32.mrb[7].mxu1 }
 0x111   :  { %395 = vst.msk [vmem:[%s768_s3 + $0x8] sm:$0xf] %vm392_vm1, %v468_v54  ;;  %403 = vst.msk [vmem:[%s768_s3 + $0x28] sm:$0xf] %vm392_vm1, %v476_v55  ;;  %v469_v60 = vpack.c.bf16 %v277_v56, %v277_v56  ;;  %v477_v61 = vpack.c.bf16 %v309_v57, %v309_v57 }
 0x113   :  { %396 = vst.msk [vmem:[%s768_s3 + $0xc] sm:$0xf] %vm392_vm1, %v469_v60  ;;  %404 = vst.msk [vmem:[%s768_s3 + $0x2c] sm:$0xf] %vm392_vm1, %v477_v61 }
 0x114   :  { %v281_v62 = vpop.f32.mrb[8].mxu0  ;;  %v313_v63 = vpop.f32.mrb[8].mxu1 }
 0x115   :  { %v282_v0 = vadd.f32 %v683_v29, %v281_v62  ;;  %v314_v1 = vadd.f32 %v683_v29, %v313_v63  ;;  %v283_v2 = vpop.f32.mrb[9].mxu0  ;;  %v315_v3 = vpop.f32.mrb[9].mxu1 }
 0x116   :  { %v284_v4 = vpop.f32.mrb[10].mxu0  ;;  %v316_v5 = vpop.f32.mrb[10].mxu1 }
 0x117   :  { %v470_v6 = vpack.c.bf16 %v282_v0, %v282_v0  ;;  %v478_v7 = vpack.c.bf16 %v314_v1, %v314_v1  ;;  %v285_v8 = vadd.f32 %v683_v29, %v284_v4  ;;  %v317_v9 = vadd.f32 %v683_v29, %v316_v5  ;;  %v286_v10 = vpop.f32.mrb[11].mxu0  ;;  %v318_v11 = vpop.f32.mrb[11].mxu1 }
 0x119   :  { %397 = vst.msk [vmem:[%s768_s3 + $0x10] sm:$0xf] %vm392_vm1, %v470_v6  ;;  %405 = vst.msk [vmem:[%s768_s3 + $0x30] sm:$0xf] %vm392_vm1, %v478_v7  ;;  %v471_v12 = vpack.c.bf16 %v285_v8, %v285_v8  ;;  %v479_v13 = vpack.c.bf16 %v317_v9, %v317_v9 }
 0x11b   :  { %398 = vst.msk [vmem:[%s768_s3 + $0x14] sm:$0xf] %vm392_vm1, %v471_v12  ;;  %406 = vst.msk [vmem:[%s768_s3 + $0x34] sm:$0xf] %vm392_vm1, %v479_v13 }
 0x11c   :  { %v289_v14 = vpop.f32.mrb[12].mxu0  ;;  %v321_v15 = vpop.f32.mrb[12].mxu1 }
 0x11d   :  { %v290_v16 = vadd.f32 %v683_v29, %v289_v14  ;;  %v322_v17 = vadd.f32 %v683_v29, %v321_v15  ;;  %v291_v18 = vpop.f32.mrb[13].mxu0  ;;  %v323_v19 = vpop.f32.mrb[13].mxu1 }
 0x11e   :  { %v292_v20 = vpop.f32.mrb[14].mxu0  ;;  %v324_v21 = vpop.f32.mrb[14].mxu1 }
 0x11f   :  { %v472_v22 = vpack.c.bf16 %v290_v16, %v290_v16  ;;  %v480_v23 = vpack.c.bf16 %v322_v17, %v322_v17  ;;  %v293_v24 = vadd.f32 %v683_v29, %v292_v20  ;;  %v325_v25 = vadd.f32 %v683_v29, %v324_v21  ;;  %v294_v26 = vpop.f32.mrb[15].mxu0  ;;  %v326_v27 = vpop.f32.mrb[15].mxu1 }
 0x121   :  { %399 = vst.msk [vmem:[%s768_s3 + $0x18] sm:$0xf] %vm392_vm1, %v472_v22  ;;  %407 = vst.msk [vmem:[%s768_s3 + $0x38] sm:$0xf] %vm392_vm1, %v480_v23  ;;  %v473_v28 = vpack.c.bf16 %v293_v24, %v293_v24  ;;  %v481_v30 = vpack.c.bf16 %v325_v25, %v325_v25 }
 0x123   :  { %400 = vst.msk [vmem:[%s768_s3 + $0x1c] sm:$0xf] %vm392_vm1, %v473_v28  ;;  %408 = vst.msk [vmem:[%s768_s3 + $0x3c] sm:$0xf] %vm392_vm1, %v481_v30 }

// kernel: fpn_forward.10
= control target key start
LH: loop header
LB: loop body
LE: loop exit
PB: predicated region body
PF: predicated region fallthrough
CT: control target
= control target key end

     0   :  { %vm857_vm0 = vcmask 1043456   ;;  %vm858_vm1 = vcmask 261124   ;;  %s1561_s1 = inlined_call_operand.vmem [shape: bf16[768,160], index: 1, kind: input, shape index: {}]   ;;  %s1562_s0 = inlined_call_operand.vmem [shape: bf16[32,768], index: 0, kind: input, shape index: {}]   ;;  %s1563_s2 = inlined_call_operand.vmem [shape: f32[1,160], index: 2, kind: input, shape index: {}]   ;;  %s1564_s3 = inlined_call_operand.vmem [shape: bf16[32,160], index: 3, kind: output, shape index: {}]  }
   0x1   :  { %v1040_v0 = vld [vmem:[%s1561_s1 + $0x4] ss:$8 sps:$4 sm:$0xff]   ;;  %v1044_v2 = vld [vmem:[%s1561_s1] ss:$8 sps:$4 sm:$0xff]   ;;  %v1046_v4 = vld [vmem:[%s1561_s1 + $0x14] ss:$8 sps:$4 sm:$0xff]  }
   0x2   :  { %v1042_v1 = vld [vmem:[%s1561_s1 + $0x104] ss:$8 sps:$4 sm:$0xff]   ;;  %674 = vmatprep.subr.bf16.mxu1 %v1040_v0  ;;  %v1045_v3 = vld [vmem:[%s1561_s1 + $0x100] ss:$8 sps:$4 sm:$0xff]   ;;  %v1048_v5 = vld [vmem:[%s1561_s1 + $0x114] ss:$8 sps:$4 sm:$0xff]  }
   0x3   :  { %727 = vmatprep.subr.bf16.mxu0 %v1042_v1  ;;  %675 = vmatpush1.bf16.msra.mxu1 %v1044_v2  ;;  %v1050_v6 = vld [vmem:[%s1561_s1 + $0x10] ss:$8 sps:$4 sm:$0xff]   ;;  %v1052_v8 = vld [vmem:[%s1561_s1 + $0x24] ss:$8 sps:$4 sm:$0xff]   ;;  %v1056_v10 = vld [vmem:[%s1561_s1 + $0x20] ss:$8 sps:$4 sm:$0xff]  }
   0x4   :  { %728 = vmatpush1.bf16.msra.mxu0 %v1045_v3  ;;  %676 = vmatprep.subr.bf16.mxu1 %v1046_v4  ;;  %v1051_v7 = vld [vmem:[%s1561_s1 + $0x110] ss:$8 sps:$4 sm:$0xff]   ;;  %v1054_v9 = vld [vmem:[%s1561_s1 + $0x124] ss:$8 sps:$4 sm:$0xff]   ;;  %v1057_v11 = vld [vmem:[%s1561_s1 + $0x120] ss:$8 sps:$4 sm:$0xff]  }
   0x5   :  { %729 = vmatprep.subr.bf16.mxu0 %v1048_v5  ;;  %v1058_v12 = vld [vmem:[%s1561_s1 + $0x34] ss:$8 sps:$4 sm:$0xff]   ;;  %v1062_v14 = vld [vmem:[%s1561_s1 + $0x30] ss:$8 sps:$4 sm:$0xff]   ;;  %v1064_v16 = vld [vmem:[%s1561_s1 + $0x44] ss:$8 sps:$4 sm:$0xff]  }
   0x6   :  { %v1060_v13 = vld [vmem:[%s1561_s1 + $0x134] ss:$8 sps:$4 sm:$0xff]   ;;  %v1063_v15 = vld [vmem:[%s1561_s1 + $0x130] ss:$8 sps:$4 sm:$0xff]   ;;  %v1066_v17 = vld [vmem:[%s1561_s1 + $0x144] ss:$8 sps:$4 sm:$0xff]  }
   0x7   :  { %677 = vmatpush1.bf16.msra.mxu1 %v1050_v6  ;;  %v1068_v18 = vld [vmem:[%s1561_s1 + $0x40] ss:$8 sps:$4 sm:$0xff]   ;;  %v1070_v20 = vld [vmem:[%s1561_s1 + $0x54] ss:$8 sps:$4 sm:$0xff]   ;;  %v1074_v22 = vld [vmem:[%s1561_s1 + $0x50] ss:$8 sps:$4 sm:$0xff]  }
   0x8   :  { %730 = vmatpush1.bf16.msra.mxu0 %v1051_v7  ;;  %678 = vmatprep.subr.bf16.mxu1 %v1052_v8  ;;  %v1069_v19 = vld [vmem:[%s1561_s1 + $0x140] ss:$8 sps:$4 sm:$0xff]   ;;  %v1072_v21 = vld [vmem:[%s1561_s1 + $0x154] ss:$8 sps:$4 sm:$0xff]   ;;  %v1075_v23 = vld [vmem:[%s1561_s1 + $0x150] ss:$8 sps:$4 sm:$0xff]  }
   0x9   :  { %731 = vmatprep.subr.bf16.mxu0 %v1054_v9  ;;  %v1076_v24 = vld [vmem:[%s1561_s1 + $0x64] ss:$8 sps:$4 sm:$0xff]   ;;  %v1080_v26 = vld [vmem:[%s1561_s1 + $0x60] ss:$8 sps:$4 sm:$0xff]   ;;  %v1082_v28 = vld [vmem:[%s1561_s1 + $0x74] ss:$8 sps:$4 sm:$0xff]  }
   0xa   :  { %v1078_v25 = vld [vmem:[%s1561_s1 + $0x164] ss:$8 sps:$4 sm:$0xff]   ;;  %v1081_v27 = vld [vmem:[%s1561_s1 + $0x160] ss:$8 sps:$4 sm:$0xff]   ;;  %v1084_v29 = vld [vmem:[%s1561_s1 + $0x174] ss:$8 sps:$4 sm:$0xff]  }
   0xb   :  { %679 = vmatpush1.bf16.msra.mxu1 %v1056_v10  ;;  %v1086_v30 = vld [vmem:[%s1561_s1 + $0x70] ss:$8 sps:$4 sm:$0xff]   ;;  %v1088_v32 = vld [vmem:[%s1561_s1 + $0x84] ss:$8 sps:$4 sm:$0xff]   ;;  %v1092_v34 = vld [vmem:[%s1561_s1 + $0x80] ss:$8 sps:$4 sm:$0xff]  }
   0xc   :  { %732 = vmatpush1.bf16.msra.mxu0 %v1057_v11  ;;  %680 = vmatprep.subr.bf16.mxu1 %v1058_v12  ;;  %v1087_v31 = vld [vmem:[%s1561_s1 + $0x170] ss:$8 sps:$4 sm:$0xff]   ;;  %v1090_v33 = vld [vmem:[%s1561_s1 + $0x184] ss:$8 sps:$4 sm:$0xff]   ;;  %v1093_v35 = vld [vmem:[%s1561_s1 + $0x180] ss:$8 sps:$4 sm:$0xff]  }
   0xd   :  { %733 = vmatprep.subr.bf16.mxu0 %v1060_v13  ;;  %v1094_v36 = vld [vmem:[%s1561_s1 + $0x94] ss:$8 sps:$4 sm:$0xff]   ;;  %v1098_v38 = vld [vmem:[%s1561_s1 + $0x90] ss:$8 sps:$4 sm:$0xff]   ;;  %v1100_v40 = vld [vmem:[%s1561_s1 + $0xa4] ss:$8 sps:$4 sm:$0xff]  }
   0xe   :  { %v1096_v37 = vld [vmem:[%s1561_s1 + $0x194] ss:$8 sps:$4 sm:$0xff]   ;;  %v1099_v39 = vld [vmem:[%s1561_s1 + $0x190] ss:$8 sps:$4 sm:$0xff]   ;;  %v1102_v41 = vld [vmem:[%s1561_s1 + $0x1a4] ss:$8 sps:$4 sm:$0xff]  }
   0xf   :  { %681 = vmatpush1.bf16.msra.mxu1 %v1062_v14  ;;  %v1104_v42 = vld [vmem:[%s1561_s1 + $0xa0] ss:$8 sps:$4 sm:$0xff]   ;;  %v1106_v44 = vld [vmem:[%s1561_s1 + $0xb4] ss:$8 sps:$4 sm:$0xff]   ;;  %v1110_v46 = vld [vmem:[%s1561_s1 + $0xb0] ss:$8 sps:$4 sm:$0xff]  }
  0x10   :  { %734 = vmatpush1.bf16.msra.mxu0 %v1063_v15  ;;  %682 = vmatprep.subr.bf16.mxu1 %v1064_v16  ;;  %v1105_v43 = vld [vmem:[%s1561_s1 + $0x1a0] ss:$8 sps:$4 sm:$0xff]   ;;  %v1108_v45 = vld [vmem:[%s1561_s1 + $0x1b4] ss:$8 sps:$4 sm:$0xff]   ;;  %v1111_v47 = vld [vmem:[%s1561_s1 + $0x1b0] ss:$8 sps:$4 sm:$0xff]  }
  0x11   :  { %735 = vmatprep.subr.bf16.mxu0 %v1066_v17  ;;  %v1112_v48 = vld [vmem:[%s1561_s1 + $0xc4] ss:$8 sps:$4 sm:$0xff]   ;;  %v1116_v52 = vld [vmem:[%s1561_s1 + $0xc0] ss:$8 sps:$4 sm:$0xff]   ;;  %v1118_v54 = vld [vmem:[%s1561_s1 + $0xd4] ss:$8 sps:$4 sm:$0xff]  }
  0x12   :  { %v1138_v49 = vld [vmem:[%s1562_s0 + $0x4] ss:$24 sps:$4 sm:$0xff]   ;;  %v1117_v53 = vld [vmem:[%s1561_s1 + $0x1c0] ss:$8 sps:$4 sm:$0xff]   ;;  %v1122_v56 = vld [vmem:[%s1561_s1 + $0xd0] ss:$8 sps:$4 sm:$0xff]  }
  0x13   :  { %683 = vmatpush1.bf16.msra.mxu1 %v1068_v18  ;;  %v1114_v50 = vld [vmem:[%s1561_s1 + $0x1c4] ss:$8 sps:$4 sm:$0xff]   ;;  %706 = vmatprep.mubr.bf16.mxu1 %v1138_v49  ;;  %v1120_v55 = vld [vmem:[%s1561_s1 + $0x1d4] ss:$8 sps:$4 sm:$0xff]   ;;  %v1123_v57 = vld [vmem:[%s1561_s1 + $0x1d0] ss:$8 sps:$4 sm:$0xff]  }
  0x14   :  { %736 = vmatpush1.bf16.msra.mxu0 %v1069_v19  ;;  %684 = vmatprep.subr.bf16.mxu1 %v1070_v20  ;;  %v1141_v51 = vld [vmem:[%s1562_s0 + $0xc] ss:$24 sps:$4 sm:$0xff]   ;;  %v1128_v60 = vld [vmem:[%s1561_s1 + $0xe0] ss:$8 sps:$4 sm:$0xff]   ;;  %v1130_v62 = vld [vmem:[%s1561_s1 + $0xf4] ss:$8 sps:$4 sm:$0xff]  }
  0x15   :  { %737 = vmatprep.subr.bf16.mxu0 %v1072_v21  ;;  %759 = vmatprep.mubr.bf16.mxu0 %v1141_v51  ;;  %v1124_v58 = vld [vmem:[%s1561_s1 + $0xe4] ss:$8 sps:$4 sm:$0xff]   ;;  %v1129_v61 = vld [vmem:[%s1561_s1 + $0x1e0] ss:$8 sps:$4 sm:$0xff]   ;;  %v1132_v63 = vld [vmem:[%s1561_s1 + $0x1f4] ss:$8 sps:$4 sm:$0xff]  }
  0x16   :  { %v1126_v59 = vld [vmem:[%s1561_s1 + $0x1e4] ss:$8 sps:$4 sm:$0xff]   ;;  %v1134_v0 = vld [vmem:[%s1561_s1 + $0xf0] ss:$8 sps:$4 sm:$0xff]   ;;  %v1139_v4 = vld [vmem:[%s1562_s0 + $0x8] ss:$24 sps:$4 sm:$0xff]  }
  0x17   :  { %685 = vmatpush1.bf16.msra.mxu1 %v1074_v22  ;;  %v1135_v1 = vld [vmem:[%s1561_s1 + $0x1f0] ss:$8 sps:$4 sm:$0xff]   ;;  %v1144_v2 = vld [vmem:[%s1561_s1 + $0x204] ss:$8 sps:$4 sm:$0xff]   ;;  %v1142_v5 = vld [vmem:[%s1561_s1 + $0x200] ss:$8 sps:$4 sm:$0xff]  }
  0x18   :  { %738 = vmatpush1.bf16.msra.mxu0 %v1075_v23  ;;  %686 = vmatprep.subr.bf16.mxu1 %v1076_v24  ;;  %v1136_v3 = vld [vmem:[%s1562_s0] ss:$24 sps:$4 sm:$0xff]   ;;  %v1147_v6 = vld [vmem:[%s1561_s1 + $0x214] ss:$8 sps:$4 sm:$0xff]   ;;  %v1150_v10 = vld [vmem:[%s1561_s1 + $0x224] ss:$8 sps:$4 sm:$0xff]  }
  0x19   :  { %739 = vmatprep.subr.bf16.mxu0 %v1078_v25  ;;  %v1181_v7 = vld [vmem:[%s1562_s0 + $0x34] ss:$24 sps:$4 sm:$0xff]   ;;  %v1145_v9 = vld [vmem:[%s1561_s1 + $0x210] ss:$8 sps:$4 sm:$0xff]   ;;  %v1148_v13 = vld [vmem:[%s1561_s1 + $0x220] ss:$8 sps:$4 sm:$0xff]  }
  0x1a   :  { %v1184_v8 = vld [vmem:[%s1562_s0 + $0x3c] ss:$24 sps:$4 sm:$0xff]   ;;  %v1183_v11 = vld [vmem:[%s1562_s0 + $0x30] ss:$24 sps:$4 sm:$0xff]   ;;  %v1156_v18 = vld [vmem:[%s1561_s1 + $0x244] ss:$8 sps:$4 sm:$0xff]  }
  0x1b   :  { %687 = vmatpush1.bf16.msra.mxu1 %v1080_v26  ;;  %v1189_v12 = vld [vmem:[%s1562_s0 + $0x38] ss:$24 sps:$4 sm:$0xff]   ;;  %v1153_v14 = vld [vmem:[%s1561_s1 + $0x234] ss:$8 sps:$4 sm:$0xff]   ;;  %v1154_v19 = vld [vmem:[%s1561_s1 + $0x240] ss:$8 sps:$4 sm:$0xff]  }
  0x1c   :  { %740 = vmatpush1.bf16.msra.mxu0 %v1081_v27  ;;  %688 = vmatprep.subr.bf16.mxu1 %v1082_v28  ;;  %v1198_v15 = vld [vmem:[%s1562_s0 + $0x14] ss:$24 sps:$4 sm:$0xff]   ;;  %v1201_v16 = vld [vmem:[%s1562_s0 + $0x44] ss:$24 sps:$4 sm:$0xff]   ;;  %v1151_v17 = vld [vmem:[%s1561_s1 + $0x230] ss:$8 sps:$4 sm:$0xff]  }
  0x1d   :  { %741 = vmatprep.subr.bf16.mxu0 %v1084_v29  ;;  %v1159_v20 = vld [vmem:[%s1561_s1 + $0x254] ss:$8 sps:$4 sm:$0xff]   ;;  %v1157_v21 = vld [vmem:[%s1561_s1 + $0x250] ss:$8 sps:$4 sm:$0xff]   ;;  %v1162_v22 = vld [vmem:[%s1561_s1 + $0x264] ss:$8 sps:$4 sm:$0xff]  }
  0x1e   :  { %v1160_v23 = vld [vmem:[%s1561_s1 + $0x260] ss:$8 sps:$4 sm:$0xff]   ;;  %v1165_v24 = vld [vmem:[%s1561_s1 + $0x274] ss:$8 sps:$4 sm:$0xff]   ;;  %v1163_v25 = vld [vmem:[%s1561_s1 + $0x270] ss:$8 sps:$4 sm:$0xff]  }
  0x1f   :  { %689 = vmatpush1.bf16.msra.mxu1 %v1086_v30  ;;  %v1168_v26 = vld [vmem:[%s1561_s1 + $0x284] ss:$8 sps:$4 sm:$0xff]   ;;  %v1166_v27 = vld [vmem:[%s1561_s1 + $0x280] ss:$8 sps:$4 sm:$0xff]   ;;  %v1171_v28 = vld [vmem:[%s1561_s1 + $0x294] ss:$8 sps:$4 sm:$0xff]  }
  0x20   :  { %742 = vmatpush1.bf16.msra.mxu0 %v1087_v31  ;;  %690 = vmatprep.subr.bf16.mxu1 %v1088_v32  ;;  %v1169_v29 = vld [vmem:[%s1561_s1 + $0x290] ss:$8 sps:$4 sm:$0xff]   ;;  %v1174_v30 = vld [vmem:[%s1561_s1 + $0x2a4] ss:$8 sps:$4 sm:$0xff]   ;;  %v1172_v31 = vld [vmem:[%s1561_s1 + $0x2a0] ss:$8 sps:$4 sm:$0xff]  }
  0x21   :  { %743 = vmatprep.subr.bf16.mxu0 %v1090_v33  ;;  %v1177_v32 = vld [vmem:[%s1561_s1 + $0x2b4] ss:$8 sps:$4 sm:$0xff]   ;;  %v1175_v33 = vld [vmem:[%s1561_s1 + $0x2b0] ss:$8 sps:$4 sm:$0xff]   ;;  %v122_v51 = vld [vmem:[%s1563_s2] sm:$0x3] }
  0x22   :  { %vm859_vm2 = vmor %vm858_vm1, %vm857_vm0 }
  0x23   :  { %691 = vmatpush1.bf16.msra.mxu1 %v1092_v34  ;;  %v1180_v34 = vld [vmem:[%s1561_s1 + $0x2c4] ss:$8 sps:$4 sm:$0xff]  }
  0x24   :  { %744 = vmatpush1.bf16.msra.mxu0 %v1093_v35  ;;  %692 = vmatprep.subr.bf16.mxu1 %v1094_v36  ;;  %v1178_v35 = vld [vmem:[%s1561_s1 + $0x2c0] ss:$8 sps:$4 sm:$0xff]   ;;  %v1188_v36 = vld [vmem:[%s1561_s1 + $0x2d4] ss:$8 sps:$4 sm:$0xff]  }
  0x25   :  { %745 = vmatprep.subr.bf16.mxu0 %v1096_v37  ;;  %v1186_v37 = vld [vmem:[%s1561_s1 + $0x2d0] ss:$8 sps:$4 sm:$0xff]  }
  0x27   :  { %693 = vmatpush1.bf16.msra.mxu1 %v1098_v38  ;;  %v1192_v38 = vld [vmem:[%s1561_s1 + $0x2e4] ss:$8 sps:$4 sm:$0xff]  }
  0x28   :  { %746 = vmatpush1.bf16.msra.mxu0 %v1099_v39  ;;  %694 = vmatprep.subr.bf16.mxu1 %v1100_v40  ;;  %v1190_v39 = vld [vmem:[%s1561_s1 + $0x2e0] ss:$8 sps:$4 sm:$0xff]   ;;  %v1195_v40 = vld [vmem:[%s1561_s1 + $0x2f4] ss:$8 sps:$4 sm:$0xff]  }
  0x29   :  { %747 = vmatprep.subr.bf16.mxu0 %v1102_v41  ;;  %v1193_v41 = vld [vmem:[%s1561_s1 + $0x2f0] ss:$8 sps:$4 sm:$0xff]  }
  0x2b   :  { %695 = vmatpush1.bf16.msra.mxu1 %v1104_v42  ;;  %v1196_v42 = vld [vmem:[%s1562_s0 + $0x10] ss:$24 sps:$4 sm:$0xff]  }
  0x2c   :  { %748 = vmatpush1.bf16.msra.mxu0 %v1105_v43  ;;  %696 = vmatprep.subr.bf16.mxu1 %v1106_v44  ;;  %v1199_v43 = vld [vmem:[%s1562_s0 + $0x40] ss:$24 sps:$4 sm:$0xff]   ;;  %v124_v44 = vlaneseq }
  0x2d   :  { %749 = vmatprep.subr.bf16.mxu0 %v1108_v45 }
  0x2e   :  { %v125_v45 = vshrl.u32 %v124_v44, 7 }
  0x2f   :  { %697 = vmatpush1.bf16.msra.mxu1 %v1110_v46 }
  0x30   :  { %750 = vmatpush1.bf16.msra.mxu0 %v1111_v47  ;;  %698 = vmatprep.subr.bf16.mxu1 %v1112_v48  ;;  %v126_v49 = vsub.s32 0, %v125_v45 }
  0x31   :  { %751 = vmatprep.subr.bf16.mxu0 %v1114_v50 }
  0x33   :  { %699 = vmatpush1.bf16.msra.mxu1 %v1116_v52  ;;  %v130_v52 = vsub.s32 1, %v125_v45 }
  0x34   :  { %752 = vmatpush1.bf16.msra.mxu0 %v1117_v53  ;;  %700 = vmatprep.subr.bf16.mxu1 %v1118_v54  ;;  %v127_v53 = vrot.slane %v122_v51, %v126_v49 }
  0x35   :  { %753 = vmatprep.subr.bf16.mxu0 %v1120_v55  ;;  %v131_v54 = vrot.slane %v122_v51, %v130_v52 }
  0x37   :  { %701 = vmatpush1.bf16.msra.mxu1 %v1122_v56 }
  0x38   :  { %754 = vmatpush1.bf16.msra.mxu0 %v1123_v57  ;;  %702 = vmatprep.subr.bf16.mxu1 %v1124_v58 }
  0x39   :  { %755 = vmatprep.subr.bf16.mxu0 %v1126_v59 }
  0x3b   :  { %703 = vmatpush1.bf16.msra.mxu1 %v1128_v60 }
  0x3c   :  { %756 = vmatpush1.bf16.msra.mxu0 %v1129_v61  ;;  %704 = vmatprep.subr.bf16.mxu1 %v1130_v62 }
  0x3d   :  { %757 = vmatprep.subr.bf16.mxu0 %v1132_v63 }
  0x3f   :  { %705 = vmatpush1.bf16.msra.mxu1 %v1134_v0 }
  0x40   :  { %758 = vmatpush1.bf16.msra.mxu0 %v1135_v1  ;;  %984 = vmatprep.subr.bf16.mxu1 %v1144_v2 }
  0x41   :  { %780 = vmatprep.subr.bf16.mxu0 %v1144_v2 }
  0x42   :  { %707 = vmatmul.mubr.bf16.vlgmr.msra.gmra.mrb[0].mxu1 %v1136_v3 }
  0x43   :  { %760 = vmatmul.mubr.bf16.vlgmr.msra.gmra.mrb[0].mxu0 %v1139_v4  ;;  %1000 = vmatpush1.bf16.msra.mxu1 %v1142_v5 }
  0x44   :  { %781 = vmatpush1.bf16.msra.mxu0 %v1142_v5  ;;  %985 = vmatprep.subr.bf16.mxu1 %v1147_v6 }
  0x45   :  { %782 = vmatprep.subr.bf16.mxu0 %v1147_v6  ;;  %716 = vmatprep.mubr.bf16.mxu1 %v1181_v7 }
  0x46   :  { %769 = vmatprep.mubr.bf16.mxu0 %v1184_v8 }
  0x47   :  { %1001 = vmatpush1.bf16.msra.mxu1 %v1145_v9 }
  0x48   :  { %783 = vmatpush1.bf16.msra.mxu0 %v1145_v9  ;;  %986 = vmatprep.subr.bf16.mxu1 %v1150_v10 }
  0x49   :  { %784 = vmatprep.subr.bf16.mxu0 %v1150_v10 }
  0x4a   :  { %717 = vmatmul.mubr.bf16.gmra.mrb[4].mxu1 %v1183_v11 }
  0x4b   :  { %770 = vmatmul.mubr.bf16.gmra.mrb[4].mxu0 %v1189_v12  ;;  %1002 = vmatpush1.bf16.msra.mxu1 %v1148_v13 }
  0x4c   :  { %785 = vmatpush1.bf16.msra.mxu0 %v1148_v13  ;;  %987 = vmatprep.subr.bf16.mxu1 %v1153_v14 }
  0x4d   :  { %786 = vmatprep.subr.bf16.mxu0 %v1153_v14  ;;  %812 = vmatprep.mubr.bf16.mxu0 %v1198_v15 }
  0x4e   :  { %822 = vmatprep.mubr.bf16.mxu1 %v1201_v16 }
  0x4f   :  { %1003 = vmatpush1.bf16.msra.mxu1 %v1151_v17 }
  0x50   :  { %787 = vmatpush1.bf16.msra.mxu0 %v1151_v17  ;;  %988 = vmatprep.subr.bf16.mxu1 %v1156_v18 }
  0x51   :  { %788 = vmatprep.subr.bf16.mxu0 %v1156_v18 }
  0x53   :  { %1004 = vmatpush1.bf16.msra.mxu1 %v1154_v19 }
  0x54   :  { %789 = vmatpush1.bf16.msra.mxu0 %v1154_v19  ;;  %989 = vmatprep.subr.bf16.mxu1 %v1159_v20 }
  0x55   :  { %790 = vmatprep.subr.bf16.mxu0 %v1159_v20 }
  0x57   :  { %1005 = vmatpush1.bf16.msra.mxu1 %v1157_v21 }
  0x58   :  { %791 = vmatpush1.bf16.msra.mxu0 %v1157_v21  ;;  %990 = vmatprep.subr.bf16.mxu1 %v1162_v22 }
  0x59   :  { %792 = vmatprep.subr.bf16.mxu0 %v1162_v22 }
  0x5b   :  { %1006 = vmatpush1.bf16.msra.mxu1 %v1160_v23 }
  0x5c   :  { %793 = vmatpush1.bf16.msra.mxu0 %v1160_v23  ;;  %991 = vmatprep.subr.bf16.mxu1 %v1165_v24 }
  0x5d   :  { %794 = vmatprep.subr.bf16.mxu0 %v1165_v24 }
  0x5f   :  { %1007 = vmatpush1.bf16.msra.mxu1 %v1163_v25 }
  0x60   :  { %795 = vmatpush1.bf16.msra.mxu0 %v1163_v25  ;;  %992 = vmatprep.subr.bf16.mxu1 %v1168_v26 }
  0x61   :  { %796 = vmatprep.subr.bf16.mxu0 %v1168_v26 }
  0x63   :  { %1008 = vmatpush1.bf16.msra.mxu1 %v1166_v27 }
  0x64   :  { %797 = vmatpush1.bf16.msra.mxu0 %v1166_v27  ;;  %993 = vmatprep.subr.bf16.mxu1 %v1171_v28 }
  0x65   :  { %798 = vmatprep.subr.bf16.mxu0 %v1171_v28 }
  0x67   :  { %1009 = vmatpush1.bf16.msra.mxu1 %v1169_v29 }
  0x68   :  { %799 = vmatpush1.bf16.msra.mxu0 %v1169_v29  ;;  %994 = vmatprep.subr.bf16.mxu1 %v1174_v30 }
  0x69   :  { %800 = vmatprep.subr.bf16.mxu0 %v1174_v30 }
  0x6b   :  { %1010 = vmatpush1.bf16.msra.mxu1 %v1172_v31 }
  0x6c   :  { %801 = vmatpush1.bf16.msra.mxu0 %v1172_v31  ;;  %995 = vmatprep.subr.bf16.mxu1 %v1177_v32 }
  0x6d   :  { %802 = vmatprep.subr.bf16.mxu0 %v1177_v32 }
  0x6f   :  { %1011 = vmatpush1.bf16.msra.mxu1 %v1175_v33 }
  0x70   :  { %803 = vmatpush1.bf16.msra.mxu0 %v1175_v33  ;;  %996 = vmatprep.subr.bf16.mxu1 %v1180_v34 }
  0x71   :  { %804 = vmatprep.subr.bf16.mxu0 %v1180_v34 }
  0x73   :  { %1012 = vmatpush1.bf16.msra.mxu1 %v1178_v35 }
  0x74   :  { %805 = vmatpush1.bf16.msra.mxu0 %v1178_v35  ;;  %997 = vmatprep.subr.bf16.mxu1 %v1188_v36 }
  0x75   :  { %806 = vmatprep.subr.bf16.mxu0 %v1188_v36 }
  0x77   :  { %1013 = vmatpush1.bf16.msra.mxu1 %v1186_v37 }
  0x78   :  { %807 = vmatpush1.bf16.msra.mxu0 %v1186_v37  ;;  %998 = vmatprep.subr.bf16.mxu1 %v1192_v38 }
  0x79   :  { %808 = vmatprep.subr.bf16.mxu0 %v1192_v38 }
  0x7b   :  { %1014 = vmatpush1.bf16.msra.mxu1 %v1190_v39 }
  0x7c   :  { %809 = vmatpush1.bf16.msra.mxu0 %v1190_v39  ;;  %999 = vmatprep.subr.bf16.mxu1 %v1195_v40 }
  0x7d   :  { %810 = vmatprep.subr.bf16.mxu0 %v1195_v40 }
  0x7f   :  { %1015 = vmatpush1.bf16.msra.mxu1 %v1193_v41 }
  0x80   :  { %811 = vmatpush1.bf16.msra.mxu0 %v1193_v41 }
  0x82   :  { %823 = vmatmul.mubr.bf16.vlgmr.msra.gmra.mrb[8].mxu1 %v1199_v43 }
  0x83   :  { %813 = vmatmul.mubr.bf16.vlgmr.msra.gmra.mrb[0].mxu0 %v1196_v42 }
 0x115   :  { %v708_v46 = vpop.f32.mrb[0].mxu1 }
 0x116   :  { %v710_v47 = vpop.f32.mrb[1].mxu1  ;;  %v709_v7 = vadd.f32 %v708_v46, %v127_v53 }
 0x117   :  { %v712_v48 = vpop.f32.mrb[2].mxu1  ;;  %v711_v8 = vadd.f32 %v710_v47, %v131_v54 }
 0x118   :  { %v714_v50 = vpop.f32.mrb[3].mxu1  ;;  %v713_v11 = vadd.f32 %v712_v48, %v127_v53 }
 0x119   :  { %v715_v16 = vadd.f32 %v714_v50, %v131_v54 }
 0x11d   :  { %v718_v55 = vpop.f32.mrb[4].mxu1 }
 0x11e   :  { %v771_v56 = vpop.f32.mrb[4].mxu0  ;;  %v719_v57 = vadd.f32 %v718_v55, %v127_v53  ;;  %v720_v58 = vpop.f32.mrb[5].mxu1 }
 0x11f   :  { %v773_v59 = vpop.f32.mrb[5].mxu0  ;;  %v721_v60 = vadd.f32 %v720_v58, %v131_v54  ;;  %v722_v61 = vpop.f32.mrb[6].mxu1 }
 0x120   :  { %v775_v62 = vpop.f32.mrb[6].mxu0  ;;  %v723_v63 = vadd.f32 %v722_v61, %v127_v53  ;;  %v772_v0 = vadd.f32 %v771_v56, %v719_v57  ;;  %v724_v1 = vpop.f32.mrb[7].mxu1 }
 0x121   :  { %v777_v2 = vpop.f32.mrb[7].mxu0  ;;  %v725_v3 = vadd.f32 %v724_v1, %v131_v54  ;;  %v774_v4 = vadd.f32 %v773_v59, %v721_v60 }
 0x122   :  { %v776_v5 = vadd.f32 %v775_v62, %v723_v63 }
 0x123   :  { %v778_v6 = vadd.f32 %v777_v2, %v725_v3 }
 0x155   :  { %v824_v10 = vpop.f32.mrb[8].mxu1 }
 0x156   :  { %v814_v9 = vpop.f32.mrb[0].mxu0  ;;  %v825_v13 = vadd.f32 %v824_v10, %v772_v0  ;;  %v826_v15 = vpop.f32.mrb[9].mxu1 }
 0x157   :  { %v1017_v12 = vadd.f32 %v814_v9, %v709_v7  ;;  %v816_v14 = vpop.f32.mrb[1].mxu0  ;;  %v827_v18 = vadd.f32 %v826_v15, %v774_v4  ;;  %v828_v20 = vpop.f32.mrb[10].mxu1 }
 0x158   :  { %v1019_v17 = vadd.f32 %v816_v14, %v711_v8  ;;  %v818_v19 = vpop.f32.mrb[2].mxu0  ;;  %v829_v22 = vadd.f32 %v828_v20, %v776_v5  ;;  %v830_v24 = vpop.f32.mrb[11].mxu1 }
 0x159   :  { %v1021_v21 = vadd.f32 %v818_v19, %v713_v11  ;;  %v820_v23 = vpop.f32.mrb[3].mxu0  ;;  %v982_v26 = vpack.c.bf16 %v827_v18, %v825_v13  ;;  %v831_v28 = vadd.f32 %v830_v24, %v778_v6 }
 0x15a   :  { %v980_v25 = vpack.c.bf16 %v1019_v17, %v1017_v12  ;;  %v1023_v27 = vadd.f32 %v820_v23, %v715_v16 }
 0x15b   :  { %862 = vst.msk [vmem:[%s1564_s3 + $0x10] sm:$0xff] %vm859_vm2, %v982_v26  ;;  %v983_v30 = vpack.c.bf16 %v831_v28, %v829_v22 }
 0x15c   :  { %860 = vst.msk [vmem:[%s1564_s3] sm:$0xff] %vm859_vm2, %v980_v25  ;;  %v981_v29 = vpack.c.bf16 %v1023_v27, %v1021_v21 }
 0x15d   :  { %863 = vst.msk [vmem:[%s1564_s3 + $0x18] sm:$0xff] %vm859_vm2, %v983_v30 }
 0x15e   :  { %861 = vst.msk [vmem:[%s1564_s3 + $0x8] sm:$0xff] %vm859_vm2, %v981_v29 }

// kernel: fpn_forward.12
= control target key start
LH: loop header
LB: loop body
LE: loop exit
PB: predicated region body
PF: predicated region fallthrough
CT: control target
= control target key end

     0   :  { %v411_v0 = vmov 0   ;;  %vm237_vm0 = vcmask 130048   ;;  %vm322_vm1 = vcmask 519168   ;;  %s528_s1 = inlined_call_operand.vmem [shape: bf16[400,64], index: 1, kind: input, shape index: {}]   ;;  %s529_s0 = inlined_call_operand.vmem [shape: bf16[8,400], index: 0, kind: input, shape index: {}]   ;;  %s530_s2 = inlined_call_operand.vmem [shape: f32[1,64], index: 2, kind: input, shape index: {}]   ;;  %s531_s3 = inlined_call_operand.vmem [shape: bf16[8,64], index: 3, kind: output, shape index: {}]  }
   0x1   :  { %281 = vmatprep.subr.bf16.mxu1 %v411_v0  ;;  %v382_v1 = vld [vmem:[%s528_s1 + $0x40] sm:$0xff]   ;;  %v385_v4 = vld [vmem:[%s528_s1 + $0x48] sm:$0xff]   ;;  %v388_v7 = vld [vmem:[%s528_s1 + $0x50] sm:$0xff]  }
   0x2   :  { %v383_v2 = vld [vmem:[%s528_s1 + $0x80] sm:$0xff]   ;;  %359 = vmatprep.subr.bf16.mxu0 %v382_v1  ;;  %v386_v5 = vld [vmem:[%s528_s1 + $0x88] sm:$0xff]   ;;  %v389_v8 = vld [vmem:[%s528_s1 + $0x90] sm:$0xff]  }
   0x3   :  { %v384_v3 = vld [vmem:[%s528_s1] sm:$0xff]   ;;  %282 = vmatpush1.bf16.msra.mxu1 %v383_v2  ;;  %v387_v6 = vld [vmem:[%s528_s1 + $0x8] sm:$0xff]   ;;  %v390_v9 = vld [vmem:[%s528_s1 + $0x10] sm:$0xff]  }
   0x4   :  { %360 = vmatpush3.bf16.msra.mxu0 %v384_v3  ;;  %283 = vmatprep.subr.bf16.mxu1 %v411_v0  ;;  %v391_v10 = vld [vmem:[%s528_s1 + $0x58] sm:$0xff]   ;;  %v394_v13 = vld [vmem:[%s528_s1 + $0x60] sm:$0xff]   ;;  %v397_v16 = vld [vmem:[%s528_s1 + $0x68] sm:$0xff]  }
   0x5   :  { %361 = vmatprep.subr.bf16.mxu0 %v385_v4  ;;  %v392_v11 = vld [vmem:[%s528_s1 + $0x98] sm:$0xff]   ;;  %v395_v14 = vld [vmem:[%s528_s1 + $0xa0] sm:$0xff]   ;;  %v398_v17 = vld [vmem:[%s528_s1 + $0xa8] sm:$0xff]  }
   0x6   :  { %v393_v12 = vld [vmem:[%s528_s1 + $0x18] sm:$0xff]   ;;  %v396_v15 = vld [vmem:[%s528_s1 + $0x20] sm:$0xff]   ;;  %v399_v18 = vld [vmem:[%s528_s1 + $0x28] sm:$0xff]  }
   0x7   :  { %284 = vmatpush1.bf16.msra.mxu1 %v386_v5  ;;  %v400_v19 = vld [vmem:[%s528_s1 + $0x70] sm:$0xff]   ;;  %v15_v22 = vld [vmem:[%s529_s0] sm:$0xff]  ;;  %v403_v23 = vld [vmem:[%s528_s1 + $0x78] sm:$0xff]  }
   0x8   :  { %362 = vmatpush3.bf16.msra.mxu0 %v387_v6  ;;  %285 = vmatprep.subr.bf16.mxu1 %v411_v0  ;;  %v401_v20 = vld [vmem:[%s528_s1 + $0xb0] sm:$0xff]   ;;  %v330_v24 = vcombine.high %v15_v22, %v15_v22  ;;  %v16_v25 = vld [vmem:[%s529_s0 + $0x8] sm:$0xff]  ;;  %v404_v27 = vld [vmem:[%s528_s1 + $0xb8] sm:$0xff]   ;;  %v329_v29 = vcombine.low %v15_v22, %v15_v22 }
   0x9   :  { %363 = vmatprep.subr.bf16.mxu0 %v388_v7  ;;  %v402_v21 = vld [vmem:[%s528_s1 + $0x30] sm:$0xff]   ;;  %v332_v26 = vcombine.high %v16_v25, %v16_v25  ;;  %v405_v28 = vld [vmem:[%s528_s1 + $0x38] sm:$0xff]   ;;  %v408_v30 = vld [vmem:[%s528_s1 + $0xc0] sm:$0xff]   ;;  %v331_v31 = vcombine.low %v16_v25, %v16_v25 }
   0xa   :  { %273 = vmatprep.mubr.bf16.mxu0 %v330_v24  ;;  %v328_v34 = vld [vmem:[%s530_s2] ss:$0 sm:$0xff] }
   0xb   :  { %286 = vmatpush1.bf16.msra.mxu1 %v389_v8  ;;  %358 = vmatprep.mubr.msk.bf16.mxu1 %vm237_vm0, %v332_v26 }
   0xc   :  { %364 = vmatpush3.bf16.msra.mxu0 %v390_v9  ;;  %287 = vmatprep.subr.bf16.mxu1 %v411_v0 }
   0xd   :  { %365 = vmatprep.subr.bf16.mxu0 %v391_v10 }
   0xf   :  { %288 = vmatpush1.bf16.msra.mxu1 %v392_v11 }
  0x10   :  { %366 = vmatpush3.bf16.msra.mxu0 %v393_v12  ;;  %289 = vmatprep.subr.bf16.mxu1 %v411_v0 }
  0x11   :  { %367 = vmatprep.subr.bf16.mxu0 %v394_v13 }
  0x13   :  { %290 = vmatpush1.bf16.msra.mxu1 %v395_v14 }
  0x14   :  { %368 = vmatpush3.bf16.msra.mxu0 %v396_v15  ;;  %291 = vmatprep.subr.bf16.mxu1 %v411_v0 }
  0x15   :  { %369 = vmatprep.subr.bf16.mxu0 %v397_v16 }
  0x17   :  { %292 = vmatpush1.bf16.msra.mxu1 %v398_v17 }
  0x18   :  { %370 = vmatpush3.bf16.msra.mxu0 %v399_v18  ;;  %293 = vmatprep.subr.bf16.mxu1 %v411_v0 }
  0x19   :  { %371 = vmatprep.subr.bf16.mxu0 %v400_v19 }
  0x1b   :  { %294 = vmatpush1.bf16.msra.mxu1 %v401_v20 }
  0x1c   :  { %372 = vmatpush3.bf16.msra.mxu0 %v402_v21  ;;  %295 = vmatprep.subr.bf16.mxu1 %v411_v0 }
  0x1d   :  { %373 = vmatprep.subr.bf16.mxu0 %v403_v23 }
  0x1f   :  { %296 = vmatpush1.bf16.msra.mxu1 %v404_v27 }
  0x20   :  { %374 = vmatpush3.bf16.msra.mxu0 %v405_v28  ;;  %297 = vmatprep.subr.bf16.mxu1 %v411_v0 }
  0x23   :  { %274 = vmatmul.mubr.bf16.vlgmr.msra.gmra.mrb[0].mxu0 %v329_v29  ;;  %298 = vmatpush1.bf16.msra.mxu1 %v408_v30 }
  0x26   :  { %314 = vmatmul.mubr.bf16.vlgmr.msra.gmra.mrb[0].mxu1 %v331_v31 }
  0xf6   :  { %v375_v32 = vpop.f32.mrb[0].mxu0 }
  0xf7   :  { %v376_v33 = vpop.f32.mrb[1].mxu0 }
  0xf8   :  { %v377_v35 = vadd.f32 %v376_v33, %v375_v32  ;;  %v378_v36 = vpop.f32.mrb[2].mxu0 }
  0xf9   :  { %v379_v37 = vpop.f32.mrb[3].mxu0  ;;  %v315_v38 = vpop.f32.mrb[0].mxu1 }
  0xfa   :  { %v276_v39 = vadd.f32 %v377_v35, %v328_v34  ;;  %v317_v40 = vpop.f32.mrb[1].mxu1 }
  0xfb   :  { %v318_v41 = vpop.f32.mrb[2].mxu1 }
  0xfc   :  { %v316_v42 = vadd.f32 %v315_v38, %v276_v39  ;;  %v319_v43 = vpop.f32.mrb[3].mxu1 }
  0xfe   :  { %v321_v44 = vpack.c.bf16 %v316_v42, %v316_v42 }
 0x100   :  { %323 = vst.msk [vmem:[%s531_s3] sm:$0xf] %vm322_vm1, %v321_v44 }

// kernel: fpn_forward.11
= control target key start
LH: loop header
LB: loop body
LE: loop exit
PB: predicated region body
PF: predicated region fallthrough
CT: control target
= control target key end

     0   :  { %vm5741_vm0 = vcmask 1043456   ;;  %vm5742_vm1 = vcmask 130052   ;;  %s10248_s1 = inlined_call_operand.vmem [shape: bf16[3072,400], index: 1, kind: input, shape index: {}]   ;;  %s10249_s0 = inlined_call_operand.vmem [shape: bf16[8,3072], index: 0, kind: input, shape index: {}]   ;;  %s10250_s2 = inlined_call_operand.vmem [shape: f32[1,400], index: 2, kind: input, shape index: {}]   ;;  %s10251_s3 = inlined_call_operand.vmem [shape: bf16[8,400], index: 3, kind: output, shape index: {}]  }
   0x1   :  { %v6637_v0 = vld [vmem:[%s10248_s1 + $0x4] ss:$16 sps:$4 sm:$0xff]   ;;  %v6639_v1 = vld [vmem:[%s10248_s1 + $0xc] ss:$16 sps:$4 sm:$0xff]   ;;  %v6641_v2 = vld [vmem:[%s10248_s1] ss:$16 sps:$4 sm:$0xff]  }
   0x2   :  { %4740 = vmatprep.subr.bf16.mxu0 %v6637_v0  ;;  %v6642_v3 = vld [vmem:[%s10248_s1 + $0x8] ss:$16 sps:$4 sm:$0xff]   ;;  %5232 = vmatprep.subr.bf16.mxu1 %v6639_v1  ;;  %v6643_v4 = vld [vmem:[%s10248_s1 + $0x24] ss:$16 sps:$4 sm:$0xff]   ;;  %v6645_v5 = vld [vmem:[%s10248_s1 + $0x2c] ss:$16 sps:$4 sm:$0xff]  }
   0x3   :  { %4741 = vmatpush1.bf16.msra.mxu0 %v6641_v2  ;;  %5233 = vmatpush1.bf16.msra.mxu1 %v6642_v3  ;;  %v6647_v6 = vld [vmem:[%s10248_s1 + $0x20] ss:$16 sps:$4 sm:$0xff]   ;;  %v6648_v7 = vld [vmem:[%s10248_s1 + $0x28] ss:$16 sps:$4 sm:$0xff]   ;;  %v6649_v8 = vld [vmem:[%s10248_s1 + $0x44] ss:$16 sps:$4 sm:$0xff]  }
   0x4   :  { %4742 = vmatprep.subr.bf16.mxu0 %v6643_v4  ;;  %5234 = vmatprep.subr.bf16.mxu1 %v6645_v5  ;;  %v6651_v9 = vld [vmem:[%s10248_s1 + $0x4c] ss:$16 sps:$4 sm:$0xff]   ;;  %v6653_v10 = vld [vmem:[%s10248_s1 + $0x40] ss:$16 sps:$4 sm:$0xff]   ;;  %v6654_v11 = vld [vmem:[%s10248_s1 + $0x48] ss:$16 sps:$4 sm:$0xff]  }
   0x5   :  { %v6655_v12 = vld [vmem:[%s10248_s1 + $0x64] ss:$16 sps:$4 sm:$0xff]   ;;  %v6657_v13 = vld [vmem:[%s10248_s1 + $0x6c] ss:$16 sps:$4 sm:$0xff]   ;;  %v6659_v14 = vld [vmem:[%s10248_s1 + $0x60] ss:$16 sps:$4 sm:$0xff]  }
   0x6   :  { %v6660_v15 = vld [vmem:[%s10248_s1 + $0x68] ss:$16 sps:$4 sm:$0xff]   ;;  %v6661_v16 = vld [vmem:[%s10248_s1 + $0x84] ss:$16 sps:$4 sm:$0xff]   ;;  %v6663_v17 = vld [vmem:[%s10248_s1 + $0x8c] ss:$16 sps:$4 sm:$0xff]  }
   0x7   :  { %4743 = vmatpush1.bf16.msra.mxu0 %v6647_v6  ;;  %5235 = vmatpush1.bf16.msra.mxu1 %v6648_v7  ;;  %v6665_v18 = vld [vmem:[%s10248_s1 + $0x80] ss:$16 sps:$4 sm:$0xff]   ;;  %v6666_v19 = vld [vmem:[%s10248_s1 + $0x88] ss:$16 sps:$4 sm:$0xff]   ;;  %v6667_v20 = vld [vmem:[%s10248_s1 + $0xa4] ss:$16 sps:$4 sm:$0xff]  }
   0x8   :  { %4744 = vmatprep.subr.bf16.mxu0 %v6649_v8  ;;  %5236 = vmatprep.subr.bf16.mxu1 %v6651_v9  ;;  %v6669_v21 = vld [vmem:[%s10248_s1 + $0xac] ss:$16 sps:$4 sm:$0xff]   ;;  %v6671_v22 = vld [vmem:[%s10248_s1 + $0xa0] ss:$16 sps:$4 sm:$0xff]   ;;  %v6672_v23 = vld [vmem:[%s10248_s1 + $0xa8] ss:$16 sps:$4 sm:$0xff]  }
   0x9   :  { %v6673_v24 = vld [vmem:[%s10248_s1 + $0xc4] ss:$16 sps:$4 sm:$0xff]   ;;  %v6675_v25 = vld [vmem:[%s10248_s1 + $0xcc] ss:$16 sps:$4 sm:$0xff]   ;;  %v6677_v26 = vld [vmem:[%s10248_s1 + $0xc0] ss:$16 sps:$4 sm:$0xff]  }
   0xa   :  { %v6678_v27 = vld [vmem:[%s10248_s1 + $0xc8] ss:$16 sps:$4 sm:$0xff]   ;;  %v6679_v28 = vld [vmem:[%s10248_s1 + $0xe4] ss:$16 sps:$4 sm:$0xff]   ;;  %v6681_v29 = vld [vmem:[%s10248_s1 + $0xec] ss:$16 sps:$4 sm:$0xff]  }
   0xb   :  { %4745 = vmatpush1.bf16.msra.mxu0 %v6653_v10  ;;  %5237 = vmatpush1.bf16.msra.mxu1 %v6654_v11  ;;  %v6683_v30 = vld [vmem:[%s10248_s1 + $0xe0] ss:$16 sps:$4 sm:$0xff]   ;;  %v6684_v31 = vld [vmem:[%s10248_s1 + $0xe8] ss:$16 sps:$4 sm:$0xff]   ;;  %v6685_v32 = vld [vmem:[%s10248_s1 + $0x104] ss:$16 sps:$4 sm:$0xff]  }
   0xc   :  { %4746 = vmatprep.subr.bf16.mxu0 %v6655_v12  ;;  %5238 = vmatprep.subr.bf16.mxu1 %v6657_v13  ;;  %v6687_v33 = vld [vmem:[%s10248_s1 + $0x10c] ss:$16 sps:$4 sm:$0xff]   ;;  %v6689_v34 = vld [vmem:[%s10248_s1 + $0x100] ss:$16 sps:$4 sm:$0xff]   ;;  %v6690_v35 = vld [vmem:[%s10248_s1 + $0x108] ss:$16 sps:$4 sm:$0xff]  }
   0xd   :  { %v6691_v36 = vld [vmem:[%s10248_s1 + $0x124] ss:$16 sps:$4 sm:$0xff]   ;;  %v6693_v37 = vld [vmem:[%s10248_s1 + $0x12c] ss:$16 sps:$4 sm:$0xff]   ;;  %v6695_v38 = vld [vmem:[%s10248_s1 + $0x120] ss:$16 sps:$4 sm:$0xff]  }
   0xe   :  { %v6696_v39 = vld [vmem:[%s10248_s1 + $0x128] ss:$16 sps:$4 sm:$0xff]   ;;  %v6697_v40 = vld [vmem:[%s10248_s1 + $0x144] ss:$16 sps:$4 sm:$0xff]   ;;  %v6699_v41 = vld [vmem:[%s10248_s1 + $0x14c] ss:$16 sps:$4 sm:$0xff]  }
   0xf   :  { %4747 = vmatpush1.bf16.msra.mxu0 %v6659_v14  ;;  %5239 = vmatpush1.bf16.msra.mxu1 %v6660_v15  ;;  %v6701_v42 = vld [vmem:[%s10248_s1 + $0x140] ss:$16 sps:$4 sm:$0xff]   ;;  %v6702_v43 = vld [vmem:[%s10248_s1 + $0x148] ss:$16 sps:$4 sm:$0xff]   ;;  %v6703_v44 = vld [vmem:[%s10248_s1 + $0x164] ss:$16 sps:$4 sm:$0xff]  }
  0x10   :  { %4748 = vmatprep.subr.bf16.mxu0 %v6661_v16  ;;  %5240 = vmatprep.subr.bf16.mxu1 %v6663_v17  ;;  %v6705_v45 = vld [vmem:[%s10248_s1 + $0x16c] ss:$16 sps:$4 sm:$0xff]   ;;  %v14_v46 = vld [vmem:[%s10249_s0] sm:$0xff]  ;;  %v6708_v49 = vld [vmem:[%s10248_s1 + $0x168] ss:$16 sps:$4 sm:$0xff]  }
  0x11   :  { %v6707_v47 = vld [vmem:[%s10248_s1 + $0x160] ss:$16 sps:$4 sm:$0xff]   ;;  %v5750_v48 = vcombine.high %v14_v46, %v14_v46  ;;  %v6709_v50 = vld [vmem:[%s10248_s1 + $0x184] ss:$16 sps:$4 sm:$0xff]   ;;  %v6711_v51 = vld [vmem:[%s10248_s1 + $0x18c] ss:$16 sps:$4 sm:$0xff]   ;;  %v5749_v4 = vcombine.low %v14_v46, %v14_v46 }
  0x12   :  { %v6713_v52 = vld [vmem:[%s10248_s1 + $0x180] ss:$16 sps:$4 sm:$0xff]   ;;  %v6714_v53 = vld [vmem:[%s10248_s1 + $0x188] ss:$16 sps:$4 sm:$0xff]   ;;  %v6715_v54 = vld [vmem:[%s10248_s1 + $0x1a4] ss:$16 sps:$4 sm:$0xff]  }
  0x13   :  { %4749 = vmatpush1.bf16.msra.mxu0 %v6665_v18  ;;  %5241 = vmatpush1.bf16.msra.mxu1 %v6666_v19  ;;  %v6717_v55 = vld [vmem:[%s10248_s1 + $0x1ac] ss:$16 sps:$4 sm:$0xff]   ;;  %v6719_v56 = vld [vmem:[%s10248_s1 + $0x1a0] ss:$16 sps:$4 sm:$0xff]   ;;  %v6720_v57 = vld [vmem:[%s10248_s1 + $0x1a8] ss:$16 sps:$4 sm:$0xff]  }
  0x14   :  { %4750 = vmatprep.subr.bf16.mxu0 %v6667_v20  ;;  %5242 = vmatprep.subr.bf16.mxu1 %v6669_v21  ;;  %v6721_v58 = vld [vmem:[%s10248_s1 + $0x1c4] ss:$16 sps:$4 sm:$0xff]   ;;  %v6723_v59 = vld [vmem:[%s10248_s1 + $0x1cc] ss:$16 sps:$4 sm:$0xff]   ;;  %v6725_v60 = vld [vmem:[%s10248_s1 + $0x1c0] ss:$16 sps:$4 sm:$0xff]  }
  0x15   :  { %4772 = vmatprep.mubr.bf16.mxu0 %v5750_v48  ;;  %5264 = vmatprep.mubr.bf16.mxu1 %v5750_v48  ;;  %v6726_v61 = vld [vmem:[%s10248_s1 + $0x1c8] ss:$16 sps:$4 sm:$0xff]   ;;  %v6727_v62 = vld [vmem:[%s10248_s1 + $0x1e4] ss:$16 sps:$4 sm:$0xff]   ;;  %v6729_v63 = vld [vmem:[%s10248_s1 + $0x1ec] ss:$16 sps:$4 sm:$0xff]  }
  0x16   :  { %v6731_v0 = vld [vmem:[%s10248_s1 + $0x1e0] ss:$16 sps:$4 sm:$0xff]   ;;  %v6732_v1 = vld [vmem:[%s10248_s1 + $0x1e8] ss:$16 sps:$4 sm:$0xff]   ;;  %v6737_v2 = vld [vmem:[%s10248_s1 + $0x204] ss:$16 sps:$4 sm:$0xff]  }
  0x17   :  { %4751 = vmatpush1.bf16.msra.mxu0 %v6671_v22  ;;  %5243 = vmatpush1.bf16.msra.mxu1 %v6672_v23  ;;  %v6740_v3 = vld [vmem:[%s10248_s1 + $0x20c] ss:$16 sps:$4 sm:$0xff]   ;;  %v6735_v5 = vld [vmem:[%s10248_s1 + $0x200] ss:$16 sps:$4 sm:$0xff]   ;;  %v6738_v6 = vld [vmem:[%s10248_s1 + $0x208] ss:$16 sps:$4 sm:$0xff]  }
  0x18   :  { %4752 = vmatprep.subr.bf16.mxu0 %v6673_v24  ;;  %5244 = vmatprep.subr.bf16.mxu1 %v6675_v25  ;;  %v6743_v7 = vld [vmem:[%s10248_s1 + $0x224] ss:$16 sps:$4 sm:$0xff]   ;;  %v6746_v8 = vld [vmem:[%s10248_s1 + $0x22c] ss:$16 sps:$4 sm:$0xff]   ;;  %v6741_v9 = vld [vmem:[%s10248_s1 + $0x220] ss:$16 sps:$4 sm:$0xff]  }
  0x19   :  { %v6744_v10 = vld [vmem:[%s10248_s1 + $0x228] ss:$16 sps:$4 sm:$0xff]   ;;  %v6749_v11 = vld [vmem:[%s10248_s1 + $0x244] ss:$16 sps:$4 sm:$0xff]   ;;  %v6752_v12 = vld [vmem:[%s10248_s1 + $0x24c] ss:$16 sps:$4 sm:$0xff]  }
  0x1a   :  { %v6747_v13 = vld [vmem:[%s10248_s1 + $0x240] ss:$16 sps:$4 sm:$0xff]   ;;  %v6750_v14 = vld [vmem:[%s10248_s1 + $0x248] ss:$16 sps:$4 sm:$0xff]   ;;  %v6755_v15 = vld [vmem:[%s10248_s1 + $0x264] ss:$16 sps:$4 sm:$0xff]  }
  0x1b   :  { %4753 = vmatpush1.bf16.msra.mxu0 %v6677_v26  ;;  %5245 = vmatpush1.bf16.msra.mxu1 %v6678_v27  ;;  %v6758_v16 = vld [vmem:[%s10248_s1 + $0x26c] ss:$16 sps:$4 sm:$0xff]   ;;  %v6753_v17 = vld [vmem:[%s10248_s1 + $0x260] ss:$16 sps:$4 sm:$0xff]   ;;  %v6756_v18 = vld [vmem:[%s10248_s1 + $0x268] ss:$16 sps:$4 sm:$0xff]  }
  0x1c   :  { %4754 = vmatprep.subr.bf16.mxu0 %v6679_v28  ;;  %5246 = vmatprep.subr.bf16.mxu1 %v6681_v29  ;;  %v6761_v19 = vld [vmem:[%s10248_s1 + $0x284] ss:$16 sps:$4 sm:$0xff]   ;;  %v6764_v20 = vld [vmem:[%s10248_s1 + $0x28c] ss:$16 sps:$4 sm:$0xff]   ;;  %v6759_v21 = vld [vmem:[%s10248_s1 + $0x280] ss:$16 sps:$4 sm:$0xff]  }
  0x1d   :  { %v6762_v22 = vld [vmem:[%s10248_s1 + $0x288] ss:$16 sps:$4 sm:$0xff]   ;;  %v6767_v23 = vld [vmem:[%s10248_s1 + $0x2a4] ss:$16 sps:$4 sm:$0xff]   ;;  %v6770_v24 = vld [vmem:[%s10248_s1 + $0x2ac] ss:$16 sps:$4 sm:$0xff]  }
  0x1e   :  { %v6765_v25 = vld [vmem:[%s10248_s1 + $0x2a0] ss:$16 sps:$4 sm:$0xff]   ;;  %v6768_v26 = vld [vmem:[%s10248_s1 + $0x2a8] ss:$16 sps:$4 sm:$0xff]   ;;  %v6773_v27 = vld [vmem:[%s10248_s1 + $0x2c4] ss:$16 sps:$4 sm:$0xff]  }
  0x1f   :  { %4755 = vmatpush1.bf16.msra.mxu0 %v6683_v30  ;;  %5247 = vmatpush1.bf16.msra.mxu1 %v6684_v31  ;;  %v6776_v28 = vld [vmem:[%s10248_s1 + $0x2cc] ss:$16 sps:$4 sm:$0xff]   ;;  %v6771_v31 = vld [vmem:[%s10248_s1 + $0x2c0] ss:$16 sps:$4 sm:$0xff]   ;;  %v6798_v48 = vld [vmem:[%s10248_s1 + $0x348] ss:$16 sps:$4 sm:$0xff]  }
  0x20   :  { %4756 = vmatprep.subr.bf16.mxu0 %v6685_v32  ;;  %5248 = vmatprep.subr.bf16.mxu1 %v6687_v33  ;;  %v8109_v29 = vld [vmem:[%s10249_s0 + $0x8] sm:$0xff]  ;;  %v6779_v33 = vld [vmem:[%s10248_s1 + $0x2e4] ss:$16 sps:$4 sm:$0xff]   ;;  %vm5743_vm2 = vmor %vm5742_vm1, %vm5741_vm0 }
  0x21   :  { %v5752_v30 = vcombine.high %v8109_v29, %v8109_v29  ;;  %v6774_v32 = vld [vmem:[%s10248_s1 + $0x2c8] ss:$16 sps:$4 sm:$0xff]   ;;  %v6800_v46 = vld [vmem:[%s10248_s1 + $0x34c] ss:$16 sps:$4 sm:$0xff]  }
  0x23   :  { %4757 = vmatpush1.bf16.msra.mxu0 %v6689_v34  ;;  %5249 = vmatpush1.bf16.msra.mxu1 %v6690_v35  ;;  %v6782_v34 = vld [vmem:[%s10248_s1 + $0x2ec] ss:$16 sps:$4 sm:$0xff]   ;;  %v6777_v35 = vld [vmem:[%s10248_s1 + $0x2e0] ss:$16 sps:$4 sm:$0xff]  }
  0x24   :  { %4758 = vmatprep.subr.bf16.mxu0 %v6691_v36  ;;  %5250 = vmatprep.subr.bf16.mxu1 %v6693_v37  ;;  %v6780_v36 = vld [vmem:[%s10248_s1 + $0x2e8] ss:$16 sps:$4 sm:$0xff]   ;;  %v6785_v37 = vld [vmem:[%s10248_s1 + $0x304] ss:$16 sps:$4 sm:$0xff]  }
  0x27   :  { %4759 = vmatpush1.bf16.msra.mxu0 %v6695_v38  ;;  %5251 = vmatpush1.bf16.msra.mxu1 %v6696_v39  ;;  %v6788_v38 = vld [vmem:[%s10248_s1 + $0x30c] ss:$16 sps:$4 sm:$0xff]   ;;  %v6783_v39 = vld [vmem:[%s10248_s1 + $0x300] ss:$16 sps:$4 sm:$0xff]  }
  0x28   :  { %4760 = vmatprep.subr.bf16.mxu0 %v6697_v40  ;;  %5252 = vmatprep.subr.bf16.mxu1 %v6699_v41  ;;  %v6786_v40 = vld [vmem:[%s10248_s1 + $0x308] ss:$16 sps:$4 sm:$0xff]   ;;  %v6791_v41 = vld [vmem:[%s10248_s1 + $0x324] ss:$16 sps:$4 sm:$0xff]  }
  0x2b   :  { %4761 = vmatpush1.bf16.msra.mxu0 %v6701_v42  ;;  %5253 = vmatpush1.bf16.msra.mxu1 %v6702_v43  ;;  %v6794_v42 = vld [vmem:[%s10248_s1 + $0x32c] ss:$16 sps:$4 sm:$0xff]   ;;  %v6789_v43 = vld [vmem:[%s10248_s1 + $0x320] ss:$16 sps:$4 sm:$0xff]  }
  0x2c   :  { %4762 = vmatprep.subr.bf16.mxu0 %v6703_v44  ;;  %5254 = vmatprep.subr.bf16.mxu1 %v6705_v45  ;;  %v6792_v44 = vld [vmem:[%s10248_s1 + $0x328] ss:$16 sps:$4 sm:$0xff]   ;;  %v6797_v45 = vld [vmem:[%s10248_s1 + $0x344] ss:$16 sps:$4 sm:$0xff]  }
  0x2f   :  { %4763 = vmatpush1.bf16.msra.mxu0 %v6707_v47  ;;  %5255 = vmatpush1.bf16.msra.mxu1 %v6708_v49  ;;  %v6795_v47 = vld [vmem:[%s10248_s1 + $0x340] ss:$16 sps:$4 sm:$0xff]   ;;  %v6803_v49 = vld [vmem:[%s10248_s1 + $0x364] ss:$16 sps:$4 sm:$0xff]  }
  0x30   :  { %4764 = vmatprep.subr.bf16.mxu0 %v6709_v50  ;;  %5256 = vmatprep.subr.bf16.mxu1 %v6711_v51  ;;  %v6806_v50 = vld [vmem:[%s10248_s1 + $0x36c] ss:$16 sps:$4 sm:$0xff]   ;;  %v6801_v51 = vld [vmem:[%s10248_s1 + $0x360] ss:$16 sps:$4 sm:$0xff]  }
  0x33   :  { %4765 = vmatpush1.bf16.msra.mxu0 %v6713_v52  ;;  %5257 = vmatpush1.bf16.msra.mxu1 %v6714_v53  ;;  %v6804_v52 = vld [vmem:[%s10248_s1 + $0x368] ss:$16 sps:$4 sm:$0xff]   ;;  %v6809_v53 = vld [vmem:[%s10248_s1 + $0x384] ss:$16 sps:$4 sm:$0xff]  }
  0x34   :  { %4766 = vmatprep.subr.bf16.mxu0 %v6715_v54  ;;  %5258 = vmatprep.subr.bf16.mxu1 %v6717_v55  ;;  %v6812_v54 = vld [vmem:[%s10248_s1 + $0x38c] ss:$16 sps:$4 sm:$0xff]   ;;  %v6807_v55 = vld [vmem:[%s10248_s1 + $0x380] ss:$16 sps:$4 sm:$0xff]  }
  0x37   :  { %4767 = vmatpush1.bf16.msra.mxu0 %v6719_v56  ;;  %5259 = vmatpush1.bf16.msra.mxu1 %v6720_v57  ;;  %v6810_v56 = vld [vmem:[%s10248_s1 + $0x388] ss:$16 sps:$4 sm:$0xff]   ;;  %v6815_v57 = vld [vmem:[%s10248_s1 + $0x3a4] ss:$16 sps:$4 sm:$0xff]  }
  0x38   :  { %4768 = vmatprep.subr.bf16.mxu0 %v6721_v58  ;;  %5260 = vmatprep.subr.bf16.mxu1 %v6723_v59  ;;  %v6818_v58 = vld [vmem:[%s10248_s1 + $0x3ac] ss:$16 sps:$4 sm:$0xff]   ;;  %v6813_v59 = vld [vmem:[%s10248_s1 + $0x3a0] ss:$16 sps:$4 sm:$0xff]  }
  0x3b   :  { %4769 = vmatpush1.bf16.msra.mxu0 %v6725_v60  ;;  %5261 = vmatpush1.bf16.msra.mxu1 %v6726_v61  ;;  %v6816_v60 = vld [vmem:[%s10248_s1 + $0x3a8] ss:$16 sps:$4 sm:$0xff]   ;;  %v6821_v61 = vld [vmem:[%s10248_s1 + $0x3c4] ss:$16 sps:$4 sm:$0xff]  }
  0x3c   :  { %4770 = vmatprep.subr.bf16.mxu0 %v6727_v62  ;;  %5262 = vmatprep.subr.bf16.mxu1 %v6729_v63  ;;  %v6824_v62 = vld [vmem:[%s10248_s1 + $0x3cc] ss:$16 sps:$4 sm:$0xff]   ;;  %v6819_v63 = vld [vmem:[%s10248_s1 + $0x3c0] ss:$16 sps:$4 sm:$0xff]  }
  0x3f   :  { %4771 = vmatpush1.bf16.msra.mxu0 %v6731_v0  ;;  %5263 = vmatpush1.bf16.msra.mxu1 %v6732_v1  ;;  %v6822_v0 = vld [vmem:[%s10248_s1 + $0x3c8] ss:$16 sps:$4 sm:$0xff]   ;;  %v6827_v1 = vld [vmem:[%s10248_s1 + $0x3e4] ss:$16 sps:$4 sm:$0xff]  }
  0x40   :  { %4781 = vmatprep.subr.bf16.mxu0 %v6737_v2  ;;  %5273 = vmatprep.subr.bf16.mxu1 %v6740_v3  ;;  %v6830_v2 = vld [vmem:[%s10248_s1 + $0x3ec] ss:$16 sps:$4 sm:$0xff]   ;;  %v6825_v3 = vld [vmem:[%s10248_s1 + $0x3e0] ss:$16 sps:$4 sm:$0xff]  }
  0x42   :  { %4773 = vmatmul.mubr.bf16.vlgmr.msra.gmra.mrb[0].mxu0 %v5749_v4  ;;  %5265 = vmatmul.mubr.bf16.vlgmr.msra.gmra.mrb[0].mxu1 %v5749_v4  ;;  %v6828_v4 = vld [vmem:[%s10248_s1 + $0x3e8] ss:$16 sps:$4 sm:$0xff]  }
  0x43   :  { %4782 = vmatpush1.bf16.msra.mxu0 %v6735_v5  ;;  %5274 = vmatpush1.bf16.msra.mxu1 %v6738_v6  ;;  %v6835_v5 = vld [vmem:[%s10248_s1 + $0x404] ss:$16 sps:$4 sm:$0xff]   ;;  %v6838_v6 = vld [vmem:[%s10248_s1 + $0x40c] ss:$16 sps:$4 sm:$0xff]  }
  0x44   :  { %4783 = vmatprep.subr.bf16.mxu0 %v6743_v7  ;;  %5275 = vmatprep.subr.bf16.mxu1 %v6746_v8  ;;  %v5751_v7 = vcombine.low %v8109_v29, %v8109_v29  ;;  %v6833_v8 = vld [vmem:[%s10248_s1 + $0x400] ss:$16 sps:$4 sm:$0xff]   ;;  %v6868_v29 = vld [vmem:[%s10248_s1 + $0x4ac] ss:$16 sps:$4 sm:$0xff]  }
  0x45   :  { %4813 = vmatprep.mubr.bf16.mxu0 %v5752_v30  ;;  %5305 = vmatprep.mubr.bf16.mxu1 %v5752_v30  ;;  %v6863_v30 = vld [vmem:[%s10248_s1 + $0x4a0] ss:$16 sps:$4 sm:$0xff]  }
  0x47   :  { %4784 = vmatpush1.bf16.msra.mxu0 %v6741_v9  ;;  %5276 = vmatpush1.bf16.msra.mxu1 %v6744_v10  ;;  %v6836_v9 = vld [vmem:[%s10248_s1 + $0x408] ss:$16 sps:$4 sm:$0xff]   ;;  %v6841_v10 = vld [vmem:[%s10248_s1 + $0x424] ss:$16 sps:$4 sm:$0xff]  }
  0x48   :  { %4785 = vmatprep.subr.bf16.mxu0 %v6749_v11  ;;  %5277 = vmatprep.subr.bf16.mxu1 %v6752_v12  ;;  %v8247_v11 = vld [vmem:[%s10249_s0 + $0x10] sm:$0xff]  ;;  %v6844_v12 = vld [vmem:[%s10248_s1 + $0x42c] ss:$16 sps:$4 sm:$0xff]  }
  0x4b   :  { %4786 = vmatpush1.bf16.msra.mxu0 %v6747_v13  ;;  %5278 = vmatpush1.bf16.msra.mxu1 %v6750_v14  ;;  %v5754_v13 = vcombine.high %v8247_v11, %v8247_v11  ;;  %v6839_v14 = vld [vmem:[%s10248_s1 + $0x420] ss:$16 sps:$4 sm:$0xff]  }
  0x4c   :  { %4787 = vmatprep.subr.bf16.mxu0 %v6755_v15  ;;  %5279 = vmatprep.subr.bf16.mxu1 %v6758_v16  ;;  %v6842_v15 = vld [vmem:[%s10248_s1 + $0x428] ss:$16 sps:$4 sm:$0xff]   ;;  %v6847_v16 = vld [vmem:[%s10248_s1 + $0x444] ss:$16 sps:$4 sm:$0xff]  }
  0x4f   :  { %4788 = vmatpush1.bf16.msra.mxu0 %v6753_v17  ;;  %5280 = vmatpush1.bf16.msra.mxu1 %v6756_v18  ;;  %v6850_v17 = vld [vmem:[%s10248_s1 + $0x44c] ss:$16 sps:$4 sm:$0xff]   ;;  %v6845_v18 = vld [vmem:[%s10248_s1 + $0x440] ss:$16 sps:$4 sm:$0xff]  }
  0x50   :  { %4789 = vmatprep.subr.bf16.mxu0 %v6761_v19  ;;  %5281 = vmatprep.subr.bf16.mxu1 %v6764_v20  ;;  %v6848_v19 = vld [vmem:[%s10248_s1 + $0x448] ss:$16 sps:$4 sm:$0xff]   ;;  %v6853_v20 = vld [vmem:[%s10248_s1 + $0x464] ss:$16 sps:$4 sm:$0xff]  }
  0x53   :  { %4790 = vmatpush1.bf16.msra.mxu0 %v6759_v21  ;;  %5282 = vmatpush1.bf16.msra.mxu1 %v6762_v22  ;;  %v6856_v21 = vld [vmem:[%s10248_s1 + $0x46c] ss:$16 sps:$4 sm:$0xff]   ;;  %v6851_v22 = vld [vmem:[%s10248_s1 + $0x460] ss:$16 sps:$4 sm:$0xff]  }
  0x54   :  { %4791 = vmatprep.subr.bf16.mxu0 %v6767_v23  ;;  %5283 = vmatprep.subr.bf16.mxu1 %v6770_v24  ;;  %v6854_v23 = vld [vmem:[%s10248_s1 + $0x468] ss:$16 sps:$4 sm:$0xff]   ;;  %v6859_v24 = vld [vmem:[%s10248_s1 + $0x484] ss:$16 sps:$4 sm:$0xff]  }
  0x57   :  { %4792 = vmatpush1.bf16.msra.mxu0 %v6765_v25  ;;  %5284 = vmatpush1.bf16.msra.mxu1 %v6768_v26  ;;  %v6862_v25 = vld [vmem:[%s10248_s1 + $0x48c] ss:$16 sps:$4 sm:$0xff]   ;;  %v6857_v26 = vld [vmem:[%s10248_s1 + $0x480] ss:$16 sps:$4 sm:$0xff]  }
  0x58   :  { %4793 = vmatprep.subr.bf16.mxu0 %v6773_v27  ;;  %5285 = vmatprep.subr.bf16.mxu1 %v6776_v28  ;;  %v6860_v27 = vld [vmem:[%s10248_s1 + $0x488] ss:$16 sps:$4 sm:$0xff]   ;;  %v6865_v28 = vld [vmem:[%s10248_s1 + $0x4a4] ss:$16 sps:$4 sm:$0xff]  }
  0x5b   :  { %4794 = vmatpush1.bf16.msra.mxu0 %v6771_v31  ;;  %5286 = vmatpush1.bf16.msra.mxu1 %v6774_v32  ;;  %v6866_v31 = vld [vmem:[%s10248_s1 + $0x4a8] ss:$16 sps:$4 sm:$0xff]   ;;  %v6871_v32 = vld [vmem:[%s10248_s1 + $0x4c4] ss:$16 sps:$4 sm:$0xff]  }
  0x5c   :  { %4795 = vmatprep.subr.bf16.mxu0 %v6779_v33  ;;  %5287 = vmatprep.subr.bf16.mxu1 %v6782_v34  ;;  %v6874_v33 = vld [vmem:[%s10248_s1 + $0x4cc] ss:$16 sps:$4 sm:$0xff]   ;;  %v6869_v34 = vld [vmem:[%s10248_s1 + $0x4c0] ss:$16 sps:$4 sm:$0xff]  }
  0x5f   :  { %4796 = vmatpush1.bf16.msra.mxu0 %v6777_v35  ;;  %5288 = vmatpush1.bf16.msra.mxu1 %v6780_v36  ;;  %v6872_v35 = vld [vmem:[%s10248_s1 + $0x4c8] ss:$16 sps:$4 sm:$0xff]   ;;  %v6877_v36 = vld [vmem:[%s10248_s1 + $0x4e4] ss:$16 sps:$4 sm:$0xff]  }
  0x60   :  { %4797 = vmatprep.subr.bf16.mxu0 %v6785_v37  ;;  %5289 = vmatprep.subr.bf16.mxu1 %v6788_v38  ;;  %v6880_v37 = vld [vmem:[%s10248_s1 + $0x4ec] ss:$16 sps:$4 sm:$0xff]   ;;  %v6875_v38 = vld [vmem:[%s10248_s1 + $0x4e0] ss:$16 sps:$4 sm:$0xff]  }
  0x63   :  { %4798 = vmatpush1.bf16.msra.mxu0 %v6783_v39  ;;  %5290 = vmatpush1.bf16.msra.mxu1 %v6786_v40  ;;  %v6878_v39 = vld [vmem:[%s10248_s1 + $0x4e8] ss:$16 sps:$4 sm:$0xff]   ;;  %v6883_v40 = vld [vmem:[%s10248_s1 + $0x504] ss:$16 sps:$4 sm:$0xff]  }
  0x64   :  { %4799 = vmatprep.subr.bf16.mxu0 %v6791_v41  ;;  %5291 = vmatprep.subr.bf16.mxu1 %v6794_v42  ;;  %v6886_v41 = vld [vmem:[%s10248_s1 + $0x50c] ss:$16 sps:$4 sm:$0xff]   ;;  %v6881_v42 = vld [vmem:[%s10248_s1 + $0x500] ss:$16 sps:$4 sm:$0xff]  }
  0x67   :  { %4800 = vmatpush1.bf16.msra.mxu0 %v6789_v43  ;;  %5292 = vmatpush1.bf16.msra.mxu1 %v6792_v44  ;;  %v6884_v43 = vld [vmem:[%s10248_s1 + $0x508] ss:$16 sps:$4 sm:$0xff]   ;;  %v6889_v44 = vld [vmem:[%s10248_s1 + $0x524] ss:$16 sps:$4 sm:$0xff]  }
  0x68   :  { %4801 = vmatprep.subr.bf16.mxu0 %v6797_v45  ;;  %5293 = vmatprep.subr.bf16.mxu1 %v6800_v46  ;;  %v6892_v45 = vld [vmem:[%s10248_s1 + $0x52c] ss:$16 sps:$4 sm:$0xff]   ;;  %v6887_v46 = vld [vmem:[%s10248_s1 + $0x520] ss:$16 sps:$4 sm:$0xff]  }
  0x6b   :  { %4802 = vmatpush1.bf16.msra.mxu0 %v6795_v47  ;;  %5294 = vmatpush1.bf16.msra.mxu1 %v6798_v48  ;;  %v6890_v47 = vld [vmem:[%s10248_s1 + $0x528] ss:$16 sps:$4 sm:$0xff]   ;;  %v6895_v48 = vld [vmem:[%s10248_s1 + $0x544] ss:$16 sps:$4 sm:$0xff]  }
  0x6c   :  { %4803 = vmatprep.subr.bf16.mxu0 %v6803_v49  ;;  %5295 = vmatprep.subr.bf16.mxu1 %v6806_v50  ;;  %v6898_v49 = vld [vmem:[%s10248_s1 + $0x54c] ss:$16 sps:$4 sm:$0xff]   ;;  %v6893_v50 = vld [vmem:[%s10248_s1 + $0x540] ss:$16 sps:$4 sm:$0xff]  }
  0x6f   :  { %4804 = vmatpush1.bf16.msra.mxu0 %v6801_v51  ;;  %5296 = vmatpush1.bf16.msra.mxu1 %v6804_v52  ;;  %v6896_v51 = vld [vmem:[%s10248_s1 + $0x548] ss:$16 sps:$4 sm:$0xff]   ;;  %v6901_v52 = vld [vmem:[%s10248_s1 + $0x564] ss:$16 sps:$4 sm:$0xff]  }
  0x70   :  { %4805 = vmatprep.subr.bf16.mxu0 %v6809_v53  ;;  %5297 = vmatprep.subr.bf16.mxu1 %v6812_v54  ;;  %v6904_v53 = vld [vmem:[%s10248_s1 + $0x56c] ss:$16 sps:$4 sm:$0xff]   ;;  %v6899_v54 = vld [vmem:[%s10248_s1 + $0x560] ss:$16 sps:$4 sm:$0xff]  }
  0x73   :  { %4806 = vmatpush1.bf16.msra.mxu0 %v6807_v55  ;;  %5298 = vmatpush1.bf16.msra.mxu1 %v6810_v56  ;;  %v6902_v55 = vld [vmem:[%s10248_s1 + $0x568] ss:$16 sps:$4 sm:$0xff]   ;;  %v6907_v56 = vld [vmem:[%s10248_s1 + $0x584] ss:$16 sps:$4 sm:$0xff]  }
  0x74   :  { %4807 = vmatprep.subr.bf16.mxu0 %v6815_v57  ;;  %5299 = vmatprep.subr.bf16.mxu1 %v6818_v58  ;;  %v6910_v57 = vld [vmem:[%s10248_s1 + $0x58c] ss:$16 sps:$4 sm:$0xff]   ;;  %v6905_v58 = vld [vmem:[%s10248_s1 + $0x580] ss:$16 sps:$4 sm:$0xff]  }
  0x77   :  { %4808 = vmatpush1.bf16.msra.mxu0 %v6813_v59  ;;  %5300 = vmatpush1.bf16.msra.mxu1 %v6816_v60  ;;  %v6908_v59 = vld [vmem:[%s10248_s1 + $0x588] ss:$16 sps:$4 sm:$0xff]   ;;  %v6913_v60 = vld [vmem:[%s10248_s1 + $0x5a4] ss:$16 sps:$4 sm:$0xff]  }
  0x78   :  { %4809 = vmatprep.subr.bf16.mxu0 %v6821_v61  ;;  %5301 = vmatprep.subr.bf16.mxu1 %v6824_v62  ;;  %v6916_v61 = vld [vmem:[%s10248_s1 + $0x5ac] ss:$16 sps:$4 sm:$0xff]   ;;  %v6911_v62 = vld [vmem:[%s10248_s1 + $0x5a0] ss:$16 sps:$4 sm:$0xff]  }
  0x7b   :  { %4810 = vmatpush1.bf16.msra.mxu0 %v6819_v63  ;;  %5302 = vmatpush1.bf16.msra.mxu1 %v6822_v0  ;;  %v6914_v63 = vld [vmem:[%s10248_s1 + $0x5a8] ss:$16 sps:$4 sm:$0xff]   ;;  %v6919_v0 = vld [vmem:[%s10248_s1 + $0x5c4] ss:$16 sps:$4 sm:$0xff]  }
  0x7c   :  { %4811 = vmatprep.subr.bf16.mxu0 %v6827_v1  ;;  %5303 = vmatprep.subr.bf16.mxu1 %v6830_v2  ;;  %v6922_v1 = vld [vmem:[%s10248_s1 + $0x5cc] ss:$16 sps:$4 sm:$0xff]   ;;  %v6917_v2 = vld [vmem:[%s10248_s1 + $0x5c0] ss:$16 sps:$4 sm:$0xff]  }
  0x7f   :  { %4812 = vmatpush1.bf16.msra.mxu0 %v6825_v3  ;;  %5304 = vmatpush1.bf16.msra.mxu1 %v6828_v4  ;;  %v6920_v3 = vld [vmem:[%s10248_s1 + $0x5c8] ss:$16 sps:$4 sm:$0xff]   ;;  %v6925_v4 = vld [vmem:[%s10248_s1 + $0x5e4] ss:$16 sps:$4 sm:$0xff]  }
  0x80   :  { %4822 = vmatprep.subr.bf16.mxu0 %v6835_v5  ;;  %5314 = vmatprep.subr.bf16.mxu1 %v6838_v6  ;;  %v6928_v5 = vld [vmem:[%s10248_s1 + $0x5ec] ss:$16 sps:$4 sm:$0xff]   ;;  %v6923_v6 = vld [vmem:[%s10248_s1 + $0x5e0] ss:$16 sps:$4 sm:$0xff]  }
  0x82   :  { %4814 = vmatmul.mubr.bf16.vlgmr.msra.gmra.mrb[0].mxu0 %v5751_v7  ;;  %5306 = vmatmul.mubr.bf16.vlgmr.msra.gmra.mrb[0].mxu1 %v5751_v7  ;;  %v6926_v7 = vld [vmem:[%s10248_s1 + $0x5e8] ss:$16 sps:$4 sm:$0xff]  }
  0x83   :  { %4823 = vmatpush1.bf16.msra.mxu0 %v6833_v8  ;;  %5315 = vmatpush1.bf16.msra.mxu1 %v6836_v9  ;;  %v6933_v8 = vld [vmem:[%s10248_s1 + $0x604] ss:$16 sps:$4 sm:$0xff]   ;;  %v6936_v9 = vld [vmem:[%s10248_s1 + $0x60c] ss:$16 sps:$4 sm:$0xff]  }
  0x84   :  { %4824 = vmatprep.subr.bf16.mxu0 %v6841_v10  ;;  %5316 = vmatprep.subr.bf16.mxu1 %v6844_v12  ;;  %v6931_v10 = vld [vmem:[%s10248_s1 + $0x600] ss:$16 sps:$4 sm:$0xff]   ;;  %v5753_v12 = vcombine.low %v8247_v11, %v8247_v11  ;;  %v6942_v11 = vld [vmem:[%s10248_s1 + $0x62c] ss:$16 sps:$4 sm:$0xff]  }
  0x85   :  { %4854 = vmatprep.mubr.bf16.mxu0 %v5754_v13  ;;  %5346 = vmatprep.mubr.bf16.mxu1 %v5754_v13  ;;  %v6934_v13 = vld [vmem:[%s10248_s1 + $0x608] ss:$16 sps:$4 sm:$0xff]  }
  0x87   :  { %4825 = vmatpush1.bf16.msra.mxu0 %v6839_v14  ;;  %5317 = vmatpush1.bf16.msra.mxu1 %v6842_v15  ;;  %v8445_v14 = vld [vmem:[%s10249_s0 + $0x18] sm:$0xff]  ;;  %v6939_v15 = vld [vmem:[%s10248_s1 + $0x624] ss:$16 sps:$4 sm:$0xff]  }
  0x88   :  { %4826 = vmatprep.subr.bf16.mxu0 %v6847_v16  ;;  %5318 = vmatprep.subr.bf16.mxu1 %v6850_v17  ;;  %v5756_v16 = vcombine.high %v8445_v14, %v8445_v14  ;;  %v6937_v17 = vld [vmem:[%s10248_s1 + $0x620] ss:$16 sps:$4 sm:$0xff]  }
  0x8b   :  { %4827 = vmatpush1.bf16.msra.mxu0 %v6845_v18  ;;  %5319 = vmatpush1.bf16.msra.mxu1 %v6848_v19  ;;  %v6940_v18 = vld [vmem:[%s10248_s1 + $0x628] ss:$16 sps:$4 sm:$0xff]   ;;  %v6945_v19 = vld [vmem:[%s10248_s1 + $0x644] ss:$16 sps:$4 sm:$0xff]  }
  0x8c   :  { %4828 = vmatprep.subr.bf16.mxu0 %v6853_v20  ;;  %5320 = vmatprep.subr.bf16.mxu1 %v6856_v21  ;;  %v6948_v20 = vld [vmem:[%s10248_s1 + $0x64c] ss:$16 sps:$4 sm:$0xff]   ;;  %v6943_v21 = vld [vmem:[%s10248_s1 + $0x640] ss:$16 sps:$4 sm:$0xff]  }
  0x8f   :  { %4829 = vmatpush1.bf16.msra.mxu0 %v6851_v22  ;;  %5321 = vmatpush1.bf16.msra.mxu1 %v6854_v23  ;;  %v6946_v22 = vld [vmem:[%s10248_s1 + $0x648] ss:$16 sps:$4 sm:$0xff]   ;;  %v6951_v23 = vld [vmem:[%s10248_s1 + $0x664] ss:$16 sps:$4 sm:$0xff]  }
  0x90   :  { %4830 = vmatprep.subr.bf16.mxu0 %v6859_v24  ;;  %5322 = vmatprep.subr.bf16.mxu1 %v6862_v25  ;;  %v6954_v24 = vld [vmem:[%s10248_s1 + $0x66c] ss:$16 sps:$4 sm:$0xff]   ;;  %v6949_v25 = vld [vmem:[%s10248_s1 + $0x660] ss:$16 sps:$4 sm:$0xff]  }
  0x93   :  { %4831 = vmatpush1.bf16.msra.mxu0 %v6857_v26  ;;  %5323 = vmatpush1.bf16.msra.mxu1 %v6860_v27  ;;  %v6952_v26 = vld [vmem:[%s10248_s1 + $0x668] ss:$16 sps:$4 sm:$0xff]   ;;  %v6957_v27 = vld [vmem:[%s10248_s1 + $0x684] ss:$16 sps:$4 sm:$0xff]  }
  0x94   :  { %4832 = vmatprep.subr.bf16.mxu0 %v6865_v28  ;;  %5324 = vmatprep.subr.bf16.mxu1 %v6868_v29  ;;  %v6960_v28 = vld [vmem:[%s10248_s1 + $0x68c] ss:$16 sps:$4 sm:$0xff]   ;;  %v6955_v29 = vld [vmem:[%s10248_s1 + $0x680] ss:$16 sps:$4 sm:$0xff]  }
  0x97   :  { %4833 = vmatpush1.bf16.msra.mxu0 %v6863_v30  ;;  %5325 = vmatpush1.bf16.msra.mxu1 %v6866_v31  ;;  %v6958_v30 = vld [vmem:[%s10248_s1 + $0x688] ss:$16 sps:$4 sm:$0xff]   ;;  %v6963_v31 = vld [vmem:[%s10248_s1 + $0x6a4] ss:$16 sps:$4 sm:$0xff]  }
  0x98   :  { %4834 = vmatprep.subr.bf16.mxu0 %v6871_v32  ;;  %5326 = vmatprep.subr.bf16.mxu1 %v6874_v33  ;;  %v6966_v32 = vld [vmem:[%s10248_s1 + $0x6ac] ss:$16 sps:$4 sm:$0xff]   ;;  %v6961_v33 = vld [vmem:[%s10248_s1 + $0x6a0] ss:$16 sps:$4 sm:$0xff]  }
  0x9b   :  { %4835 = vmatpush1.bf16.msra.mxu0 %v6869_v34  ;;  %5327 = vmatpush1.bf16.msra.mxu1 %v6872_v35  ;;  %v6964_v34 = vld [vmem:[%s10248_s1 + $0x6a8] ss:$16 sps:$4 sm:$0xff]   ;;  %v6969_v35 = vld [vmem:[%s10248_s1 + $0x6c4] ss:$16 sps:$4 sm:$0xff]  }
  0x9c   :  { %4836 = vmatprep.subr.bf16.mxu0 %v6877_v36  ;;  %5328 = vmatprep.subr.bf16.mxu1 %v6880_v37  ;;  %v6972_v36 = vld [vmem:[%s10248_s1 + $0x6cc] ss:$16 sps:$4 sm:$0xff]   ;;  %v6967_v37 = vld [vmem:[%s10248_s1 + $0x6c0] ss:$16 sps:$4 sm:$0xff]  }
  0x9f   :  { %4837 = vmatpush1.bf16.msra.mxu0 %v6875_v38  ;;  %5329 = vmatpush1.bf16.msra.mxu1 %v6878_v39  ;;  %v6970_v38 = vld [vmem:[%s10248_s1 + $0x6c8] ss:$16 sps:$4 sm:$0xff]   ;;  %v6975_v39 = vld [vmem:[%s10248_s1 + $0x6e4] ss:$16 sps:$4 sm:$0xff]  }
  0xa0   :  { %4838 = vmatprep.subr.bf16.mxu0 %v6883_v40  ;;  %5330 = vmatprep.subr.bf16.mxu1 %v6886_v41  ;;  %v6978_v40 = vld [vmem:[%s10248_s1 + $0x6ec] ss:$16 sps:$4 sm:$0xff]   ;;  %v6973_v41 = vld [vmem:[%s10248_s1 + $0x6e0] ss:$16 sps:$4 sm:$0xff]  }
  0xa3   :  { %4839 = vmatpush1.bf16.msra.mxu0 %v6881_v42  ;;  %5331 = vmatpush1.bf16.msra.mxu1 %v6884_v43  ;;  %v6976_v42 = vld [vmem:[%s10248_s1 + $0x6e8] ss:$16 sps:$4 sm:$0xff]   ;;  %v6981_v43 = vld [vmem:[%s10248_s1 + $0x704] ss:$16 sps:$4 sm:$0xff]  }
  0xa4   :  { %4840 = vmatprep.subr.bf16.mxu0 %v6889_v44  ;;  %5332 = vmatprep.subr.bf16.mxu1 %v6892_v45  ;;  %v6984_v44 = vld [vmem:[%s10248_s1 + $0x70c] ss:$16 sps:$4 sm:$0xff]   ;;  %v6979_v45 = vld [vmem:[%s10248_s1 + $0x700] ss:$16 sps:$4 sm:$0xff]  }
  0xa7   :  { %4841 = vmatpush1.bf16.msra.mxu0 %v6887_v46  ;;  %5333 = vmatpush1.bf16.msra.mxu1 %v6890_v47  ;;  %v6982_v46 = vld [vmem:[%s10248_s1 + $0x708] ss:$16 sps:$4 sm:$0xff]   ;;  %v6987_v47 = vld [vmem:[%s10248_s1 + $0x724] ss:$16 sps:$4 sm:$0xff]  }
  0xa8   :  { %4842 = vmatprep.subr.bf16.mxu0 %v6895_v48  ;;  %5334 = vmatprep.subr.bf16.mxu1 %v6898_v49  ;;  %v6990_v48 = vld [vmem:[%s10248_s1 + $0x72c] ss:$16 sps:$4 sm:$0xff]   ;;  %v6985_v49 = vld [vmem:[%s10248_s1 + $0x720] ss:$16 sps:$4 sm:$0xff]  }
  0xab   :  { %4843 = vmatpush1.bf16.msra.mxu0 %v6893_v50  ;;  %5335 = vmatpush1.bf16.msra.mxu1 %v6896_v51  ;;  %v6988_v50 = vld [vmem:[%s10248_s1 + $0x728] ss:$16 sps:$4 sm:$0xff]   ;;  %v6993_v51 = vld [vmem:[%s10248_s1 + $0x744] ss:$16 sps:$4 sm:$0xff]  }
  0xac   :  { %4844 = vmatprep.subr.bf16.mxu0 %v6901_v52  ;;  %5336 = vmatprep.subr.bf16.mxu1 %v6904_v53  ;;  %v6996_v52 = vld [vmem:[%s10248_s1 + $0x74c] ss:$16 sps:$4 sm:$0xff]   ;;  %v6991_v53 = vld [vmem:[%s10248_s1 + $0x740] ss:$16 sps:$4 sm:$0xff]  }
  0xaf   :  { %4845 = vmatpush1.bf16.msra.mxu0 %v6899_v54  ;;  %5337 = vmatpush1.bf16.msra.mxu1 %v6902_v55  ;;  %v6994_v54 = vld [vmem:[%s10248_s1 + $0x748] ss:$16 sps:$4 sm:$0xff]   ;;  %v6999_v55 = vld [vmem:[%s10248_s1 + $0x764] ss:$16 sps:$4 sm:$0xff]  }
  0xb0   :  { %4846 = vmatprep.subr.bf16.mxu0 %v6907_v56  ;;  %5338 = vmatprep.subr.bf16.mxu1 %v6910_v57  ;;  %v7002_v56 = vld [vmem:[%s10248_s1 + $0x76c] ss:$16 sps:$4 sm:$0xff]   ;;  %v6997_v57 = vld [vmem:[%s10248_s1 + $0x760] ss:$16 sps:$4 sm:$0xff]  }
  0xb3   :  { %4847 = vmatpush1.bf16.msra.mxu0 %v6905_v58  ;;  %5339 = vmatpush1.bf16.msra.mxu1 %v6908_v59  ;;  %v7000_v58 = vld [vmem:[%s10248_s1 + $0x768] ss:$16 sps:$4 sm:$0xff]   ;;  %v7005_v59 = vld [vmem:[%s10248_s1 + $0x784] ss:$16 sps:$4 sm:$0xff]  }
  0xb4   :  { %4848 = vmatprep.subr.bf16.mxu0 %v6913_v60  ;;  %5340 = vmatprep.subr.bf16.mxu1 %v6916_v61  ;;  %v7008_v60 = vld [vmem:[%s10248_s1 + $0x78c] ss:$16 sps:$4 sm:$0xff]   ;;  %v7003_v61 = vld [vmem:[%s10248_s1 + $0x780] ss:$16 sps:$4 sm:$0xff]  }
  0xb7   :  { %4849 = vmatpush1.bf16.msra.mxu0 %v6911_v62  ;;  %5341 = vmatpush1.bf16.msra.mxu1 %v6914_v63  ;;  %v7006_v62 = vld [vmem:[%s10248_s1 + $0x788] ss:$16 sps:$4 sm:$0xff]   ;;  %v7011_v63 = vld [vmem:[%s10248_s1 + $0x7a4] ss:$16 sps:$4 sm:$0xff]  }
  0xb8   :  { %4850 = vmatprep.subr.bf16.mxu0 %v6919_v0  ;;  %5342 = vmatprep.subr.bf16.mxu1 %v6922_v1  ;;  %v7014_v0 = vld [vmem:[%s10248_s1 + $0x7ac] ss:$16 sps:$4 sm:$0xff]   ;;  %v7009_v1 = vld [vmem:[%s10248_s1 + $0x7a0] ss:$16 sps:$4 sm:$0xff]  }
  0xbb   :  { %4851 = vmatpush1.bf16.msra.mxu0 %v6917_v2  ;;  %5343 = vmatpush1.bf16.msra.mxu1 %v6920_v3  ;;  %v7012_v2 = vld [vmem:[%s10248_s1 + $0x7a8] ss:$16 sps:$4 sm:$0xff]   ;;  %v7017_v3 = vld [vmem:[%s10248_s1 + $0x7c4] ss:$16 sps:$4 sm:$0xff]  }
  0xbc   :  { %4852 = vmatprep.subr.bf16.mxu0 %v6925_v4  ;;  %5344 = vmatprep.subr.bf16.mxu1 %v6928_v5  ;;  %v7020_v4 = vld [vmem:[%s10248_s1 + $0x7cc] ss:$16 sps:$4 sm:$0xff]   ;;  %v7015_v5 = vld [vmem:[%s10248_s1 + $0x7c0] ss:$16 sps:$4 sm:$0xff]  }
  0xbf   :  { %4853 = vmatpush1.bf16.msra.mxu0 %v6923_v6  ;;  %5345 = vmatpush1.bf16.msra.mxu1 %v6926_v7  ;;  %v7018_v6 = vld [vmem:[%s10248_s1 + $0x7c8] ss:$16 sps:$4 sm:$0xff]   ;;  %v7023_v7 = vld [vmem:[%s10248_s1 + $0x7e4] ss:$16 sps:$4 sm:$0xff]  }
  0xc0   :  { %4863 = vmatprep.subr.bf16.mxu0 %v6933_v8  ;;  %5355 = vmatprep.subr.bf16.mxu1 %v6936_v9  ;;  %v7026_v8 = vld [vmem:[%s10248_s1 + $0x7ec] ss:$16 sps:$4 sm:$0xff]   ;;  %v7021_v9 = vld [vmem:[%s10248_s1 + $0x7e0] ss:$16 sps:$4 sm:$0xff]  }
  0xc2   :  { %4855 = vmatmul.mubr.bf16.vlgmr.msra.gmra.mrb[0].mxu0 %v5753_v12  ;;  %5347 = vmatmul.mubr.bf16.vlgmr.msra.gmra.mrb[0].mxu1 %v5753_v12  ;;  %v7031_v12 = vld [vmem:[%s10248_s1 + $0x804] ss:$16 sps:$4 sm:$0xff]  }
  0xc3   :  { %4864 = vmatpush1.bf16.msra.mxu0 %v6931_v10  ;;  %5356 = vmatpush1.bf16.msra.mxu1 %v6934_v13  ;;  %v7024_v10 = vld [vmem:[%s10248_s1 + $0x7e8] ss:$16 sps:$4 sm:$0xff]   ;;  %v7034_v13 = vld [vmem:[%s10248_s1 + $0x80c] ss:$16 sps:$4 sm:$0xff]  }
  0xc4   :  { %4865 = vmatprep.subr.bf16.mxu0 %v6939_v15  ;;  %5357 = vmatprep.subr.bf16.mxu1 %v6942_v11  ;;  %v7029_v15 = vld [vmem:[%s10248_s1 + $0x800] ss:$16 sps:$4 sm:$0xff]   ;;  %v5755_v11 = vcombine.low %v8445_v14, %v8445_v14  ;;  %v7040_v14 = vld [vmem:[%s10248_s1 + $0x82c] ss:$16 sps:$4 sm:$0xff]  }
  0xc5   :  { %4895 = vmatprep.mubr.bf16.mxu0 %v5756_v16  ;;  %5387 = vmatprep.mubr.bf16.mxu1 %v5756_v16  ;;  %v8643_v16 = vld [vmem:[%s10249_s0 + $0x20] sm:$0xff] }
  0xc7   :  { %4866 = vmatpush1.bf16.msra.mxu0 %v6937_v17  ;;  %5358 = vmatpush1.bf16.msra.mxu1 %v6940_v18  ;;  %v7032_v17 = vld [vmem:[%s10248_s1 + $0x808] ss:$16 sps:$4 sm:$0xff]   ;;  %v7037_v18 = vld [vmem:[%s10248_s1 + $0x824] ss:$16 sps:$4 sm:$0xff]  }
  0xc8   :  { %4867 = vmatprep.subr.bf16.mxu0 %v6945_v19  ;;  %5359 = vmatprep.subr.bf16.mxu1 %v6948_v20  ;;  %v5758_v19 = vcombine.high %v8643_v16, %v8643_v16  ;;  %v7035_v20 = vld [vmem:[%s10248_s1 + $0x820] ss:$16 sps:$4 sm:$0xff]  }
  0xcb   :  { %4868 = vmatpush1.bf16.msra.mxu0 %v6943_v21  ;;  %5360 = vmatpush1.bf16.msra.mxu1 %v6946_v22  ;;  %v7038_v21 = vld [vmem:[%s10248_s1 + $0x828] ss:$16 sps:$4 sm:$0xff]   ;;  %v7043_v22 = vld [vmem:[%s10248_s1 + $0x844] ss:$16 sps:$4 sm:$0xff]  }
  0xcc   :  { %4869 = vmatprep.subr.bf16.mxu0 %v6951_v23  ;;  %5361 = vmatprep.subr.bf16.mxu1 %v6954_v24  ;;  %v7046_v23 = vld [vmem:[%s10248_s1 + $0x84c] ss:$16 sps:$4 sm:$0xff]   ;;  %v7041_v24 = vld [vmem:[%s10248_s1 + $0x840] ss:$16 sps:$4 sm:$0xff]  }
  0xcf   :  { %4870 = vmatpush1.bf16.msra.mxu0 %v6949_v25  ;;  %5362 = vmatpush1.bf16.msra.mxu1 %v6952_v26  ;;  %v7044_v25 = vld [vmem:[%s10248_s1 + $0x848] ss:$16 sps:$4 sm:$0xff]   ;;  %v7049_v26 = vld [vmem:[%s10248_s1 + $0x864] ss:$16 sps:$4 sm:$0xff]  }
  0xd0   :  { %4871 = vmatprep.subr.bf16.mxu0 %v6957_v27  ;;  %5363 = vmatprep.subr.bf16.mxu1 %v6960_v28  ;;  %v7052_v27 = vld [vmem:[%s10248_s1 + $0x86c] ss:$16 sps:$4 sm:$0xff]   ;;  %v7047_v28 = vld [vmem:[%s10248_s1 + $0x860] ss:$16 sps:$4 sm:$0xff]  }
  0xd3   :  { %4872 = vmatpush1.bf16.msra.mxu0 %v6955_v29  ;;  %5364 = vmatpush1.bf16.msra.mxu1 %v6958_v30  ;;  %v7050_v29 = vld [vmem:[%s10248_s1 + $0x868] ss:$16 sps:$4 sm:$0xff]   ;;  %v7055_v30 = vld [vmem:[%s10248_s1 + $0x884] ss:$16 sps:$4 sm:$0xff]  }
  0xd4   :  { %4873 = vmatprep.subr.bf16.mxu0 %v6963_v31  ;;  %5365 = vmatprep.subr.bf16.mxu1 %v6966_v32  ;;  %v7058_v31 = vld [vmem:[%s10248_s1 + $0x88c] ss:$16 sps:$4 sm:$0xff]   ;;  %v7053_v32 = vld [vmem:[%s10248_s1 + $0x880] ss:$16 sps:$4 sm:$0xff]  }
  0xd7   :  { %4874 = vmatpush1.bf16.msra.mxu0 %v6961_v33  ;;  %5366 = vmatpush1.bf16.msra.mxu1 %v6964_v34  ;;  %v7056_v33 = vld [vmem:[%s10248_s1 + $0x888] ss:$16 sps:$4 sm:$0xff]   ;;  %v7061_v34 = vld [vmem:[%s10248_s1 + $0x8a4] ss:$16 sps:$4 sm:$0xff]  }
  0xd8   :  { %4875 = vmatprep.subr.bf16.mxu0 %v6969_v35  ;;  %5367 = vmatprep.subr.bf16.mxu1 %v6972_v36  ;;  %v7064_v35 = vld [vmem:[%s10248_s1 + $0x8ac] ss:$16 sps:$4 sm:$0xff]   ;;  %v7059_v36 = vld [vmem:[%s10248_s1 + $0x8a0] ss:$16 sps:$4 sm:$0xff]  }
  0xdb   :  { %4876 = vmatpush1.bf16.msra.mxu0 %v6967_v37  ;;  %5368 = vmatpush1.bf16.msra.mxu1 %v6970_v38  ;;  %v7062_v37 = vld [vmem:[%s10248_s1 + $0x8a8] ss:$16 sps:$4 sm:$0xff]   ;;  %v7067_v38 = vld [vmem:[%s10248_s1 + $0x8c4] ss:$16 sps:$4 sm:$0xff]  }
  0xdc   :  { %4877 = vmatprep.subr.bf16.mxu0 %v6975_v39  ;;  %5369 = vmatprep.subr.bf16.mxu1 %v6978_v40  ;;  %v7070_v39 = vld [vmem:[%s10248_s1 + $0x8cc] ss:$16 sps:$4 sm:$0xff]   ;;  %v7065_v40 = vld [vmem:[%s10248_s1 + $0x8c0] ss:$16 sps:$4 sm:$0xff]  }
  0xdf   :  { %4878 = vmatpush1.bf16.msra.mxu0 %v6973_v41  ;;  %5370 = vmatpush1.bf16.msra.mxu1 %v6976_v42  ;;  %v7068_v41 = vld [vmem:[%s10248_s1 + $0x8c8] ss:$16 sps:$4 sm:$0xff]   ;;  %v7073_v42 = vld [vmem:[%s10248_s1 + $0x8e4] ss:$16 sps:$4 sm:$0xff]  }
  0xe0   :  { %4879 = vmatprep.subr.bf16.mxu0 %v6981_v43  ;;  %5371 = vmatprep.subr.bf16.mxu1 %v6984_v44  ;;  %v7076_v43 = vld [vmem:[%s10248_s1 + $0x8ec] ss:$16 sps:$4 sm:$0xff]   ;;  %v7071_v44 = vld [vmem:[%s10248_s1 + $0x8e0] ss:$16 sps:$4 sm:$0xff]  }
  0xe3   :  { %4880 = vmatpush1.bf16.msra.mxu0 %v6979_v45  ;;  %5372 = vmatpush1.bf16.msra.mxu1 %v6982_v46  ;;  %v7074_v45 = vld [vmem:[%s10248_s1 + $0x8e8] ss:$16 sps:$4 sm:$0xff]   ;;  %v7079_v46 = vld [vmem:[%s10248_s1 + $0x904] ss:$16 sps:$4 sm:$0xff]  }
  0xe4   :  { %4881 = vmatprep.subr.bf16.mxu0 %v6987_v47  ;;  %5373 = vmatprep.subr.bf16.mxu1 %v6990_v48  ;;  %v7082_v47 = vld [vmem:[%s10248_s1 + $0x90c] ss:$16 sps:$4 sm:$0xff]   ;;  %v7077_v48 = vld [vmem:[%s10248_s1 + $0x900] ss:$16 sps:$4 sm:$0xff]  }
  0xe7   :  { %4882 = vmatpush1.bf16.msra.mxu0 %v6985_v49  ;;  %5374 = vmatpush1.bf16.msra.mxu1 %v6988_v50  ;;  %v7080_v49 = vld [vmem:[%s10248_s1 + $0x908] ss:$16 sps:$4 sm:$0xff]   ;;  %v7085_v50 = vld [vmem:[%s10248_s1 + $0x924] ss:$16 sps:$4 sm:$0xff]  }
  0xe8   :  { %4883 = vmatprep.subr.bf16.mxu0 %v6993_v51  ;;  %5375 = vmatprep.subr.bf16.mxu1 %v6996_v52  ;;  %v7088_v51 = vld [vmem:[%s10248_s1 + $0x92c] ss:$16 sps:$4 sm:$0xff]   ;;  %v7083_v52 = vld [vmem:[%s10248_s1 + $0x920] ss:$16 sps:$4 sm:$0xff]  }
  0xeb   :  { %4884 = vmatpush1.bf16.msra.mxu0 %v6991_v53  ;;  %5376 = vmatpush1.bf16.msra.mxu1 %v6994_v54  ;;  %v7086_v53 = vld [vmem:[%s10248_s1 + $0x928] ss:$16 sps:$4 sm:$0xff]   ;;  %v7091_v54 = vld [vmem:[%s10248_s1 + $0x944] ss:$16 sps:$4 sm:$0xff]  }
  0xec   :  { %4885 = vmatprep.subr.bf16.mxu0 %v6999_v55  ;;  %5377 = vmatprep.subr.bf16.mxu1 %v7002_v56  ;;  %v7094_v55 = vld [vmem:[%s10248_s1 + $0x94c] ss:$16 sps:$4 sm:$0xff]   ;;  %v7089_v56 = vld [vmem:[%s10248_s1 + $0x940] ss:$16 sps:$4 sm:$0xff]  }
  0xef   :  { %4886 = vmatpush1.bf16.msra.mxu0 %v6997_v57  ;;  %5378 = vmatpush1.bf16.msra.mxu1 %v7000_v58  ;;  %v7092_v57 = vld [vmem:[%s10248_s1 + $0x948] ss:$16 sps:$4 sm:$0xff]   ;;  %v7097_v58 = vld [vmem:[%s10248_s1 + $0x964] ss:$16 sps:$4 sm:$0xff]  }
  0xf0   :  { %4887 = vmatprep.subr.bf16.mxu0 %v7005_v59  ;;  %5379 = vmatprep.subr.bf16.mxu1 %v7008_v60  ;;  %v7100_v59 = vld [vmem:[%s10248_s1 + $0x96c] ss:$16 sps:$4 sm:$0xff]   ;;  %v7095_v60 = vld [vmem:[%s10248_s1 + $0x960] ss:$16 sps:$4 sm:$0xff]  }
  0xf3   :  { %4888 = vmatpush1.bf16.msra.mxu0 %v7003_v61  ;;  %5380 = vmatpush1.bf16.msra.mxu1 %v7006_v62  ;;  %v7098_v61 = vld [vmem:[%s10248_s1 + $0x968] ss:$16 sps:$4 sm:$0xff]   ;;  %v7103_v62 = vld [vmem:[%s10248_s1 + $0x984] ss:$16 sps:$4 sm:$0xff]  }
  0xf4   :  { %4889 = vmatprep.subr.bf16.mxu0 %v7011_v63  ;;  %5381 = vmatprep.subr.bf16.mxu1 %v7014_v0  ;;  %v7106_v63 = vld [vmem:[%s10248_s1 + $0x98c] ss:$16 sps:$4 sm:$0xff]   ;;  %v7101_v0 = vld [vmem:[%s10248_s1 + $0x980] ss:$16 sps:$4 sm:$0xff]  }
  0xf7   :  { %4890 = vmatpush1.bf16.msra.mxu0 %v7009_v1  ;;  %5382 = vmatpush1.bf16.msra.mxu1 %v7012_v2  ;;  %v7104_v1 = vld [vmem:[%s10248_s1 + $0x988] ss:$16 sps:$4 sm:$0xff]   ;;  %v7109_v2 = vld [vmem:[%s10248_s1 + $0x9a4] ss:$16 sps:$4 sm:$0xff]  }
  0xf8   :  { %4891 = vmatprep.subr.bf16.mxu0 %v7017_v3  ;;  %5383 = vmatprep.subr.bf16.mxu1 %v7020_v4  ;;  %v7112_v3 = vld [vmem:[%s10248_s1 + $0x9ac] ss:$16 sps:$4 sm:$0xff]   ;;  %v7107_v4 = vld [vmem:[%s10248_s1 + $0x9a0] ss:$16 sps:$4 sm:$0xff]  }
  0xfb   :  { %4892 = vmatpush1.bf16.msra.mxu0 %v7015_v5  ;;  %5384 = vmatpush1.bf16.msra.mxu1 %v7018_v6  ;;  %v7110_v5 = vld [vmem:[%s10248_s1 + $0x9a8] ss:$16 sps:$4 sm:$0xff]   ;;  %v7115_v6 = vld [vmem:[%s10248_s1 + $0x9c4] ss:$16 sps:$4 sm:$0xff]  }
  0xfc   :  { %4893 = vmatprep.subr.bf16.mxu0 %v7023_v7  ;;  %5385 = vmatprep.subr.bf16.mxu1 %v7026_v8  ;;  %v7118_v7 = vld [vmem:[%s10248_s1 + $0x9cc] ss:$16 sps:$4 sm:$0xff]   ;;  %v7113_v8 = vld [vmem:[%s10248_s1 + $0x9c0] ss:$16 sps:$4 sm:$0xff]  }
  0xff   :  { %4894 = vmatpush1.bf16.msra.mxu0 %v7021_v9  ;;  %5386 = vmatpush1.bf16.msra.mxu1 %v7024_v10  ;;  %v7116_v9 = vld [vmem:[%s10248_s1 + $0x9c8] ss:$16 sps:$4 sm:$0xff]   ;;  %v7121_v10 = vld [vmem:[%s10248_s1 + $0x9e4] ss:$16 sps:$4 sm:$0xff]  }
 0x100   :  { %4904 = vmatprep.subr.bf16.mxu0 %v7031_v12  ;;  %5396 = vmatprep.subr.bf16.mxu1 %v7034_v13  ;;  %v7124_v12 = vld [vmem:[%s10248_s1 + $0x9ec] ss:$16 sps:$4 sm:$0xff]   ;;  %v7119_v13 = vld [vmem:[%s10248_s1 + $0x9e0] ss:$16 sps:$4 sm:$0xff]  }
 0x102   :  { %4896 = vmatmul.mubr.bf16.vlgmr.msra.gmra.mrb[0].mxu0 %v5755_v11  ;;  %5388 = vmatmul.mubr.bf16.vlgmr.msra.gmra.mrb[0].mxu1 %v5755_v11  ;;  %v7129_v11 = vld [vmem:[%s10248_s1 + $0xa04] ss:$16 sps:$4 sm:$0xff]  }
 0x103   :  { %4905 = vmatpush1.bf16.msra.mxu0 %v7029_v15  ;;  %5397 = vmatpush1.bf16.msra.mxu1 %v7032_v17  ;;  %v7122_v15 = vld [vmem:[%s10248_s1 + $0x9e8] ss:$16 sps:$4 sm:$0xff]   ;;  %v7132_v17 = vld [vmem:[%s10248_s1 + $0xa0c] ss:$16 sps:$4 sm:$0xff]  }
 0x104   :  { %4906 = vmatprep.subr.bf16.mxu0 %v7037_v18  ;;  %5398 = vmatprep.subr.bf16.mxu1 %v7040_v14  ;;  %v8839_v18 = vld [vmem:[%s10249_s0 + $0x28] sm:$0xff]  ;;  %v5757_v14 = vcombine.low %v8643_v16, %v8643_v16 }
 0x105   :  { %4936 = vmatprep.mubr.bf16.mxu0 %v5758_v19  ;;  %5428 = vmatprep.mubr.bf16.mxu1 %v5758_v19  ;;  %v7127_v19 = vld [vmem:[%s10248_s1 + $0xa00] ss:$16 sps:$4 sm:$0xff]   ;;  %v7138_v16 = vld [vmem:[%s10248_s1 + $0xa2c] ss:$16 sps:$4 sm:$0xff]  }
 0x107   :  { %4907 = vmatpush1.bf16.msra.mxu0 %v7035_v20  ;;  %5399 = vmatpush1.bf16.msra.mxu1 %v7038_v21  ;;  %v7130_v20 = vld [vmem:[%s10248_s1 + $0xa08] ss:$16 sps:$4 sm:$0xff]   ;;  %v7135_v21 = vld [vmem:[%s10248_s1 + $0xa24] ss:$16 sps:$4 sm:$0xff]  }
 0x108   :  { %4908 = vmatprep.subr.bf16.mxu0 %v7043_v22  ;;  %5400 = vmatprep.subr.bf16.mxu1 %v7046_v23  ;;  %v5760_v22 = vcombine.high %v8839_v18, %v8839_v18  ;;  %v7133_v23 = vld [vmem:[%s10248_s1 + $0xa20] ss:$16 sps:$4 sm:$0xff]  }
 0x10b   :  { %4909 = vmatpush1.bf16.msra.mxu0 %v7041_v24  ;;  %5401 = vmatpush1.bf16.msra.mxu1 %v7044_v25  ;;  %v7136_v24 = vld [vmem:[%s10248_s1 + $0xa28] ss:$16 sps:$4 sm:$0xff]   ;;  %v7141_v25 = vld [vmem:[%s10248_s1 + $0xa44] ss:$16 sps:$4 sm:$0xff]  }
 0x10c   :  { %4910 = vmatprep.subr.bf16.mxu0 %v7049_v26  ;;  %5402 = vmatprep.subr.bf16.mxu1 %v7052_v27  ;;  %v7144_v26 = vld [vmem:[%s10248_s1 + $0xa4c] ss:$16 sps:$4 sm:$0xff]   ;;  %v7139_v27 = vld [vmem:[%s10248_s1 + $0xa40] ss:$16 sps:$4 sm:$0xff]  }
 0x10f   :  { %4911 = vmatpush1.bf16.msra.mxu0 %v7047_v28  ;;  %5403 = vmatpush1.bf16.msra.mxu1 %v7050_v29  ;;  %v7142_v28 = vld [vmem:[%s10248_s1 + $0xa48] ss:$16 sps:$4 sm:$0xff]   ;;  %v7147_v29 = vld [vmem:[%s10248_s1 + $0xa64] ss:$16 sps:$4 sm:$0xff]  }
 0x110   :  { %4912 = vmatprep.subr.bf16.mxu0 %v7055_v30  ;;  %5404 = vmatprep.subr.bf16.mxu1 %v7058_v31  ;;  %v7150_v30 = vld [vmem:[%s10248_s1 + $0xa6c] ss:$16 sps:$4 sm:$0xff]   ;;  %v7145_v31 = vld [vmem:[%s10248_s1 + $0xa60] ss:$16 sps:$4 sm:$0xff]  }
 0x113   :  { %4913 = vmatpush1.bf16.msra.mxu0 %v7053_v32  ;;  %5405 = vmatpush1.bf16.msra.mxu1 %v7056_v33  ;;  %v7148_v32 = vld [vmem:[%s10248_s1 + $0xa68] ss:$16 sps:$4 sm:$0xff]   ;;  %v7153_v33 = vld [vmem:[%s10248_s1 + $0xa84] ss:$16 sps:$4 sm:$0xff]  }
 0x114   :  { %4914 = vmatprep.subr.bf16.mxu0 %v7061_v34  ;;  %5406 = vmatprep.subr.bf16.mxu1 %v7064_v35  ;;  %v7156_v34 = vld [vmem:[%s10248_s1 + $0xa8c] ss:$16 sps:$4 sm:$0xff]   ;;  %v7151_v35 = vld [vmem:[%s10248_s1 + $0xa80] ss:$16 sps:$4 sm:$0xff]  }
 0x117   :  { %4915 = vmatpush1.bf16.msra.mxu0 %v7059_v36  ;;  %5407 = vmatpush1.bf16.msra.mxu1 %v7062_v37  ;;  %v7154_v36 = vld [vmem:[%s10248_s1 + $0xa88] ss:$16 sps:$4 sm:$0xff]   ;;  %v7159_v37 = vld [vmem:[%s10248_s1 + $0xaa4] ss:$16 sps:$4 sm:$0xff]  }
 0x118   :  { %4916 = vmatprep.subr.bf16.mxu0 %v7067_v38  ;;  %5408 = vmatprep.subr.bf16.mxu1 %v7070_v39  ;;  %v7162_v38 = vld [vmem:[%s10248_s1 + $0xaac] ss:$16 sps:$4 sm:$0xff]   ;;  %v7157_v39 = vld [vmem:[%s10248_s1 + $0xaa0] ss:$16 sps:$4 sm:$0xff]  }
 0x11b   :  { %4917 = vmatpush1.bf16.msra.mxu0 %v7065_v40  ;;  %5409 = vmatpush1.bf16.msra.mxu1 %v7068_v41  ;;  %v7160_v40 = vld [vmem:[%s10248_s1 + $0xaa8] ss:$16 sps:$4 sm:$0xff]   ;;  %v7165_v41 = vld [vmem:[%s10248_s1 + $0xac4] ss:$16 sps:$4 sm:$0xff]  }
 0x11c   :  { %4918 = vmatprep.subr.bf16.mxu0 %v7073_v42  ;;  %5410 = vmatprep.subr.bf16.mxu1 %v7076_v43  ;;  %v7168_v42 = vld [vmem:[%s10248_s1 + $0xacc] ss:$16 sps:$4 sm:$0xff]   ;;  %v7163_v43 = vld [vmem:[%s10248_s1 + $0xac0] ss:$16 sps:$4 sm:$0xff]  }
 0x11f   :  { %4919 = vmatpush1.bf16.msra.mxu0 %v7071_v44  ;;  %5411 = vmatpush1.bf16.msra.mxu1 %v7074_v45  ;;  %v7166_v44 = vld [vmem:[%s10248_s1 + $0xac8] ss:$16 sps:$4 sm:$0xff]   ;;  %v7171_v45 = vld [vmem:[%s10248_s1 + $0xae4] ss:$16 sps:$4 sm:$0xff]  }
 0x120   :  { %4920 = vmatprep.subr.bf16.mxu0 %v7079_v46  ;;  %5412 = vmatprep.subr.bf16.mxu1 %v7082_v47  ;;  %v7174_v46 = vld [vmem:[%s10248_s1 + $0xaec] ss:$16 sps:$4 sm:$0xff]   ;;  %v7169_v47 = vld [vmem:[%s10248_s1 + $0xae0] ss:$16 sps:$4 sm:$0xff]  }
 0x123   :  { %4921 = vmatpush1.bf16.msra.mxu0 %v7077_v48  ;;  %5413 = vmatpush1.bf16.msra.mxu1 %v7080_v49  ;;  %v7172_v48 = vld [vmem:[%s10248_s1 + $0xae8] ss:$16 sps:$4 sm:$0xff]   ;;  %v7177_v49 = vld [vmem:[%s10248_s1 + $0xb04] ss:$16 sps:$4 sm:$0xff]  }
 0x124   :  { %4922 = vmatprep.subr.bf16.mxu0 %v7085_v50  ;;  %5414 = vmatprep.subr.bf16.mxu1 %v7088_v51  ;;  %v7180_v50 = vld [vmem:[%s10248_s1 + $0xb0c] ss:$16 sps:$4 sm:$0xff]   ;;  %v7175_v51 = vld [vmem:[%s10248_s1 + $0xb00] ss:$16 sps:$4 sm:$0xff]  }
 0x127   :  { %4923 = vmatpush1.bf16.msra.mxu0 %v7083_v52  ;;  %5415 = vmatpush1.bf16.msra.mxu1 %v7086_v53  ;;  %v7178_v52 = vld [vmem:[%s10248_s1 + $0xb08] ss:$16 sps:$4 sm:$0xff]   ;;  %v7183_v53 = vld [vmem:[%s10248_s1 + $0xb24] ss:$16 sps:$4 sm:$0xff]  }
 0x128   :  { %4924 = vmatprep.subr.bf16.mxu0 %v7091_v54  ;;  %5416 = vmatprep.subr.bf16.mxu1 %v7094_v55  ;;  %v7186_v54 = vld [vmem:[%s10248_s1 + $0xb2c] ss:$16 sps:$4 sm:$0xff]   ;;  %v7181_v55 = vld [vmem:[%s10248_s1 + $0xb20] ss:$16 sps:$4 sm:$0xff]  }
 0x12b   :  { %4925 = vmatpush1.bf16.msra.mxu0 %v7089_v56  ;;  %5417 = vmatpush1.bf16.msra.mxu1 %v7092_v57  ;;  %v7184_v56 = vld [vmem:[%s10248_s1 + $0xb28] ss:$16 sps:$4 sm:$0xff]   ;;  %v7189_v57 = vld [vmem:[%s10248_s1 + $0xb44] ss:$16 sps:$4 sm:$0xff]  }
 0x12c   :  { %4926 = vmatprep.subr.bf16.mxu0 %v7097_v58  ;;  %5418 = vmatprep.subr.bf16.mxu1 %v7100_v59  ;;  %v7192_v58 = vld [vmem:[%s10248_s1 + $0xb4c] ss:$16 sps:$4 sm:$0xff]   ;;  %v7187_v59 = vld [vmem:[%s10248_s1 + $0xb40] ss:$16 sps:$4 sm:$0xff]  }
 0x12f   :  { %4927 = vmatpush1.bf16.msra.mxu0 %v7095_v60  ;;  %5419 = vmatpush1.bf16.msra.mxu1 %v7098_v61  ;;  %v7190_v60 = vld [vmem:[%s10248_s1 + $0xb48] ss:$16 sps:$4 sm:$0xff]   ;;  %v7195_v61 = vld [vmem:[%s10248_s1 + $0xb64] ss:$16 sps:$4 sm:$0xff]  }
 0x130   :  { %4928 = vmatprep.subr.bf16.mxu0 %v7103_v62  ;;  %5420 = vmatprep.subr.bf16.mxu1 %v7106_v63  ;;  %v7198_v62 = vld [vmem:[%s10248_s1 + $0xb6c] ss:$16 sps:$4 sm:$0xff]   ;;  %v7193_v63 = vld [vmem:[%s10248_s1 + $0xb60] ss:$16 sps:$4 sm:$0xff]  }
 0x133   :  { %4929 = vmatpush1.bf16.msra.mxu0 %v7101_v0  ;;  %5421 = vmatpush1.bf16.msra.mxu1 %v7104_v1  ;;  %v7196_v0 = vld [vmem:[%s10248_s1 + $0xb68] ss:$16 sps:$4 sm:$0xff]   ;;  %v7201_v1 = vld [vmem:[%s10248_s1 + $0xb84] ss:$16 sps:$4 sm:$0xff]  }
 0x134   :  { %4930 = vmatprep.subr.bf16.mxu0 %v7109_v2  ;;  %5422 = vmatprep.subr.bf16.mxu1 %v7112_v3  ;;  %v7204_v2 = vld [vmem:[%s10248_s1 + $0xb8c] ss:$16 sps:$4 sm:$0xff]   ;;  %v7199_v3 = vld [vmem:[%s10248_s1 + $0xb80] ss:$16 sps:$4 sm:$0xff]  }
 0x137   :  { %4931 = vmatpush1.bf16.msra.mxu0 %v7107_v4  ;;  %5423 = vmatpush1.bf16.msra.mxu1 %v7110_v5  ;;  %v7202_v4 = vld [vmem:[%s10248_s1 + $0xb88] ss:$16 sps:$4 sm:$0xff]   ;;  %v7207_v5 = vld [vmem:[%s10248_s1 + $0xba4] ss:$16 sps:$4 sm:$0xff]  }
 0x138   :  { %4932 = vmatprep.subr.bf16.mxu0 %v7115_v6  ;;  %5424 = vmatprep.subr.bf16.mxu1 %v7118_v7  ;;  %v7210_v6 = vld [vmem:[%s10248_s1 + $0xbac] ss:$16 sps:$4 sm:$0xff]   ;;  %v7205_v7 = vld [vmem:[%s10248_s1 + $0xba0] ss:$16 sps:$4 sm:$0xff]  }
 0x13b   :  { %4933 = vmatpush1.bf16.msra.mxu0 %v7113_v8  ;;  %5425 = vmatpush1.bf16.msra.mxu1 %v7116_v9  ;;  %v7208_v8 = vld [vmem:[%s10248_s1 + $0xba8] ss:$16 sps:$4 sm:$0xff]   ;;  %v7213_v9 = vld [vmem:[%s10248_s1 + $0xbc4] ss:$16 sps:$4 sm:$0xff]  }
 0x13c   :  { %4934 = vmatprep.subr.bf16.mxu0 %v7121_v10  ;;  %5426 = vmatprep.subr.bf16.mxu1 %v7124_v12  ;;  %v7216_v10 = vld [vmem:[%s10248_s1 + $0xbcc] ss:$16 sps:$4 sm:$0xff]   ;;  %v7211_v12 = vld [vmem:[%s10248_s1 + $0xbc0] ss:$16 sps:$4 sm:$0xff]  }
 0x13f   :  { %4935 = vmatpush1.bf16.msra.mxu0 %v7119_v13  ;;  %5427 = vmatpush1.bf16.msra.mxu1 %v7122_v15  ;;  %v7214_v13 = vld [vmem:[%s10248_s1 + $0xbc8] ss:$16 sps:$4 sm:$0xff]   ;;  %v7219_v15 = vld [vmem:[%s10248_s1 + $0xbe4] ss:$16 sps:$4 sm:$0xff]  }
 0x140   :  { %4945 = vmatprep.subr.bf16.mxu0 %v7129_v11  ;;  %5437 = vmatprep.subr.bf16.mxu1 %v7132_v17  ;;  %v7222_v11 = vld [vmem:[%s10248_s1 + $0xbec] ss:$16 sps:$4 sm:$0xff]   ;;  %v7217_v17 = vld [vmem:[%s10248_s1 + $0xbe0] ss:$16 sps:$4 sm:$0xff]  }
 0x142   :  { %4937 = vmatmul.mubr.bf16.vlgmr.msra.gmra.mrb[0].mxu0 %v5757_v14  ;;  %5429 = vmatmul.mubr.bf16.vlgmr.msra.gmra.mrb[0].mxu1 %v5757_v14  ;;  %v7220_v14 = vld [vmem:[%s10248_s1 + $0xbe8] ss:$16 sps:$4 sm:$0xff]  }
 0x143   :  { %4946 = vmatpush1.bf16.msra.mxu0 %v7127_v19  ;;  %5438 = vmatpush1.bf16.msra.mxu1 %v7130_v20  ;;  %v7227_v19 = vld [vmem:[%s10248_s1 + $0xc04] ss:$16 sps:$4 sm:$0xff]   ;;  %v7230_v20 = vld [vmem:[%s10248_s1 + $0xc0c] ss:$16 sps:$4 sm:$0xff]  }
 0x144   :  { %4947 = vmatprep.subr.bf16.mxu0 %v7135_v21  ;;  %5439 = vmatprep.subr.bf16.mxu1 %v7138_v16  ;;  %v9040_v21 = vld [vmem:[%s10249_s0 + $0x30] sm:$0xff]  ;;  %v5759_v16 = vcombine.low %v8839_v18, %v8839_v18  ;;  %v7236_v18 = vld [vmem:[%s10248_s1 + $0xc2c] ss:$16 sps:$4 sm:$0xff]  }
 0x145   :  { %4977 = vmatprep.mubr.bf16.mxu0 %v5760_v22  ;;  %5469 = vmatprep.mubr.bf16.mxu1 %v5760_v22  ;;  %v7225_v22 = vld [vmem:[%s10248_s1 + $0xc00] ss:$16 sps:$4 sm:$0xff]  }
 0x147   :  { %4948 = vmatpush1.bf16.msra.mxu0 %v7133_v23  ;;  %5440 = vmatpush1.bf16.msra.mxu1 %v7136_v24  ;;  %v7228_v23 = vld [vmem:[%s10248_s1 + $0xc08] ss:$16 sps:$4 sm:$0xff]   ;;  %v7233_v24 = vld [vmem:[%s10248_s1 + $0xc24] ss:$16 sps:$4 sm:$0xff]  }
 0x148   :  { %4949 = vmatprep.subr.bf16.mxu0 %v7141_v25  ;;  %5441 = vmatprep.subr.bf16.mxu1 %v7144_v26  ;;  %v5762_v25 = vcombine.high %v9040_v21, %v9040_v21  ;;  %v7231_v26 = vld [vmem:[%s10248_s1 + $0xc20] ss:$16 sps:$4 sm:$0xff]  }
 0x14b   :  { %4950 = vmatpush1.bf16.msra.mxu0 %v7139_v27  ;;  %5442 = vmatpush1.bf16.msra.mxu1 %v7142_v28  ;;  %v7234_v27 = vld [vmem:[%s10248_s1 + $0xc28] ss:$16 sps:$4 sm:$0xff]   ;;  %v7239_v28 = vld [vmem:[%s10248_s1 + $0xc44] ss:$16 sps:$4 sm:$0xff]  }
 0x14c   :  { %4951 = vmatprep.subr.bf16.mxu0 %v7147_v29  ;;  %5443 = vmatprep.subr.bf16.mxu1 %v7150_v30  ;;  %v7242_v29 = vld [vmem:[%s10248_s1 + $0xc4c] ss:$16 sps:$4 sm:$0xff]   ;;  %v7237_v30 = vld [vmem:[%s10248_s1 + $0xc40] ss:$16 sps:$4 sm:$0xff]  }
 0x14f   :  { %4952 = vmatpush1.bf16.msra.mxu0 %v7145_v31  ;;  %5444 = vmatpush1.bf16.msra.mxu1 %v7148_v32  ;;  %v7240_v31 = vld [vmem:[%s10248_s1 + $0xc48] ss:$16 sps:$4 sm:$0xff]   ;;  %v7245_v32 = vld [vmem:[%s10248_s1 + $0xc64] ss:$16 sps:$4 sm:$0xff]  }
 0x150   :  { %4953 = vmatprep.subr.bf16.mxu0 %v7153_v33  ;;  %5445 = vmatprep.subr.bf16.mxu1 %v7156_v34  ;;  %v7248_v33 = vld [vmem:[%s10248_s1 + $0xc6c] ss:$16 sps:$4 sm:$0xff]   ;;  %v7243_v34 = vld [vmem:[%s10248_s1 + $0xc60] ss:$16 sps:$4 sm:$0xff]  }
 0x153   :  { %4954 = vmatpush1.bf16.msra.mxu0 %v7151_v35  ;;  %5446 = vmatpush1.bf16.msra.mxu1 %v7154_v36  ;;  %v7246_v35 = vld [vmem:[%s10248_s1 + $0xc68] ss:$16 sps:$4 sm:$0xff]   ;;  %v7251_v36 = vld [vmem:[%s10248_s1 + $0xc84] ss:$16 sps:$4 sm:$0xff]  }
 0x154   :  { %4955 = vmatprep.subr.bf16.mxu0 %v7159_v37  ;;  %5447 = vmatprep.subr.bf16.mxu1 %v7162_v38  ;;  %v7254_v37 = vld [vmem:[%s10248_s1 + $0xc8c] ss:$16 sps:$4 sm:$0xff]   ;;  %v7249_v38 = vld [vmem:[%s10248_s1 + $0xc80] ss:$16 sps:$4 sm:$0xff]  }
 0x157   :  { %4956 = vmatpush1.bf16.msra.mxu0 %v7157_v39  ;;  %5448 = vmatpush1.bf16.msra.mxu1 %v7160_v40  ;;  %v7252_v39 = vld [vmem:[%s10248_s1 + $0xc88] ss:$16 sps:$4 sm:$0xff]   ;;  %v7257_v40 = vld [vmem:[%s10248_s1 + $0xca4] ss:$16 sps:$4 sm:$0xff]  }
 0x158   :  { %4957 = vmatprep.subr.bf16.mxu0 %v7165_v41  ;;  %5449 = vmatprep.subr.bf16.mxu1 %v7168_v42  ;;  %v7260_v41 = vld [vmem:[%s10248_s1 + $0xcac] ss:$16 sps:$4 sm:$0xff]   ;;  %v7255_v42 = vld [vmem:[%s10248_s1 + $0xca0] ss:$16 sps:$4 sm:$0xff]  }
 0x15b   :  { %4958 = vmatpush1.bf16.msra.mxu0 %v7163_v43  ;;  %5450 = vmatpush1.bf16.msra.mxu1 %v7166_v44  ;;  %v7258_v43 = vld [vmem:[%s10248_s1 + $0xca8] ss:$16 sps:$4 sm:$0xff]   ;;  %v7263_v44 = vld [vmem:[%s10248_s1 + $0xcc4] ss:$16 sps:$4 sm:$0xff]  }
 0x15c   :  { %4959 = vmatprep.subr.bf16.mxu0 %v7171_v45  ;;  %5451 = vmatprep.subr.bf16.mxu1 %v7174_v46  ;;  %v7266_v45 = vld [vmem:[%s10248_s1 + $0xccc] ss:$16 sps:$4 sm:$0xff]   ;;  %v7261_v46 = vld [vmem:[%s10248_s1 + $0xcc0] ss:$16 sps:$4 sm:$0xff]  }
 0x15f   :  { %4960 = vmatpush1.bf16.msra.mxu0 %v7169_v47  ;;  %5452 = vmatpush1.bf16.msra.mxu1 %v7172_v48  ;;  %v7264_v47 = vld [vmem:[%s10248_s1 + $0xcc8] ss:$16 sps:$4 sm:$0xff]   ;;  %v7269_v48 = vld [vmem:[%s10248_s1 + $0xce4] ss:$16 sps:$4 sm:$0xff]  }
 0x160   :  { %4961 = vmatprep.subr.bf16.mxu0 %v7177_v49  ;;  %5453 = vmatprep.subr.bf16.mxu1 %v7180_v50  ;;  %v7272_v49 = vld [vmem:[%s10248_s1 + $0xcec] ss:$16 sps:$4 sm:$0xff]   ;;  %v7267_v50 = vld [vmem:[%s10248_s1 + $0xce0] ss:$16 sps:$4 sm:$0xff]  }
 0x163   :  { %4962 = vmatpush1.bf16.msra.mxu0 %v7175_v51  ;;  %5454 = vmatpush1.bf16.msra.mxu1 %v7178_v52  ;;  %v7270_v51 = vld [vmem:[%s10248_s1 + $0xce8] ss:$16 sps:$4 sm:$0xff]   ;;  %v7275_v52 = vld [vmem:[%s10248_s1 + $0xd04] ss:$16 sps:$4 sm:$0xff]  }
 0x164   :  { %4963 = vmatprep.subr.bf16.mxu0 %v7183_v53  ;;  %5455 = vmatprep.subr.bf16.mxu1 %v7186_v54  ;;  %v7278_v53 = vld [vmem:[%s10248_s1 + $0xd0c] ss:$16 sps:$4 sm:$0xff]   ;;  %v7273_v54 = vld [vmem:[%s10248_s1 + $0xd00] ss:$16 sps:$4 sm:$0xff]  }
 0x167   :  { %4964 = vmatpush1.bf16.msra.mxu0 %v7181_v55  ;;  %5456 = vmatpush1.bf16.msra.mxu1 %v7184_v56  ;;  %v7276_v55 = vld [vmem:[%s10248_s1 + $0xd08] ss:$16 sps:$4 sm:$0xff]   ;;  %v7281_v56 = vld [vmem:[%s10248_s1 + $0xd24] ss:$16 sps:$4 sm:$0xff]  }
 0x168   :  { %4965 = vmatprep.subr.bf16.mxu0 %v7189_v57  ;;  %5457 = vmatprep.subr.bf16.mxu1 %v7192_v58  ;;  %v7284_v57 = vld [vmem:[%s10248_s1 + $0xd2c] ss:$16 sps:$4 sm:$0xff]   ;;  %v7279_v58 = vld [vmem:[%s10248_s1 + $0xd20] ss:$16 sps:$4 sm:$0xff]  }
 0x16b   :  { %4966 = vmatpush1.bf16.msra.mxu0 %v7187_v59  ;;  %5458 = vmatpush1.bf16.msra.mxu1 %v7190_v60  ;;  %v7282_v59 = vld [vmem:[%s10248_s1 + $0xd28] ss:$16 sps:$4 sm:$0xff]   ;;  %v7287_v60 = vld [vmem:[%s10248_s1 + $0xd44] ss:$16 sps:$4 sm:$0xff]  }
 0x16c   :  { %4967 = vmatprep.subr.bf16.mxu0 %v7195_v61  ;;  %5459 = vmatprep.subr.bf16.mxu1 %v7198_v62  ;;  %v7290_v61 = vld [vmem:[%s10248_s1 + $0xd4c] ss:$16 sps:$4 sm:$0xff]   ;;  %v7285_v62 = vld [vmem:[%s10248_s1 + $0xd40] ss:$16 sps:$4 sm:$0xff]  }
 0x16f   :  { %4968 = vmatpush1.bf16.msra.mxu0 %v7193_v63  ;;  %5460 = vmatpush1.bf16.msra.mxu1 %v7196_v0  ;;  %v7288_v63 = vld [vmem:[%s10248_s1 + $0xd48] ss:$16 sps:$4 sm:$0xff]   ;;  %v7293_v0 = vld [vmem:[%s10248_s1 + $0xd64] ss:$16 sps:$4 sm:$0xff]  }
 0x170   :  { %4969 = vmatprep.subr.bf16.mxu0 %v7201_v1  ;;  %5461 = vmatprep.subr.bf16.mxu1 %v7204_v2  ;;  %v7296_v1 = vld [vmem:[%s10248_s1 + $0xd6c] ss:$16 sps:$4 sm:$0xff]   ;;  %v7291_v2 = vld [vmem:[%s10248_s1 + $0xd60] ss:$16 sps:$4 sm:$0xff]  }
 0x173   :  { %4970 = vmatpush1.bf16.msra.mxu0 %v7199_v3  ;;  %5462 = vmatpush1.bf16.msra.mxu1 %v7202_v4  ;;  %v7294_v3 = vld [vmem:[%s10248_s1 + $0xd68] ss:$16 sps:$4 sm:$0xff]   ;;  %v7299_v4 = vld [vmem:[%s10248_s1 + $0xd84] ss:$16 sps:$4 sm:$0xff]  }
 0x174   :  { %4971 = vmatprep.subr.bf16.mxu0 %v7207_v5  ;;  %5463 = vmatprep.subr.bf16.mxu1 %v7210_v6  ;;  %v7302_v5 = vld [vmem:[%s10248_s1 + $0xd8c] ss:$16 sps:$4 sm:$0xff]   ;;  %v7297_v6 = vld [vmem:[%s10248_s1 + $0xd80] ss:$16 sps:$4 sm:$0xff]  }
 0x177   :  { %4972 = vmatpush1.bf16.msra.mxu0 %v7205_v7  ;;  %5464 = vmatpush1.bf16.msra.mxu1 %v7208_v8  ;;  %v7300_v7 = vld [vmem:[%s10248_s1 + $0xd88] ss:$16 sps:$4 sm:$0xff]   ;;  %v7305_v8 = vld [vmem:[%s10248_s1 + $0xda4] ss:$16 sps:$4 sm:$0xff]  }
 0x178   :  { %4973 = vmatprep.subr.bf16.mxu0 %v7213_v9  ;;  %5465 = vmatprep.subr.bf16.mxu1 %v7216_v10  ;;  %v7308_v9 = vld [vmem:[%s10248_s1 + $0xdac] ss:$16 sps:$4 sm:$0xff]   ;;  %v7303_v10 = vld [vmem:[%s10248_s1 + $0xda0] ss:$16 sps:$4 sm:$0xff]  }
 0x17b   :  { %4974 = vmatpush1.bf16.msra.mxu0 %v7211_v12  ;;  %5466 = vmatpush1.bf16.msra.mxu1 %v7214_v13  ;;  %v7306_v12 = vld [vmem:[%s10248_s1 + $0xda8] ss:$16 sps:$4 sm:$0xff]   ;;  %v7311_v13 = vld [vmem:[%s10248_s1 + $0xdc4] ss:$16 sps:$4 sm:$0xff]  }
 0x17c   :  { %4975 = vmatprep.subr.bf16.mxu0 %v7219_v15  ;;  %5467 = vmatprep.subr.bf16.mxu1 %v7222_v11  ;;  %v7314_v15 = vld [vmem:[%s10248_s1 + $0xdcc] ss:$16 sps:$4 sm:$0xff]   ;;  %v7309_v11 = vld [vmem:[%s10248_s1 + $0xdc0] ss:$16 sps:$4 sm:$0xff]  }
 0x17f   :  { %4976 = vmatpush1.bf16.msra.mxu0 %v7217_v17  ;;  %5468 = vmatpush1.bf16.msra.mxu1 %v7220_v14  ;;  %v7312_v17 = vld [vmem:[%s10248_s1 + $0xdc8] ss:$16 sps:$4 sm:$0xff]   ;;  %v7317_v14 = vld [vmem:[%s10248_s1 + $0xde4] ss:$16 sps:$4 sm:$0xff]  }
 0x180   :  { %4986 = vmatprep.subr.bf16.mxu0 %v7227_v19  ;;  %5478 = vmatprep.subr.bf16.mxu1 %v7230_v20  ;;  %v7320_v19 = vld [vmem:[%s10248_s1 + $0xdec] ss:$16 sps:$4 sm:$0xff]   ;;  %v7315_v20 = vld [vmem:[%s10248_s1 + $0xde0] ss:$16 sps:$4 sm:$0xff]  }
 0x182   :  { %4978 = vmatmul.mubr.bf16.vlgmr.msra.gmra.mrb[0].mxu0 %v5759_v16  ;;  %5470 = vmatmul.mubr.bf16.vlgmr.msra.gmra.mrb[0].mxu1 %v5759_v16  ;;  %v7318_v16 = vld [vmem:[%s10248_s1 + $0xde8] ss:$16 sps:$4 sm:$0xff]  }
 0x183   :  { %4987 = vmatpush1.bf16.msra.mxu0 %v7225_v22  ;;  %5479 = vmatpush1.bf16.msra.mxu1 %v7228_v23  ;;  %v7325_v22 = vld [vmem:[%s10248_s1 + $0xe04] ss:$16 sps:$4 sm:$0xff]   ;;  %v7328_v23 = vld [vmem:[%s10248_s1 + $0xe0c] ss:$16 sps:$4 sm:$0xff]  }
 0x184   :  { %4988 = vmatprep.subr.bf16.mxu0 %v7233_v24  ;;  %5480 = vmatprep.subr.bf16.mxu1 %v7236_v18  ;;  %v9241_v24 = vld [vmem:[%s10249_s0 + $0x38] sm:$0xff]  ;;  %v5761_v18 = vcombine.low %v9040_v21, %v9040_v21 }
 0x185   :  { %5018 = vmatprep.mubr.bf16.mxu0 %v5762_v25  ;;  %5510 = vmatprep.mubr.bf16.mxu1 %v5762_v25  ;;  %v7323_v25 = vld [vmem:[%s10248_s1 + $0xe00] ss:$16 sps:$4 sm:$0xff]   ;;  %v7334_v21 = vld [vmem:[%s10248_s1 + $0xe2c] ss:$16 sps:$4 sm:$0xff]  }
 0x187   :  { %4989 = vmatpush1.bf16.msra.mxu0 %v7231_v26  ;;  %5481 = vmatpush1.bf16.msra.mxu1 %v7234_v27  ;;  %v7326_v26 = vld [vmem:[%s10248_s1 + $0xe08] ss:$16 sps:$4 sm:$0xff]   ;;  %v7331_v27 = vld [vmem:[%s10248_s1 + $0xe24] ss:$16 sps:$4 sm:$0xff]  }
 0x188   :  { %4990 = vmatprep.subr.bf16.mxu0 %v7239_v28  ;;  %5482 = vmatprep.subr.bf16.mxu1 %v7242_v29  ;;  %v5764_v28 = vcombine.high %v9241_v24, %v9241_v24  ;;  %v7329_v29 = vld [vmem:[%s10248_s1 + $0xe20] ss:$16 sps:$4 sm:$0xff]  }
 0x18b   :  { %4991 = vmatpush1.bf16.msra.mxu0 %v7237_v30  ;;  %5483 = vmatpush1.bf16.msra.mxu1 %v7240_v31  ;;  %v7332_v30 = vld [vmem:[%s10248_s1 + $0xe28] ss:$16 sps:$4 sm:$0xff]   ;;  %v7337_v31 = vld [vmem:[%s10248_s1 + $0xe44] ss:$16 sps:$4 sm:$0xff]  }
 0x18c   :  { %4992 = vmatprep.subr.bf16.mxu0 %v7245_v32  ;;  %5484 = vmatprep.subr.bf16.mxu1 %v7248_v33  ;;  %v7340_v32 = vld [vmem:[%s10248_s1 + $0xe4c] ss:$16 sps:$4 sm:$0xff]   ;;  %v7335_v33 = vld [vmem:[%s10248_s1 + $0xe40] ss:$16 sps:$4 sm:$0xff]  }
 0x18f   :  { %4993 = vmatpush1.bf16.msra.mxu0 %v7243_v34  ;;  %5485 = vmatpush1.bf16.msra.mxu1 %v7246_v35  ;;  %v7338_v34 = vld [vmem:[%s10248_s1 + $0xe48] ss:$16 sps:$4 sm:$0xff]   ;;  %v7343_v35 = vld [vmem:[%s10248_s1 + $0xe64] ss:$16 sps:$4 sm:$0xff]  }
 0x190   :  { %4994 = vmatprep.subr.bf16.mxu0 %v7251_v36  ;;  %5486 = vmatprep.subr.bf16.mxu1 %v7254_v37  ;;  %v7346_v36 = vld [vmem:[%s10248_s1 + $0xe6c] ss:$16 sps:$4 sm:$0xff]   ;;  %v7341_v37 = vld [vmem:[%s10248_s1 + $0xe60] ss:$16 sps:$4 sm:$0xff]  }
 0x193   :  { %4995 = vmatpush1.bf16.msra.mxu0 %v7249_v38  ;;  %5487 = vmatpush1.bf16.msra.mxu1 %v7252_v39  ;;  %v7344_v38 = vld [vmem:[%s10248_s1 + $0xe68] ss:$16 sps:$4 sm:$0xff]   ;;  %v7349_v39 = vld [vmem:[%s10248_s1 + $0xe84] ss:$16 sps:$4 sm:$0xff]  }
 0x194   :  { %4996 = vmatprep.subr.bf16.mxu0 %v7257_v40  ;;  %5488 = vmatprep.subr.bf16.mxu1 %v7260_v41  ;;  %v7352_v40 = vld [vmem:[%s10248_s1 + $0xe8c] ss:$16 sps:$4 sm:$0xff]   ;;  %v7347_v41 = vld [vmem:[%s10248_s1 + $0xe80] ss:$16 sps:$4 sm:$0xff]  }
 0x197   :  { %4997 = vmatpush1.bf16.msra.mxu0 %v7255_v42  ;;  %5489 = vmatpush1.bf16.msra.mxu1 %v7258_v43  ;;  %v7350_v42 = vld [vmem:[%s10248_s1 + $0xe88] ss:$16 sps:$4 sm:$0xff]   ;;  %v7355_v43 = vld [vmem:[%s10248_s1 + $0xea4] ss:$16 sps:$4 sm:$0xff]  }
 0x198   :  { %4998 = vmatprep.subr.bf16.mxu0 %v7263_v44  ;;  %5490 = vmatprep.subr.bf16.mxu1 %v7266_v45  ;;  %v7358_v44 = vld [vmem:[%s10248_s1 + $0xeac] ss:$16 sps:$4 sm:$0xff]   ;;  %v7353_v45 = vld [vmem:[%s10248_s1 + $0xea0] ss:$16 sps:$4 sm:$0xff]  }
 0x19b   :  { %4999 = vmatpush1.bf16.msra.mxu0 %v7261_v46  ;;  %5491 = vmatpush1.bf16.msra.mxu1 %v7264_v47  ;;  %v7356_v46 = vld [vmem:[%s10248_s1 + $0xea8] ss:$16 sps:$4 sm:$0xff]   ;;  %v7361_v47 = vld [vmem:[%s10248_s1 + $0xec4] ss:$16 sps:$4 sm:$0xff]  }
 0x19c   :  { %5000 = vmatprep.subr.bf16.mxu0 %v7269_v48  ;;  %5492 = vmatprep.subr.bf16.mxu1 %v7272_v49  ;;  %v7364_v48 = vld [vmem:[%s10248_s1 + $0xecc] ss:$16 sps:$4 sm:$0xff]   ;;  %v7359_v49 = vld [vmem:[%s10248_s1 + $0xec0] ss:$16 sps:$4 sm:$0xff]  }
 0x19f   :  { %5001 = vmatpush1.bf16.msra.mxu0 %v7267_v50  ;;  %5493 = vmatpush1.bf16.msra.mxu1 %v7270_v51  ;;  %v7362_v50 = vld [vmem:[%s10248_s1 + $0xec8] ss:$16 sps:$4 sm:$0xff]   ;;  %v7367_v51 = vld [vmem:[%s10248_s1 + $0xee4] ss:$16 sps:$4 sm:$0xff]  }
 0x1a0   :  { %5002 = vmatprep.subr.bf16.mxu0 %v7275_v52  ;;  %5494 = vmatprep.subr.bf16.mxu1 %v7278_v53  ;;  %v7370_v52 = vld [vmem:[%s10248_s1 + $0xeec] ss:$16 sps:$4 sm:$0xff]   ;;  %v7365_v53 = vld [vmem:[%s10248_s1 + $0xee0] ss:$16 sps:$4 sm:$0xff]  }
 0x1a3   :  { %5003 = vmatpush1.bf16.msra.mxu0 %v7273_v54  ;;  %5495 = vmatpush1.bf16.msra.mxu1 %v7276_v55  ;;  %v7368_v54 = vld [vmem:[%s10248_s1 + $0xee8] ss:$16 sps:$4 sm:$0xff]   ;;  %v7373_v55 = vld [vmem:[%s10248_s1 + $0xf04] ss:$16 sps:$4 sm:$0xff]  }
 0x1a4   :  { %5004 = vmatprep.subr.bf16.mxu0 %v7281_v56  ;;  %5496 = vmatprep.subr.bf16.mxu1 %v7284_v57  ;;  %v7376_v56 = vld [vmem:[%s10248_s1 + $0xf0c] ss:$16 sps:$4 sm:$0xff]   ;;  %v7371_v57 = vld [vmem:[%s10248_s1 + $0xf00] ss:$16 sps:$4 sm:$0xff]  }
 0x1a7   :  { %5005 = vmatpush1.bf16.msra.mxu0 %v7279_v58  ;;  %5497 = vmatpush1.bf16.msra.mxu1 %v7282_v59  ;;  %v7374_v58 = vld [vmem:[%s10248_s1 + $0xf08] ss:$16 sps:$4 sm:$0xff]   ;;  %v7379_v59 = vld [vmem:[%s10248_s1 + $0xf24] ss:$16 sps:$4 sm:$0xff]  }
 0x1a8   :  { %5006 = vmatprep.subr.bf16.mxu0 %v7287_v60  ;;  %5498 = vmatprep.subr.bf16.mxu1 %v7290_v61  ;;  %v7382_v60 = vld [vmem:[%s10248_s1 + $0xf2c] ss:$16 sps:$4 sm:$0xff]   ;;  %v7377_v61 = vld [vmem:[%s10248_s1 + $0xf20] ss:$16 sps:$4 sm:$0xff]  }
 0x1ab   :  { %5007 = vmatpush1.bf16.msra.mxu0 %v7285_v62  ;;  %5499 = vmatpush1.bf16.msra.mxu1 %v7288_v63  ;;  %v7380_v62 = vld [vmem:[%s10248_s1 + $0xf28] ss:$16 sps:$4 sm:$0xff]   ;;  %v7385_v63 = vld [vmem:[%s10248_s1 + $0xf44] ss:$16 sps:$4 sm:$0xff]  }
 0x1ac   :  { %5008 = vmatprep.subr.bf16.mxu0 %v7293_v0  ;;  %5500 = vmatprep.subr.bf16.mxu1 %v7296_v1  ;;  %v7388_v0 = vld [vmem:[%s10248_s1 + $0xf4c] ss:$16 sps:$4 sm:$0xff]   ;;  %v7383_v1 = vld [vmem:[%s10248_s1 + $0xf40] ss:$16 sps:$4 sm:$0xff]  }
 0x1af   :  { %5009 = vmatpush1.bf16.msra.mxu0 %v7291_v2  ;;  %5501 = vmatpush1.bf16.msra.mxu1 %v7294_v3  ;;  %v7386_v2 = vld [vmem:[%s10248_s1 + $0xf48] ss:$16 sps:$4 sm:$0xff]   ;;  %v7391_v3 = vld [vmem:[%s10248_s1 + $0xf64] ss:$16 sps:$4 sm:$0xff]  }
 0x1b0   :  { %5010 = vmatprep.subr.bf16.mxu0 %v7299_v4  ;;  %5502 = vmatprep.subr.bf16.mxu1 %v7302_v5  ;;  %v7394_v4 = vld [vmem:[%s10248_s1 + $0xf6c] ss:$16 sps:$4 sm:$0xff]   ;;  %v7389_v5 = vld [vmem:[%s10248_s1 + $0xf60] ss:$16 sps:$4 sm:$0xff]  }
 0x1b3   :  { %5011 = vmatpush1.bf16.msra.mxu0 %v7297_v6  ;;  %5503 = vmatpush1.bf16.msra.mxu1 %v7300_v7  ;;  %v7392_v6 = vld [vmem:[%s10248_s1 + $0xf68] ss:$16 sps:$4 sm:$0xff]   ;;  %v7397_v7 = vld [vmem:[%s10248_s1 + $0xf84] ss:$16 sps:$4 sm:$0xff]  }
 0x1b4   :  { %5012 = vmatprep.subr.bf16.mxu0 %v7305_v8  ;;  %5504 = vmatprep.subr.bf16.mxu1 %v7308_v9  ;;  %v7400_v8 = vld [vmem:[%s10248_s1 + $0xf8c] ss:$16 sps:$4 sm:$0xff]   ;;  %v7395_v9 = vld [vmem:[%s10248_s1 + $0xf80] ss:$16 sps:$4 sm:$0xff]  }
 0x1b7   :  { %5013 = vmatpush1.bf16.msra.mxu0 %v7303_v10  ;;  %5505 = vmatpush1.bf16.msra.mxu1 %v7306_v12  ;;  %v7398_v10 = vld [vmem:[%s10248_s1 + $0xf88] ss:$16 sps:$4 sm:$0xff]   ;;  %v7403_v12 = vld [vmem:[%s10248_s1 + $0xfa4] ss:$16 sps:$4 sm:$0xff]  }
 0x1b8   :  { %5014 = vmatprep.subr.bf16.mxu0 %v7311_v13  ;;  %5506 = vmatprep.subr.bf16.mxu1 %v7314_v15  ;;  %v7406_v13 = vld [vmem:[%s10248_s1 + $0xfac] ss:$16 sps:$4 sm:$0xff]   ;;  %v7401_v15 = vld [vmem:[%s10248_s1 + $0xfa0] ss:$16 sps:$4 sm:$0xff]  }
 0x1bb   :  { %5015 = vmatpush1.bf16.msra.mxu0 %v7309_v11  ;;  %5507 = vmatpush1.bf16.msra.mxu1 %v7312_v17  ;;  %v7404_v11 = vld [vmem:[%s10248_s1 + $0xfa8] ss:$16 sps:$4 sm:$0xff]   ;;  %v7409_v17 = vld [vmem:[%s10248_s1 + $0xfc4] ss:$16 sps:$4 sm:$0xff]  }
 0x1bc   :  { %5016 = vmatprep.subr.bf16.mxu0 %v7317_v14  ;;  %5508 = vmatprep.subr.bf16.mxu1 %v7320_v19  ;;  %v7412_v14 = vld [vmem:[%s10248_s1 + $0xfcc] ss:$16 sps:$4 sm:$0xff]   ;;  %v7407_v19 = vld [vmem:[%s10248_s1 + $0xfc0] ss:$16 sps:$4 sm:$0xff]  }
 0x1bf   :  { %5017 = vmatpush1.bf16.msra.mxu0 %v7315_v20  ;;  %5509 = vmatpush1.bf16.msra.mxu1 %v7318_v16  ;;  %v7410_v20 = vld [vmem:[%s10248_s1 + $0xfc8] ss:$16 sps:$4 sm:$0xff]   ;;  %v7415_v16 = vld [vmem:[%s10248_s1 + $0xfe4] ss:$16 sps:$4 sm:$0xff]  }
 0x1c0   :  { %5027 = vmatprep.subr.bf16.mxu0 %v7325_v22  ;;  %5519 = vmatprep.subr.bf16.mxu1 %v7328_v23  ;;  %v7418_v22 = vld [vmem:[%s10248_s1 + $0xfec] ss:$16 sps:$4 sm:$0xff]   ;;  %v7413_v23 = vld [vmem:[%s10248_s1 + $0xfe0] ss:$16 sps:$4 sm:$0xff]  }
 0x1c2   :  { %5019 = vmatmul.mubr.bf16.vlgmr.msra.gmra.mrb[0].mxu0 %v5761_v18  ;;  %5511 = vmatmul.mubr.bf16.vlgmr.msra.gmra.mrb[0].mxu1 %v5761_v18  ;;  %v7416_v18 = vld [vmem:[%s10248_s1 + $0xfe8] ss:$16 sps:$4 sm:$0xff]  }
 0x1c3   :  { %5028 = vmatpush1.bf16.msra.mxu0 %v7323_v25  ;;  %5520 = vmatpush1.bf16.msra.mxu1 %v7326_v26  ;;  %v7423_v25 = vld [vmem:[%s10248_s1 + $0x1004] ss:$16 sps:$4 sm:$0xff]   ;;  %v7426_v26 = vld [vmem:[%s10248_s1 + $0x100c] ss:$16 sps:$4 sm:$0xff]  }
 0x1c4   :  { %5029 = vmatprep.subr.bf16.mxu0 %v7331_v27  ;;  %5521 = vmatprep.subr.bf16.mxu1 %v7334_v21  ;;  %v5763_v27 = vcombine.low %v9241_v24, %v9241_v24  ;;  %v9444_v21 = vld [vmem:[%s10249_s0 + $0x40] sm:$0xff] }
 0x1c5   :  { %5059 = vmatprep.mubr.bf16.mxu0 %v5764_v28  ;;  %5551 = vmatprep.mubr.bf16.mxu1 %v5764_v28  ;;  %v7421_v28 = vld [vmem:[%s10248_s1 + $0x1000] ss:$16 sps:$4 sm:$0xff]   ;;  %v7429_v24 = vld [vmem:[%s10248_s1 + $0x1024] ss:$16 sps:$4 sm:$0xff]  }
 0x1c7   :  { %5030 = vmatpush1.bf16.msra.mxu0 %v7329_v29  ;;  %5522 = vmatpush1.bf16.msra.mxu1 %v7332_v30  ;;  %v7424_v29 = vld [vmem:[%s10248_s1 + $0x1008] ss:$16 sps:$4 sm:$0xff]   ;;  %v7432_v30 = vld [vmem:[%s10248_s1 + $0x102c] ss:$16 sps:$4 sm:$0xff]  }
 0x1c8   :  { %5031 = vmatprep.subr.bf16.mxu0 %v7337_v31  ;;  %5523 = vmatprep.subr.bf16.mxu1 %v7340_v32  ;;  %v5766_v31 = vcombine.high %v9444_v21, %v9444_v21  ;;  %v7427_v32 = vld [vmem:[%s10248_s1 + $0x1020] ss:$16 sps:$4 sm:$0xff]  }
 0x1cb   :  { %5032 = vmatpush1.bf16.msra.mxu0 %v7335_v33  ;;  %5524 = vmatpush1.bf16.msra.mxu1 %v7338_v34  ;;  %v7430_v33 = vld [vmem:[%s10248_s1 + $0x1028] ss:$16 sps:$4 sm:$0xff]   ;;  %v7435_v34 = vld [vmem:[%s10248_s1 + $0x1044] ss:$16 sps:$4 sm:$0xff]  }
 0x1cc   :  { %5033 = vmatprep.subr.bf16.mxu0 %v7343_v35  ;;  %5525 = vmatprep.subr.bf16.mxu1 %v7346_v36  ;;  %v7438_v35 = vld [vmem:[%s10248_s1 + $0x104c] ss:$16 sps:$4 sm:$0xff]   ;;  %v7433_v36 = vld [vmem:[%s10248_s1 + $0x1040] ss:$16 sps:$4 sm:$0xff]  }
 0x1cf   :  { %5034 = vmatpush1.bf16.msra.mxu0 %v7341_v37  ;;  %5526 = vmatpush1.bf16.msra.mxu1 %v7344_v38  ;;  %v7436_v37 = vld [vmem:[%s10248_s1 + $0x1048] ss:$16 sps:$4 sm:$0xff]   ;;  %v7441_v38 = vld [vmem:[%s10248_s1 + $0x1064] ss:$16 sps:$4 sm:$0xff]  }
 0x1d0   :  { %5035 = vmatprep.subr.bf16.mxu0 %v7349_v39  ;;  %5527 = vmatprep.subr.bf16.mxu1 %v7352_v40  ;;  %v7444_v39 = vld [vmem:[%s10248_s1 + $0x106c] ss:$16 sps:$4 sm:$0xff]   ;;  %v7439_v40 = vld [vmem:[%s10248_s1 + $0x1060] ss:$16 sps:$4 sm:$0xff]  }
 0x1d3   :  { %5036 = vmatpush1.bf16.msra.mxu0 %v7347_v41  ;;  %5528 = vmatpush1.bf16.msra.mxu1 %v7350_v42  ;;  %v7442_v41 = vld [vmem:[%s10248_s1 + $0x1068] ss:$16 sps:$4 sm:$0xff]   ;;  %v7447_v42 = vld [vmem:[%s10248_s1 + $0x1084] ss:$16 sps:$4 sm:$0xff]  }
 0x1d4   :  { %5037 = vmatprep.subr.bf16.mxu0 %v7355_v43  ;;  %5529 = vmatprep.subr.bf16.mxu1 %v7358_v44  ;;  %v7450_v43 = vld [vmem:[%s10248_s1 + $0x108c] ss:$16 sps:$4 sm:$0xff]   ;;  %v7445_v44 = vld [vmem:[%s10248_s1 + $0x1080] ss:$16 sps:$4 sm:$0xff]  }
 0x1d7   :  { %5038 = vmatpush1.bf16.msra.mxu0 %v7353_v45  ;;  %5530 = vmatpush1.bf16.msra.mxu1 %v7356_v46  ;;  %v7448_v45 = vld [vmem:[%s10248_s1 + $0x1088] ss:$16 sps:$4 sm:$0xff]   ;;  %v7453_v46 = vld [vmem:[%s10248_s1 + $0x10a4] ss:$16 sps:$4 sm:$0xff]  }
 0x1d8   :  { %5039 = vmatprep.subr.bf16.mxu0 %v7361_v47  ;;  %5531 = vmatprep.subr.bf16.mxu1 %v7364_v48  ;;  %v7456_v47 = vld [vmem:[%s10248_s1 + $0x10ac] ss:$16 sps:$4 sm:$0xff]   ;;  %v7451_v48 = vld [vmem:[%s10248_s1 + $0x10a0] ss:$16 sps:$4 sm:$0xff]  }
 0x1db   :  { %5040 = vmatpush1.bf16.msra.mxu0 %v7359_v49  ;;  %5532 = vmatpush1.bf16.msra.mxu1 %v7362_v50  ;;  %v7454_v49 = vld [vmem:[%s10248_s1 + $0x10a8] ss:$16 sps:$4 sm:$0xff]   ;;  %v7459_v50 = vld [vmem:[%s10248_s1 + $0x10c4] ss:$16 sps:$4 sm:$0xff]  }
 0x1dc   :  { %5041 = vmatprep.subr.bf16.mxu0 %v7367_v51  ;;  %5533 = vmatprep.subr.bf16.mxu1 %v7370_v52  ;;  %v7462_v51 = vld [vmem:[%s10248_s1 + $0x10cc] ss:$16 sps:$4 sm:$0xff]   ;;  %v7457_v52 = vld [vmem:[%s10248_s1 + $0x10c0] ss:$16 sps:$4 sm:$0xff]  }
 0x1df   :  { %5042 = vmatpush1.bf16.msra.mxu0 %v7365_v53  ;;  %5534 = vmatpush1.bf16.msra.mxu1 %v7368_v54  ;;  %v7460_v53 = vld [vmem:[%s10248_s1 + $0x10c8] ss:$16 sps:$4 sm:$0xff]   ;;  %v7465_v54 = vld [vmem:[%s10248_s1 + $0x10e4] ss:$16 sps:$4 sm:$0xff]  }
 0x1e0   :  { %5043 = vmatprep.subr.bf16.mxu0 %v7373_v55  ;;  %5535 = vmatprep.subr.bf16.mxu1 %v7376_v56  ;;  %v7468_v55 = vld [vmem:[%s10248_s1 + $0x10ec] ss:$16 sps:$4 sm:$0xff]   ;;  %v7463_v56 = vld [vmem:[%s10248_s1 + $0x10e0] ss:$16 sps:$4 sm:$0xff]  }
 0x1e3   :  { %5044 = vmatpush1.bf16.msra.mxu0 %v7371_v57  ;;  %5536 = vmatpush1.bf16.msra.mxu1 %v7374_v58  ;;  %v7466_v57 = vld [vmem:[%s10248_s1 + $0x10e8] ss:$16 sps:$4 sm:$0xff]   ;;  %v7471_v58 = vld [vmem:[%s10248_s1 + $0x1104] ss:$16 sps:$4 sm:$0xff]  }
 0x1e4   :  { %5045 = vmatprep.subr.bf16.mxu0 %v7379_v59  ;;  %5537 = vmatprep.subr.bf16.mxu1 %v7382_v60  ;;  %v7474_v59 = vld [vmem:[%s10248_s1 + $0x110c] ss:$16 sps:$4 sm:$0xff]   ;;  %v7469_v60 = vld [vmem:[%s10248_s1 + $0x1100] ss:$16 sps:$4 sm:$0xff]  }
 0x1e7   :  { %5046 = vmatpush1.bf16.msra.mxu0 %v7377_v61  ;;  %5538 = vmatpush1.bf16.msra.mxu1 %v7380_v62  ;;  %v7472_v61 = vld [vmem:[%s10248_s1 + $0x1108] ss:$16 sps:$4 sm:$0xff]   ;;  %v7477_v62 = vld [vmem:[%s10248_s1 + $0x1124] ss:$16 sps:$4 sm:$0xff]  }
 0x1e8   :  { %5047 = vmatprep.subr.bf16.mxu0 %v7385_v63  ;;  %5539 = vmatprep.subr.bf16.mxu1 %v7388_v0  ;;  %v7480_v63 = vld [vmem:[%s10248_s1 + $0x112c] ss:$16 sps:$4 sm:$0xff]   ;;  %v7475_v0 = vld [vmem:[%s10248_s1 + $0x1120] ss:$16 sps:$4 sm:$0xff]  }
 0x1eb   :  { %5048 = vmatpush1.bf16.msra.mxu0 %v7383_v1  ;;  %5540 = vmatpush1.bf16.msra.mxu1 %v7386_v2  ;;  %v7478_v1 = vld [vmem:[%s10248_s1 + $0x1128] ss:$16 sps:$4 sm:$0xff]   ;;  %v7483_v2 = vld [vmem:[%s10248_s1 + $0x1144] ss:$16 sps:$4 sm:$0xff]  }
 0x1ec   :  { %5049 = vmatprep.subr.bf16.mxu0 %v7391_v3  ;;  %5541 = vmatprep.subr.bf16.mxu1 %v7394_v4  ;;  %v7486_v3 = vld [vmem:[%s10248_s1 + $0x114c] ss:$16 sps:$4 sm:$0xff]   ;;  %v7481_v4 = vld [vmem:[%s10248_s1 + $0x1140] ss:$16 sps:$4 sm:$0xff]  }
 0x1ef   :  { %5050 = vmatpush1.bf16.msra.mxu0 %v7389_v5  ;;  %5542 = vmatpush1.bf16.msra.mxu1 %v7392_v6  ;;  %v7484_v5 = vld [vmem:[%s10248_s1 + $0x1148] ss:$16 sps:$4 sm:$0xff]   ;;  %v7489_v6 = vld [vmem:[%s10248_s1 + $0x1164] ss:$16 sps:$4 sm:$0xff]  }
 0x1f0   :  { %5051 = vmatprep.subr.bf16.mxu0 %v7397_v7  ;;  %5543 = vmatprep.subr.bf16.mxu1 %v7400_v8  ;;  %v7492_v7 = vld [vmem:[%s10248_s1 + $0x116c] ss:$16 sps:$4 sm:$0xff]   ;;  %v7487_v8 = vld [vmem:[%s10248_s1 + $0x1160] ss:$16 sps:$4 sm:$0xff]  }
 0x1f3   :  { %5052 = vmatpush1.bf16.msra.mxu0 %v7395_v9  ;;  %5544 = vmatpush1.bf16.msra.mxu1 %v7398_v10  ;;  %v7490_v9 = vld [vmem:[%s10248_s1 + $0x1168] ss:$16 sps:$4 sm:$0xff]   ;;  %v7495_v10 = vld [vmem:[%s10248_s1 + $0x1184] ss:$16 sps:$4 sm:$0xff]  }
 0x1f4   :  { %5053 = vmatprep.subr.bf16.mxu0 %v7403_v12  ;;  %5545 = vmatprep.subr.bf16.mxu1 %v7406_v13  ;;  %v7498_v12 = vld [vmem:[%s10248_s1 + $0x118c] ss:$16 sps:$4 sm:$0xff]   ;;  %v7493_v13 = vld [vmem:[%s10248_s1 + $0x1180] ss:$16 sps:$4 sm:$0xff]  }
 0x1f7   :  { %5054 = vmatpush1.bf16.msra.mxu0 %v7401_v15  ;;  %5546 = vmatpush1.bf16.msra.mxu1 %v7404_v11  ;;  %v7496_v15 = vld [vmem:[%s10248_s1 + $0x1188] ss:$16 sps:$4 sm:$0xff]   ;;  %v7501_v11 = vld [vmem:[%s10248_s1 + $0x11a4] ss:$16 sps:$4 sm:$0xff]  }
 0x1f8   :  { %5055 = vmatprep.subr.bf16.mxu0 %v7409_v17  ;;  %5547 = vmatprep.subr.bf16.mxu1 %v7412_v14  ;;  %v7504_v17 = vld [vmem:[%s10248_s1 + $0x11ac] ss:$16 sps:$4 sm:$0xff]   ;;  %v7499_v14 = vld [vmem:[%s10248_s1 + $0x11a0] ss:$16 sps:$4 sm:$0xff]  }
 0x1fb   :  { %5056 = vmatpush1.bf16.msra.mxu0 %v7407_v19  ;;  %5548 = vmatpush1.bf16.msra.mxu1 %v7410_v20  ;;  %v7502_v19 = vld [vmem:[%s10248_s1 + $0x11a8] ss:$16 sps:$4 sm:$0xff]   ;;  %v7507_v20 = vld [vmem:[%s10248_s1 + $0x11c4] ss:$16 sps:$4 sm:$0xff]  }
 0x1fc   :  { %5057 = vmatprep.subr.bf16.mxu0 %v7415_v16  ;;  %5549 = vmatprep.subr.bf16.mxu1 %v7418_v22  ;;  %v7510_v16 = vld [vmem:[%s10248_s1 + $0x11cc] ss:$16 sps:$4 sm:$0xff]   ;;  %v7505_v22 = vld [vmem:[%s10248_s1 + $0x11c0] ss:$16 sps:$4 sm:$0xff]  }
 0x1ff   :  { %5058 = vmatpush1.bf16.msra.mxu0 %v7413_v23  ;;  %5550 = vmatpush1.bf16.msra.mxu1 %v7416_v18  ;;  %v7508_v23 = vld [vmem:[%s10248_s1 + $0x11c8] ss:$16 sps:$4 sm:$0xff]   ;;  %v7513_v18 = vld [vmem:[%s10248_s1 + $0x11e4] ss:$16 sps:$4 sm:$0xff]  }
 0x200   :  { %5068 = vmatprep.subr.bf16.mxu0 %v7423_v25  ;;  %5560 = vmatprep.subr.bf16.mxu1 %v7426_v26  ;;  %v7516_v25 = vld [vmem:[%s10248_s1 + $0x11ec] ss:$16 sps:$4 sm:$0xff]   ;;  %v7511_v26 = vld [vmem:[%s10248_s1 + $0x11e0] ss:$16 sps:$4 sm:$0xff]  }
 0x202   :  { %5060 = vmatmul.mubr.bf16.vlgmr.msra.gmra.mrb[0].mxu0 %v5763_v27  ;;  %5552 = vmatmul.mubr.bf16.vlgmr.msra.gmra.mrb[0].mxu1 %v5763_v27  ;;  %v7514_v27 = vld [vmem:[%s10248_s1 + $0x11e8] ss:$16 sps:$4 sm:$0xff]  }
 0x203   :  { %5069 = vmatpush1.bf16.msra.mxu0 %v7421_v28  ;;  %5561 = vmatpush1.bf16.msra.mxu1 %v7424_v29  ;;  %v7521_v28 = vld [vmem:[%s10248_s1 + $0x1204] ss:$16 sps:$4 sm:$0xff]   ;;  %v7524_v29 = vld [vmem:[%s10248_s1 + $0x120c] ss:$16 sps:$4 sm:$0xff]  }
 0x204   :  { %5070 = vmatprep.subr.bf16.mxu0 %v7429_v24  ;;  %5562 = vmatprep.subr.bf16.mxu1 %v7432_v30  ;;  %v5765_v24 = vcombine.low %v9444_v21, %v9444_v21  ;;  %v9645_v30 = vld [vmem:[%s10249_s0 + $0x48] sm:$0xff]  ;;  %v7527_v21 = vld [vmem:[%s10248_s1 + $0x1224] ss:$16 sps:$4 sm:$0xff]  }
 0x205   :  { %5100 = vmatprep.mubr.bf16.mxu0 %v5766_v31  ;;  %5592 = vmatprep.mubr.bf16.mxu1 %v5766_v31  ;;  %v7519_v31 = vld [vmem:[%s10248_s1 + $0x1200] ss:$16 sps:$4 sm:$0xff]  }
 0x207   :  { %5071 = vmatpush1.bf16.msra.mxu0 %v7427_v32  ;;  %5563 = vmatpush1.bf16.msra.mxu1 %v7430_v33  ;;  %v7522_v32 = vld [vmem:[%s10248_s1 + $0x1208] ss:$16 sps:$4 sm:$0xff]   ;;  %v7530_v33 = vld [vmem:[%s10248_s1 + $0x122c] ss:$16 sps:$4 sm:$0xff]  }
 0x208   :  { %5072 = vmatprep.subr.bf16.mxu0 %v7435_v34  ;;  %5564 = vmatprep.subr.bf16.mxu1 %v7438_v35  ;;  %v5768_v34 = vcombine.high %v9645_v30, %v9645_v30  ;;  %v7525_v35 = vld [vmem:[%s10248_s1 + $0x1220] ss:$16 sps:$4 sm:$0xff]  }
 0x20b   :  { %5073 = vmatpush1.bf16.msra.mxu0 %v7433_v36  ;;  %5565 = vmatpush1.bf16.msra.mxu1 %v7436_v37  ;;  %v7528_v36 = vld [vmem:[%s10248_s1 + $0x1228] ss:$16 sps:$4 sm:$0xff]   ;;  %v7533_v37 = vld [vmem:[%s10248_s1 + $0x1244] ss:$16 sps:$4 sm:$0xff]  }
 0x20c   :  { %5074 = vmatprep.subr.bf16.mxu0 %v7441_v38  ;;  %5566 = vmatprep.subr.bf16.mxu1 %v7444_v39  ;;  %v7536_v38 = vld [vmem:[%s10248_s1 + $0x124c] ss:$16 sps:$4 sm:$0xff]   ;;  %v7531_v39 = vld [vmem:[%s10248_s1 + $0x1240] ss:$16 sps:$4 sm:$0xff]  }
 0x20f   :  { %5075 = vmatpush1.bf16.msra.mxu0 %v7439_v40  ;;  %5567 = vmatpush1.bf16.msra.mxu1 %v7442_v41  ;;  %v7534_v40 = vld [vmem:[%s10248_s1 + $0x1248] ss:$16 sps:$4 sm:$0xff]   ;;  %v7539_v41 = vld [vmem:[%s10248_s1 + $0x1264] ss:$16 sps:$4 sm:$0xff]  }
 0x210   :  { %5076 = vmatprep.subr.bf16.mxu0 %v7447_v42  ;;  %5568 = vmatprep.subr.bf16.mxu1 %v7450_v43  ;;  %v7542_v42 = vld [vmem:[%s10248_s1 + $0x126c] ss:$16 sps:$4 sm:$0xff]   ;;  %v7537_v43 = vld [vmem:[%s10248_s1 + $0x1260] ss:$16 sps:$4 sm:$0xff]  }
 0x213   :  { %5077 = vmatpush1.bf16.msra.mxu0 %v7445_v44  ;;  %5569 = vmatpush1.bf16.msra.mxu1 %v7448_v45  ;;  %v7540_v44 = vld [vmem:[%s10248_s1 + $0x1268] ss:$16 sps:$4 sm:$0xff]   ;;  %v7545_v45 = vld [vmem:[%s10248_s1 + $0x1284] ss:$16 sps:$4 sm:$0xff]  }
 0x214   :  { %5078 = vmatprep.subr.bf16.mxu0 %v7453_v46  ;;  %5570 = vmatprep.subr.bf16.mxu1 %v7456_v47  ;;  %v7548_v46 = vld [vmem:[%s10248_s1 + $0x128c] ss:$16 sps:$4 sm:$0xff]   ;;  %v7543_v47 = vld [vmem:[%s10248_s1 + $0x1280] ss:$16 sps:$4 sm:$0xff]  }
 0x217   :  { %5079 = vmatpush1.bf16.msra.mxu0 %v7451_v48  ;;  %5571 = vmatpush1.bf16.msra.mxu1 %v7454_v49  ;;  %v7546_v48 = vld [vmem:[%s10248_s1 + $0x1288] ss:$16 sps:$4 sm:$0xff]   ;;  %v7551_v49 = vld [vmem:[%s10248_s1 + $0x12a4] ss:$16 sps:$4 sm:$0xff]  }
 0x218   :  { %5080 = vmatprep.subr.bf16.mxu0 %v7459_v50  ;;  %5572 = vmatprep.subr.bf16.mxu1 %v7462_v51  ;;  %v7554_v50 = vld [vmem:[%s10248_s1 + $0x12ac] ss:$16 sps:$4 sm:$0xff]   ;;  %v7549_v51 = vld [vmem:[%s10248_s1 + $0x12a0] ss:$16 sps:$4 sm:$0xff]  }
 0x21b   :  { %5081 = vmatpush1.bf16.msra.mxu0 %v7457_v52  ;;  %5573 = vmatpush1.bf16.msra.mxu1 %v7460_v53  ;;  %v7552_v52 = vld [vmem:[%s10248_s1 + $0x12a8] ss:$16 sps:$4 sm:$0xff]   ;;  %v7557_v53 = vld [vmem:[%s10248_s1 + $0x12c4] ss:$16 sps:$4 sm:$0xff]  }
 0x21c   :  { %5082 = vmatprep.subr.bf16.mxu0 %v7465_v54  ;;  %5574 = vmatprep.subr.bf16.mxu1 %v7468_v55  ;;  %v7560_v54 = vld [vmem:[%s10248_s1 + $0x12cc] ss:$16 sps:$4 sm:$0xff]   ;;  %v7555_v55 = vld [vmem:[%s10248_s1 + $0x12c0] ss:$16 sps:$4 sm:$0xff]  }
 0x21f   :  { %5083 = vmatpush1.bf16.msra.mxu0 %v7463_v56  ;;  %5575 = vmatpush1.bf16.msra.mxu1 %v7466_v57  ;;  %v7558_v56 = vld [vmem:[%s10248_s1 + $0x12c8] ss:$16 sps:$4 sm:$0xff]   ;;  %v7563_v57 = vld [vmem:[%s10248_s1 + $0x12e4] ss:$16 sps:$4 sm:$0xff]  }
 0x220   :  { %5084 = vmatprep.subr.bf16.mxu0 %v7471_v58  ;;  %5576 = vmatprep.subr.bf16.mxu1 %v7474_v59  ;;  %v7566_v58 = vld [vmem:[%s10248_s1 + $0x12ec] ss:$16 sps:$4 sm:$0xff]   ;;  %v7561_v59 = vld [vmem:[%s10248_s1 + $0x12e0] ss:$16 sps:$4 sm:$0xff]  }
 0x223   :  { %5085 = vmatpush1.bf16.msra.mxu0 %v7469_v60  ;;  %5577 = vmatpush1.bf16.msra.mxu1 %v7472_v61  ;;  %v7564_v60 = vld [vmem:[%s10248_s1 + $0x12e8] ss:$16 sps:$4 sm:$0xff]   ;;  %v7569_v61 = vld [vmem:[%s10248_s1 + $0x1304] ss:$16 sps:$4 sm:$0xff]  }
 0x224   :  { %5086 = vmatprep.subr.bf16.mxu0 %v7477_v62  ;;  %5578 = vmatprep.subr.bf16.mxu1 %v7480_v63  ;;  %v7572_v62 = vld [vmem:[%s10248_s1 + $0x130c] ss:$16 sps:$4 sm:$0xff]   ;;  %v7567_v63 = vld [vmem:[%s10248_s1 + $0x1300] ss:$16 sps:$4 sm:$0xff]  }
 0x227   :  { %5087 = vmatpush1.bf16.msra.mxu0 %v7475_v0  ;;  %5579 = vmatpush1.bf16.msra.mxu1 %v7478_v1  ;;  %v7570_v0 = vld [vmem:[%s10248_s1 + $0x1308] ss:$16 sps:$4 sm:$0xff]   ;;  %v7575_v1 = vld [vmem:[%s10248_s1 + $0x1324] ss:$16 sps:$4 sm:$0xff]  }
 0x228   :  { %5088 = vmatprep.subr.bf16.mxu0 %v7483_v2  ;;  %5580 = vmatprep.subr.bf16.mxu1 %v7486_v3  ;;  %v7578_v2 = vld [vmem:[%s10248_s1 + $0x132c] ss:$16 sps:$4 sm:$0xff]   ;;  %v7573_v3 = vld [vmem:[%s10248_s1 + $0x1320] ss:$16 sps:$4 sm:$0xff]  }
 0x22b   :  { %5089 = vmatpush1.bf16.msra.mxu0 %v7481_v4  ;;  %5581 = vmatpush1.bf16.msra.mxu1 %v7484_v5  ;;  %v7576_v4 = vld [vmem:[%s10248_s1 + $0x1328] ss:$16 sps:$4 sm:$0xff]   ;;  %v7581_v5 = vld [vmem:[%s10248_s1 + $0x1344] ss:$16 sps:$4 sm:$0xff]  }
 0x22c   :  { %5090 = vmatprep.subr.bf16.mxu0 %v7489_v6  ;;  %5582 = vmatprep.subr.bf16.mxu1 %v7492_v7  ;;  %v7584_v6 = vld [vmem:[%s10248_s1 + $0x134c] ss:$16 sps:$4 sm:$0xff]   ;;  %v7579_v7 = vld [vmem:[%s10248_s1 + $0x1340] ss:$16 sps:$4 sm:$0xff]  }
 0x22f   :  { %5091 = vmatpush1.bf16.msra.mxu0 %v7487_v8  ;;  %5583 = vmatpush1.bf16.msra.mxu1 %v7490_v9  ;;  %v7582_v8 = vld [vmem:[%s10248_s1 + $0x1348] ss:$16 sps:$4 sm:$0xff]   ;;  %v7587_v9 = vld [vmem:[%s10248_s1 + $0x1364] ss:$16 sps:$4 sm:$0xff]  }
 0x230   :  { %5092 = vmatprep.subr.bf16.mxu0 %v7495_v10  ;;  %5584 = vmatprep.subr.bf16.mxu1 %v7498_v12  ;;  %v7590_v10 = vld [vmem:[%s10248_s1 + $0x136c] ss:$16 sps:$4 sm:$0xff]   ;;  %v7585_v12 = vld [vmem:[%s10248_s1 + $0x1360] ss:$16 sps:$4 sm:$0xff]  }
 0x233   :  { %5093 = vmatpush1.bf16.msra.mxu0 %v7493_v13  ;;  %5585 = vmatpush1.bf16.msra.mxu1 %v7496_v15  ;;  %v7588_v13 = vld [vmem:[%s10248_s1 + $0x1368] ss:$16 sps:$4 sm:$0xff]   ;;  %v7593_v15 = vld [vmem:[%s10248_s1 + $0x1384] ss:$16 sps:$4 sm:$0xff]  }
 0x234   :  { %5094 = vmatprep.subr.bf16.mxu0 %v7501_v11  ;;  %5586 = vmatprep.subr.bf16.mxu1 %v7504_v17  ;;  %v7596_v11 = vld [vmem:[%s10248_s1 + $0x138c] ss:$16 sps:$4 sm:$0xff]   ;;  %v7591_v17 = vld [vmem:[%s10248_s1 + $0x1380] ss:$16 sps:$4 sm:$0xff]  }
 0x237   :  { %5095 = vmatpush1.bf16.msra.mxu0 %v7499_v14  ;;  %5587 = vmatpush1.bf16.msra.mxu1 %v7502_v19  ;;  %v7594_v14 = vld [vmem:[%s10248_s1 + $0x1388] ss:$16 sps:$4 sm:$0xff]   ;;  %v7599_v19 = vld [vmem:[%s10248_s1 + $0x13a4] ss:$16 sps:$4 sm:$0xff]  }
 0x238   :  { %5096 = vmatprep.subr.bf16.mxu0 %v7507_v20  ;;  %5588 = vmatprep.subr.bf16.mxu1 %v7510_v16  ;;  %v7602_v20 = vld [vmem:[%s10248_s1 + $0x13ac] ss:$16 sps:$4 sm:$0xff]   ;;  %v7597_v16 = vld [vmem:[%s10248_s1 + $0x13a0] ss:$16 sps:$4 sm:$0xff]  }
 0x23b   :  { %5097 = vmatpush1.bf16.msra.mxu0 %v7505_v22  ;;  %5589 = vmatpush1.bf16.msra.mxu1 %v7508_v23  ;;  %v7600_v22 = vld [vmem:[%s10248_s1 + $0x13a8] ss:$16 sps:$4 sm:$0xff]   ;;  %v7605_v23 = vld [vmem:[%s10248_s1 + $0x13c4] ss:$16 sps:$4 sm:$0xff]  }
 0x23c   :  { %5098 = vmatprep.subr.bf16.mxu0 %v7513_v18  ;;  %5590 = vmatprep.subr.bf16.mxu1 %v7516_v25  ;;  %v7608_v18 = vld [vmem:[%s10248_s1 + $0x13cc] ss:$16 sps:$4 sm:$0xff]   ;;  %v7603_v25 = vld [vmem:[%s10248_s1 + $0x13c0] ss:$16 sps:$4 sm:$0xff]  }
 0x23f   :  { %5099 = vmatpush1.bf16.msra.mxu0 %v7511_v26  ;;  %5591 = vmatpush1.bf16.msra.mxu1 %v7514_v27  ;;  %v7606_v26 = vld [vmem:[%s10248_s1 + $0x13c8] ss:$16 sps:$4 sm:$0xff]   ;;  %v7611_v27 = vld [vmem:[%s10248_s1 + $0x13e4] ss:$16 sps:$4 sm:$0xff]  }
 0x240   :  { %5109 = vmatprep.subr.bf16.mxu0 %v7521_v28  ;;  %5601 = vmatprep.subr.bf16.mxu1 %v7524_v29  ;;  %v7614_v28 = vld [vmem:[%s10248_s1 + $0x13ec] ss:$16 sps:$4 sm:$0xff]   ;;  %v7609_v29 = vld [vmem:[%s10248_s1 + $0x13e0] ss:$16 sps:$4 sm:$0xff]  }
 0x242   :  { %5101 = vmatmul.mubr.bf16.vlgmr.msra.gmra.mrb[0].mxu0 %v5765_v24  ;;  %5593 = vmatmul.mubr.bf16.vlgmr.msra.gmra.mrb[0].mxu1 %v5765_v24  ;;  %v7612_v24 = vld [vmem:[%s10248_s1 + $0x13e8] ss:$16 sps:$4 sm:$0xff]  }
 0x243   :  { %5110 = vmatpush1.bf16.msra.mxu0 %v7519_v31  ;;  %5602 = vmatpush1.bf16.msra.mxu1 %v7522_v32  ;;  %v7619_v31 = vld [vmem:[%s10248_s1 + $0x1404] ss:$16 sps:$4 sm:$0xff]   ;;  %v7622_v32 = vld [vmem:[%s10248_s1 + $0x140c] ss:$16 sps:$4 sm:$0xff]  }
 0x244   :  { %5111 = vmatprep.subr.bf16.mxu0 %v7527_v21  ;;  %5603 = vmatprep.subr.bf16.mxu1 %v7530_v33  ;;  %v5767_v21 = vcombine.low %v9645_v30, %v9645_v30  ;;  %v9846_v33 = vld [vmem:[%s10249_s0 + $0x50] sm:$0xff] }
 0x245   :  { %5141 = vmatprep.mubr.bf16.mxu0 %v5768_v34  ;;  %5633 = vmatprep.mubr.bf16.mxu1 %v5768_v34  ;;  %v7617_v34 = vld [vmem:[%s10248_s1 + $0x1400] ss:$16 sps:$4 sm:$0xff]   ;;  %v7625_v30 = vld [vmem:[%s10248_s1 + $0x1424] ss:$16 sps:$4 sm:$0xff]  }
 0x247   :  { %5112 = vmatpush1.bf16.msra.mxu0 %v7525_v35  ;;  %5604 = vmatpush1.bf16.msra.mxu1 %v7528_v36  ;;  %v7620_v35 = vld [vmem:[%s10248_s1 + $0x1408] ss:$16 sps:$4 sm:$0xff]   ;;  %v7628_v36 = vld [vmem:[%s10248_s1 + $0x142c] ss:$16 sps:$4 sm:$0xff]  }
 0x248   :  { %5113 = vmatprep.subr.bf16.mxu0 %v7533_v37  ;;  %5605 = vmatprep.subr.bf16.mxu1 %v7536_v38  ;;  %v5770_v37 = vcombine.high %v9846_v33, %v9846_v33  ;;  %v7623_v38 = vld [vmem:[%s10248_s1 + $0x1420] ss:$16 sps:$4 sm:$0xff]  }
 0x24b   :  { %5114 = vmatpush1.bf16.msra.mxu0 %v7531_v39  ;;  %5606 = vmatpush1.bf16.msra.mxu1 %v7534_v40  ;;  %v7626_v39 = vld [vmem:[%s10248_s1 + $0x1428] ss:$16 sps:$4 sm:$0xff]   ;;  %v7631_v40 = vld [vmem:[%s10248_s1 + $0x1444] ss:$16 sps:$4 sm:$0xff]  }
 0x24c   :  { %5115 = vmatprep.subr.bf16.mxu0 %v7539_v41  ;;  %5607 = vmatprep.subr.bf16.mxu1 %v7542_v42  ;;  %v7634_v41 = vld [vmem:[%s10248_s1 + $0x144c] ss:$16 sps:$4 sm:$0xff]   ;;  %v7629_v42 = vld [vmem:[%s10248_s1 + $0x1440] ss:$16 sps:$4 sm:$0xff]  }
 0x24f   :  { %5116 = vmatpush1.bf16.msra.mxu0 %v7537_v43  ;;  %5608 = vmatpush1.bf16.msra.mxu1 %v7540_v44  ;;  %v7632_v43 = vld [vmem:[%s10248_s1 + $0x1448] ss:$16 sps:$4 sm:$0xff]   ;;  %v7637_v44 = vld [vmem:[%s10248_s1 + $0x1464] ss:$16 sps:$4 sm:$0xff]  }
 0x250   :  { %5117 = vmatprep.subr.bf16.mxu0 %v7545_v45  ;;  %5609 = vmatprep.subr.bf16.mxu1 %v7548_v46  ;;  %v7640_v45 = vld [vmem:[%s10248_s1 + $0x146c] ss:$16 sps:$4 sm:$0xff]   ;;  %v7635_v46 = vld [vmem:[%s10248_s1 + $0x1460] ss:$16 sps:$4 sm:$0xff]  }
 0x253   :  { %5118 = vmatpush1.bf16.msra.mxu0 %v7543_v47  ;;  %5610 = vmatpush1.bf16.msra.mxu1 %v7546_v48  ;;  %v7638_v47 = vld [vmem:[%s10248_s1 + $0x1468] ss:$16 sps:$4 sm:$0xff]   ;;  %v7643_v48 = vld [vmem:[%s10248_s1 + $0x1484] ss:$16 sps:$4 sm:$0xff]  }
 0x254   :  { %5119 = vmatprep.subr.bf16.mxu0 %v7551_v49  ;;  %5611 = vmatprep.subr.bf16.mxu1 %v7554_v50  ;;  %v7646_v49 = vld [vmem:[%s10248_s1 + $0x148c] ss:$16 sps:$4 sm:$0xff]   ;;  %v7641_v50 = vld [vmem:[%s10248_s1 + $0x1480] ss:$16 sps:$4 sm:$0xff]  }
 0x257   :  { %5120 = vmatpush1.bf16.msra.mxu0 %v7549_v51  ;;  %5612 = vmatpush1.bf16.msra.mxu1 %v7552_v52  ;;  %v7644_v51 = vld [vmem:[%s10248_s1 + $0x1488] ss:$16 sps:$4 sm:$0xff]   ;;  %v7649_v52 = vld [vmem:[%s10248_s1 + $0x14a4] ss:$16 sps:$4 sm:$0xff]  }
 0x258   :  { %5121 = vmatprep.subr.bf16.mxu0 %v7557_v53  ;;  %5613 = vmatprep.subr.bf16.mxu1 %v7560_v54  ;;  %v7652_v53 = vld [vmem:[%s10248_s1 + $0x14ac] ss:$16 sps:$4 sm:$0xff]   ;;  %v7647_v54 = vld [vmem:[%s10248_s1 + $0x14a0] ss:$16 sps:$4 sm:$0xff]  }
 0x25b   :  { %5122 = vmatpush1.bf16.msra.mxu0 %v7555_v55  ;;  %5614 = vmatpush1.bf16.msra.mxu1 %v7558_v56  ;;  %v7650_v55 = vld [vmem:[%s10248_s1 + $0x14a8] ss:$16 sps:$4 sm:$0xff]   ;;  %v7655_v56 = vld [vmem:[%s10248_s1 + $0x14c4] ss:$16 sps:$4 sm:$0xff]  }
 0x25c   :  { %5123 = vmatprep.subr.bf16.mxu0 %v7563_v57  ;;  %5615 = vmatprep.subr.bf16.mxu1 %v7566_v58  ;;  %v7658_v57 = vld [vmem:[%s10248_s1 + $0x14cc] ss:$16 sps:$4 sm:$0xff]   ;;  %v7653_v58 = vld [vmem:[%s10248_s1 + $0x14c0] ss:$16 sps:$4 sm:$0xff]  }
 0x25f   :  { %5124 = vmatpush1.bf16.msra.mxu0 %v7561_v59  ;;  %5616 = vmatpush1.bf16.msra.mxu1 %v7564_v60  ;;  %v7656_v59 = vld [vmem:[%s10248_s1 + $0x14c8] ss:$16 sps:$4 sm:$0xff]   ;;  %v7661_v60 = vld [vmem:[%s10248_s1 + $0x14e4] ss:$16 sps:$4 sm:$0xff]  }
 0x260   :  { %5125 = vmatprep.subr.bf16.mxu0 %v7569_v61  ;;  %5617 = vmatprep.subr.bf16.mxu1 %v7572_v62  ;;  %v7664_v61 = vld [vmem:[%s10248_s1 + $0x14ec] ss:$16 sps:$4 sm:$0xff]   ;;  %v7659_v62 = vld [vmem:[%s10248_s1 + $0x14e0] ss:$16 sps:$4 sm:$0xff]  }
 0x263   :  { %5126 = vmatpush1.bf16.msra.mxu0 %v7567_v63  ;;  %5618 = vmatpush1.bf16.msra.mxu1 %v7570_v0  ;;  %v7662_v63 = vld [vmem:[%s10248_s1 + $0x14e8] ss:$16 sps:$4 sm:$0xff]   ;;  %v7667_v0 = vld [vmem:[%s10248_s1 + $0x1504] ss:$16 sps:$4 sm:$0xff]  }
 0x264   :  { %5127 = vmatprep.subr.bf16.mxu0 %v7575_v1  ;;  %5619 = vmatprep.subr.bf16.mxu1 %v7578_v2  ;;  %v7670_v1 = vld [vmem:[%s10248_s1 + $0x150c] ss:$16 sps:$4 sm:$0xff]   ;;  %v7665_v2 = vld [vmem:[%s10248_s1 + $0x1500] ss:$16 sps:$4 sm:$0xff]  }
 0x267   :  { %5128 = vmatpush1.bf16.msra.mxu0 %v7573_v3  ;;  %5620 = vmatpush1.bf16.msra.mxu1 %v7576_v4  ;;  %v7668_v3 = vld [vmem:[%s10248_s1 + $0x1508] ss:$16 sps:$4 sm:$0xff]   ;;  %v7673_v4 = vld [vmem:[%s10248_s1 + $0x1524] ss:$16 sps:$4 sm:$0xff]  }
 0x268   :  { %5129 = vmatprep.subr.bf16.mxu0 %v7581_v5  ;;  %5621 = vmatprep.subr.bf16.mxu1 %v7584_v6  ;;  %v7676_v5 = vld [vmem:[%s10248_s1 + $0x152c] ss:$16 sps:$4 sm:$0xff]   ;;  %v7671_v6 = vld [vmem:[%s10248_s1 + $0x1520] ss:$16 sps:$4 sm:$0xff]  }
 0x26b   :  { %5130 = vmatpush1.bf16.msra.mxu0 %v7579_v7  ;;  %5622 = vmatpush1.bf16.msra.mxu1 %v7582_v8  ;;  %v7674_v7 = vld [vmem:[%s10248_s1 + $0x1528] ss:$16 sps:$4 sm:$0xff]   ;;  %v7679_v8 = vld [vmem:[%s10248_s1 + $0x1544] ss:$16 sps:$4 sm:$0xff]  }
 0x26c   :  { %5131 = vmatprep.subr.bf16.mxu0 %v7587_v9  ;;  %5623 = vmatprep.subr.bf16.mxu1 %v7590_v10  ;;  %v7682_v9 = vld [vmem:[%s10248_s1 + $0x154c] ss:$16 sps:$4 sm:$0xff]   ;;  %v7677_v10 = vld [vmem:[%s10248_s1 + $0x1540] ss:$16 sps:$4 sm:$0xff]  }
 0x26f   :  { %5132 = vmatpush1.bf16.msra.mxu0 %v7585_v12  ;;  %5624 = vmatpush1.bf16.msra.mxu1 %v7588_v13  ;;  %v7680_v12 = vld [vmem:[%s10248_s1 + $0x1548] ss:$16 sps:$4 sm:$0xff]   ;;  %v7685_v13 = vld [vmem:[%s10248_s1 + $0x1564] ss:$16 sps:$4 sm:$0xff]  }
 0x270   :  { %5133 = vmatprep.subr.bf16.mxu0 %v7593_v15  ;;  %5625 = vmatprep.subr.bf16.mxu1 %v7596_v11  ;;  %v7688_v15 = vld [vmem:[%s10248_s1 + $0x156c] ss:$16 sps:$4 sm:$0xff]   ;;  %v7683_v11 = vld [vmem:[%s10248_s1 + $0x1560] ss:$16 sps:$4 sm:$0xff]  }
 0x273   :  { %5134 = vmatpush1.bf16.msra.mxu0 %v7591_v17  ;;  %5626 = vmatpush1.bf16.msra.mxu1 %v7594_v14  ;;  %v7686_v17 = vld [vmem:[%s10248_s1 + $0x1568] ss:$16 sps:$4 sm:$0xff]   ;;  %v7691_v14 = vld [vmem:[%s10248_s1 + $0x1584] ss:$16 sps:$4 sm:$0xff]  }
 0x274   :  { %5135 = vmatprep.subr.bf16.mxu0 %v7599_v19  ;;  %5627 = vmatprep.subr.bf16.mxu1 %v7602_v20  ;;  %v7694_v19 = vld [vmem:[%s10248_s1 + $0x158c] ss:$16 sps:$4 sm:$0xff]   ;;  %v7689_v20 = vld [vmem:[%s10248_s1 + $0x1580] ss:$16 sps:$4 sm:$0xff]  }
 0x277   :  { %5136 = vmatpush1.bf16.msra.mxu0 %v7597_v16  ;;  %5628 = vmatpush1.bf16.msra.mxu1 %v7600_v22  ;;  %v7692_v16 = vld [vmem:[%s10248_s1 + $0x1588] ss:$16 sps:$4 sm:$0xff]   ;;  %v7697_v22 = vld [vmem:[%s10248_s1 + $0x15a4] ss:$16 sps:$4 sm:$0xff]  }
 0x278   :  { %5137 = vmatprep.subr.bf16.mxu0 %v7605_v23  ;;  %5629 = vmatprep.subr.bf16.mxu1 %v7608_v18  ;;  %v7700_v23 = vld [vmem:[%s10248_s1 + $0x15ac] ss:$16 sps:$4 sm:$0xff]   ;;  %v7695_v18 = vld [vmem:[%s10248_s1 + $0x15a0] ss:$16 sps:$4 sm:$0xff]  }
 0x27b   :  { %5138 = vmatpush1.bf16.msra.mxu0 %v7603_v25  ;;  %5630 = vmatpush1.bf16.msra.mxu1 %v7606_v26  ;;  %v7698_v25 = vld [vmem:[%s10248_s1 + $0x15a8] ss:$16 sps:$4 sm:$0xff]   ;;  %v7703_v26 = vld [vmem:[%s10248_s1 + $0x15c4] ss:$16 sps:$4 sm:$0xff]  }
 0x27c   :  { %5139 = vmatprep.subr.bf16.mxu0 %v7611_v27  ;;  %5631 = vmatprep.subr.bf16.mxu1 %v7614_v28  ;;  %v7706_v27 = vld [vmem:[%s10248_s1 + $0x15cc] ss:$16 sps:$4 sm:$0xff]   ;;  %v7701_v28 = vld [vmem:[%s10248_s1 + $0x15c0] ss:$16 sps:$4 sm:$0xff]  }
 0x27f   :  { %5140 = vmatpush1.bf16.msra.mxu0 %v7609_v29  ;;  %5632 = vmatpush1.bf16.msra.mxu1 %v7612_v24  ;;  %v7704_v29 = vld [vmem:[%s10248_s1 + $0x15c8] ss:$16 sps:$4 sm:$0xff]   ;;  %v7709_v24 = vld [vmem:[%s10248_s1 + $0x15e4] ss:$16 sps:$4 sm:$0xff]  }
 0x280   :  { %5150 = vmatprep.subr.bf16.mxu0 %v7619_v31  ;;  %5642 = vmatprep.subr.bf16.mxu1 %v7622_v32  ;;  %v7712_v31 = vld [vmem:[%s10248_s1 + $0x15ec] ss:$16 sps:$4 sm:$0xff]   ;;  %v7707_v32 = vld [vmem:[%s10248_s1 + $0x15e0] ss:$16 sps:$4 sm:$0xff]  }
 0x282   :  { %5142 = vmatmul.mubr.bf16.vlgmr.msra.gmra.mrb[0].mxu0 %v5767_v21  ;;  %5634 = vmatmul.mubr.bf16.vlgmr.msra.gmra.mrb[0].mxu1 %v5767_v21  ;;  %v7710_v21 = vld [vmem:[%s10248_s1 + $0x15e8] ss:$16 sps:$4 sm:$0xff]  }
 0x283   :  { %5151 = vmatpush1.bf16.msra.mxu0 %v7617_v34  ;;  %5643 = vmatpush1.bf16.msra.mxu1 %v7620_v35  ;;  %v7717_v34 = vld [vmem:[%s10248_s1 + $0x1604] ss:$16 sps:$4 sm:$0xff]   ;;  %v7720_v35 = vld [vmem:[%s10248_s1 + $0x160c] ss:$16 sps:$4 sm:$0xff]  }
 0x284   :  { %5152 = vmatprep.subr.bf16.mxu0 %v7625_v30  ;;  %5644 = vmatprep.subr.bf16.mxu1 %v7628_v36  ;;  %v5769_v30 = vcombine.low %v9846_v33, %v9846_v33  ;;  %v10047_v36 = vld [vmem:[%s10249_s0 + $0x58] sm:$0xff]  ;;  %v7723_v33 = vld [vmem:[%s10248_s1 + $0x1624] ss:$16 sps:$4 sm:$0xff]  }
 0x285   :  { %5182 = vmatprep.mubr.bf16.mxu0 %v5770_v37  ;;  %5674 = vmatprep.mubr.bf16.mxu1 %v5770_v37  ;;  %v7715_v37 = vld [vmem:[%s10248_s1 + $0x1600] ss:$16 sps:$4 sm:$0xff]  }
 0x287   :  { %5153 = vmatpush1.bf16.msra.mxu0 %v7623_v38  ;;  %5645 = vmatpush1.bf16.msra.mxu1 %v7626_v39  ;;  %v7718_v38 = vld [vmem:[%s10248_s1 + $0x1608] ss:$16 sps:$4 sm:$0xff]   ;;  %v7726_v39 = vld [vmem:[%s10248_s1 + $0x162c] ss:$16 sps:$4 sm:$0xff]  }
 0x288   :  { %5154 = vmatprep.subr.bf16.mxu0 %v7631_v40  ;;  %5646 = vmatprep.subr.bf16.mxu1 %v7634_v41  ;;  %v5772_v40 = vcombine.high %v10047_v36, %v10047_v36  ;;  %v7721_v41 = vld [vmem:[%s10248_s1 + $0x1620] ss:$16 sps:$4 sm:$0xff]  }
 0x28b   :  { %5155 = vmatpush1.bf16.msra.mxu0 %v7629_v42  ;;  %5647 = vmatpush1.bf16.msra.mxu1 %v7632_v43  ;;  %v7724_v42 = vld [vmem:[%s10248_s1 + $0x1628] ss:$16 sps:$4 sm:$0xff]   ;;  %v7729_v43 = vld [vmem:[%s10248_s1 + $0x1644] ss:$16 sps:$4 sm:$0xff]  }
 0x28c   :  { %5156 = vmatprep.subr.bf16.mxu0 %v7637_v44  ;;  %5648 = vmatprep.subr.bf16.mxu1 %v7640_v45  ;;  %v7732_v44 = vld [vmem:[%s10248_s1 + $0x164c] ss:$16 sps:$4 sm:$0xff]   ;;  %v7727_v45 = vld [vmem:[%s10248_s1 + $0x1640] ss:$16 sps:$4 sm:$0xff]  }
 0x28f   :  { %5157 = vmatpush1.bf16.msra.mxu0 %v7635_v46  ;;  %5649 = vmatpush1.bf16.msra.mxu1 %v7638_v47  ;;  %v7730_v46 = vld [vmem:[%s10248_s1 + $0x1648] ss:$16 sps:$4 sm:$0xff]   ;;  %v7735_v47 = vld [vmem:[%s10248_s1 + $0x1664] ss:$16 sps:$4 sm:$0xff]  }
 0x290   :  { %5158 = vmatprep.subr.bf16.mxu0 %v7643_v48  ;;  %5650 = vmatprep.subr.bf16.mxu1 %v7646_v49  ;;  %v7738_v48 = vld [vmem:[%s10248_s1 + $0x166c] ss:$16 sps:$4 sm:$0xff]   ;;  %v7733_v49 = vld [vmem:[%s10248_s1 + $0x1660] ss:$16 sps:$4 sm:$0xff]  }
 0x293   :  { %5159 = vmatpush1.bf16.msra.mxu0 %v7641_v50  ;;  %5651 = vmatpush1.bf16.msra.mxu1 %v7644_v51  ;;  %v7736_v50 = vld [vmem:[%s10248_s1 + $0x1668] ss:$16 sps:$4 sm:$0xff]   ;;  %v7741_v51 = vld [vmem:[%s10248_s1 + $0x1684] ss:$16 sps:$4 sm:$0xff]  }
 0x294   :  { %5160 = vmatprep.subr.bf16.mxu0 %v7649_v52  ;;  %5652 = vmatprep.subr.bf16.mxu1 %v7652_v53  ;;  %v7744_v52 = vld [vmem:[%s10248_s1 + $0x168c] ss:$16 sps:$4 sm:$0xff]   ;;  %v7739_v53 = vld [vmem:[%s10248_s1 + $0x1680] ss:$16 sps:$4 sm:$0xff]  }
 0x297   :  { %5161 = vmatpush1.bf16.msra.mxu0 %v7647_v54  ;;  %5653 = vmatpush1.bf16.msra.mxu1 %v7650_v55  ;;  %v7742_v54 = vld [vmem:[%s10248_s1 + $0x1688] ss:$16 sps:$4 sm:$0xff]   ;;  %v7747_v55 = vld [vmem:[%s10248_s1 + $0x16a4] ss:$16 sps:$4 sm:$0xff]  }
 0x298   :  { %5162 = vmatprep.subr.bf16.mxu0 %v7655_v56  ;;  %5654 = vmatprep.subr.bf16.mxu1 %v7658_v57  ;;  %v7750_v56 = vld [vmem:[%s10248_s1 + $0x16ac] ss:$16 sps:$4 sm:$0xff]   ;;  %v7745_v57 = vld [vmem:[%s10248_s1 + $0x16a0] ss:$16 sps:$4 sm:$0xff]  }
 0x29b   :  { %5163 = vmatpush1.bf16.msra.mxu0 %v7653_v58  ;;  %5655 = vmatpush1.bf16.msra.mxu1 %v7656_v59  ;;  %v7748_v58 = vld [vmem:[%s10248_s1 + $0x16a8] ss:$16 sps:$4 sm:$0xff]   ;;  %v7753_v59 = vld [vmem:[%s10248_s1 + $0x16c4] ss:$16 sps:$4 sm:$0xff]  }
 0x29c   :  { %5164 = vmatprep.subr.bf16.mxu0 %v7661_v60  ;;  %5656 = vmatprep.subr.bf16.mxu1 %v7664_v61  ;;  %v7756_v60 = vld [vmem:[%s10248_s1 + $0x16cc] ss:$16 sps:$4 sm:$0xff]   ;;  %v7751_v61 = vld [vmem:[%s10248_s1 + $0x16c0] ss:$16 sps:$4 sm:$0xff]  }
 0x29f   :  { %5165 = vmatpush1.bf16.msra.mxu0 %v7659_v62  ;;  %5657 = vmatpush1.bf16.msra.mxu1 %v7662_v63  ;;  %v7754_v62 = vld [vmem:[%s10248_s1 + $0x16c8] ss:$16 sps:$4 sm:$0xff]   ;;  %v7759_v63 = vld [vmem:[%s10248_s1 + $0x16e4] ss:$16 sps:$4 sm:$0xff]  }
 0x2a0   :  { %5166 = vmatprep.subr.bf16.mxu0 %v7667_v0  ;;  %5658 = vmatprep.subr.bf16.mxu1 %v7670_v1  ;;  %v7762_v0 = vld [vmem:[%s10248_s1 + $0x16ec] ss:$16 sps:$4 sm:$0xff]   ;;  %v7757_v1 = vld [vmem:[%s10248_s1 + $0x16e0] ss:$16 sps:$4 sm:$0xff]  }
 0x2a3   :  { %5167 = vmatpush1.bf16.msra.mxu0 %v7665_v2  ;;  %5659 = vmatpush1.bf16.msra.mxu1 %v7668_v3  ;;  %v7760_v2 = vld [vmem:[%s10248_s1 + $0x16e8] ss:$16 sps:$4 sm:$0xff]   ;;  %v7765_v3 = vld [vmem:[%s10248_s1 + $0x1704] ss:$16 sps:$4 sm:$0xff]  }
 0x2a4   :  { %5168 = vmatprep.subr.bf16.mxu0 %v7673_v4  ;;  %5660 = vmatprep.subr.bf16.mxu1 %v7676_v5  ;;  %v7768_v4 = vld [vmem:[%s10248_s1 + $0x170c] ss:$16 sps:$4 sm:$0xff]   ;;  %v7763_v5 = vld [vmem:[%s10248_s1 + $0x1700] ss:$16 sps:$4 sm:$0xff]  }
 0x2a7   :  { %5169 = vmatpush1.bf16.msra.mxu0 %v7671_v6  ;;  %5661 = vmatpush1.bf16.msra.mxu1 %v7674_v7  ;;  %v7766_v6 = vld [vmem:[%s10248_s1 + $0x1708] ss:$16 sps:$4 sm:$0xff]   ;;  %v7771_v7 = vld [vmem:[%s10248_s1 + $0x1724] ss:$16 sps:$4 sm:$0xff]  }
 0x2a8   :  { %5170 = vmatprep.subr.bf16.mxu0 %v7679_v8  ;;  %5662 = vmatprep.subr.bf16.mxu1 %v7682_v9  ;;  %v7774_v8 = vld [vmem:[%s10248_s1 + $0x172c] ss:$16 sps:$4 sm:$0xff]   ;;  %v7769_v9 = vld [vmem:[%s10248_s1 + $0x1720] ss:$16 sps:$4 sm:$0xff]  }
 0x2ab   :  { %5171 = vmatpush1.bf16.msra.mxu0 %v7677_v10  ;;  %5663 = vmatpush1.bf16.msra.mxu1 %v7680_v12  ;;  %v7772_v10 = vld [vmem:[%s10248_s1 + $0x1728] ss:$16 sps:$4 sm:$0xff]   ;;  %v7777_v12 = vld [vmem:[%s10248_s1 + $0x1744] ss:$16 sps:$4 sm:$0xff]  }
 0x2ac   :  { %5172 = vmatprep.subr.bf16.mxu0 %v7685_v13  ;;  %5664 = vmatprep.subr.bf16.mxu1 %v7688_v15  ;;  %v7780_v13 = vld [vmem:[%s10248_s1 + $0x174c] ss:$16 sps:$4 sm:$0xff]   ;;  %v7775_v15 = vld [vmem:[%s10248_s1 + $0x1740] ss:$16 sps:$4 sm:$0xff]  }
 0x2af   :  { %5173 = vmatpush1.bf16.msra.mxu0 %v7683_v11  ;;  %5665 = vmatpush1.bf16.msra.mxu1 %v7686_v17  ;;  %v7778_v11 = vld [vmem:[%s10248_s1 + $0x1748] ss:$16 sps:$4 sm:$0xff]   ;;  %v7783_v17 = vld [vmem:[%s10248_s1 + $0x1764] ss:$16 sps:$4 sm:$0xff]  }
 0x2b0   :  { %5174 = vmatprep.subr.bf16.mxu0 %v7691_v14  ;;  %5666 = vmatprep.subr.bf16.mxu1 %v7694_v19  ;;  %v7786_v14 = vld [vmem:[%s10248_s1 + $0x176c] ss:$16 sps:$4 sm:$0xff]   ;;  %v7781_v19 = vld [vmem:[%s10248_s1 + $0x1760] ss:$16 sps:$4 sm:$0xff]  }
 0x2b3   :  { %5175 = vmatpush1.bf16.msra.mxu0 %v7689_v20  ;;  %5667 = vmatpush1.bf16.msra.mxu1 %v7692_v16  ;;  %v7784_v20 = vld [vmem:[%s10248_s1 + $0x1768] ss:$16 sps:$4 sm:$0xff]   ;;  %v7789_v16 = vld [vmem:[%s10248_s1 + $0x1784] ss:$16 sps:$4 sm:$0xff]  }
 0x2b4   :  { %5176 = vmatprep.subr.bf16.mxu0 %v7697_v22  ;;  %5668 = vmatprep.subr.bf16.mxu1 %v7700_v23  ;;  %v7792_v22 = vld [vmem:[%s10248_s1 + $0x178c] ss:$16 sps:$4 sm:$0xff]   ;;  %v7787_v23 = vld [vmem:[%s10248_s1 + $0x1780] ss:$16 sps:$4 sm:$0xff]  }
 0x2b7   :  { %5177 = vmatpush1.bf16.msra.mxu0 %v7695_v18  ;;  %5669 = vmatpush1.bf16.msra.mxu1 %v7698_v25  ;;  %v7790_v18 = vld [vmem:[%s10248_s1 + $0x1788] ss:$16 sps:$4 sm:$0xff]   ;;  %v7795_v25 = vld [vmem:[%s10248_s1 + $0x17a4] ss:$16 sps:$4 sm:$0xff]  }
 0x2b8   :  { %5178 = vmatprep.subr.bf16.mxu0 %v7703_v26  ;;  %5670 = vmatprep.subr.bf16.mxu1 %v7706_v27  ;;  %v7798_v26 = vld [vmem:[%s10248_s1 + $0x17ac] ss:$16 sps:$4 sm:$0xff]   ;;  %v7793_v27 = vld [vmem:[%s10248_s1 + $0x17a0] ss:$16 sps:$4 sm:$0xff]  }
 0x2bb   :  { %5179 = vmatpush1.bf16.msra.mxu0 %v7701_v28  ;;  %5671 = vmatpush1.bf16.msra.mxu1 %v7704_v29  ;;  %v7796_v28 = vld [vmem:[%s10248_s1 + $0x17a8] ss:$16 sps:$4 sm:$0xff]   ;;  %v7801_v29 = vld [vmem:[%s10248_s1 + $0x17c4] ss:$16 sps:$4 sm:$0xff]  }
 0x2bc   :  { %5180 = vmatprep.subr.bf16.mxu0 %v7709_v24  ;;  %5672 = vmatprep.subr.bf16.mxu1 %v7712_v31  ;;  %v7804_v24 = vld [vmem:[%s10248_s1 + $0x17cc] ss:$16 sps:$4 sm:$0xff]   ;;  %v7799_v31 = vld [vmem:[%s10248_s1 + $0x17c0] ss:$16 sps:$4 sm:$0xff]  }
 0x2bf   :  { %5181 = vmatpush1.bf16.msra.mxu0 %v7707_v32  ;;  %5673 = vmatpush1.bf16.msra.mxu1 %v7710_v21  ;;  %v7802_v32 = vld [vmem:[%s10248_s1 + $0x17c8] ss:$16 sps:$4 sm:$0xff]   ;;  %v7807_v21 = vld [vmem:[%s10248_s1 + $0x17e4] ss:$16 sps:$4 sm:$0xff]  }
 0x2c0   :  { %5191 = vmatprep.subr.bf16.mxu0 %v7717_v34  ;;  %5683 = vmatprep.subr.bf16.mxu1 %v7720_v35  ;;  %v7810_v34 = vld [vmem:[%s10248_s1 + $0x17ec] ss:$16 sps:$4 sm:$0xff]   ;;  %v7805_v35 = vld [vmem:[%s10248_s1 + $0x17e0] ss:$16 sps:$4 sm:$0xff]  }
 0x2c2   :  { %5183 = vmatmul.mubr.bf16.vlgmr.msra.gmra.mrb[0].mxu0 %v5769_v30  ;;  %5675 = vmatmul.mubr.bf16.vlgmr.msra.gmra.mrb[0].mxu1 %v5769_v30  ;;  %v7808_v30 = vld [vmem:[%s10248_s1 + $0x17e8] ss:$16 sps:$4 sm:$0xff]  }
 0x2c3   :  { %5192 = vmatpush1.bf16.msra.mxu0 %v7715_v37  ;;  %5684 = vmatpush1.bf16.msra.mxu1 %v7718_v38  ;;  %v5771_v37 = vcombine.low %v10047_v36, %v10047_v36  ;;  %v796_v38 = vlaneseq }
 0x2c4   :  { %5193 = vmatprep.subr.bf16.mxu0 %v7723_v33  ;;  %5685 = vmatprep.subr.bf16.mxu1 %v7726_v39 }
 0x2c5   :  { %5223 = vmatprep.mubr.bf16.mxu0 %v5772_v40  ;;  %5715 = vmatprep.mubr.bf16.mxu1 %v5772_v40  ;;  %v797_v33 = vshrl.u32 %v796_v38, 7 }
 0x2c7   :  { %5194 = vmatpush1.bf16.msra.mxu0 %v7721_v41  ;;  %5686 = vmatpush1.bf16.msra.mxu1 %v7724_v42  ;;  %v798_v39 = vsub.s32 0, %v797_v33  ;;  %v806_v40 = vsub.s32 2, %v797_v33  ;;  %v794_v41 = vld [vmem:[%s10250_s2] sm:$0xf]  ;;  %v802_v42 = vsub.s32 1, %v797_v33 }
 0x2c8   :  { %5195 = vmatprep.subr.bf16.mxu0 %v7729_v43  ;;  %5687 = vmatprep.subr.bf16.mxu1 %v7732_v44  ;;  %v810_v43 = vsub.s32 3, %v797_v33 }
 0x2c9   :  { %v799_v44 = vrot.slane %v794_v41, %v798_v39 }
 0x2cb   :  { %5196 = vmatpush1.bf16.msra.mxu0 %v7727_v45  ;;  %5688 = vmatpush1.bf16.msra.mxu1 %v7730_v46  ;;  %v807_v45 = vrot.slane %v794_v41, %v806_v40  ;;  %v803_v46 = vrot.slane %v794_v41, %v802_v42 }
 0x2cc   :  { %5197 = vmatprep.subr.bf16.mxu0 %v7735_v47  ;;  %5689 = vmatprep.subr.bf16.mxu1 %v7738_v48  ;;  %v811_v47 = vrot.slane %v794_v41, %v810_v43 }
 0x2cf   :  { %5198 = vmatpush1.bf16.msra.mxu0 %v7733_v49  ;;  %5690 = vmatpush1.bf16.msra.mxu1 %v7736_v50 }
 0x2d0   :  { %5199 = vmatprep.subr.bf16.mxu0 %v7741_v51  ;;  %5691 = vmatprep.subr.bf16.mxu1 %v7744_v52 }
 0x2d3   :  { %5200 = vmatpush1.bf16.msra.mxu0 %v7739_v53  ;;  %5692 = vmatpush1.bf16.msra.mxu1 %v7742_v54 }
 0x2d4   :  { %5201 = vmatprep.subr.bf16.mxu0 %v7747_v55  ;;  %5693 = vmatprep.subr.bf16.mxu1 %v7750_v56 }
 0x2d7   :  { %5202 = vmatpush1.bf16.msra.mxu0 %v7745_v57  ;;  %5694 = vmatpush1.bf16.msra.mxu1 %v7748_v58 }
 0x2d8   :  { %5203 = vmatprep.subr.bf16.mxu0 %v7753_v59  ;;  %5695 = vmatprep.subr.bf16.mxu1 %v7756_v60 }
 0x2db   :  { %5204 = vmatpush1.bf16.msra.mxu0 %v7751_v61  ;;  %5696 = vmatpush1.bf16.msra.mxu1 %v7754_v62 }
 0x2dc   :  { %5205 = vmatprep.subr.bf16.mxu0 %v7759_v63  ;;  %5697 = vmatprep.subr.bf16.mxu1 %v7762_v0 }
 0x2df   :  { %5206 = vmatpush1.bf16.msra.mxu0 %v7757_v1  ;;  %5698 = vmatpush1.bf16.msra.mxu1 %v7760_v2 }
 0x2e0   :  { %5207 = vmatprep.subr.bf16.mxu0 %v7765_v3  ;;  %5699 = vmatprep.subr.bf16.mxu1 %v7768_v4 }
 0x2e3   :  { %5208 = vmatpush1.bf16.msra.mxu0 %v7763_v5  ;;  %5700 = vmatpush1.bf16.msra.mxu1 %v7766_v6 }
 0x2e4   :  { %5209 = vmatprep.subr.bf16.mxu0 %v7771_v7  ;;  %5701 = vmatprep.subr.bf16.mxu1 %v7774_v8 }
 0x2e7   :  { %5210 = vmatpush1.bf16.msra.mxu0 %v7769_v9  ;;  %5702 = vmatpush1.bf16.msra.mxu1 %v7772_v10 }
 0x2e8   :  { %5211 = vmatprep.subr.bf16.mxu0 %v7777_v12  ;;  %5703 = vmatprep.subr.bf16.mxu1 %v7780_v13 }
 0x2eb   :  { %5212 = vmatpush1.bf16.msra.mxu0 %v7775_v15  ;;  %5704 = vmatpush1.bf16.msra.mxu1 %v7778_v11 }
 0x2ec   :  { %5213 = vmatprep.subr.bf16.mxu0 %v7783_v17  ;;  %5705 = vmatprep.subr.bf16.mxu1 %v7786_v14 }
 0x2ef   :  { %5214 = vmatpush1.bf16.msra.mxu0 %v7781_v19  ;;  %5706 = vmatpush1.bf16.msra.mxu1 %v7784_v20 }
 0x2f0   :  { %5215 = vmatprep.subr.bf16.mxu0 %v7789_v16  ;;  %5707 = vmatprep.subr.bf16.mxu1 %v7792_v22 }
 0x2f3   :  { %5216 = vmatpush1.bf16.msra.mxu0 %v7787_v23  ;;  %5708 = vmatpush1.bf16.msra.mxu1 %v7790_v18 }
 0x2f4   :  { %5217 = vmatprep.subr.bf16.mxu0 %v7795_v25  ;;  %5709 = vmatprep.subr.bf16.mxu1 %v7798_v26 }
 0x2f7   :  { %5218 = vmatpush1.bf16.msra.mxu0 %v7793_v27  ;;  %5710 = vmatpush1.bf16.msra.mxu1 %v7796_v28 }
 0x2f8   :  { %5219 = vmatprep.subr.bf16.mxu0 %v7801_v29  ;;  %5711 = vmatprep.subr.bf16.mxu1 %v7804_v24 }
 0x2fb   :  { %5220 = vmatpush1.bf16.msra.mxu0 %v7799_v31  ;;  %5712 = vmatpush1.bf16.msra.mxu1 %v7802_v32 }
 0x2fc   :  { %5221 = vmatprep.subr.bf16.mxu0 %v7807_v21  ;;  %5713 = vmatprep.subr.bf16.mxu1 %v7810_v34 }
 0x2ff   :  { %5222 = vmatpush1.bf16.msra.mxu0 %v7805_v35  ;;  %5714 = vmatpush1.bf16.msra.mxu1 %v7808_v30 }
 0x302   :  { %5224 = vmatmul.mubr.bf16.vlgmr.msra.gmra.mrb[0].mxu0 %v5771_v37  ;;  %5716 = vmatmul.mubr.bf16.vlgmr.msra.gmra.mrb[0].mxu1 %v5771_v37 }
 0x3d5   :  { %v5225_v48 = vpop.f32.mrb[0].mxu0  ;;  %v5717_v36 = vpop.f32.mrb[0].mxu1 }
 0x3d6   :  { %v6545_v49 = vadd.f32 %v5225_v48, %v799_v44  ;;  %v6547_v50 = vadd.f32 %v5717_v36, %v807_v45  ;;  %v5227_v51 = vpop.f32.mrb[1].mxu0  ;;  %v5719_v52 = vpop.f32.mrb[1].mxu1 }
 0x3d7   :  { %v6546_v53 = vadd.f32 %v5227_v51, %v803_v46  ;;  %v6548_v54 = vadd.f32 %v5719_v52, %v811_v47  ;;  %v5229_v55 = vpop.f32.mrb[2].mxu0  ;;  %v5721_v56 = vpop.f32.mrb[2].mxu1 }
 0x3d8   :  { %v5230_v57 = vpop.f32.mrb[3].mxu0  ;;  %v5722_v58 = vpop.f32.mrb[3].mxu1 }
 0x3d9   :  { %v6543_v59 = vpack.c.bf16 %v6546_v53, %v6545_v49  ;;  %v6544_v60 = vpack.c.bf16 %v6548_v54, %v6547_v50 }
 0x3db   :  { %5740 = vst [vmem:[%s10251_s3] sm:$0xff] %v6543_v59  ;;  %5744 = vst.msk [vmem:[%s10251_s3 + $0x8] sm:$0xff] %vm5743_vm2, %v6544_v60 }

// kernel: fpn_forward.13
= control target key start
LH: loop header
LB: loop body
LE: loop exit
PB: predicated region body
PF: predicated region fallthrough
CT: control target
= control target key end

     0   :  { %v291_v0 = vmov 0   ;;  %vm127_vm0 = vcmask 261120   ;;  %vm211_vm1 = vcmask 519168   ;;  %s380_s1 = inlined_call_operand.vmem [shape: bf16[160,64], index: 1, kind: input, shape index: {}]   ;;  %s381_s0 = inlined_call_operand.vmem [shape: bf16[32,160], index: 0, kind: input, shape index: {}]   ;;  %s382_s3 = inlined_call_operand.vmem [shape: bf16[32,64], index: 3, kind: input, shape index: {}, may-alias: {3,4}]   ;;  %s383_s2 = inlined_call_operand.vmem [shape: f32[1,64], index: 2, kind: input, shape index: {}]   ;;  %s384_s4 = inlined_call_operand.vmem [shape: bf16[32,64], index: 4, kind: output, shape index: {}, may-alias: {3,4}]  }
   0x1   :  { %134 = vmatprep.subr.bf16.mxu0 %v291_v0  ;;  %254 = vmatprep.subr.bf16.mxu1 %v291_v0  ;;  %v275_v1 = vld [vmem:[%s380_s1] sm:$0xff]   ;;  %v276_v2 = vld [vmem:[%s380_s1 + $0x8] sm:$0xff]   ;;  %v277_v3 = vld [vmem:[%s380_s1 + $0x10] sm:$0xff]  }
   0x2   :  { %135 = vmatpush1.bf16.msra.mxu0 %v275_v1  ;;  %264 = vmatpush1.bf16.msra.mxu1 %v275_v1  ;;  %v278_v4 = vld [vmem:[%s380_s1 + $0x18] sm:$0xff]   ;;  %v287_v5 = vld [vmem:[%s381_s0 + $0x4] ss:$8 sps:$4 sm:$0xff]   ;;  %v281_v9 = vld [vmem:[%s380_s1 + $0x30] sm:$0xff]  }
   0x3   :  { %136 = vmatprep.subr.bf16.mxu0 %v291_v0  ;;  %255 = vmatprep.subr.bf16.mxu1 %v291_v0  ;;  %v290_v6 = vld [vmem:[%s381_s0 + $0x14] ss:$8 sps:$4 sm:$0xff]   ;;  %v279_v7 = vld [vmem:[%s380_s1 + $0x20] sm:$0xff]   ;;  %v280_v8 = vld [vmem:[%s380_s1 + $0x28] sm:$0xff]  }
   0x4   :  { %235 = vmatprep.mubr.msk.bf16.mxu0 %vm127_vm0, %v287_v5  ;;  %236 = vmatprep.mubr.msk.bf16.mxu1 %vm127_vm0, %v290_v6  ;;  %v282_v10 = vld [vmem:[%s380_s1 + $0x38] sm:$0xff]   ;;  %v283_v11 = vld [vmem:[%s380_s1 + $0x40] sm:$0xff]   ;;  %v284_v12 = vld [vmem:[%s380_s1 + $0x48] sm:$0xff]  }
   0x5   :  { %v285_v13 = vld [vmem:[%s381_s0] ss:$8 sps:$4 sm:$0xff]   ;;  %v288_v14 = vld [vmem:[%s381_s0 + $0x10] ss:$8 sps:$4 sm:$0xff]  }
   0x6   :  { %137 = vmatpush1.bf16.msra.mxu0 %v276_v2  ;;  %265 = vmatpush1.bf16.msra.mxu1 %v276_v2  ;;  %v246_v15 = vld [vmem:[%s382_s3] sm:$0xff]   ;;  %v253_v16 = vld [vmem:[%s382_s3 + $0x8] sm:$0xff]  }
   0x7   :  { %138 = vmatprep.subr.bf16.mxu0 %v291_v0  ;;  %256 = vmatprep.subr.bf16.mxu1 %v291_v0  ;;  %v220_v17 = vld [vmem:[%s383_s2] ss:$0 sm:$0xff]  ;;  %v247_v18 = vunpack.c.l.bf16 %v246_v15  ;;  %v251_v19 = vunpack.c.l.bf16 %v253_v16  ;;  %v248_v26 = vunpack.c.h.bf16 %v246_v15  ;;  %v252_v27 = vunpack.c.h.bf16 %v253_v16 }
   0xa   :  { %139 = vmatpush1.bf16.msra.mxu0 %v277_v3  ;;  %266 = vmatpush1.bf16.msra.mxu1 %v277_v3 }
   0xb   :  { %140 = vmatprep.subr.bf16.mxu0 %v291_v0  ;;  %257 = vmatprep.subr.bf16.mxu1 %v291_v0 }
   0xe   :  { %141 = vmatpush1.bf16.msra.mxu0 %v278_v4  ;;  %267 = vmatpush1.bf16.msra.mxu1 %v278_v4 }
   0xf   :  { %142 = vmatprep.subr.bf16.mxu0 %v291_v0  ;;  %258 = vmatprep.subr.bf16.mxu1 %v291_v0 }
  0x12   :  { %143 = vmatpush1.bf16.msra.mxu0 %v279_v7  ;;  %268 = vmatpush1.bf16.msra.mxu1 %v279_v7 }
  0x13   :  { %144 = vmatprep.subr.bf16.mxu0 %v291_v0  ;;  %259 = vmatprep.subr.bf16.mxu1 %v291_v0 }
  0x16   :  { %145 = vmatpush1.bf16.msra.mxu0 %v280_v8  ;;  %269 = vmatpush1.bf16.msra.mxu1 %v280_v8 }
  0x17   :  { %146 = vmatprep.subr.bf16.mxu0 %v291_v0  ;;  %260 = vmatprep.subr.bf16.mxu1 %v291_v0 }
  0x1a   :  { %147 = vmatpush1.bf16.msra.mxu0 %v281_v9  ;;  %270 = vmatpush1.bf16.msra.mxu1 %v281_v9 }
  0x1b   :  { %148 = vmatprep.subr.bf16.mxu0 %v291_v0  ;;  %261 = vmatprep.subr.bf16.mxu1 %v291_v0 }
  0x1e   :  { %149 = vmatpush1.bf16.msra.mxu0 %v282_v10  ;;  %271 = vmatpush1.bf16.msra.mxu1 %v282_v10 }
  0x1f   :  { %150 = vmatprep.subr.bf16.mxu0 %v291_v0  ;;  %262 = vmatprep.subr.bf16.mxu1 %v291_v0 }
  0x22   :  { %151 = vmatpush1.bf16.msra.mxu0 %v283_v11  ;;  %272 = vmatpush1.bf16.msra.mxu1 %v283_v11 }
  0x23   :  { %152 = vmatprep.subr.bf16.mxu0 %v291_v0  ;;  %263 = vmatprep.subr.bf16.mxu1 %v291_v0 }
  0x26   :  { %153 = vmatpush1.bf16.msra.mxu0 %v284_v12  ;;  %273 = vmatpush1.bf16.msra.mxu1 %v284_v12 }
  0x29   :  { %167 = vmatmul.mubr.bf16.vlgmr.msra.gmra.mrb[0].mxu0 %v285_v13  ;;  %175 = vmatmul.mubr.bf16.vlgmr.msra.gmra.mrb[0].mxu1 %v288_v14 }
  0xfc   :  { %v168_v20 = vpop.f32.mrb[0].mxu0  ;;  %v176_v21 = vpop.f32.mrb[0].mxu1 }
  0xfd   :  { %v169_v22 = vadd.f32 %v220_v17, %v168_v20  ;;  %v177_v23 = vadd.f32 %v220_v17, %v176_v21  ;;  %v170_v24 = vpop.f32.mrb[1].mxu0  ;;  %v178_v25 = vpop.f32.mrb[1].mxu1 }
  0xfe   :  { %v171_v28 = vpop.f32.mrb[2].mxu0  ;;  %v179_v29 = vpop.f32.mrb[2].mxu1 }
  0xff   :  { %v191_v30 = vadd.f32 %v247_v18, %v169_v22  ;;  %v193_v31 = vadd.f32 %v251_v19, %v177_v23  ;;  %v172_v32 = vadd.f32 %v220_v17, %v171_v28  ;;  %v180_v33 = vadd.f32 %v220_v17, %v179_v29  ;;  %v173_v34 = vpop.f32.mrb[3].mxu0  ;;  %v181_v35 = vpop.f32.mrb[3].mxu1 }
 0x101   :  { %v241_v36 = vpack.c.bf16 %v191_v30, %v191_v30  ;;  %v243_v37 = vpack.c.bf16 %v193_v31, %v193_v31  ;;  %v192_v38 = vadd.f32 %v248_v26, %v172_v32  ;;  %v194_v39 = vadd.f32 %v252_v27, %v180_v33 }
 0x103   :  { %212 = vst.msk [vmem:[%s384_s4] sm:$0xf] %vm211_vm1, %v241_v36  ;;  %214 = vst.msk [vmem:[%s384_s4 + $0x8] sm:$0xf] %vm211_vm1, %v243_v37  ;;  %v242_v40 = vpack.c.bf16 %v192_v38, %v192_v38  ;;  %v244_v41 = vpack.c.bf16 %v194_v39, %v194_v39 }
 0x105   :  { %213 = vst.msk [vmem:[%s384_s4 + $0x4] sm:$0xf] %vm211_vm1, %v242_v40  ;;  %215 = vst.msk [vmem:[%s384_s4 + $0xc] sm:$0xf] %vm211_vm1, %v244_v41 }

// kernel: fpn_forward.14
= control target key start
LH: loop header
LB: loop body
LE: loop exit
PB: predicated region body
PF: predicated region fallthrough
CT: control target
= control target key end

     0   :  { %vm113_vm0 = vcmask 523264   ;;  %vm347_vm1 = vcmask 519168   ;;  %s694_s1 = inlined_call_operand.vmem [shape: bf16[64,64], index: 1, kind: input, shape index: {}]   ;;  %s695_s0 = inlined_call_operand.vmem [shape: bf16[128,64], index: 0, kind: input, shape index: {}]   ;;  %s696_s3 = inlined_call_operand.vmem [shape: bf16[128,64], index: 3, kind: input, shape index: {}, may-alias: {3,4}]   ;;  %s697_s2 = inlined_call_operand.vmem [shape: f32[1,64], index: 2, kind: input, shape index: {}]   ;;  %s698_s4 = inlined_call_operand.vmem [shape: bf16[128,64], index: 4, kind: output, shape index: {}, may-alias: {3,4}]  }
   0x1   :  { %v504_v0 = vld [vmem:[%s694_s1] sm:$0xff]   ;;  %v505_v1 = vld [vmem:[%s694_s1 + $0x8] sm:$0xff]   ;;  %v506_v2 = vld [vmem:[%s694_s1 + $0x10] sm:$0xff]  }
   0x2   :  { %472 = vmatprep.subr.bf16.mxu0 %v504_v0  ;;  %496 = vmatprep.subr.bf16.mxu1 %v504_v0  ;;  %v508_v3 = vld [vmem:[%s695_s0] sm:$0xff]   ;;  %v507_v5 = vld [vmem:[%s694_s1 + $0x18] sm:$0xff]   ;;  %v510_v6 = vld [vmem:[%s695_s0 + $0x8] sm:$0xff]  }
   0x3   :  { %473 = vmatpush3.bf16.msra.mxu0 %v504_v0  ;;  %500 = vmatpush3.bf16.msra.mxu1 %v504_v0  ;;  %v509_v4 = vld [vmem:[%s695_s0 + $0x20] sm:$0xff]   ;;  %v511_v7 = vld [vmem:[%s695_s0 + $0x28] sm:$0xff]   ;;  %v512_v8 = vld [vmem:[%s695_s0 + $0x10] sm:$0xff]  }
   0x4   :  { %474 = vmatprep.subr.bf16.mxu0 %v505_v1  ;;  %497 = vmatprep.subr.bf16.mxu1 %v505_v1  ;;  %v513_v9 = vld [vmem:[%s695_s0 + $0x30] sm:$0xff]   ;;  %v514_v10 = vld [vmem:[%s695_s0 + $0x18] sm:$0xff]   ;;  %v453_v12 = vld [vmem:[%s696_s3 + $0x8] sm:$0xff]  }
   0x5   :  { %480 = vmatprep.mubr.msk.bf16.mxu0 %vm113_vm0, %v508_v3  ;;  %488 = vmatprep.mubr.msk.bf16.mxu1 %vm113_vm0, %v509_v4  ;;  %v515_v11 = vld [vmem:[%s695_s0 + $0x38] sm:$0xff]   ;;  %v457_v13 = vld [vmem:[%s696_s3 + $0x28] sm:$0xff]   ;;  %v422_v14 = vld [vmem:[%s696_s3] sm:$0xff]   ;;  %v427_v17 = vunpack.c.l.bf16 %v453_v12  ;;  %v428_v23 = vunpack.c.h.bf16 %v453_v12 }
   0x6   :  { %v456_v15 = vld [vmem:[%s696_s3 + $0x20] sm:$0xff]   ;;  %v443_v18 = vunpack.c.l.bf16 %v457_v13  ;;  %v423_v21 = vunpack.c.l.bf16 %v422_v14  ;;  %v444_v28 = vunpack.c.h.bf16 %v457_v13  ;;  %v424_v29 = vunpack.c.h.bf16 %v422_v14  ;;  %v455_v45 = vld [vmem:[%s696_s3 + $0x18] sm:$0xff]   ;;  %v454_v51 = vld [vmem:[%s696_s3 + $0x10] sm:$0xff]  }
   0x7   :  { %475 = vmatpush3.bf16.msra.mxu0 %v505_v1  ;;  %501 = vmatpush3.bf16.msra.mxu1 %v505_v1  ;;  %v600_v16 = vld [vmem:[%s697_s2] ss:$0 sm:$0xff]  ;;  %v439_v22 = vunpack.c.l.bf16 %v456_v15  ;;  %v440_v34 = vunpack.c.h.bf16 %v456_v15  ;;  %v459_v46 = vld [vmem:[%s696_s3 + $0x38] sm:$0xff]   ;;  %v458_v52 = vld [vmem:[%s696_s3 + $0x30] sm:$0xff]   ;;  %v435_v59 = vunpack.c.l.bf16 %v455_v45  ;;  %v431_v1 = vunpack.c.l.bf16 %v454_v51 }
   0x8   :  { %476 = vmatprep.subr.bf16.mxu0 %v506_v2  ;;  %498 = vmatprep.subr.bf16.mxu1 %v506_v2  ;;  %v451_v60 = vunpack.c.l.bf16 %v459_v46  ;;  %v432_v13 = vunpack.c.h.bf16 %v454_v51  ;;  %v448_v14 = vunpack.c.h.bf16 %v458_v52 }
   0xb   :  { %477 = vmatpush3.bf16.msra.mxu0 %v506_v2  ;;  %502 = vmatpush3.bf16.msra.mxu1 %v506_v2  ;;  %v447_v2 = vunpack.c.l.bf16 %v458_v52 }
   0xc   :  { %478 = vmatprep.subr.bf16.mxu0 %v507_v5  ;;  %499 = vmatprep.subr.bf16.mxu1 %v507_v5 }
   0xf   :  { %479 = vmatpush3.bf16.msra.mxu0 %v507_v5  ;;  %503 = vmatpush3.bf16.msra.mxu1 %v507_v5 }
  0x12   :  { %481 = vmatmul.mubr.msk.bf16.vlgmr.msra.gmra.mrb[0].mxu0 %vm113_vm0, %v510_v6  ;;  %489 = vmatmul.mubr.msk.bf16.vlgmr.msra.gmra.mrb[0].mxu1 %vm113_vm0, %v511_v7  ;;  %v436_v7 = vunpack.c.h.bf16 %v455_v45 }
  0x13   :  { %484 = vmatprep.mubr.msk.bf16.mxu0 %vm113_vm0, %v512_v8  ;;  %492 = vmatprep.mubr.msk.bf16.mxu1 %vm113_vm0, %v513_v9  ;;  %v452_v8 = vunpack.c.h.bf16 %v459_v46 }
  0x1a   :  { %485 = vmatmul.mubr.msk.bf16.gmra.mrb[4].mxu0 %vm113_vm0, %v514_v10  ;;  %493 = vmatmul.mubr.msk.bf16.gmra.mrb[4].mxu1 %vm113_vm0, %v515_v11 }
  0xe5   :  { %v482_v19 = vpop.f32.mrb[0].mxu0  ;;  %v490_v20 = vpop.f32.mrb[0].mxu1 }
  0xe6   :  { %v181_v24 = vadd.f32 %v482_v19, %v600_v16  ;;  %v213_v25 = vadd.f32 %v490_v20, %v600_v16  ;;  %v172_v26 = vpop.f32.mrb[1].mxu0  ;;  %v204_v27 = vpop.f32.mrb[1].mxu1 }
  0xe7   :  { %v173_v30 = vadd.f32 %v600_v16, %v172_v26  ;;  %v205_v31 = vadd.f32 %v600_v16, %v204_v27  ;;  %v483_v32 = vpop.f32.mrb[2].mxu0  ;;  %v491_v33 = vpop.f32.mrb[2].mxu1 }
  0xe8   :  { %v269_v35 = vadd.f32 %v427_v17, %v181_v24  ;;  %v277_v36 = vadd.f32 %v443_v18, %v213_v25  ;;  %v184_v37 = vadd.f32 %v483_v32, %v600_v16  ;;  %v216_v38 = vadd.f32 %v491_v33, %v600_v16  ;;  %v175_v39 = vpop.f32.mrb[3].mxu0  ;;  %v207_v40 = vpop.f32.mrb[3].mxu1 }
  0xe9   :  { %v267_v41 = vadd.f32 %v423_v21, %v173_v30  ;;  %v275_v42 = vadd.f32 %v439_v22, %v205_v31  ;;  %v176_v43 = vadd.f32 %v600_v16, %v175_v39  ;;  %v208_v44 = vadd.f32 %v600_v16, %v207_v40 }
  0xea   :  { %v407_v47 = vpack.c.bf16 %v269_v35, %v269_v35  ;;  %v415_v48 = vpack.c.bf16 %v277_v36, %v277_v36  ;;  %v270_v49 = vadd.f32 %v428_v23, %v184_v37  ;;  %v278_v50 = vadd.f32 %v444_v28, %v216_v38 }
  0xeb   :  { %v405_v53 = vpack.c.bf16 %v267_v41, %v267_v41  ;;  %v413_v54 = vpack.c.bf16 %v275_v42, %v275_v42  ;;  %v268_v55 = vadd.f32 %v424_v29, %v176_v43  ;;  %v276_v56 = vadd.f32 %v440_v34, %v208_v44 }
  0xec   :  { %350 = vst.msk [vmem:[%s698_s4 + $0x8] sm:$0xf] %vm347_vm1, %v407_v47  ;;  %358 = vst.msk [vmem:[%s698_s4 + $0x28] sm:$0xf] %vm347_vm1, %v415_v48  ;;  %v408_v57 = vpack.c.bf16 %v270_v49, %v270_v49  ;;  %v416_v58 = vpack.c.bf16 %v278_v50, %v278_v50 }
  0xed   :  { %348 = vst.msk [vmem:[%s698_s4] sm:$0xf] %vm347_vm1, %v405_v53  ;;  %356 = vst.msk [vmem:[%s698_s4 + $0x20] sm:$0xf] %vm347_vm1, %v413_v54  ;;  %v406_v61 = vpack.c.bf16 %v268_v55, %v268_v55  ;;  %v414_v62 = vpack.c.bf16 %v276_v56, %v276_v56  ;;  %v486_v63 = vpop.f32.mrb[4].mxu0  ;;  %v494_v0 = vpop.f32.mrb[4].mxu1 }
  0xee   :  { %351 = vst.msk [vmem:[%s698_s4 + $0xc] sm:$0xf] %vm347_vm1, %v408_v57  ;;  %359 = vst.msk [vmem:[%s698_s4 + $0x2c] sm:$0xf] %vm347_vm1, %v416_v58  ;;  %v197_v3 = vadd.f32 %v486_v63, %v600_v16  ;;  %v229_v4 = vadd.f32 %v494_v0, %v600_v16  ;;  %v188_v5 = vpop.f32.mrb[5].mxu0  ;;  %v220_v6 = vpop.f32.mrb[5].mxu1 }
  0xef   :  { %349 = vst.msk [vmem:[%s698_s4 + $0x4] sm:$0xf] %vm347_vm1, %v406_v61  ;;  %357 = vst.msk [vmem:[%s698_s4 + $0x24] sm:$0xf] %vm347_vm1, %v414_v62  ;;  %v189_v9 = vadd.f32 %v600_v16, %v188_v5  ;;  %v221_v10 = vadd.f32 %v600_v16, %v220_v6  ;;  %v487_v11 = vpop.f32.mrb[6].mxu0  ;;  %v495_v12 = vpop.f32.mrb[6].mxu1 }
  0xf0   :  { %v273_v15 = vadd.f32 %v435_v59, %v197_v3  ;;  %v281_v17 = vadd.f32 %v451_v60, %v229_v4  ;;  %v200_v18 = vadd.f32 %v487_v11, %v600_v16  ;;  %v232_v19 = vadd.f32 %v495_v12, %v600_v16  ;;  %v191_v20 = vpop.f32.mrb[7].mxu0  ;;  %v223_v21 = vpop.f32.mrb[7].mxu1 }
  0xf1   :  { %v271_v22 = vadd.f32 %v431_v1, %v189_v9  ;;  %v279_v23 = vadd.f32 %v447_v2, %v221_v10  ;;  %v192_v24 = vadd.f32 %v600_v16, %v191_v20  ;;  %v224_v25 = vadd.f32 %v600_v16, %v223_v21 }
  0xf2   :  { %v411_v26 = vpack.c.bf16 %v273_v15, %v273_v15  ;;  %v419_v27 = vpack.c.bf16 %v281_v17, %v281_v17  ;;  %v274_v28 = vadd.f32 %v436_v7, %v200_v18  ;;  %v282_v29 = vadd.f32 %v452_v8, %v232_v19 }
  0xf3   :  { %v409_v30 = vpack.c.bf16 %v271_v22, %v271_v22  ;;  %v417_v31 = vpack.c.bf16 %v279_v23, %v279_v23  ;;  %v272_v32 = vadd.f32 %v432_v13, %v192_v24  ;;  %v280_v33 = vadd.f32 %v448_v14, %v224_v25 }
  0xf4   :  { %354 = vst.msk [vmem:[%s698_s4 + $0x18] sm:$0xf] %vm347_vm1, %v411_v26  ;;  %362 = vst.msk [vmem:[%s698_s4 + $0x38] sm:$0xf] %vm347_vm1, %v419_v27  ;;  %v412_v34 = vpack.c.bf16 %v274_v28, %v274_v28  ;;  %v420_v16 = vpack.c.bf16 %v282_v29, %v282_v29 }
  0xf5   :  { %352 = vst.msk [vmem:[%s698_s4 + $0x10] sm:$0xf] %vm347_vm1, %v409_v30  ;;  %360 = vst.msk [vmem:[%s698_s4 + $0x30] sm:$0xf] %vm347_vm1, %v417_v31  ;;  %v410_v35 = vpack.c.bf16 %v272_v32, %v272_v32  ;;  %v418_v36 = vpack.c.bf16 %v280_v33, %v280_v33 }
  0xf6   :  { %355 = vst.msk [vmem:[%s698_s4 + $0x1c] sm:$0xf] %vm347_vm1, %v412_v34  ;;  %363 = vst.msk [vmem:[%s698_s4 + $0x3c] sm:$0xf] %vm347_vm1, %v420_v16 }
  0xf7   :  { %353 = vst.msk [vmem:[%s698_s4 + $0x14] sm:$0xf] %vm347_vm1, %v410_v35  ;;  %361 = vst.msk [vmem:[%s698_s4 + $0x34] sm:$0xf] %vm347_vm1, %v418_v36 }

// kernel: fpn_forward.15
= control target key start
LH: loop header
LB: loop body
LE: loop exit
PB: predicated region body
PF: predicated region fallthrough
CT: control target
= control target key end

     0   :  { %8 = vsyncpa [#allocation3], 0  ;;  %s1511_s0 = inlined_call_operand.vmem [shape: bf16[2,80,192], index: 0, kind: input, shape index: {}]   ;;  %s1512_s1 = inlined_call_operand.vmem [shape: bf16[576,64], index: 1, kind: input, shape index: {}]   ;;  %s1513_s2 = inlined_call_operand.vmem [shape: f32[1,64], index: 2, kind: input, shape index: {}]   ;;  %s1514_s3 = inlined_call_operand.hbm [shape: f32[2,64,64], index: 3, kind: output, shape index: {}]  }
   0x1   :  { %10 = vsyncpa [#allocation3 + $0x1], 0  ;;  %s1195_s12 = smov 0   ;;  %s1197_s13 = smov 0  }
   0x2   :  { %s1199_s14 = smov 0   ;;  %s1201_s15 = smov 0  }
   0x3 LB: > { %s1216_s16 = sadd.s32 4294967295, %s1169_s15   ;;  %s901_s17 = sadd.s32 4294967294, %s1169_s15   ;;  %s1169_s15 = sphi %s1201_s15, %s1520_s15   ;;  %s1165_s14 = sphi %s1199_s14, %s1519_s14   ;;  %s1161_s13 = sphi %s1197_s13, %s1518_s13   ;;  %s1157_s12 = sphi %s1195_s12, %s1517_s12  }
   0x4   : > { %s1220_s18 = sadd.s32 1, %s1169_s15   ;;  %s91_s19 = sadd.s32 1, %s1165_s14 }
   0x5   : > { %s88_s20 = ssub.s32 %s1169_s15, %s1220_s18  ;;  %p101_p0 = scmp.ne.s32.totalorder %s1165_s14, %s1161_s13 }
   0x6   : > { %p89_p1 = scmp.eq.s32.totalorder %s88_s20, 0  ;;  %p102_p2 = scmp.eq.s32.totalorder %s1216_s16, 1 }
   0x7   : > { %p107_p3 = scmp.ne.s32.totalorder %s1161_s13, %s1157_s12  ;;  %p108_p4 = scmp.eq.s32.totalorder %s901_s17, 1 }
   0x8   : > { %s1231_s21 = scalar_select %p89_p1, %s1165_s14, %s91_s19  }
   0x9   : > { %p1233_p5 = por %p102_p2, %p101_p0  ;;  %p1237_p6 = por %p108_p4, %p107_p3 }
   0xa   : > { %p904_p7 = scmp.ge.s32.totalorder %s1169_s15, 1  ;;  %p140_p8 = scmp.lt.s32.totalorder %s1169_s15, 3 }
   0xc   : > { %p141_p9 = pnand %p904_p7, %p140_p8 }
   0xd   : > { %v1053_v0 = vld [vmem:[%s1512_s1 + $0x60] sm:$0xff] (!%p141_p9)   ;;  %v1171_v1 = vmov (!%p141_p9), 0   ;;  %v1055_v3 = vld [vmem:[%s1512_s1 + $0x68] sm:$0xff] (!%p141_p9)   ;;  %v1057_v5 = vld [vmem:[%s1512_s1 + $0x70] sm:$0xff] (!%p141_p9)   ;;  %p164_p10 = scmp.lt.s32.totalorder (!%p141_p9), %s1216_s16, 1  ;;  %vm335_vm0 = vcmask (!%p141_p9), 523264  }
   0xe   : > { %144 = sbr.rel (%p141_p9) target bundleno = 351 (0x15f), region = 32  ;;  %348 = vmatprep.subr.bf16.mxu0 (!%p141_p9), %v1171_v1  ;;  %512 = vmatprep.subr.bf16.mxu1 (!%p141_p9), %v1171_v1  ;;  %v1054_v2 = vld [vmem:[%s1512_s1] sm:$0xff] (!%p141_p9)   ;;  %v1056_v4 = vld [vmem:[%s1512_s1 + $0x8] sm:$0xff] (!%p141_p9)   ;;  %v1058_v6 = vld [vmem:[%s1512_s1 + $0x10] sm:$0xff] (!%p141_p9)   ;;  %s985_s9 = sshll.u32 (!%p141_p9), %s1216_s16, 10 }
   0xf   : > { %349 = vmatpush1.bf16.msra.mxu0 (!%p141_p9), %v1053_v0  ;;  %513 = vmatpush1.bf16.msra.mxu1 (!%p141_p9), %v1054_v2  ;;  %v1059_v7 = vld [vmem:[%s1512_s1 + $0x78] sm:$0xff] (!%p141_p9)   ;;  %v1061_v9 = vld [vmem:[%s1512_s1 + $0x80] sm:$0xff] (!%p141_p9)   ;;  %v1063_v11 = vld [vmem:[%s1512_s1 + $0x88] sm:$0xff] (!%p141_p9)   ;;  %s1172_s24 = smov (!%p141_p9), [#allocation2]  }
  0x10   : > { %350 = vmatprep.subr.bf16.mxu0 (!%p141_p9), %v1171_v1  ;;  %514 = vmatprep.subr.bf16.mxu1 (!%p141_p9), %v1171_v1  ;;  %v1060_v8 = vld [vmem:[%s1512_s1 + $0x18] sm:$0xff] (!%p141_p9)   ;;  %v1062_v10 = vld [vmem:[%s1512_s1 + $0x20] sm:$0xff] (!%p141_p9)   ;;  %v1064_v12 = vld [vmem:[%s1512_s1 + $0x28] sm:$0xff] (!%p141_p9)   ;;  %s1111_s25 = sshll.u32 (!%p141_p9), %s1172_s24, 4  ;;  %s1112_s25 = int_to_ptr.vmem [resolvable:$false] %s1111_s25 }
  0x11   : > { %v1065_v13 = vld [vmem:[%s1512_s1 + $0x90] sm:$0xff] (!%p141_p9)   ;;  %v1067_v20 = vld [vmem:[%s1512_s1 + $0x98] sm:$0xff] (!%p141_p9)   ;;  %v1069_v22 = vld [vmem:[%s1512_s1 + $0xa0] sm:$0xff] (!%p141_p9)   ;;  %s1113_s26 = scalar_lea.vmem (!%p141_p9), %s1112_s25, 2048 }
  0x12   : > { %v1066_v14 = vld [vmem:[%s1512_s1 + $0x30] sm:$0xff] (!%p141_p9)   ;;  %v1068_v21 = vld [vmem:[%s1512_s1 + $0x38] sm:$0xff] (!%p141_p9)   ;;  %v1070_v23 = vld [vmem:[%s1512_s1 + $0x40] sm:$0xff] (!%p141_p9)  }
  0x13   : > { %351 = vmatpush1.bf16.msra.mxu0 (!%p141_p9), %v1055_v3  ;;  %515 = vmatpush1.bf16.msra.mxu1 (!%p141_p9), %v1056_v4  ;;  %v1071_v24 = vld [vmem:[%s1512_s1 + $0xa8] sm:$0xff] (!%p141_p9)   ;;  %v1073_v26 = vld [vmem:[%s1512_s1 + $0xb0] sm:$0xff] (!%p141_p9)   ;;  %v1075_v28 = vld [vmem:[%s1512_s1 + $0xb8] sm:$0xff] (!%p141_p9)  }
  0x14   : > { %352 = vmatprep.subr.bf16.mxu0 (!%p141_p9), %v1171_v1  ;;  %516 = vmatprep.subr.bf16.mxu1 (!%p141_p9), %v1171_v1  ;;  %v1072_v25 = vld [vmem:[%s1512_s1 + $0x48] sm:$0xff] (!%p141_p9)   ;;  %v1074_v27 = vld [vmem:[%s1512_s1 + $0x50] sm:$0xff] (!%p141_p9)   ;;  %v1076_v29 = vld [vmem:[%s1512_s1 + $0x58] sm:$0xff] (!%p141_p9)  }
  0x15   : > { %s165_s19 = scalar_select %p164_p10, %s1216_s16, 1  ;;  %v1081_v34 = vld [vmem:[%s1512_s1 + $0xc0] sm:$0xff]   ;;  %v1082_v37 = vld [vmem:[%s1512_s1 + $0xc8] sm:$0xff]   ;;  %v1083_v41 = vld [vmem:[%s1512_s1 + $0xd0] sm:$0xff]  }
  0x16   : > { %v1084_v45 = vld [vmem:[%s1512_s1 + $0xd8] sm:$0xff]   ;;  %v1085_v49 = vld [vmem:[%s1512_s1 + $0xe0] sm:$0xff]   ;;  %v1090_v53 = vld [vmem:[%s1512_s1 + $0xe8] sm:$0xff]  }
  0x17   : > { %353 = vmatpush1.bf16.msra.mxu0 %v1057_v5  ;;  %517 = vmatpush1.bf16.msra.mxu1 %v1058_v6  ;;  %s1010_s27 = smul.u32 80, %s165_s19  ;;  %v1091_v55 = vld [vmem:[%s1512_s1 + $0xf0] sm:$0xff]   ;;  %v1096_v57 = vld [vmem:[%s1512_s1 + $0xf8] sm:$0xff]   ;;  %v1097_v58 = vld [vmem:[%s1512_s1 + $0x100] sm:$0xff]   ;;  %s1461_s19 = scalar_lea.hbm %s1514_s3, %s985_s9 }
  0x18   : > { %354 = vmatprep.subr.bf16.mxu0 %v1171_v1  ;;  %518 = vmatprep.subr.bf16.mxu1 %v1171_v1  ;;  %v1102_v59 = vld [vmem:[%s1512_s1 + $0x108] sm:$0xff]   ;;  %v1103_v60 = vld [vmem:[%s1512_s1 + $0x110] sm:$0xff]   ;;  %v1104_v61 = vld [vmem:[%s1512_s1 + $0x118] sm:$0xff]  }
  0x19   : > { %s1296_s7 = scalar_lea.vmem %s1511_s0, %s1010_s27 }
  0x1a   : > { %v171_v15 = vld [vmem:[%s1296_s7 + $0x8] sm:$0xff]  ;;  %v172_v16 = vld [vmem:[%s1296_s7 + $0x10] sm:$0xff]  ;;  %v170_v17 = vld [vmem:[%s1296_s7] sm:$0xff] }
  0x1b   : > { %355 = vmatpush1.bf16.msra.mxu0 %v1059_v7  ;;  %519 = vmatpush1.bf16.msra.mxu1 %v1060_v8  ;;  %v908_v18 = vcombine.high %v171_v15, %v172_v16  ;;  %v932_v19 = vcombine.high %v170_v17, %v171_v15  ;;  %v907_v30 = vcombine.low %v171_v15, %v172_v16  ;;  %v173_v31 = vld [vmem:[%s1296_s7 + $0x18] sm:$0xff]  ;;  %v174_v32 = vld [vmem:[%s1296_s7 + $0x20] sm:$0xff]  ;;  %v175_v39 = vld [vmem:[%s1296_s7 + $0x28] sm:$0xff] }
  0x1c   : > { %356 = vmatprep.subr.bf16.mxu0 %v1171_v1  ;;  %520 = vmatprep.subr.bf16.mxu1 %v1171_v1  ;;  %v931_v33 = vcombine.low %v170_v17, %v171_v15  ;;  %v910_v35 = vcombine.high %v173_v31, %v174_v32  ;;  %v1358_v36 = vcombine.high %v172_v16, %v173_v31  ;;  %v176_v40 = vld [vmem:[%s1296_s7 + $0x30] sm:$0xff]  ;;  %v177_v47 = vld [vmem:[%s1296_s7 + $0x38] sm:$0xff]  ;;  %v1390_v48 = vld [vmem:[%s1296_s7 + $0x40] sm:$0xff] }
  0x1d   : > { %927 = vmatprep.mubr.msk.bf16.mxu0 %vm335_vm0, %v908_v18  ;;  %951 = vmatprep.mubr.msk.bf16.mxu1 %vm335_vm0, %v932_v19  ;;  %v909_v38 = vcombine.low %v173_v31, %v174_v32  ;;  %v1373_v42 = vcombine.low %v172_v16, %v173_v31  ;;  %v912_v43 = vcombine.high %v175_v39, %v176_v40  ;;  %v584_v62 = vld [vmem:[%s1296_s7 + $0x48] sm:$0xff]  ;;  %s161_s7 = sand.u32 1, %s1161_s13  }
  0x1e   : > { %v1377_v44 = vcombine.high %v174_v32, %v175_v39  ;;  %v911_v46 = vcombine.low %v175_v39, %v176_v40  ;;  %v935_v50 = vcombine.low %v174_v32, %v175_v39  ;;  %v914_v51 = vcombine.high %v177_v47, %v1390_v48  ;;  %s905_s4 = sshll.u32 %s161_s7, 6  ;;  %s1470_s16 = scalar_lea.sflag [#allocation3], %s161_s7 }
  0x1f   : > { %357 = vmatpush1.bf16.msra.mxu0 %v1061_v9  ;;  %521 = vmatpush1.bf16.msra.mxu1 %v1062_v10  ;;  %v938_v52 = vcombine.high %v176_v40, %v177_v47  ;;  %v913_v54 = vcombine.low %v177_v47, %v1390_v48  ;;  %v937_v56 = vcombine.low %v176_v40, %v177_v47  ;;  %s163_s8 = scalar_lea.vmem [#allocation2], %s905_s4 }
  0x20   : > { %358 = vmatprep.subr.bf16.mxu0 %v1171_v1  ;;  %522 = vmatprep.subr.bf16.mxu1 %v1171_v1  ;;  %v962_v63 = vcombine.high %v1390_v48, %v584_v62  ;;  %v961_v0 = vcombine.low %v1390_v48, %v584_v62  ;;  %s839_s10 = sshll.u32 %s163_s8, 4  ;;  %s1463_s10 = int_to_ptr.vmem [resolvable:$true] %s839_s10 }
  0x21   : > { %s1107_s20 = scalar_lea.vmem %s1463_s10, 1024  ;;  %p1114_p0 = scmp.lt.s32.totalorder %s1463_s10, %s1112_s25 }
  0x22   : > { %p1108_p11 = scmp.ne.s32.totalorder %s1463_s10, %s1107_s20  ;;  %p1115_p1 = scmp.lt.s32.totalorder %s1113_s26, %s1107_s20 }
  0x23   : > { %359 = vmatpush1.bf16.msra.mxu0 %v1063_v11  ;;  %523 = vmatpush1.bf16.msra.mxu1 %v1064_v12 }
  0x24   : > { %360 = vmatprep.subr.bf16.mxu0 %v1171_v1  ;;  %524 = vmatprep.subr.bf16.mxu1 %v1171_v1  ;;  %p1109_p12 = pnand %p1108_p11, %p1233_p5  ;;  %p1116_p2 = por %p1115_p1, %p1114_p0 }
  0x26   : > { %p1110_p13 = pneg %p1109_p12 }
  0x27   : > { %361 = vmatpush1.bf16.msra.mxu0 %v1065_v13  ;;  %525 = vmatpush1.bf16.msra.mxu1 %v1066_v14 }
  0x28   : > { %362 = vmatprep.subr.bf16.mxu0 %v1171_v1  ;;  %526 = vmatprep.subr.bf16.mxu1 %v1171_v1  ;;  %p1117_p3 = pnand %p1116_p2, %p1110_p13 }
  0x2b   : > { %363 = vmatpush1.bf16.msra.mxu0 %v1067_v20  ;;  %527 = vmatpush1.bf16.msra.mxu1 %v1068_v21 }
  0x2c   : > { %364 = vmatprep.subr.bf16.mxu0 %v1171_v1  ;;  %528 = vmatprep.subr.bf16.mxu1 %v1171_v1 }
  0x2f   : > { %365 = vmatpush1.bf16.msra.mxu0 %v1069_v22  ;;  %529 = vmatpush1.bf16.msra.mxu1 %v1070_v23 }
  0x30   : > { %366 = vmatprep.subr.bf16.mxu0 %v1171_v1  ;;  %530 = vmatprep.subr.bf16.mxu1 %v1171_v1 }
  0x33   : > { %367 = vmatpush1.bf16.msra.mxu0 %v1071_v24  ;;  %531 = vmatpush1.bf16.msra.mxu1 %v1072_v25 }
  0x34   : > { %368 = vmatprep.subr.bf16.mxu0 %v1171_v1  ;;  %532 = vmatprep.subr.bf16.mxu1 %v1171_v1 }
  0x37   : > { %369 = vmatpush1.bf16.msra.mxu0 %v1073_v26  ;;  %533 = vmatpush1.bf16.msra.mxu1 %v1074_v27 }
  0x38   : > { %370 = vmatprep.subr.bf16.mxu0 %v1171_v1  ;;  %534 = vmatprep.subr.bf16.mxu1 %v1171_v1 }
  0x3b   : > { %371 = vmatpush1.bf16.msra.mxu0 %v1075_v28  ;;  %535 = vmatpush1.bf16.msra.mxu1 %v1076_v29 }
  0x3c   : > { %729 = vmatprep.subr.bf16.mxu0 %v1171_v1  ;;  %986 = vmatprep.subr.bf16.mxu1 %v1171_v1 }
  0x3e   : > { %381 = vmatmul.mubr.bf16.vlgmr.msra.gmra.mrb[0].mxu0 %v907_v30  ;;  %545 = vmatmul.mubr.bf16.vlgmr.msra.gmra.mrb[0].mxu1 %v931_v33 }
  0x3f   : > { %730 = vmatpush1.bf16.msra.mxu0 %v1081_v34  ;;  %998 = vmatpush1.bf16.msra.mxu1 %v1081_v34 }
  0x40   : > { %731 = vmatprep.subr.bf16.mxu0 %v1171_v1  ;;  %987 = vmatprep.subr.bf16.mxu1 %v1171_v1 }
  0x41   : > { %928 = vmatprep.mubr.msk.bf16.mxu0 %vm335_vm0, %v910_v35  ;;  %952 = vmatprep.mubr.msk.bf16.mxu1 %vm335_vm0, %v1358_v36 }
  0x43   : > { %732 = vmatpush1.bf16.msra.mxu0 %v1082_v37  ;;  %999 = vmatpush1.bf16.msra.mxu1 %v1082_v37 }
  0x44   : > { %733 = vmatprep.subr.bf16.mxu0 %v1171_v1  ;;  %988 = vmatprep.subr.bf16.mxu1 %v1171_v1 }
  0x46   : > { %389 = vmatmul.mubr.bf16.gmra.mrb[4].mxu0 %v909_v38  ;;  %553 = vmatmul.mubr.bf16.gmra.mrb[4].mxu1 %v1373_v42 }
  0x47   : > { %734 = vmatpush1.bf16.msra.mxu0 %v1083_v41  ;;  %1000 = vmatpush1.bf16.msra.mxu1 %v1083_v41 }
  0x48   : > { %735 = vmatprep.subr.bf16.mxu0 %v1171_v1  ;;  %989 = vmatprep.subr.bf16.mxu1 %v1171_v1 }
  0x49   : > { %929 = vmatprep.mubr.msk.bf16.mxu0 %vm335_vm0, %v912_v43  ;;  %953 = vmatprep.mubr.msk.bf16.mxu1 %vm335_vm0, %v1377_v44 }
  0x4b   : > { %736 = vmatpush1.bf16.msra.mxu0 %v1084_v45  ;;  %1001 = vmatpush1.bf16.msra.mxu1 %v1084_v45 }
  0x4c   : > { %737 = vmatprep.subr.bf16.mxu0 %v1171_v1  ;;  %990 = vmatprep.subr.bf16.mxu1 %v1171_v1 }
  0x4e   : > { %397 = vmatmul.mubr.bf16.gmra.mrb[8].mxu0 %v911_v46  ;;  %561 = vmatmul.mubr.bf16.gmra.mrb[8].mxu1 %v935_v50 }
  0x4f   : > { %738 = vmatpush1.bf16.msra.mxu0 %v1085_v49  ;;  %1002 = vmatpush1.bf16.msra.mxu1 %v1085_v49 }
  0x50   : > { %739 = vmatprep.subr.bf16.mxu0 %v1171_v1  ;;  %991 = vmatprep.subr.bf16.mxu1 %v1171_v1 }
  0x51   : > { %930 = vmatprep.mubr.msk.bf16.mxu0 %vm335_vm0, %v914_v51  ;;  %954 = vmatprep.mubr.msk.bf16.mxu1 %vm335_vm0, %v938_v52 }
  0x53   : > { %740 = vmatpush1.bf16.msra.mxu0 %v1090_v53  ;;  %1003 = vmatpush1.bf16.msra.mxu1 %v1090_v53 }
  0x54   : > { %741 = vmatprep.subr.bf16.mxu0 %v1171_v1  ;;  %992 = vmatprep.subr.bf16.mxu1 %v1171_v1 }
  0x56   : > { %405 = vmatmul.mubr.bf16.gmra.mrb[12].mxu0 %v913_v54  ;;  %569 = vmatmul.mubr.bf16.gmra.mrb[12].mxu1 %v937_v56 }
  0x57   : > { %742 = vmatpush1.bf16.msra.mxu0 %v1091_v55  ;;  %1004 = vmatpush1.bf16.msra.mxu1 %v1091_v55 }
  0x58   : > { %743 = vmatprep.subr.bf16.mxu0 %v1171_v1  ;;  %993 = vmatprep.subr.bf16.mxu1 %v1171_v1 }
  0x59   : > { %975 = vmatprep.mubr.msk.bf16.mxu0 %vm335_vm0, %v1358_v36  ;;  %977 = vmatprep.mubr.msk.bf16.mxu1 %vm335_vm0, %v938_v52 }
  0x5b   : > { %744 = vmatpush1.bf16.msra.mxu0 %v1096_v57  ;;  %1005 = vmatpush1.bf16.msra.mxu1 %v1096_v57 }
  0x5c   : > { %745 = vmatprep.subr.bf16.mxu0 %v1171_v1  ;;  %994 = vmatprep.subr.bf16.mxu1 %v1171_v1 }
  0x5f   : > { %746 = vmatpush1.bf16.msra.mxu0 %v1097_v58  ;;  %1006 = vmatpush1.bf16.msra.mxu1 %v1097_v58 }
  0x60   : > { %747 = vmatprep.subr.bf16.mxu0 %v1171_v1  ;;  %995 = vmatprep.subr.bf16.mxu1 %v1171_v1 }
  0x63   : > { %748 = vmatpush1.bf16.msra.mxu0 %v1102_v59  ;;  %1007 = vmatpush1.bf16.msra.mxu1 %v1102_v59 }
  0x64   : > { %749 = vmatprep.subr.bf16.mxu0 %v1171_v1  ;;  %996 = vmatprep.subr.bf16.mxu1 %v1171_v1 }
  0x67   : > { %750 = vmatpush1.bf16.msra.mxu0 %v1103_v60  ;;  %1008 = vmatpush1.bf16.msra.mxu1 %v1103_v60 }
  0x68   : > { %751 = vmatprep.subr.bf16.mxu0 %v1171_v1  ;;  %997 = vmatprep.subr.bf16.mxu1 %v1171_v1 }
  0x6b   : > { %752 = vmatpush1.bf16.msra.mxu0 %v1104_v61  ;;  %1009 = vmatpush1.bf16.msra.mxu1 %v1104_v61 }
  0x6e   : > { %762 = vmatmul.mubr.bf16.vlgmr.msra.gmra.mrb[16].mxu0 %v1373_v42  ;;  %778 = vmatmul.mubr.bf16.vlgmr.msra.gmra.mrb[16].mxu1 %v937_v56  ;;  %v979_v42 = vld [vmem:[%s1513_s2] ss:$0 sm:$0xff] }
  0x6f   : > { %976 = vmatprep.mubr.msk.bf16.mxu0 %vm335_vm0, %v1377_v44  ;;  %978 = vmatprep.mubr.msk.bf16.mxu1 %vm335_vm0, %v962_v63 }
  0x76   : > { %770 = vmatmul.mubr.bf16.gmra.mrb[20].mxu0 %v935_v50  ;;  %786 = vmatmul.mubr.bf16.gmra.mrb[20].mxu1 %v961_v0 }
 0x111   : > { %v382_v2 = vpop.f32.mrb[0].mxu0  ;;  %v546_v3 = vpop.f32.mrb[0].mxu1 }
 0x112   : > { %v384_v1 = vpop.f32.mrb[1].mxu0  ;;  %v547_v4 = vadd.f32 %v546_v3, %v382_v2  ;;  %v548_v5 = vpop.f32.mrb[1].mxu1 }
 0x113   : > { %v385_v6 = vpop.f32.mrb[2].mxu0  ;;  %v549_v7 = vpop.f32.mrb[2].mxu1 }
 0x114   : > { %v387_v8 = vpop.f32.mrb[3].mxu0  ;;  %v550_v9 = vadd.f32 %v549_v7, %v385_v6  ;;  %v551_v10 = vpop.f32.mrb[3].mxu1 }
 0x119   : > { %v390_v11 = vpop.f32.mrb[4].mxu0  ;;  %v554_v12 = vpop.f32.mrb[4].mxu1 }
 0x11a   : > { %v392_v13 = vpop.f32.mrb[5].mxu0  ;;  %v555_v14 = vadd.f32 %v554_v12, %v390_v11  ;;  %v556_v15 = vpop.f32.mrb[5].mxu1 }
 0x11b   : > { %v393_v16 = vpop.f32.mrb[6].mxu0  ;;  %v557_v17 = vpop.f32.mrb[6].mxu1 }
 0x11c   : > { %v395_v18 = vpop.f32.mrb[7].mxu0  ;;  %v558_v19 = vadd.f32 %v557_v17, %v393_v16  ;;  %v559_v20 = vpop.f32.mrb[7].mxu1 }
 0x121   : > { %v398_v21 = vpop.f32.mrb[8].mxu0  ;;  %v562_v22 = vpop.f32.mrb[8].mxu1 }
 0x122   : > { %v400_v23 = vpop.f32.mrb[9].mxu0  ;;  %v563_v24 = vadd.f32 %v562_v22, %v398_v21  ;;  %v564_v25 = vpop.f32.mrb[9].mxu1 }
 0x123   : > { %v401_v26 = vpop.f32.mrb[10].mxu0  ;;  %v565_v27 = vpop.f32.mrb[10].mxu1 }
 0x124   : > { %v403_v28 = vpop.f32.mrb[11].mxu0  ;;  %v566_v29 = vadd.f32 %v565_v27, %v401_v26  ;;  %v567_v30 = vpop.f32.mrb[11].mxu1 }
 0x129   : > { %v406_v31 = vpop.f32.mrb[12].mxu0  ;;  %v570_v32 = vpop.f32.mrb[12].mxu1 }
 0x12a   : > { %v408_v33 = vpop.f32.mrb[13].mxu0  ;;  %v571_v34 = vadd.f32 %v570_v32, %v406_v31  ;;  %v572_v35 = vpop.f32.mrb[13].mxu1 }
 0x12b   : > { %v409_v36 = vpop.f32.mrb[14].mxu0  ;;  %v573_v37 = vpop.f32.mrb[14].mxu1 }
 0x12c   : > { %v411_v38 = vpop.f32.mrb[15].mxu0  ;;  %v574_v39 = vadd.f32 %v573_v37, %v409_v36  ;;  %v575_v40 = vpop.f32.mrb[15].mxu1 }
 0x141   : > { %v763_v41 = vpop.f32.mrb[16].mxu0  ;;  %v779_v44 = vpop.f32.mrb[16].mxu1 }
 0x142   : > { %v794_v43 = vadd.f32 %v763_v41, %v547_v4  ;;  %v765_v45 = vpop.f32.mrb[17].mxu0  ;;  %v798_v46 = vadd.f32 %v779_v44, %v563_v24  ;;  %v781_v47 = vpop.f32.mrb[17].mxu1 }
 0x143   : > { %v766_v48 = vpop.f32.mrb[18].mxu0  ;;  %v782_v51 = vpop.f32.mrb[18].mxu1 }
 0x144   : > { %v809_v49 = vadd.f32 %v979_v42, %v794_v43  ;;  %v795_v50 = vadd.f32 %v766_v48, %v550_v9  ;;  %v768_v52 = vpop.f32.mrb[19].mxu0  ;;  %v813_v53 = vadd.f32 %v979_v42, %v798_v46  ;;  %v799_v54 = vadd.f32 %v782_v51, %v566_v29  ;;  %v784_v55 = vpop.f32.mrb[19].mxu1 }
 0x146   : > { %817 = vst.msk [vmem:[%s163_s8] sm:$0xff] %vm335_vm0, %v809_v49  ;;  %v810_v56 = vadd.f32 %v979_v42, %v795_v50  ;;  %821 = vst.msk [vmem:[%s163_s8 + $0x20] sm:$0xff] %vm335_vm0, %v813_v53  ;;  %v814_v57 = vadd.f32 %v979_v42, %v799_v54 }
 0x148   : > { %818 = vst.msk [vmem:[%s163_s8 + $0x8] sm:$0xff] %vm335_vm0, %v810_v56  ;;  %822 = vst.msk [vmem:[%s163_s8 + $0x28] sm:$0xff] %vm335_vm0, %v814_v57 }
 0x149   : > { %v771_v58 = vpop.f32.mrb[20].mxu0  ;;  %v787_v60 = vpop.f32.mrb[20].mxu1 }
 0x14a   : > { %v796_v59 = vadd.f32 %v771_v58, %v555_v14  ;;  %v773_v61 = vpop.f32.mrb[21].mxu0  ;;  %v800_v62 = vadd.f32 %v787_v60, %v571_v34  ;;  %v789_v63 = vpop.f32.mrb[21].mxu1 }
 0x14b   : > { %v774_v0 = vpop.f32.mrb[22].mxu0  ;;  %v790_v1 = vpop.f32.mrb[22].mxu1 }
 0x14c   : > { %v811_v2 = vadd.f32 %v979_v42, %v796_v59  ;;  %v797_v3 = vadd.f32 %v774_v0, %v558_v19  ;;  %v776_v4 = vpop.f32.mrb[23].mxu0  ;;  %v815_v5 = vadd.f32 %v979_v42, %v800_v62  ;;  %v801_v6 = vadd.f32 %v790_v1, %v574_v39  ;;  %v792_v7 = vpop.f32.mrb[23].mxu1 }
 0x14e   : > { %819 = vst.msk [vmem:[%s163_s8 + $0x10] sm:$0xff] %vm335_vm0, %v811_v2  ;;  %v812_v8 = vadd.f32 %v979_v42, %v797_v3  ;;  %823 = vst.msk [vmem:[%s163_s8 + $0x30] sm:$0xff] %vm335_vm0, %v815_v5  ;;  %v816_v9 = vadd.f32 %v979_v42, %v801_v6 }
 0x150   : > { %820 = vst.msk [vmem:[%s163_s8 + $0x18] sm:$0xff] %vm335_vm0, %v812_v8  ;;  %824 = vst.msk [vmem:[%s163_s8 + $0x38] sm:$0xff] %vm335_vm0, %v816_v9 }
 0x151   : > { %1120 = shalt.err (!%p1117_p3)
}
 0x152   : > { %s1121_s27 = scalar_lea.hbm %s1461_s19, 1024  ;;  %s1125_s30 = scalar_lea.hbm %s1514_s3, 2048 }
 0x153   : > { %p1122_p4 = scmp.ne.s32.totalorder %s1461_s19, %s1121_s27  ;;  %p1126_p9 = scmp.lt.u32.totalorder %s1461_s19, %s1514_s3 }
 0x154   : > { %p1127_p10 = scmp.lt.u32.totalorder %s1125_s30, %s1121_s27  ;;  %p1129_p12 = scmp.lt.u32.totalorder %s1121_s27, %s1461_s19 }
 0x155   : > { %p1123_p7 = pnand %p1122_p4, %p1233_p5 }
 0x156   : > { %p1128_p11 = por %p1127_p10, %p1126_p9 }
 0x157   : > { %p1124_p8 = pneg %p1123_p7 }
 0x158   : > { %p1130_p13 = por %p1129_p12, %p1128_p11 }
 0x15a   : > { %p1131_p0 = pnand %p1130_p13, %p1124_p8 }
 0x15c   : > { %1134 = shalt.err (!%p1131_p0)
}
 0x15d   : > { %s1173_s5 = smov 128   ;;  %s1174_s6 = smov 8  }
 0x15e   : > { %1011 = dma.vmem_to_hbm [thread:$0]  (%p1233_p5), %s1463_s10, 1024, %s1461_s19, %s1470_s16, %s1173_s5, %s1173_s5, %s1174_s6  }
 0x15f PF: > { %p1017_p1 = scmp.ge.s32.totalorder %s1169_s15, 2  ;;  %s854_s8 = sand.u32 1, %s1157_s12  }
 0x160   : > { %s855_s9 = scalar_lea.sflag [#allocation3], %s854_s8 }
 0x161   : > { %p1014_p2 = pnand %p1017_p1, %p1237_p6 }
 0x163   : > { %1152 = dma.done.wait (!%p1014_p2), %s855_s9, 1024  }
 0x164   : > { %1154 = vsyncadd (!%p1014_p2), %s855_s9, 4294966272  ;;  %p13_p3 = scmp.ge.s32.totalorder %s1220_s18, 4   ;;  %s1517_s12 = smov %s1161_s13 }
 0x165   : > { %s1518_s13 = smov %s1165_s14  ;;  %s1519_s14 = smov %s1231_s21 }
 0x166   : > { %s1520_s15 = smov %s1220_s18  ;;  %15 = sbr.rel (!%p13_p3) target bundleno = 3 (0x3), region = 67 }
 0x16d   :  { %860 = vsyncpa [#allocation3], 1 }
 0x16e   :  { %862 = vsyncpa [#allocation3 + $0x1], 1 }

// kernel: fpn_forward.16
= control target key start
LH: loop header
LB: loop body
LE: loop exit
PB: predicated region body
PF: predicated region fallthrough
CT: control target
= control target key end

     0   :  { %8 = vsyncpa [#allocation3], 0  ;;  %s1225_s0 = inlined_call_operand.vmem [shape: bf16[2,24,192], index: 0, kind: input, shape index: {}]   ;;  %s1226_s1 = inlined_call_operand.vmem [shape: bf16[576,64], index: 1, kind: input, shape index: {}]   ;;  %s1227_s2 = inlined_call_operand.vmem [shape: f32[1,64], index: 2, kind: input, shape index: {}]   ;;  %s1228_s3 = inlined_call_operand.hbm [shape: f32[2,16,64], index: 3, kind: output, shape index: {}]  }
   0x1   :  { %10 = vsyncpa [#allocation3 + $0x1], 0  ;;  %s953_s12 = smov 0   ;;  %s955_s13 = smov 0  }
   0x2   :  { %s957_s14 = smov 0   ;;  %s959_s15 = smov 0  }
   0x3 LB: > { %s974_s16 = sadd.s32 4294967295, %s927_s15   ;;  %s718_s17 = sadd.s32 4294967294, %s927_s15   ;;  %s927_s15 = sphi %s959_s15, %s1234_s15   ;;  %s923_s14 = sphi %s957_s14, %s1233_s14   ;;  %s919_s13 = sphi %s955_s13, %s1232_s13   ;;  %s915_s12 = sphi %s953_s12, %s1231_s12  }
   0x4   : > { %s978_s18 = sadd.s32 1, %s927_s15   ;;  %s91_s19 = sadd.s32 1, %s923_s14 }
   0x5   : > { %s88_s20 = ssub.s32 %s927_s15, %s978_s18  ;;  %p101_p0 = scmp.ne.s32.totalorder %s923_s14, %s919_s13 }
   0x6   : > { %p89_p1 = scmp.eq.s32.totalorder %s88_s20, 0  ;;  %p102_p2 = scmp.eq.s32.totalorder %s974_s16, 1 }
   0x7   : > { %p107_p3 = scmp.ne.s32.totalorder %s919_s13, %s915_s12  ;;  %p108_p4 = scmp.eq.s32.totalorder %s718_s17, 1 }
   0x8   : > { %s989_s21 = scalar_select %p89_p1, %s923_s14, %s91_s19  }
   0x9   : > { %p991_p5 = por %p102_p2, %p101_p0  ;;  %p995_p6 = por %p108_p4, %p107_p3 }
   0xa   : > { %p721_p7 = scmp.ge.s32.totalorder %s927_s15, 1  ;;  %p140_p8 = scmp.lt.s32.totalorder %s927_s15, 3 }
   0xc   : > { %p141_p9 = pnand %p721_p7, %p140_p8 }
   0xd   : > { %v821_v0 = vld [vmem:[%s1226_s1 + $0x60] sm:$0xff] (!%p141_p9)   ;;  %v929_v1 = vmov (!%p141_p9), 0   ;;  %v823_v3 = vld [vmem:[%s1226_s1 + $0x68] sm:$0xff] (!%p141_p9)   ;;  %v825_v5 = vld [vmem:[%s1226_s1 + $0x70] sm:$0xff] (!%p141_p9)   ;;  %p164_p10 = scmp.lt.s32.totalorder (!%p141_p9), %s974_s16, 1  ;;  %vm315_vm0 = vcmask (!%p141_p9), 523264  }
   0xe   : > { %144 = sbr.rel (%p141_p9) target bundleno = 343 (0x157), region = 32  ;;  %319 = vmatprep.subr.bf16.mxu0 (!%p141_p9), %v929_v1  ;;  %441 = vmatprep.subr.bf16.mxu1 (!%p141_p9), %v929_v1  ;;  %v822_v2 = vld [vmem:[%s1226_s1] sm:$0xff] (!%p141_p9)   ;;  %v824_v4 = vld [vmem:[%s1226_s1 + $0x8] sm:$0xff] (!%p141_p9)   ;;  %v826_v6 = vld [vmem:[%s1226_s1 + $0x10] sm:$0xff] (!%p141_p9)   ;;  %vm235_vm1 = vcmask (!%p141_p9), 1045504   ;;  %s161_s29 = sand.u32 (!%p141_p9), 1, %s919_s13  }
   0xf   : > { %320 = vmatpush1.bf16.msra.mxu0 (!%p141_p9), %v821_v0  ;;  %442 = vmatpush1.bf16.msra.mxu1 (!%p141_p9), %v822_v2  ;;  %v827_v7 = vld [vmem:[%s1226_s1 + $0x78] sm:$0xff] (!%p141_p9)   ;;  %v829_v9 = vld [vmem:[%s1226_s1 + $0x80] sm:$0xff] (!%p141_p9)   ;;  %v831_v11 = vld [vmem:[%s1226_s1 + $0x88] sm:$0xff] (!%p141_p9)   ;;  %s722_s30 = sshll.u32 (!%p141_p9), %s161_s29, 4  ;;  %s777_s9 = sshll.u32 (!%p141_p9), %s974_s16, 8 }
  0x10   : > { %321 = vmatprep.subr.bf16.mxu0 (!%p141_p9), %v929_v1  ;;  %443 = vmatprep.subr.bf16.mxu1 (!%p141_p9), %v929_v1  ;;  %v828_v8 = vld [vmem:[%s1226_s1 + $0x18] sm:$0xff] (!%p141_p9)   ;;  %v830_v10 = vld [vmem:[%s1226_s1 + $0x20] sm:$0xff] (!%p141_p9)   ;;  %v832_v12 = vld [vmem:[%s1226_s1 + $0x28] sm:$0xff] (!%p141_p9)   ;;  %s163_s6 = scalar_lea.vmem (!%p141_p9), [#allocation2], %s722_s30  ;;  %s1178_s17 = scalar_lea.hbm (!%p141_p9), %s1228_s3, %s777_s9 }
  0x11   : > { %v833_v13 = vld [vmem:[%s1226_s1 + $0x90] sm:$0xff] (!%p141_p9)   ;;  %v835_v21 = vld [vmem:[%s1226_s1 + $0x98] sm:$0xff] (!%p141_p9)   ;;  %v837_v27 = vld [vmem:[%s1226_s1 + $0xa0] sm:$0xff] (!%p141_p9)   ;;  %s656_s8 = sshll.u32 (!%p141_p9), %s163_s6, 4  ;;  %s930_s20 = smov (!%p141_p9), [#allocation2]   ;;  %s1180_s8 = int_to_ptr.vmem [resolvable:$true] %s656_s8 }
  0x12   : > { %v834_v14 = vld [vmem:[%s1226_s1 + $0x30] sm:$0xff] (!%p141_p9)   ;;  %v836_v23 = vld [vmem:[%s1226_s1 + $0x38] sm:$0xff] (!%p141_p9)   ;;  %v838_v28 = vld [vmem:[%s1226_s1 + $0x40] sm:$0xff] (!%p141_p9)   ;;  %s869_s24 = sshll.u32 (!%p141_p9), %s930_s20, 4  ;;  %s870_s24 = int_to_ptr.vmem [resolvable:$false] %s869_s24 }
  0x13   : > { %322 = vmatpush1.bf16.msra.mxu0 (!%p141_p9), %v823_v3  ;;  %444 = vmatpush1.bf16.msra.mxu1 (!%p141_p9), %v824_v4  ;;  %v839_v29 = vld [vmem:[%s1226_s1 + $0xa8] sm:$0xff] (!%p141_p9)   ;;  %v841_v31 = vld [vmem:[%s1226_s1 + $0xb0] sm:$0xff] (!%p141_p9)   ;;  %v843_v35 = vld [vmem:[%s1226_s1 + $0xb8] sm:$0xff] (!%p141_p9)   ;;  %s871_s25 = scalar_lea.vmem (!%p141_p9), %s870_s24, 512  ;;  %p872_p0 = scmp.lt.s32.totalorder (!%p141_p9), %s1180_s8, %s870_s24 }
  0x14   : > { %323 = vmatprep.subr.bf16.mxu0 (!%p141_p9), %v929_v1  ;;  %445 = vmatprep.subr.bf16.mxu1 (!%p141_p9), %v929_v1  ;;  %v840_v30 = vld [vmem:[%s1226_s1 + $0x48] sm:$0xff] (!%p141_p9)   ;;  %v842_v34 = vld [vmem:[%s1226_s1 + $0x50] sm:$0xff] (!%p141_p9)   ;;  %v844_v38 = vld [vmem:[%s1226_s1 + $0x58] sm:$0xff] (!%p141_p9)  }
  0x15   : > { %s165_s19 = scalar_select %p164_p10, %s974_s16, 1  ;;  %v851_v42 = vld [vmem:[%s1226_s1 + $0xc0] sm:$0xff]   ;;  %v852_v44 = vld [vmem:[%s1226_s1 + $0xc8] sm:$0xff]   ;;  %v853_v45 = vld [vmem:[%s1226_s1 + $0xd0] sm:$0xff]  }
  0x16   : > { %v854_v46 = vld [vmem:[%s1226_s1 + $0xd8] sm:$0xff]   ;;  %v855_v47 = vld [vmem:[%s1226_s1 + $0xe0] sm:$0xff]   ;;  %v856_v48 = vld [vmem:[%s1226_s1 + $0xe8] sm:$0xff]   ;;  %s1184_s16 = scalar_lea.sflag [#allocation3], %s161_s29 }
  0x17   : > { %324 = vmatpush1.bf16.msra.mxu0 %v825_v5  ;;  %446 = vmatpush1.bf16.msra.mxu1 %v826_v6  ;;  %s778_s27 = smul.u32 24, %s165_s19  ;;  %v857_v49 = vld [vmem:[%s1226_s1 + $0xf0] sm:$0xff]   ;;  %v858_v50 = vld [vmem:[%s1226_s1 + $0xf8] sm:$0xff]   ;;  %v859_v51 = vld [vmem:[%s1226_s1 + $0x100] sm:$0xff]   ;;  %s865_s19 = scalar_lea.vmem %s1180_s8, 256 }
  0x18   : > { %325 = vmatprep.subr.bf16.mxu0 %v929_v1  ;;  %447 = vmatprep.subr.bf16.mxu1 %v929_v1  ;;  %v860_v52 = vld [vmem:[%s1226_s1 + $0x108] sm:$0xff]   ;;  %v861_v53 = vld [vmem:[%s1226_s1 + $0x110] sm:$0xff]   ;;  %v862_v54 = vld [vmem:[%s1226_s1 + $0x118] sm:$0xff]   ;;  %p866_p11 = scmp.ne.s32.totalorder %s1180_s8, %s865_s19  ;;  %p873_p1 = scmp.lt.s32.totalorder %s871_s25, %s865_s19 }
  0x19   : > { %s1054_s7 = scalar_lea.vmem %s1225_s0, %s778_s27 }
  0x1a   : > { %v1065_v15 = vld [vmem:[%s1054_s7 + $0x8] sm:$0xff]  ;;  %v196_v16 = vld [vmem:[%s1054_s7] sm:$0xcc]  ;;  %v197_v17 = vld [vmem:[%s1054_s7 + $0x10] sm:$0x33]  ;;  %p867_p12 = pnand %p866_p11, %p991_p5  ;;  %p874_p2 = por %p873_p1, %p872_p0 }
  0x1b   : > { %326 = vmatpush1.bf16.msra.mxu0 %v827_v7  ;;  %448 = vmatpush1.bf16.msra.mxu1 %v828_v8  ;;  %v725_v18 = vcombine.high %v196_v16, %v1065_v15  ;;  %v727_v19 = vcombine.high %v197_v17, %v197_v17  ;;  %v170_v20 = vld [vmem:[%s1054_s7] sm:$0xff]  ;;  %v724_v32 = vcombine.low %v196_v16, %v1065_v15  ;;  %v482_v39 = vld [vmem:[%s1054_s7 + $0x10] sm:$0xff] }
  0x1c   : > { %327 = vmatprep.subr.bf16.mxu0 %v929_v1  ;;  %449 = vmatprep.subr.bf16.mxu1 %v929_v1  ;;  %v742_v22 = vcombine.high %v170_v20, %v1065_v15  ;;  %v726_v33 = vcombine.low %v197_v17, %v197_v17  ;;  %v741_v40 = vcombine.low %v170_v20, %v1065_v15  ;;  %p868_p13 = pneg %p867_p12 }
  0x1d   : > { %v239_v24 = vrot.slane %v725_v18, 2  ;;  %v240_v25 = vrot.slane %v727_v19, 2  ;;  %v236_v36 = vrot.slane %v724_v32, 2  ;;  %v757_v43 = vcombine.high %v1065_v15, %v482_v39 }
  0x1e   : > { %755 = vmatprep.mubr.msk.bf16.mxu1 %vm315_vm0, %v742_v22  ;;  %v237_v37 = vrot.slane %v726_v33, 2  ;;  %v756_v55 = vcombine.low %v1065_v15, %v482_v39  ;;  %p875_p3 = pnand %p874_p2, %p868_p13 }
  0x1f   : > { %328 = vmatpush1.bf16.msra.mxu0 %v829_v9  ;;  %450 = vmatpush1.bf16.msra.mxu1 %v830_v10  ;;  %v241_v26 = vsel %vm235_vm1, %v239_v24, %v240_v25 }
  0x20   : > { %329 = vmatprep.subr.bf16.mxu0 %v929_v1  ;;  %451 = vmatprep.subr.bf16.mxu1 %v929_v1  ;;  %v238_v41 = vsel %vm235_vm1, %v236_v36, %v237_v37 }
  0x21   : > { %740 = vmatprep.mubr.msk.bf16.mxu0 %vm315_vm0, %v241_v26 }
  0x23   : > { %330 = vmatpush1.bf16.msra.mxu0 %v831_v11  ;;  %452 = vmatpush1.bf16.msra.mxu1 %v832_v12 }
  0x24   : > { %331 = vmatprep.subr.bf16.mxu0 %v929_v1  ;;  %453 = vmatprep.subr.bf16.mxu1 %v929_v1 }
  0x27   : > { %332 = vmatpush1.bf16.msra.mxu0 %v833_v13  ;;  %454 = vmatpush1.bf16.msra.mxu1 %v834_v14 }
  0x28   : > { %333 = vmatprep.subr.bf16.mxu0 %v929_v1  ;;  %455 = vmatprep.subr.bf16.mxu1 %v929_v1 }
  0x2b   : > { %334 = vmatpush1.bf16.msra.mxu0 %v835_v21  ;;  %456 = vmatpush1.bf16.msra.mxu1 %v836_v23 }
  0x2c   : > { %335 = vmatprep.subr.bf16.mxu0 %v929_v1  ;;  %457 = vmatprep.subr.bf16.mxu1 %v929_v1 }
  0x2f   : > { %336 = vmatpush1.bf16.msra.mxu0 %v837_v27  ;;  %458 = vmatpush1.bf16.msra.mxu1 %v838_v28 }
  0x30   : > { %337 = vmatprep.subr.bf16.mxu0 %v929_v1  ;;  %459 = vmatprep.subr.bf16.mxu1 %v929_v1 }
  0x33   : > { %338 = vmatpush1.bf16.msra.mxu0 %v839_v29  ;;  %460 = vmatpush1.bf16.msra.mxu1 %v840_v30 }
  0x34   : > { %339 = vmatprep.subr.bf16.mxu0 %v929_v1  ;;  %461 = vmatprep.subr.bf16.mxu1 %v929_v1 }
  0x37   : > { %340 = vmatpush1.bf16.msra.mxu0 %v841_v31  ;;  %462 = vmatpush1.bf16.msra.mxu1 %v842_v34 }
  0x38   : > { %341 = vmatprep.subr.bf16.mxu0 %v929_v1  ;;  %463 = vmatprep.subr.bf16.mxu1 %v929_v1 }
  0x3b   : > { %342 = vmatpush1.bf16.msra.mxu0 %v843_v35  ;;  %464 = vmatpush1.bf16.msra.mxu1 %v844_v38 }
  0x3c   : > { %588 = vmatprep.subr.bf16.mxu0 %v929_v1 }
  0x3e   : > { %352 = vmatmul.mubr.bf16.vlgmr.msra.gmra.mrb[0].mxu0 %v238_v41  ;;  %474 = vmatmul.mubr.bf16.vlgmr.msra.gmra.mrb[0].mxu1 %v741_v40 }
  0x3f   : > { %589 = vmatpush1.bf16.msra.mxu0 %v851_v42  ;;  %770 = vmatprep.mubr.msk.bf16.mxu0 %vm315_vm0, %v757_v43 }
  0x40   : > { %590 = vmatprep.subr.bf16.mxu0 %v929_v1 }
  0x43   : > { %591 = vmatpush1.bf16.msra.mxu0 %v852_v44 }
  0x44   : > { %592 = vmatprep.subr.bf16.mxu0 %v929_v1 }
  0x47   : > { %593 = vmatpush1.bf16.msra.mxu0 %v853_v45 }
  0x48   : > { %594 = vmatprep.subr.bf16.mxu0 %v929_v1 }
  0x4b   : > { %595 = vmatpush1.bf16.msra.mxu0 %v854_v46 }
  0x4c   : > { %596 = vmatprep.subr.bf16.mxu0 %v929_v1 }
  0x4f   : > { %597 = vmatpush1.bf16.msra.mxu0 %v855_v47 }
  0x50   : > { %598 = vmatprep.subr.bf16.mxu0 %v929_v1 }
  0x53   : > { %599 = vmatpush1.bf16.msra.mxu0 %v856_v48 }
  0x54   : > { %600 = vmatprep.subr.bf16.mxu0 %v929_v1 }
  0x57   : > { %601 = vmatpush1.bf16.msra.mxu0 %v857_v49 }
  0x58   : > { %602 = vmatprep.subr.bf16.mxu0 %v929_v1 }
  0x5b   : > { %603 = vmatpush1.bf16.msra.mxu0 %v858_v50 }
  0x5c   : > { %604 = vmatprep.subr.bf16.mxu0 %v929_v1 }
  0x5f   : > { %605 = vmatpush1.bf16.msra.mxu0 %v859_v51 }
  0x60   : > { %606 = vmatprep.subr.bf16.mxu0 %v929_v1 }
  0x63   : > { %607 = vmatpush1.bf16.msra.mxu0 %v860_v52 }
  0x64   : > { %608 = vmatprep.subr.bf16.mxu0 %v929_v1 }
  0x67   : > { %609 = vmatpush1.bf16.msra.mxu0 %v861_v53 }
  0x68   : > { %610 = vmatprep.subr.bf16.mxu0 %v929_v1  ;;  %v771_v1 = vld [vmem:[%s1227_s2] ss:$0 sm:$0xff] }
  0x6b   : > { %611 = vmatpush1.bf16.msra.mxu0 %v862_v54 }
  0x6e   : > { %621 = vmatmul.mubr.bf16.vlgmr.msra.gmra.mrb[4].mxu0 %v756_v55 }
 0x111   : > { %v353_v56 = vpop.f32.mrb[0].mxu0  ;;  %v475_v57 = vpop.f32.mrb[0].mxu1 }
 0x112   : > { %v355_v58 = vpop.f32.mrb[1].mxu0  ;;  %v476_v59 = vadd.f32 %v475_v57, %v353_v56  ;;  %v477_v60 = vpop.f32.mrb[1].mxu1 }
 0x113   : > { %v356_v61 = vpop.f32.mrb[2].mxu0  ;;  %v478_v62 = vpop.f32.mrb[2].mxu1 }
 0x114   : > { %v358_v63 = vpop.f32.mrb[3].mxu0  ;;  %v479_v0 = vadd.f32 %v478_v62, %v356_v61  ;;  %v480_v2 = vpop.f32.mrb[3].mxu1 }
 0x141   : > { %v622_v3 = vpop.f32.mrb[4].mxu0 }
 0x142   : > { %v629_v4 = vadd.f32 %v622_v3, %v476_v59  ;;  %v624_v5 = vpop.f32.mrb[5].mxu0 }
 0x143   : > { %v625_v6 = vpop.f32.mrb[6].mxu0 }
 0x144   : > { %v638_v7 = vadd.f32 %v771_v1, %v629_v4  ;;  %v630_v8 = vadd.f32 %v625_v6, %v479_v0  ;;  %v627_v9 = vpop.f32.mrb[7].mxu0 }
 0x146   : > { %640 = vst.msk [vmem:[%s163_s6] sm:$0xff] %vm315_vm0, %v638_v7  ;;  %v639_v10 = vadd.f32 %v771_v1, %v630_v8 }
 0x148   : > { %641 = vst.msk [vmem:[%s163_s6 + $0x8] sm:$0xff] %vm315_vm0, %v639_v10 }
 0x149   : > { %878 = shalt.err (!%p875_p3)
}
 0x14a   : > { %s879_s26 = scalar_lea.hbm %s1178_s17, 256  ;;  %s883_s28 = scalar_lea.hbm %s1228_s3, 512 }
 0x14b   : > { %p880_p4 = scmp.ne.s32.totalorder %s1178_s17, %s879_s26  ;;  %p884_p9 = scmp.lt.u32.totalorder %s1178_s17, %s1228_s3 }
 0x14c   : > { %p885_p10 = scmp.lt.u32.totalorder %s883_s28, %s879_s26  ;;  %p887_p12 = scmp.lt.u32.totalorder %s879_s26, %s1178_s17 }
 0x14d   : > { %p881_p7 = pnand %p880_p4, %p991_p5 }
 0x14e   : > { %p886_p11 = por %p885_p10, %p884_p9 }
 0x14f   : > { %p882_p8 = pneg %p881_p7 }
 0x150   : > { %p888_p13 = por %p887_p12, %p886_p11 }
 0x152   : > { %p889_p0 = pnand %p888_p13, %p882_p8 }
 0x154   : > { %892 = shalt.err (!%p889_p0)
}
 0x155   : > { %s931_s4 = smov 128   ;;  %s932_s5 = smov 8  }
 0x156   : > { %779 = dma.vmem_to_hbm [thread:$0]  (%p991_p5), %s1180_s8, 256, %s1178_s17, %s1184_s16, %s931_s4, %s931_s4, %s932_s5  }
 0x157 PF: > { %p785_p1 = scmp.ge.s32.totalorder %s927_s15, 2  ;;  %s671_s6 = sand.u32 1, %s915_s12  }
 0x158   : > { %s672_s9 = scalar_lea.sflag [#allocation3], %s671_s6 }
 0x159   : > { %p782_p2 = pnand %p785_p1, %p995_p6 }
 0x15b   : > { %910 = dma.done.wait (!%p782_p2), %s672_s9, 256  }
 0x15c   : > { %912 = vsyncadd (!%p782_p2), %s672_s9, 4294967040  ;;  %p13_p3 = scmp.ge.s32.totalorder %s978_s18, 4   ;;  %s1231_s12 = smov %s919_s13 }
 0x15d   : > { %s1232_s13 = smov %s923_s14  ;;  %s1233_s14 = smov %s989_s21 }
 0x15e   : > { %s1234_s15 = smov %s978_s18  ;;  %15 = sbr.rel (!%p13_p3) target bundleno = 3 (0x3), region = 67 }
 0x165   :  { %677 = vsyncpa [#allocation3], 1 }
 0x166   :  { %679 = vsyncpa [#allocation3 + $0x1], 1 }

// kernel: fpn_forward.17
= control target key start
LH: loop header
LB: loop body
LE: loop exit
PB: predicated region body
PF: predicated region fallthrough
CT: control target
= control target key end

     0   :  { %8 = vsyncpa [#allocation3], 0  ;;  %s1178_s0 = inlined_call_operand.vmem [shape: bf16[2,8,192], index: 0, kind: input, shape index: {}]   ;;  %s1179_s1 = inlined_call_operand.vmem [shape: bf16[576,64], index: 1, kind: input, shape index: {}]   ;;  %s1180_s2 = inlined_call_operand.vmem [shape: f32[1,64], index: 2, kind: input, shape index: {}]   ;;  %s1181_s3 = inlined_call_operand.hbm [shape: f32[2,4,64], index: 3, kind: output, shape index: {}]  }
   0x1   :  { %10 = vsyncpa [#allocation3 + $0x1], 0  ;;  %s923_s12 = smov 0   ;;  %s925_s13 = smov 0  }
   0x2   :  { %s927_s14 = smov 0   ;;  %s929_s15 = smov 0  }
   0x3 LB: > { %s944_s16 = sadd.s32 4294967295, %s899_s15   ;;  %s697_s17 = sadd.s32 4294967294, %s899_s15   ;;  %s899_s15 = sphi %s929_s15, %s1187_s15   ;;  %s895_s14 = sphi %s927_s14, %s1186_s14   ;;  %s891_s13 = sphi %s925_s13, %s1185_s13   ;;  %s887_s12 = sphi %s923_s12, %s1184_s12  }
   0x4   : > { %s948_s18 = sadd.s32 1, %s899_s15   ;;  %s91_s19 = sadd.s32 1, %s895_s14 }
   0x5   : > { %s88_s20 = ssub.s32 %s899_s15, %s948_s18  ;;  %p101_p0 = scmp.ne.s32.totalorder %s895_s14, %s891_s13 }
   0x6   : > { %p89_p1 = scmp.eq.s32.totalorder %s88_s20, 0  ;;  %p102_p2 = scmp.eq.s32.totalorder %s944_s16, 1 }
   0x7   : > { %p107_p3 = scmp.ne.s32.totalorder %s891_s13, %s887_s12  ;;  %p108_p4 = scmp.eq.s32.totalorder %s697_s17, 1 }
   0x8   : > { %s959_s21 = scalar_select %p89_p1, %s895_s14, %s91_s19  }
   0x9   : > { %p961_p5 = por %p102_p2, %p101_p0  ;;  %p965_p6 = por %p108_p4, %p107_p3 }
   0xa   : > { %p700_p7 = scmp.ge.s32.totalorder %s899_s15, 1  ;;  %p140_p8 = scmp.lt.s32.totalorder %s899_s15, 3 }
   0xc   : > { %p141_p9 = pnand %p700_p7, %p140_p8 }
   0xd   : > { %v795_v0 = vld [vmem:[%s1179_s1 + $0x60] sm:$0xff] (!%p141_p9)   ;;  %v901_v1 = vmov (!%p141_p9), 0   ;;  %v797_v3 = vld [vmem:[%s1179_s1 + $0x68] sm:$0xff] (!%p141_p9)   ;;  %v799_v5 = vld [vmem:[%s1179_s1 + $0x70] sm:$0xff] (!%p141_p9)   ;;  %p164_p10 = scmp.lt.s32.totalorder (!%p141_p9), %s944_s16, 1  ;;  %vm300_vm0 = vcmask (!%p141_p9), 523264  }
   0xe   : > { %144 = sbr.rel (%p141_p9) target bundleno = 340 (0x154), region = 32  ;;  %304 = vmatprep.subr.bf16.mxu0 (!%p141_p9), %v901_v1  ;;  %425 = vmatprep.subr.bf16.mxu1 (!%p141_p9), %v901_v1  ;;  %v796_v2 = vld [vmem:[%s1179_s1] sm:$0xff] (!%p141_p9)   ;;  %v798_v4 = vld [vmem:[%s1179_s1 + $0x8] sm:$0xff] (!%p141_p9)   ;;  %v800_v6 = vld [vmem:[%s1179_s1 + $0x10] sm:$0xff] (!%p141_p9)   ;;  %s751_s6 = sshll.u32 (!%p141_p9), %s944_s16, 6  ;;  %vm622_vm1 = vcmask (!%p141_p9), 519168  }
   0xf   : > { %305 = vmatpush1.bf16.msra.mxu0 (!%p141_p9), %v795_v0  ;;  %426 = vmatpush1.bf16.msra.mxu1 (!%p141_p9), %v796_v2  ;;  %v801_v7 = vld [vmem:[%s1179_s1 + $0x78] sm:$0xff] (!%p141_p9)   ;;  %v803_v9 = vld [vmem:[%s1179_s1 + $0x80] sm:$0xff] (!%p141_p9)   ;;  %v805_v11 = vld [vmem:[%s1179_s1 + $0x88] sm:$0xff] (!%p141_p9)   ;;  %s1136_s17 = scalar_lea.hbm (!%p141_p9), %s1181_s3, %s751_s6  ;;  %s902_s20 = smov (!%p141_p9), [#allocation2]  }
  0x10   : > { %306 = vmatprep.subr.bf16.mxu0 (!%p141_p9), %v901_v1  ;;  %427 = vmatprep.subr.bf16.mxu1 (!%p141_p9), %v901_v1  ;;  %v802_v8 = vld [vmem:[%s1179_s1 + $0x18] sm:$0xff] (!%p141_p9)   ;;  %v804_v10 = vld [vmem:[%s1179_s1 + $0x20] sm:$0xff] (!%p141_p9)   ;;  %v806_v12 = vld [vmem:[%s1179_s1 + $0x28] sm:$0xff] (!%p141_p9)  }
  0x11   : > { %v807_v13 = vld [vmem:[%s1179_s1 + $0x90] sm:$0xff] (!%p141_p9)   ;;  %v809_v19 = vld [vmem:[%s1179_s1 + $0x98] sm:$0xff] (!%p141_p9)   ;;  %v811_v22 = vld [vmem:[%s1179_s1 + $0xa0] sm:$0xff] (!%p141_p9)  }
  0x12   : > { %v808_v14 = vld [vmem:[%s1179_s1 + $0x30] sm:$0xff] (!%p141_p9)   ;;  %v810_v20 = vld [vmem:[%s1179_s1 + $0x38] sm:$0xff] (!%p141_p9)   ;;  %v812_v23 = vld [vmem:[%s1179_s1 + $0x40] sm:$0xff] (!%p141_p9)  }
  0x13   : > { %307 = vmatpush1.bf16.msra.mxu0 (!%p141_p9), %v797_v3  ;;  %428 = vmatpush1.bf16.msra.mxu1 (!%p141_p9), %v798_v4  ;;  %v813_v24 = vld [vmem:[%s1179_s1 + $0xa8] sm:$0xff] (!%p141_p9)   ;;  %v815_v26 = vld [vmem:[%s1179_s1 + $0xb0] sm:$0xff] (!%p141_p9)   ;;  %v817_v30 = vld [vmem:[%s1179_s1 + $0xb8] sm:$0xff] (!%p141_p9)  }
  0x14   : > { %308 = vmatprep.subr.bf16.mxu0 (!%p141_p9), %v901_v1  ;;  %429 = vmatprep.subr.bf16.mxu1 (!%p141_p9), %v901_v1  ;;  %v814_v25 = vld [vmem:[%s1179_s1 + $0x48] sm:$0xff] (!%p141_p9)   ;;  %v816_v27 = vld [vmem:[%s1179_s1 + $0x50] sm:$0xff] (!%p141_p9)   ;;  %v818_v31 = vld [vmem:[%s1179_s1 + $0x58] sm:$0xff] (!%p141_p9)  }
  0x15   : > { %s165_s24 = scalar_select %p164_p10, %s944_s16, 1  ;;  %v823_v35 = vld [vmem:[%s1179_s1 + $0xc0] sm:$0xff]   ;;  %v824_v37 = vld [vmem:[%s1179_s1 + $0xc8] sm:$0xff]   ;;  %v825_v38 = vld [vmem:[%s1179_s1 + $0xd0] sm:$0xff]  }
  0x16   : > { %v826_v39 = vld [vmem:[%s1179_s1 + $0xd8] sm:$0xff]   ;;  %v827_v40 = vld [vmem:[%s1179_s1 + $0xe0] sm:$0xff]   ;;  %v828_v41 = vld [vmem:[%s1179_s1 + $0xe8] sm:$0xff]  }
  0x17   : > { %309 = vmatpush1.bf16.msra.mxu0 %v799_v5  ;;  %430 = vmatpush1.bf16.msra.mxu1 %v800_v6  ;;  %s754_s29 = sshll.u32 %s165_s24, 3  ;;  %v829_v42 = vld [vmem:[%s1179_s1 + $0xf0] sm:$0xff]   ;;  %v830_v43 = vld [vmem:[%s1179_s1 + $0xf8] sm:$0xff]   ;;  %v831_v44 = vld [vmem:[%s1179_s1 + $0x100] sm:$0xff]  }
  0x18   : > { %310 = vmatprep.subr.bf16.mxu0 %v901_v1  ;;  %431 = vmatprep.subr.bf16.mxu1 %v901_v1  ;;  %s1024_s7 = scalar_lea.vmem %s1178_s0, %s754_s29  ;;  %v832_v45 = vld [vmem:[%s1179_s1 + $0x108] sm:$0xff]   ;;  %v833_v46 = vld [vmem:[%s1179_s1 + $0x110] sm:$0xff]   ;;  %v834_v48 = vld [vmem:[%s1179_s1 + $0x118] sm:$0xff]   ;;  %s161_s29 = sand.u32 1, %s891_s13  }
  0x19   : > { %v195_v15 = vld [vmem:[%s1024_s7] sm:$0x66]  ;;  %s701_s30 = sshll.u32 %s161_s29, 2  ;;  %v749_v60 = vld [vmem:[%s1180_s2] ss:$0 sm:$0xff]  ;;  %s625_s16 = scalar_lea.sflag [#allocation3], %s161_s29 }
  0x1a   : > { %v170_v16 = vld [vmem:[%s1024_s7] sm:$0x33]  ;;  %v705_v17 = vcombine.high %v195_v15, %v195_v15  ;;  %v465_v28 = vld [vmem:[%s1024_s7] sm:$0xcc]  ;;  %v704_v29 = vcombine.low %v195_v15, %v195_v15  ;;  %s163_s8 = scalar_lea.vmem [#allocation2], %s701_s30  ;;  %s841_s7 = sshll.u32 %s902_s20, 4  ;;  %s842_s7 = int_to_ptr.vmem [resolvable:$false] %s841_s7 }
  0x1b   : > { %311 = vmatpush1.bf16.msra.mxu0 %v801_v7  ;;  %432 = vmatpush1.bf16.msra.mxu1 %v802_v8  ;;  %v720_v18 = vcombine.high %v170_v16, %v170_v16  ;;  %v735_v32 = vcombine.high %v465_v28, %v465_v28  ;;  %v719_v34 = vcombine.low %v170_v16, %v170_v16  ;;  %s638_s9 = sshll.u32 %s163_s8, 4  ;;  %s843_s24 = scalar_lea.vmem %s842_s7, 128  ;;  %s1138_s9 = int_to_ptr.vmem [resolvable:$true] %s638_s9 }
  0x1c   : > { %312 = vmatprep.subr.bf16.mxu0 %v901_v1  ;;  %433 = vmatprep.subr.bf16.mxu1 %v901_v1  ;;  %v226_v21 = vrot.slane %v705_v17, 1  ;;  %v225_v33 = vrot.slane %v704_v29, 1  ;;  %v734_v47 = vcombine.low %v465_v28, %v465_v28  ;;  %s837_s19 = scalar_lea.vmem %s1138_s9, 64  ;;  %p844_p0 = scmp.lt.s32.totalorder %s1138_s9, %s842_s7 }
  0x1d   : > { %733 = vmatprep.mubr.msk.bf16.mxu1 %vm300_vm0, %v720_v18  ;;  %v496_v36 = vrot.slane %v735_v32, 2  ;;  %p838_p11 = scmp.ne.s32.totalorder %s1138_s9, %s837_s19  ;;  %p845_p1 = scmp.lt.s32.totalorder %s843_s24, %s837_s19 }
  0x1e   : > { %718 = vmatprep.mubr.msk.bf16.mxu0 %vm300_vm0, %v226_v21  ;;  %v495_v49 = vrot.slane %v734_v47, 2 }
  0x1f   : > { %313 = vmatpush1.bf16.msra.mxu0 %v803_v9  ;;  %434 = vmatpush1.bf16.msra.mxu1 %v804_v10  ;;  %p839_p12 = pnand %p838_p11, %p961_p5  ;;  %p846_p2 = por %p845_p1, %p844_p0 }
  0x20   : > { %314 = vmatprep.subr.bf16.mxu0 %v901_v1  ;;  %435 = vmatprep.subr.bf16.mxu1 %v901_v1 }
  0x21   : > { %p840_p13 = pneg %p839_p12 }
  0x23   : > { %315 = vmatpush1.bf16.msra.mxu0 %v805_v11  ;;  %436 = vmatpush1.bf16.msra.mxu1 %v806_v12  ;;  %p847_p3 = pnand %p846_p2, %p840_p13 }
  0x24   : > { %316 = vmatprep.subr.bf16.mxu0 %v901_v1  ;;  %437 = vmatprep.subr.bf16.mxu1 %v901_v1 }
  0x27   : > { %317 = vmatpush1.bf16.msra.mxu0 %v807_v13  ;;  %438 = vmatpush1.bf16.msra.mxu1 %v808_v14 }
  0x28   : > { %318 = vmatprep.subr.bf16.mxu0 %v901_v1  ;;  %439 = vmatprep.subr.bf16.mxu1 %v901_v1 }
  0x2b   : > { %319 = vmatpush1.bf16.msra.mxu0 %v809_v19  ;;  %440 = vmatpush1.bf16.msra.mxu1 %v810_v20 }
  0x2c   : > { %320 = vmatprep.subr.bf16.mxu0 %v901_v1  ;;  %441 = vmatprep.subr.bf16.mxu1 %v901_v1 }
  0x2f   : > { %321 = vmatpush1.bf16.msra.mxu0 %v811_v22  ;;  %442 = vmatpush1.bf16.msra.mxu1 %v812_v23 }
  0x30   : > { %322 = vmatprep.subr.bf16.mxu0 %v901_v1  ;;  %443 = vmatprep.subr.bf16.mxu1 %v901_v1 }
  0x33   : > { %323 = vmatpush1.bf16.msra.mxu0 %v813_v24  ;;  %444 = vmatpush1.bf16.msra.mxu1 %v814_v25 }
  0x34   : > { %324 = vmatprep.subr.bf16.mxu0 %v901_v1  ;;  %445 = vmatprep.subr.bf16.mxu1 %v901_v1 }
  0x37   : > { %325 = vmatpush1.bf16.msra.mxu0 %v815_v26  ;;  %446 = vmatpush1.bf16.msra.mxu1 %v816_v27 }
  0x38   : > { %326 = vmatprep.subr.bf16.mxu0 %v901_v1  ;;  %447 = vmatprep.subr.bf16.mxu1 %v901_v1 }
  0x3b   : > { %327 = vmatpush1.bf16.msra.mxu0 %v817_v30  ;;  %448 = vmatpush1.bf16.msra.mxu1 %v818_v31 }
  0x3c   : > { %573 = vmatprep.subr.bf16.mxu0 %v901_v1 }
  0x3e   : > { %337 = vmatmul.mubr.bf16.vlgmr.msra.gmra.mrb[0].mxu0 %v225_v33  ;;  %458 = vmatmul.mubr.bf16.vlgmr.msra.gmra.mrb[0].mxu1 %v719_v34 }
  0x3f   : > { %574 = vmatpush1.bf16.msra.mxu0 %v823_v35  ;;  %748 = vmatprep.mubr.msk.bf16.mxu0 %vm300_vm0, %v496_v36 }
  0x40   : > { %575 = vmatprep.subr.bf16.mxu0 %v901_v1 }
  0x43   : > { %576 = vmatpush1.bf16.msra.mxu0 %v824_v37 }
  0x44   : > { %577 = vmatprep.subr.bf16.mxu0 %v901_v1 }
  0x47   : > { %578 = vmatpush1.bf16.msra.mxu0 %v825_v38 }
  0x48   : > { %579 = vmatprep.subr.bf16.mxu0 %v901_v1 }
  0x4b   : > { %580 = vmatpush1.bf16.msra.mxu0 %v826_v39 }
  0x4c   : > { %581 = vmatprep.subr.bf16.mxu0 %v901_v1 }
  0x4f   : > { %582 = vmatpush1.bf16.msra.mxu0 %v827_v40 }
  0x50   : > { %583 = vmatprep.subr.bf16.mxu0 %v901_v1 }
  0x53   : > { %584 = vmatpush1.bf16.msra.mxu0 %v828_v41 }
  0x54   : > { %585 = vmatprep.subr.bf16.mxu0 %v901_v1 }
  0x57   : > { %586 = vmatpush1.bf16.msra.mxu0 %v829_v42 }
  0x58   : > { %587 = vmatprep.subr.bf16.mxu0 %v901_v1 }
  0x5b   : > { %588 = vmatpush1.bf16.msra.mxu0 %v830_v43 }
  0x5c   : > { %589 = vmatprep.subr.bf16.mxu0 %v901_v1 }
  0x5f   : > { %590 = vmatpush1.bf16.msra.mxu0 %v831_v44 }
  0x60   : > { %591 = vmatprep.subr.bf16.mxu0 %v901_v1 }
  0x63   : > { %592 = vmatpush1.bf16.msra.mxu0 %v832_v45 }
  0x64   : > { %593 = vmatprep.subr.bf16.mxu0 %v901_v1 }
  0x67   : > { %594 = vmatpush1.bf16.msra.mxu0 %v833_v46 }
  0x68   : > { %595 = vmatprep.subr.bf16.mxu0 %v901_v1 }
  0x6b   : > { %596 = vmatpush1.bf16.msra.mxu0 %v834_v48 }
  0x6e   : > { %606 = vmatmul.mubr.bf16.vlgmr.msra.gmra.mrb[4].mxu0 %v495_v49 }
 0x111   : > { %v338_v50 = vpop.f32.mrb[0].mxu0  ;;  %v459_v52 = vpop.f32.mrb[0].mxu1 }
 0x112   : > { %v340_v51 = vpop.f32.mrb[1].mxu0  ;;  %v460_v53 = vadd.f32 %v459_v52, %v338_v50  ;;  %v461_v55 = vpop.f32.mrb[1].mxu1 }
 0x113   : > { %v341_v54 = vpop.f32.mrb[2].mxu0  ;;  %v462_v57 = vpop.f32.mrb[2].mxu1 }
 0x114   : > { %v342_v56 = vpop.f32.mrb[3].mxu0  ;;  %v463_v58 = vpop.f32.mrb[3].mxu1 }
 0x141   : > { %v607_v59 = vpop.f32.mrb[4].mxu0 }
 0x142   : > { %v613_v61 = vadd.f32 %v607_v59, %v460_v53  ;;  %v609_v62 = vpop.f32.mrb[5].mxu0 }
 0x143   : > { %v610_v63 = vpop.f32.mrb[6].mxu0 }
 0x144   : > { %v621_v0 = vadd.f32 %v749_v60, %v613_v61  ;;  %v611_v1 = vpop.f32.mrb[7].mxu0 }
 0x146   : > { %623 = vst.msk [vmem:[%s163_s8] sm:$0xf] %vm622_vm1, %v621_v0 }
 0x147   : > { %850 = shalt.err (!%p847_p3)
}
 0x148   : > { %s851_s25 = scalar_lea.hbm %s1136_s17, 64  ;;  %s855_s28 = scalar_lea.hbm %s1181_s3, 128 }
 0x149   : > { %p852_p4 = scmp.ne.s32.totalorder %s1136_s17, %s851_s25  ;;  %p856_p9 = scmp.lt.u32.totalorder %s1136_s17, %s1181_s3 }
 0x14a   : > { %p857_p10 = scmp.lt.u32.totalorder %s855_s28, %s851_s25  ;;  %p859_p12 = scmp.lt.u32.totalorder %s851_s25, %s1136_s17 }
 0x14b   : > { %p853_p7 = pnand %p852_p4, %p961_p5 }
 0x14c   : > { %p858_p11 = por %p857_p10, %p856_p9 }
 0x14d   : > { %p854_p8 = pneg %p853_p7 }
 0x14e   : > { %p860_p13 = por %p859_p12, %p858_p11 }
 0x150   : > { %p861_p0 = pnand %p860_p13, %p854_p8 }
 0x152   : > { %864 = shalt.err (!%p861_p0)
}
 0x153   : > { %755 = dma.vmem_to_hbm [thread:$0]  (%p961_p5), %s1138_s9, 64, %s1136_s17, %s625_s16  }
 0x154 PF: > { %p761_p1 = scmp.ge.s32.totalorder %s899_s15, 2  ;;  %s650_s4 = sand.u32 1, %s887_s12  }
 0x155   : > { %s651_s5 = scalar_lea.sflag [#allocation3], %s650_s4 }
 0x156   : > { %p758_p2 = pnand %p761_p1, %p965_p6 }
 0x158   : > { %882 = dma.done.wait (!%p758_p2), %s651_s5, 64  }
 0x159   : > { %884 = vsyncadd (!%p758_p2), %s651_s5, 4294967232  ;;  %p13_p3 = scmp.ge.s32.totalorder %s948_s18, 4   ;;  %s1184_s12 = smov %s891_s13 }
 0x15a   : > { %s1185_s13 = smov %s895_s14  ;;  %s1186_s14 = smov %s959_s21 }
 0x15b   : > { %s1187_s15 = smov %s948_s18  ;;  %15 = sbr.rel (!%p13_p3) target bundleno = 3 (0x3), region = 67 }
 0x162   :  { %656 = vsyncpa [#allocation3], 1 }
 0x163   :  { %658 = vsyncpa [#allocation3 + $0x1], 1 }

</bundles_post_ra>
